<compile_context>
chip_gen: v7x
topology: tpu7x:2x2x1
jax: 0.10.0
libtpu: 0.0.40
codegen_flags: <defaults>
</compile_context>

<pallas_src>
import math

import jax
import jax.numpy as jnp
from jax import lax
from jax.experimental import pallas as pl
from jax.experimental.pallas import tpu as pltpu


# ---------------------------------------------------------------------------
# in-kernel helpers (f32 element-wise math; matmuls run bf16 with f32 accum)
# ---------------------------------------------------------------------------
def _gelu(x):
    # TODO(synk): PyTorch F.gelu / nn.GELU default is the exact erf-based GELU;
    # erf has no guaranteed Mosaic lowering, so the tanh approximation is used
    # (max abs deviation ~3e-4).
    c = math.sqrt(2.0 / math.pi)
    return 0.5 * x * (1.0 + jnp.tanh(c * (x + 0.044715 * x * x * x)))


def _layernorm(x, w, b, eps=1e-5):
    # single-pass variance: E[x^2] - mean^2 (saves one full (x-m) VPU pass)
    m = jnp.mean(x, axis=-1, keepdims=True)
    v = jnp.mean(x * x, axis=-1, keepdims=True) - m * m
    return (x - m) * lax.rsqrt(v + eps) * w + b


# ---------------------------------------------------------------------------
# fully fused forward kernel.
#   grid = (B // G,); each step processes G batch elements as a (G*L, .) slab.
# ---------------------------------------------------------------------------
def make_fused_forward(B, L, A, H, HI, K, dilations, G):
    assert B % G == 0
    NG = B // G
    NL = len(dilations)
    pad_max = (K - 1) // 2 * max(dilations)
    OFF = pad_max                 # data offset inside the halo buffer
    LP = L + 2 * pad_max          # halo-buffer length (covers the largest dilation)
    GL = G * L                    # matmul M dimension (batch folded into rows)
    CI2 = 2 * K * A               # merged input-conv im2col width (oh | rc)
    H2 = 2 * H                    # interleaved (h | rc_h) channel width

    def kernel(incols_ref, inw_ref, inb_ref, lnp_ref, cw_ref, cb_ref,
               mw1, mb1, mw2, mb2, mln1, mw3, mb3, mw4, mb4, mln2,
               out_ref, hrbuf):
        # ---- input convs (oh & rc), merged block-diagonally into one dot ----
        x0 = jnp.dot(incols_ref[...], inw_ref[...],
                     preferred_element_type=jnp.float32) + inb_ref[...]
        x0 = _gelu(x0)                         # (GL, 2H)
        feat = x0[:, :H]                       # (GL, H)
        rc = x0[:, H:]                         # (GL, H)

        # Zero the halo buffer once per grid step.  Every layer fully rewrites
        # the data rows [OFF, OFF+L) of each batch segment before reading, so
        # the halos stay zero for all layers (do NOT hoist/remove this memset:
        # scratch persists across grid steps and is per-core under megacore).
        hrbuf[...] = jnp.zeros((G, LP, H2), jnp.float32)

        # ---- gated dilated-conv blocks (statically unrolled, VMEM weights) ----
        for i, dil in enumerate(dilations):
            pad = (K - 1) // 2 * dil
            lnp = lnp_ref[i]                                   # (4, H)
            h = _layernorm(feat, lnp[0:1, :], lnp[1:2, :])
            rh = _layernorm(rc, lnp[2:3, :], lnp[3:4, :])
            hr = jnp.concatenate([h, rh], axis=-1)             # (GL, 2H)
            # scatter the data rows into the per-batch halo segments
            for b in range(G):
                hrbuf[b, OFF:OFF + L, :] = hr[b * L:(b + 1) * L, :]
            base = OFF - pad
            # im2col: each tap is a contiguous 64-lane (h | rh) read; taps are
            # cast to bf16 before the lane-concat to keep vreg pressure low.
            taps = []
            for k in range(K):
                s = base + k * dil
                tap = jnp.concatenate(
                    [hrbuf[b, s:s + L, :] for b in range(G)], axis=0)  # (GL, 2H)
                taps.append(tap.astype(jnp.bfloat16))
            cols = jnp.concatenate(taps, axis=-1)              # (GL, K*2H) bf16
            # merged per-tap block-diagonal weight -> [conv(h) | gate(rh)]
            hg = jnp.dot(cols, cw_ref[i],
                         preferred_element_type=jnp.float32) + cb_ref[i]
            act = _gelu(hg)                                    # (GL, 2H)
            h_act = act[:, :H]
            g_act = act[:, H:]
            feat = h_act + g_act + feat                        # forget=False branch
            rc = g_act + rc
            # dropout(p=0) == identity

        # ---- milinear MLP (Lin-GELU-Lin-LN-Lin-GELU-Lin-LN) + residual ----
        x = feat
        y = _gelu(jnp.dot(x.astype(jnp.bfloat16), mw1[...],
                          preferred_element_type=jnp.float32) + mb1[...])
        y = jnp.dot(y.astype(jnp.bfloat16), mw2[...],
                    preferred_element_type=jnp.float32) + mb2[...]
        y = _layernorm(y, mln1[0:1, :], mln1[1:2, :])
        y = _gelu(jnp.dot(y.astype(jnp.bfloat16), mw3[...],
                          preferred_element_type=jnp.float32) + mb3[...])
        y = jnp.dot(y.astype(jnp.bfloat16), mw4[...],
                    preferred_element_type=jnp.float32) + mb4[...]
        y = _layernorm(y, mln2[0:1, :], mln2[1:2, :])
        out_ref[...] = y + x

    const2 = lambda r, c: pl.BlockSpec((r, c), lambda g: (0, 0))
    const3 = lambda a, r, c: pl.BlockSpec((a, r, c), lambda g: (0, 0, 0))

    return pl.pallas_call(
        kernel,
        out_shape=jax.ShapeDtypeStruct((B * L, H), jnp.float32),
        grid_spec=pltpu.PrefetchScalarGridSpec(
            num_scalar_prefetch=0,
            grid=(NG,),
            in_specs=[
                pl.BlockSpec((GL, CI2), lambda g: (g, 0)),   # input im2col (bf16)
                const2(CI2, H2),              # merged input conv weight (block-diag, bf16)
                const2(1, H2),                # merged input conv bias
                const3(NL, 4, H),             # per-layer LN params (ln_w,ln_b,rc_ln_w,rc_ln_b)
                const3(NL, K * H2, H2),       # merged per-tap conv|gate weights (bf16)
                const3(NL, 1, H2),            # merged conv|gate biases
                const2(H, HI), const2(1, HI),     # mlp w1,b1
                const2(HI, HI), const2(1, HI),    # mlp w2,b2
                const2(2, HI),                    # mlp LN1 (w;b)
                const2(HI, HI), const2(1, HI),    # mlp w3,b3
                const2(HI, H), const2(1, H),      # mlp w4,b4
                const2(2, H),                     # mlp LN2 (w;b)
            ],
            out_specs=pl.BlockSpec((GL, H), lambda g: (g, 0)),
            scratch_shapes=[pltpu.VMEM((G, LP, H2), jnp.float32)],
        ),
        compiler_params=pltpu.CompilerParams(
            dimension_semantics=("parallel",)),   # >1 step only if batches_per_step < B
    )


# ---------------------------------------------------------------------------
# parameter init (deterministic, synthetic — shapes follow the module __init__),
# packed into the merged / interleaved layout the fused kernel consumes.
#   conv weights: (K, Cin, Cout) im2col rows = k*Cin + cin; matmul weights bf16.
# ---------------------------------------------------------------------------
def init_params(key, A, H, K, dilations, d_inner):
    HI = H * d_inner
    keys = iter(jax.random.split(key, 64))

    def w(shape, scale=0.1):
        return (scale * jax.random.normal(next(keys), shape)).astype(jnp.float32)

    def im2col(conv_w):    # (K, Cin, Cout) -> (K*Cin, Cout)
        kk, cin, cout = conv_w.shape
        return conv_w.reshape(kk * cin, cout)

    # input convs, merged block-diagonally: rows = [oh branch (K*A) | rc branch (K*A)]
    lin_w, rc_lin_w = w((K, A, H)), w((K, A, H))
    zA = jnp.zeros((K * A, H), jnp.float32)
    inw = jnp.concatenate(
        [jnp.concatenate([im2col(lin_w), zA], axis=1),
         jnp.concatenate([zA, im2col(rc_lin_w)], axis=1)], axis=0)       # (2KA, 2H)
    inb = jnp.concatenate([w((1, H)), w((1, H))], axis=1)                # (1, 2H)

    # gated blocks: per-tap interleaved block-diagonal weights (K*2H, 2H)
    #   row k*2H + c:  c <  H -> h  channel c   -> conv_w[k,c,:]  in cols [0,H)
    #                  c >= H -> rh channel c-H -> gate_w[k,c-H,:] in cols [H,2H)
    lnp, cw, cb = [], [], []
    zH = jnp.zeros((H, H), jnp.float32)
    for _ in dilations:
        conv_w, gate_w = w((K, H, H)), w((K, H, H))
        conv_b, gate_b = w((1, H)), w((1, H))
        blocks = [jnp.concatenate(
                      [jnp.concatenate([conv_w[k], zH], axis=1),
                       jnp.concatenate([zH, gate_w[k]], axis=1)], axis=0)
                  for k in range(K)]
        cw.append(jnp.concatenate(blocks, axis=0))                       # (K*2H, 2H)
        cb.append(jnp.concatenate([conv_b, gate_b], axis=1))             # (1, 2H)
        lnp.append(jnp.stack([jnp.ones((H,)), jnp.zeros((H,)),
                              jnp.ones((H,)), jnp.zeros((H,))]).astype(jnp.float32))

    params = {
        "inw": inw.astype(jnp.bfloat16), "inb": inb.astype(jnp.float32),
        "lnp": jnp.stack(lnp).astype(jnp.float32),       # (NL, 4, H)
        "cw": jnp.stack(cw).astype(jnp.bfloat16),        # (NL, K*2H, 2H)
        "cb": jnp.stack(cb).astype(jnp.float32),         # (NL, 1, 2H)
        "mw1": w((H, HI)).astype(jnp.bfloat16), "mb1": w((1, HI)),
        "mw2": w((HI, HI)).astype(jnp.bfloat16), "mb2": w((1, HI)),
        "mln1": jnp.concatenate([jnp.ones((1, HI)), jnp.zeros((1, HI))],
                                axis=0).astype(jnp.float32),
        "mw3": w((HI, HI)).astype(jnp.bfloat16), "mb3": w((1, HI)),
        "mw4": w((HI, H)).astype(jnp.bfloat16), "mb4": w((1, H)),
        "mln2": jnp.concatenate([jnp.ones((1, H)), jnp.zeros((1, H))],
                                axis=0).astype(jnp.float32),
    }
    return params


# ---------------------------------------------------------------------------
# full forward: one-hot / input im2col glue in plain JAX; everything else is
# the single fused Pallas kernel.
# ---------------------------------------------------------------------------
def cnn_model_forward(seq, p, *, A, H, K, dilations, d_inner, batches_per_step=None):
    B, L = seq.shape
    pad_in = (K - 1) // 2          # input Conv1d: kernel=9, padding=4, dilation=1
    # reverse-complement tokens: N(=4) stays N, else 3 - token (no L reversal —
    # matches the PyTorch reference, which only complements).
    rc_seq = jnp.where(seq == 4, 4, 3 - seq)
    oh = jax.nn.one_hot(seq, A, dtype=jnp.float32)
    rc_oh = jax.nn.one_hot(rc_seq, A, dtype=jnp.float32)
    ohp = jnp.pad(oh, ((0, 0), (pad_in, pad_in), (0, 0)))
    rcp = jnp.pad(rc_oh, ((0, 0), (pad_in, pad_in), (0, 0)))
    # input im2col precomputed here (removes 18 sub-lane slice+concats from the
    # kernel); oh and rc columns concatenated -> one block-diagonal input dot.
    oh_cols = jnp.concatenate([ohp[:, k:k + L, :] for k in range(K)], axis=-1)
    rc_cols = jnp.concatenate([rcp[:, k:k + L, :] for k in range(K)], axis=-1)
    in_cols = jnp.concatenate([oh_cols, rc_cols], axis=-1)               # (B, L, 2KA)
    in_cols = in_cols.reshape(B * L, 2 * K * A).astype(jnp.bfloat16)

    G = B if batches_per_step is None else batches_per_step
    fwd = make_fused_forward(B, L, A, H, H * d_inner, K, dilations, G)
    flat = fwd(in_cols, p["inw"], p["inb"], p["lnp"], p["cw"], p["cb"],
               p["mw1"], p["mb1"], p["mw2"], p["mb2"], p["mln1"],
               p["mw3"], p["mb3"], p["mw4"], p["mb4"], p["mln2"])
    feat = flat.reshape(B, L, H)   # row-major reshape outside the kernel (free)
    # for_representation=True, use_outlinear=False  ->  return (feat, None)
    return feat, None


if __name__ == "__main__":
    A = 5                       # alphabet_size (A,C,G,T,N)
    H = 32                      # args.hidden_dim
    K = 9                       # kernel_size
    d_inner = 2
    dilations = [1, 1, 2, 4, 8] # num_conv1d=5, num_cnn_stacks=1, dilation=2
    B, L = 2, 32

    key = jax.random.PRNGKey(0)
    kseq, kparam = jax.random.split(key)
    seq = jax.random.randint(kseq, (B, L), 0, A, dtype=jnp.int32)
    params = init_params(kparam, A, H, K, dilations, d_inner)

    feat, _ = cnn_model_forward(seq, params, A=A, H=H, K=K,
                                dilations=dilations, d_inner=d_inner)
    feat = jax.block_until_ready(feat)
    assert feat.shape == (B, L, H) and feat.dtype == jnp.float32
    assert bool(jnp.all(jnp.isfinite(feat)))
    print("KERNEL_OK")
</pallas_src>

<mosaic_0001>
module attributes {stable_mosaic.version = 11 : i64} {
  func.func @kernel(%arg0: i32, %arg1: memref<64x90xbf16, #tpu.memory_space<vmem>>, %arg2: memref<90x64xbf16, #tpu.memory_space<vmem>>, %arg3: memref<1x64xf32, #tpu.memory_space<vmem>>, %arg4: memref<5x4x32xf32, #tpu.memory_space<vmem>>, %arg5: memref<5x576x64xbf16, #tpu.memory_space<vmem>>, %arg6: memref<5x1x64xf32, #tpu.memory_space<vmem>>, %arg7: memref<32x64xbf16, #tpu.memory_space<vmem>>, %arg8: memref<1x64xf32, #tpu.memory_space<vmem>>, %arg9: memref<64x64xbf16, #tpu.memory_space<vmem>>, %arg10: memref<1x64xf32, #tpu.memory_space<vmem>>, %arg11: memref<2x64xf32, #tpu.memory_space<vmem>>, %arg12: memref<64x64xbf16, #tpu.memory_space<vmem>>, %arg13: memref<1x64xf32, #tpu.memory_space<vmem>>, %arg14: memref<64x32xbf16, #tpu.memory_space<vmem>>, %arg15: memref<1x32xf32, #tpu.memory_space<vmem>>, %arg16: memref<2x32xf32, #tpu.memory_space<vmem>>, %arg17: memref<64x32xf32, #tpu.memory_space<vmem>>, %arg18: memref<2x96x64xf32, #tpu.memory_space<vmem>>) attributes {dimension_semantics = [#tpu.dimension_semantics<parallel>], iteration_bounds = array<i64: 1>, scalar_prefetch = 0 : i64, scratch_operands = 1 : i64, tpu.core_type = #tpu.core_type<tc>, window_params = [{transform_indices = @transform_0, window_bounds = array<i64: 64, 90>}, {pipeline_mode = #tpu.pipeline_mode<synchronous>, transform_indices = @transform_1, window_bounds = array<i64: 90, 64>}, {pipeline_mode = #tpu.pipeline_mode<synchronous>, transform_indices = @transform_2, window_bounds = array<i64: 1, 64>}, {pipeline_mode = #tpu.pipeline_mode<synchronous>, transform_indices = @transform_3, window_bounds = array<i64: 5, 4, 32>}, {pipeline_mode = #tpu.pipeline_mode<synchronous>, transform_indices = @transform_4, window_bounds = array<i64: 5, 576, 64>}, {pipeline_mode = #tpu.pipeline_mode<synchronous>, transform_indices = @transform_5, window_bounds = array<i64: 5, 1, 64>}, {pipeline_mode = #tpu.pipeline_mode<synchronous>, transform_indices = @transform_6, window_bounds = array<i64: 32, 64>}, {pipeline_mode = #tpu.pipeline_mode<synchronous>, transform_indices = @transform_7, window_bounds = array<i64: 1, 64>}, {pipeline_mode = #tpu.pipeline_mode<synchronous>, transform_indices = @transform_8, window_bounds = array<i64: 64, 64>}, {pipeline_mode = #tpu.pipeline_mode<synchronous>, transform_indices = @transform_9, window_bounds = array<i64: 1, 64>}, {pipeline_mode = #tpu.pipeline_mode<synchronous>, transform_indices = @transform_10, window_bounds = array<i64: 2, 64>}, {pipeline_mode = #tpu.pipeline_mode<synchronous>, transform_indices = @transform_11, window_bounds = array<i64: 64, 64>}, {pipeline_mode = #tpu.pipeline_mode<synchronous>, transform_indices = @transform_12, window_bounds = array<i64: 1, 64>}, {pipeline_mode = #tpu.pipeline_mode<synchronous>, transform_indices = @transform_13, window_bounds = array<i64: 64, 32>}, {pipeline_mode = #tpu.pipeline_mode<synchronous>, transform_indices = @transform_14, window_bounds = array<i64: 1, 32>}, {pipeline_mode = #tpu.pipeline_mode<synchronous>, transform_indices = @transform_15, window_bounds = array<i64: 2, 32>}, {transform_indices = @transform_16, window_bounds = array<i64: 64, 32>}]} {
    %c0 = arith.constant 0 : index
    %c0_0 = arith.constant 0 : index
    %0 = vector.load %arg1[%c0, %c0_0] : memref<64x90xbf16, #tpu.memory_space<vmem>>, vector<64x90xbf16>
    %c0_1 = arith.constant 0 : index
    %c0_2 = arith.constant 0 : index
    %1 = vector.load %arg2[%c0_1, %c0_2] : memref<90x64xbf16, #tpu.memory_space<vmem>>, vector<90x64xbf16>
    %cst = arith.constant dense<0.000000e+00> : vector<64x64xf32>
    %2 = tpu.matmul %0, %1, %cst {dimension_numbers = #tpu.dot_dimension_numbers<[1], [0], [0], [1], [0, 0, 1, 1], [], []>} : vector<64x90xbf16>, vector<90x64xbf16>, vector<64x64xf32> -> vector<64x64xf32>
    %c0_3 = arith.constant 0 : index
    %c0_4 = arith.constant 0 : index
    %3 = vector.load %arg3[%c0_3, %c0_4] : memref<1x64xf32, #tpu.memory_space<vmem>>, vector<1x64xf32>
    %4 = vector.broadcast %3 : vector<1x64xf32> to vector<64x64xf32>
    %5 = arith.addf %2, %4 : vector<64x64xf32>
    %cst_5 = arith.constant 5.000000e-01 : f32
    %6 = vector.broadcast %cst_5 : f32 to vector<64x64xf32>
    %7 = arith.mulf %6, %5 : vector<64x64xf32>
    %cst_6 = arith.constant 4.471500e-02 : f32
    %8 = vector.broadcast %cst_6 : f32 to vector<64x64xf32>
    %9 = arith.mulf %8, %5 : vector<64x64xf32>
    %10 = arith.mulf %9, %5 : vector<64x64xf32>
    %11 = arith.mulf %10, %5 : vector<64x64xf32>
    %12 = arith.addf %5, %11 : vector<64x64xf32>
    %cst_7 = arith.constant 0.797884583 : f32
    %13 = vector.broadcast %cst_7 : f32 to vector<64x64xf32>
    %14 = arith.mulf %13, %12 : vector<64x64xf32>
    %15 = math.tanh %14 : vector<64x64xf32>
    %cst_8 = arith.constant 1.000000e+00 : f32
    %16 = vector.broadcast %cst_8 : f32 to vector<64x64xf32>
    %17 = arith.addf %16, %15 : vector<64x64xf32>
    %18 = arith.mulf %7, %17 : vector<64x64xf32>
    %19 = vector.extract_strided_slice %18 {offsets = [0, 0], sizes = [64, 32], strides = [1, 1]} : vector<64x64xf32> to vector<64x32xf32>
    %20 = vector.extract_strided_slice %18 {offsets = [0, 32], sizes = [64, 32], strides = [1, 1]} : vector<64x64xf32> to vector<64x32xf32>
    %cst_9 = arith.constant 0.000000e+00 : f32
    %21 = vector.broadcast %cst_9 : f32 to vector<2x96x64xf32>
    %c0_10 = arith.constant 0 : index
    %c0_11 = arith.constant 0 : index
    %c0_12 = arith.constant 0 : index
    %22 = vector.load %arg18[%c0_10, %c0_11, %c0_12] : memref<2x96x64xf32, #tpu.memory_space<vmem>>, vector<2x96x64xf32>
    tpu.vector_store %arg18[%c0_10, %c0_11, %c0_12], %21 {strides = array<i32>} : memref<2x96x64xf32, #tpu.memory_space<vmem>>, vector<2x96x64xf32>,
    %c0_13 = arith.constant 0 : index
    %c0_14 = arith.constant 0 : index
    %c0_15 = arith.constant 0 : index
    %23 = vector.load %arg4[%c0_13, %c0_14, %c0_15] : memref<5x4x32xf32, #tpu.memory_space<vmem>>, vector<1x4x32xf32>
    %24 = vector.shape_cast %23 : vector<1x4x32xf32> to vector<4x32xf32>
    %25 = vector.extract_strided_slice %24 {offsets = [0, 0], sizes = [1, 32], strides = [1, 1]} : vector<4x32xf32> to vector<1x32xf32>
    %26 = vector.extract_strided_slice %24 {offsets = [1, 0], sizes = [1, 32], strides = [1, 1]} : vector<4x32xf32> to vector<1x32xf32>
    %cst_16 = arith.constant dense<0.000000e+00> : vector<64xf32>
    %27 = vector.multi_reduction <add>, %19, %cst_16 [1] : vector<64x32xf32> to vector<64xf32>
    %28 = vector.shape_cast %27 : vector<64xf32> to vector<64x1xf32>
    %cst_17 = arith.constant 3.200000e+01 : f32
    %29 = vector.broadcast %cst_17 : f32 to vector<64x1xf32>
    %30 = arith.divf %28, %29 : vector<64x1xf32>
    %31 = arith.mulf %19, %19 : vector<64x32xf32>
    %cst_18 = arith.constant dense<0.000000e+00> : vector<64xf32>
    %32 = vector.multi_reduction <add>, %31, %cst_18 [1] : vector<64x32xf32> to vector<64xf32>
    %33 = vector.shape_cast %32 : vector<64xf32> to vector<64x1xf32>
    %cst_19 = arith.constant 3.200000e+01 : f32
    %34 = vector.broadcast %cst_19 : f32 to vector<64x1xf32>
    %35 = arith.divf %33, %34 : vector<64x1xf32>
    %36 = arith.mulf %30, %30 : vector<64x1xf32>
    %37 = arith.subf %35, %36 : vector<64x1xf32>
    %38 = vector.broadcast %30 : vector<64x1xf32> to vector<64x32xf32>
    %39 = arith.subf %19, %38 : vector<64x32xf32>
    %cst_20 = arith.constant 9.99999974E-6 : f32
    %40 = vector.broadcast %cst_20 : f32 to vector<64x1xf32>
    %41 = arith.addf %37, %40 : vector<64x1xf32>
    %42 = math.rsqrt %41 : vector<64x1xf32>
    %43 = vector.broadcast %42 : vector<64x1xf32> to vector<64x32xf32>
    %44 = arith.mulf %39, %43 : vector<64x32xf32>
    %45 = vector.broadcast %25 : vector<1x32xf32> to vector<64x32xf32>
    %46 = arith.mulf %44, %45 : vector<64x32xf32>
    %47 = vector.broadcast %26 : vector<1x32xf32> to vector<64x32xf32>
    %48 = arith.addf %46, %47 : vector<64x32xf32>
    %49 = vector.extract_strided_slice %24 {offsets = [2, 0], sizes = [1, 32], strides = [1, 1]} : vector<4x32xf32> to vector<1x32xf32>
    %50 = vector.extract_strided_slice %24 {offsets = [3, 0], sizes = [1, 32], strides = [1, 1]} : vector<4x32xf32> to vector<1x32xf32>
    %cst_21 = arith.constant dense<0.000000e+00> : vector<64xf32>
    %51 = vector.multi_reduction <add>, %20, %cst_21 [1] : vector<64x32xf32> to vector<64xf32>
    %52 = vector.shape_cast %51 : vector<64xf32> to vector<64x1xf32>
    %cst_22 = arith.constant 3.200000e+01 : f32
    %53 = vector.broadcast %cst_22 : f32 to vector<64x1xf32>
    %54 = arith.divf %52, %53 : vector<64x1xf32>
    %55 = arith.mulf %20, %20 : vector<64x32xf32>
    %cst_23 = arith.constant dense<0.000000e+00> : vector<64xf32>
    %56 = vector.multi_reduction <add>, %55, %cst_23 [1] : vector<64x32xf32> to vector<64xf32>
    %57 = vector.shape_cast %56 : vector<64xf32> to vector<64x1xf32>
    %cst_24 = arith.constant 3.200000e+01 : f32
    %58 = vector.broadcast %cst_24 : f32 to vector<64x1xf32>
    %59 = arith.divf %57, %58 : vector<64x1xf32>
    %60 = arith.mulf %54, %54 : vector<64x1xf32>
    %61 = arith.subf %59, %60 : vector<64x1xf32>
    %62 = vector.broadcast %54 : vector<64x1xf32> to vector<64x32xf32>
    %63 = arith.subf %20, %62 : vector<64x32xf32>
    %cst_25 = arith.constant 9.99999974E-6 : f32
    %64 = vector.broadcast %cst_25 : f32 to vector<64x1xf32>
    %65 = arith.addf %61, %64 : vector<64x1xf32>
    %66 = math.rsqrt %65 : vector<64x1xf32>
    %67 = vector.broadcast %66 : vector<64x1xf32> to vector<64x32xf32>
    %68 = arith.mulf %63, %67 : vector<64x32xf32>
    %69 = vector.broadcast %49 : vector<1x32xf32> to vector<64x32xf32>
    %70 = arith.mulf %68, %69 : vector<64x32xf32>
    %71 = vector.broadcast %50 : vector<1x32xf32> to vector<64x32xf32>
    %72 = arith.addf %70, %71 : vector<64x32xf32>
    %73 = tpu.concatenate %48, %72 in 1 : vector<64x32xf32>, vector<64x32xf32> -> vector<64x64xf32>
    %74 = vector.extract_strided_slice %73 {offsets = [0, 0], sizes = [32, 64], strides = [1, 1]} : vector<64x64xf32> to vector<32x64xf32>
    %c0_26 = arith.constant 0 : index
    %c32 = arith.constant 32 : index
    %c0_27 = arith.constant 0 : index
    %75 = vector.load %arg18[%c0_26, %c32, %c0_27] : memref<2x96x64xf32, #tpu.memory_space<vmem>>, vector<1x32x64xf32>
    %76 = vector.shape_cast %75 : vector<1x32x64xf32> to vector<32x64xf32>
    %77 = vector.shape_cast %74 : vector<32x64xf32> to vector<1x32x64xf32>
    tpu.vector_store %arg18[%c0_26, %c32, %c0_27], %77 {strides = array<i32>} : memref<2x96x64xf32, #tpu.memory_space<vmem>>, vector<1x32x64xf32>,
    %78 = vector.extract_strided_slice %73 {offsets = [32, 0], sizes = [32, 64], strides = [1, 1]} : vector<64x64xf32> to vector<32x64xf32>
    %c1 = arith.constant 1 : index
    %c32_28 = arith.constant 32 : index
    %c0_29 = arith.constant 0 : index
    %79 = vector.load %arg18[%c1, %c32_28, %c0_29] : memref<2x96x64xf32, #tpu.memory_space<vmem>>, vector<1x32x64xf32>
    %80 = vector.shape_cast %79 : vector<1x32x64xf32> to vector<32x64xf32>
    %81 = vector.shape_cast %78 : vector<32x64xf32> to vector<1x32x64xf32>
    tpu.vector_store %arg18[%c1, %c32_28, %c0_29], %81 {strides = array<i32>} : memref<2x96x64xf32, #tpu.memory_space<vmem>>, vector<1x32x64xf32>,
    %c0_30 = arith.constant 0 : index
    %c28 = arith.constant 28 : index
    %c0_31 = arith.constant 0 : index
    %82 = vector.load %arg18[%c0_30, %c28, %c0_31] : memref<2x96x64xf32, #tpu.memory_space<vmem>>, vector<1x32x64xf32>
    %83 = vector.shape_cast %82 : vector<1x32x64xf32> to vector<32x64xf32>
    %c1_32 = arith.constant 1 : index
    %c28_33 = arith.constant 28 : index
    %c0_34 = arith.constant 0 : index
    %84 = vector.load %arg18[%c1_32, %c28_33, %c0_34] : memref<2x96x64xf32, #tpu.memory_space<vmem>>, vector<1x32x64xf32>
    %85 = vector.shape_cast %84 : vector<1x32x64xf32> to vector<32x64xf32>
    %86 = tpu.concatenate %83, %85 in 0 : vector<32x64xf32>, vector<32x64xf32> -> vector<64x64xf32>
    %87 = arith.truncf %86 : vector<64x64xf32> to vector<64x64xbf16>
    %c0_35 = arith.constant 0 : index
    %c29 = arith.constant 29 : index
    %c0_36 = arith.constant 0 : index
    %88 = vector.load %arg18[%c0_35, %c29, %c0_36] : memref<2x96x64xf32, #tpu.memory_space<vmem>>, vector<1x32x64xf32>
    %89 = vector.shape_cast %88 : vector<1x32x64xf32> to vector<32x64xf32>
    %c1_37 = arith.constant 1 : index
    %c29_38 = arith.constant 29 : index
    %c0_39 = arith.constant 0 : index
    %90 = vector.load %arg18[%c1_37, %c29_38, %c0_39] : memref<2x96x64xf32, #tpu.memory_space<vmem>>, vector<1x32x64xf32>
    %91 = vector.shape_cast %90 : vector<1x32x64xf32> to vector<32x64xf32>
    %92 = tpu.concatenate %89, %91 in 0 : vector<32x64xf32>, vector<32x64xf32> -> vector<64x64xf32>
    %93 = arith.truncf %92 : vector<64x64xf32> to vector<64x64xbf16>
    %c0_40 = arith.constant 0 : index
    %c30 = arith.constant 30 : index
    %c0_41 = arith.constant 0 : index
    %94 = vector.load %arg18[%c0_40, %c30, %c0_41] : memref<2x96x64xf32, #tpu.memory_space<vmem>>, vector<1x32x64xf32>
    %95 = vector.shape_cast %94 : vector<1x32x64xf32> to vector<32x64xf32>
    %c1_42 = arith.constant 1 : index
    %c30_43 = arith.constant 30 : index
    %c0_44 = arith.constant 0 : index
    %96 = vector.load %arg18[%c1_42, %c30_43, %c0_44] : memref<2x96x64xf32, #tpu.memory_space<vmem>>, vector<1x32x64xf32>
    %97 = vector.shape_cast %96 : vector<1x32x64xf32> to vector<32x64xf32>
    %98 = tpu.concatenate %95, %97 in 0 : vector<32x64xf32>, vector<32x64xf32> -> vector<64x64xf32>
    %99 = arith.truncf %98 : vector<64x64xf32> to vector<64x64xbf16>
    %c0_45 = arith.constant 0 : index
    %c31 = arith.constant 31 : index
    %c0_46 = arith.constant 0 : index
    %100 = vector.load %arg18[%c0_45, %c31, %c0_46] : memref<2x96x64xf32, #tpu.memory_space<vmem>>, vector<1x32x64xf32>
    %101 = vector.shape_cast %100 : vector<1x32x64xf32> to vector<32x64xf32>
    %c1_47 = arith.constant 1 : index
    %c31_48 = arith.constant 31 : index
    %c0_49 = arith.constant 0 : index
    %102 = vector.load %arg18[%c1_47, %c31_48, %c0_49] : memref<2x96x64xf32, #tpu.memory_space<vmem>>, vector<1x32x64xf32>
    %103 = vector.shape_cast %102 : vector<1x32x64xf32> to vector<32x64xf32>
    %104 = tpu.concatenate %101, %103 in 0 : vector<32x64xf32>, vector<32x64xf32> -> vector<64x64xf32>
    %105 = arith.truncf %104 : vector<64x64xf32> to vector<64x64xbf16>
    %c0_50 = arith.constant 0 : index
    %c32_51 = arith.constant 32 : index
    %c0_52 = arith.constant 0 : index
    %106 = vector.load %arg18[%c0_50, %c32_51, %c0_52] : memref<2x96x64xf32, #tpu.memory_space<vmem>>, vector<1x32x64xf32>
    %107 = vector.shape_cast %106 : vector<1x32x64xf32> to vector<32x64xf32>
    %c1_53 = arith.constant 1 : index
    %c32_54 = arith.constant 32 : index
    %c0_55 = arith.constant 0 : index
    %108 = vector.load %arg18[%c1_53, %c32_54, %c0_55] : memref<2x96x64xf32, #tpu.memory_space<vmem>>, vector<1x32x64xf32>
    %109 = vector.shape_cast %108 : vector<1x32x64xf32> to vector<32x64xf32>
    %110 = tpu.concatenate %107, %109 in 0 : vector<32x64xf32>, vector<32x64xf32> -> vector<64x64xf32>
    %111 = arith.truncf %110 : vector<64x64xf32> to vector<64x64xbf16>
    %c0_56 = arith.constant 0 : index
    %c33 = arith.constant 33 : index
    %c0_57 = arith.constant 0 : index
    %112 = vector.load %arg18[%c0_56, %c33, %c0_57] : memref<2x96x64xf32, #tpu.memory_space<vmem>>, vector<1x32x64xf32>
    %113 = vector.shape_cast %112 : vector<1x32x64xf32> to vector<32x64xf32>
    %c1_58 = arith.constant 1 : index
    %c33_59 = arith.constant 33 : index
    %c0_60 = arith.constant 0 : index
    %114 = vector.load %arg18[%c1_58, %c33_59, %c0_60] : memref<2x96x64xf32, #tpu.memory_space<vmem>>, vector<1x32x64xf32>
    %115 = vector.shape_cast %114 : vector<1x32x64xf32> to vector<32x64xf32>
    %116 = tpu.concatenate %113, %115 in 0 : vector<32x64xf32>, vector<32x64xf32> -> vector<64x64xf32>
    %117 = arith.truncf %116 : vector<64x64xf32> to vector<64x64xbf16>
    %c0_61 = arith.constant 0 : index
    %c34 = arith.constant 34 : index
    %c0_62 = arith.constant 0 : index
    %118 = vector.load %arg18[%c0_61, %c34, %c0_62] : memref<2x96x64xf32, #tpu.memory_space<vmem>>, vector<1x32x64xf32>
    %119 = vector.shape_cast %118 : vector<1x32x64xf32> to vector<32x64xf32>
    %c1_63 = arith.constant 1 : index
    %c34_64 = arith.constant 34 : index
    %c0_65 = arith.constant 0 : index
    %120 = vector.load %arg18[%c1_63, %c34_64, %c0_65] : memref<2x96x64xf32, #tpu.memory_space<vmem>>, vector<1x32x64xf32>
    %121 = vector.shape_cast %120 : vector<1x32x64xf32> to vector<32x64xf32>
    %122 = tpu.concatenate %119, %121 in 0 : vector<32x64xf32>, vector<32x64xf32> -> vector<64x64xf32>
    %123 = arith.truncf %122 : vector<64x64xf32> to vector<64x64xbf16>
    %c0_66 = arith.constant 0 : index
    %c35 = arith.constant 35 : index
    %c0_67 = arith.constant 0 : index
    %124 = vector.load %arg18[%c0_66, %c35, %c0_67] : memref<2x96x64xf32, #tpu.memory_space<vmem>>, vector<1x32x64xf32>
    %125 = vector.shape_cast %124 : vector<1x32x64xf32> to vector<32x64xf32>
    %c1_68 = arith.constant 1 : index
    %c35_69 = arith.constant 35 : index
    %c0_70 = arith.constant 0 : index
    %126 = vector.load %arg18[%c1_68, %c35_69, %c0_70] : memref<2x96x64xf32, #tpu.memory_space<vmem>>, vector<1x32x64xf32>
    %127 = vector.shape_cast %126 : vector<1x32x64xf32> to vector<32x64xf32>
    %128 = tpu.concatenate %125, %127 in 0 : vector<32x64xf32>, vector<32x64xf32> -> vector<64x64xf32>
    %129 = arith.truncf %128 : vector<64x64xf32> to vector<64x64xbf16>
    %c0_71 = arith.constant 0 : index
    %c36 = arith.constant 36 : index
    %c0_72 = arith.constant 0 : index
    %130 = vector.load %arg18[%c0_71, %c36, %c0_72] : memref<2x96x64xf32, #tpu.memory_space<vmem>>, vector<1x32x64xf32>
    %131 = vector.shape_cast %130 : vector<1x32x64xf32> to vector<32x64xf32>
    %c1_73 = arith.constant 1 : index
    %c36_74 = arith.constant 36 : index
    %c0_75 = arith.constant 0 : index
    %132 = vector.load %arg18[%c1_73, %c36_74, %c0_75] : memref<2x96x64xf32, #tpu.memory_space<vmem>>, vector<1x32x64xf32>
    %133 = vector.shape_cast %132 : vector<1x32x64xf32> to vector<32x64xf32>
    %134 = tpu.concatenate %131, %133 in 0 : vector<32x64xf32>, vector<32x64xf32> -> vector<64x64xf32>
    %135 = arith.truncf %134 : vector<64x64xf32> to vector<64x64xbf16>
    %136 = tpu.concatenate %87, %93, %99, %105, %111, %117, %123, %129, %135 in 1 : vector<64x64xbf16>, vector<64x64xbf16>, vector<64x64xbf16>, vector<64x64xbf16>, vector<64x64xbf16>, vector<64x64xbf16>, vector<64x64xbf16>, vector<64x64xbf16>, vector<64x64xbf16> -> vector<64x576xbf16>
    %c0_76 = arith.constant 0 : index
    %c0_77 = arith.constant 0 : index
    %c0_78 = arith.constant 0 : index
    %137 = vector.load %arg5[%c0_76, %c0_77, %c0_78] : memref<5x576x64xbf16, #tpu.memory_space<vmem>>, vector<1x576x64xbf16>
    %138 = vector.shape_cast %137 : vector<1x576x64xbf16> to vector<576x64xbf16>
    %cst_79 = arith.constant dense<0.000000e+00> : vector<64x64xf32>
    %139 = tpu.matmul %136, %138, %cst_79 {dimension_numbers = #tpu.dot_dimension_numbers<[1], [0], [0], [1], [0, 0, 1, 1], [], []>} : vector<64x576xbf16>, vector<576x64xbf16>, vector<64x64xf32> -> vector<64x64xf32>
    %c0_80 = arith.constant 0 : index
    %c0_81 = arith.constant 0 : index
    %c0_82 = arith.constant 0 : index
    %140 = vector.load %arg6[%c0_80, %c0_81, %c0_82] : memref<5x1x64xf32, #tpu.memory_space<vmem>>, vector<1x1x64xf32>
    %141 = vector.shape_cast %140 : vector<1x1x64xf32> to vector<1x64xf32>
    %142 = vector.broadcast %141 : vector<1x64xf32> to vector<64x64xf32>
    %143 = arith.addf %139, %142 : vector<64x64xf32>
    %cst_83 = arith.constant 5.000000e-01 : f32
    %144 = vector.broadcast %cst_83 : f32 to vector<64x64xf32>
    %145 = arith.mulf %144, %143 : vector<64x64xf32>
    %cst_84 = arith.constant 4.471500e-02 : f32
    %146 = vector.broadcast %cst_84 : f32 to vector<64x64xf32>
    %147 = arith.mulf %146, %143 : vector<64x64xf32>
    %148 = arith.mulf %147, %143 : vector<64x64xf32>
    %149 = arith.mulf %148, %143 : vector<64x64xf32>
    %150 = arith.addf %143, %149 : vector<64x64xf32>
    %cst_85 = arith.constant 0.797884583 : f32
    %151 = vector.broadcast %cst_85 : f32 to vector<64x64xf32>
    %152 = arith.mulf %151, %150 : vector<64x64xf32>
    %153 = math.tanh %152 : vector<64x64xf32>
    %cst_86 = arith.constant 1.000000e+00 : f32
    %154 = vector.broadcast %cst_86 : f32 to vector<64x64xf32>
    %155 = arith.addf %154, %153 : vector<64x64xf32>
    %156 = arith.mulf %145, %155 : vector<64x64xf32>
    %157 = vector.extract_strided_slice %156 {offsets = [0, 0], sizes = [64, 32], strides = [1, 1]} : vector<64x64xf32> to vector<64x32xf32>
    %158 = vector.extract_strided_slice %156 {offsets = [0, 32], sizes = [64, 32], strides = [1, 1]} : vector<64x64xf32> to vector<64x32xf32>
    %159 = arith.addf %157, %158 : vector<64x32xf32>
    %160 = arith.addf %159, %19 : vector<64x32xf32>
    %161 = arith.addf %158, %20 : vector<64x32xf32>
    %c1_87 = arith.constant 1 : index
    %c0_88 = arith.constant 0 : index
    %c0_89 = arith.constant 0 : index
    %162 = vector.load %arg4[%c1_87, %c0_88, %c0_89] : memref<5x4x32xf32, #tpu.memory_space<vmem>>, vector<1x4x32xf32>
    %163 = vector.shape_cast %162 : vector<1x4x32xf32> to vector<4x32xf32>
    %164 = vector.extract_strided_slice %163 {offsets = [0, 0], sizes = [1, 32], strides = [1, 1]} : vector<4x32xf32> to vector<1x32xf32>
    %165 = vector.extract_strided_slice %163 {offsets = [1, 0], sizes = [1, 32], strides = [1, 1]} : vector<4x32xf32> to vector<1x32xf32>
    %cst_90 = arith.constant dense<0.000000e+00> : vector<64xf32>
    %166 = vector.multi_reduction <add>, %160, %cst_90 [1] : vector<64x32xf32> to vector<64xf32>
    %167 = vector.shape_cast %166 : vector<64xf32> to vector<64x1xf32>
    %cst_91 = arith.constant 3.200000e+01 : f32
    %168 = vector.broadcast %cst_91 : f32 to vector<64x1xf32>
    %169 = arith.divf %167, %168 : vector<64x1xf32>
    %170 = arith.mulf %160, %160 : vector<64x32xf32>
    %cst_92 = arith.constant dense<0.000000e+00> : vector<64xf32>
    %171 = vector.multi_reduction <add>, %170, %cst_92 [1] : vector<64x32xf32> to vector<64xf32>
    %172 = vector.shape_cast %171 : vector<64xf32> to vector<64x1xf32>
    %cst_93 = arith.constant 3.200000e+01 : f32
    %173 = vector.broadcast %cst_93 : f32 to vector<64x1xf32>
    %174 = arith.divf %172, %173 : vector<64x1xf32>
    %175 = arith.mulf %169, %169 : vector<64x1xf32>
    %176 = arith.subf %174, %175 : vector<64x1xf32>
    %177 = vector.broadcast %169 : vector<64x1xf32> to vector<64x32xf32>
    %178 = arith.subf %160, %177 : vector<64x32xf32>
    %cst_94 = arith.constant 9.99999974E-6 : f32
    %179 = vector.broadcast %cst_94 : f32 to vector<64x1xf32>
    %180 = arith.addf %176, %179 : vector<64x1xf32>
    %181 = math.rsqrt %180 : vector<64x1xf32>
    %182 = vector.broadcast %181 : vector<64x1xf32> to vector<64x32xf32>
    %183 = arith.mulf %178, %182 : vector<64x32xf32>
    %184 = vector.broadcast %164 : vector<1x32xf32> to vector<64x32xf32>
    %185 = arith.mulf %183, %184 : vector<64x32xf32>
    %186 = vector.broadcast %165 : vector<1x32xf32> to vector<64x32xf32>
    %187 = arith.addf %185, %186 : vector<64x32xf32>
    %188 = vector.extract_strided_slice %163 {offsets = [2, 0], sizes = [1, 32], strides = [1, 1]} : vector<4x32xf32> to vector<1x32xf32>
    %189 = vector.extract_strided_slice %163 {offsets = [3, 0], sizes = [1, 32], strides = [1, 1]} : vector<4x32xf32> to vector<1x32xf32>
    %cst_95 = arith.constant dense<0.000000e+00> : vector<64xf32>
    %190 = vector.multi_reduction <add>, %161, %cst_95 [1] : vector<64x32xf32> to vector<64xf32>
    %191 = vector.shape_cast %190 : vector<64xf32> to vector<64x1xf32>
    %cst_96 = arith.constant 3.200000e+01 : f32
    %192 = vector.broadcast %cst_96 : f32 to vector<64x1xf32>
    %193 = arith.divf %191, %192 : vector<64x1xf32>
    %194 = arith.mulf %161, %161 : vector<64x32xf32>
    %cst_97 = arith.constant dense<0.000000e+00> : vector<64xf32>
    %195 = vector.multi_reduction <add>, %194, %cst_97 [1] : vector<64x32xf32> to vector<64xf32>
    %196 = vector.shape_cast %195 : vector<64xf32> to vector<64x1xf32>
    %cst_98 = arith.constant 3.200000e+01 : f32
    %197 = vector.broadcast %cst_98 : f32 to vector<64x1xf32>
    %198 = arith.divf %196, %197 : vector<64x1xf32>
    %199 = arith.mulf %193, %193 : vector<64x1xf32>
    %200 = arith.subf %198, %199 : vector<64x1xf32>
    %201 = vector.broadcast %193 : vector<64x1xf32> to vector<64x32xf32>
    %202 = arith.subf %161, %201 : vector<64x32xf32>
    %cst_99 = arith.constant 9.99999974E-6 : f32
    %203 = vector.broadcast %cst_99 : f32 to vector<64x1xf32>
    %204 = arith.addf %200, %203 : vector<64x1xf32>
    %205 = math.rsqrt %204 : vector<64x1xf32>
    %206 = vector.broadcast %205 : vector<64x1xf32> to vector<64x32xf32>
    %207 = arith.mulf %202, %206 : vector<64x32xf32>
    %208 = vector.broadcast %188 : vector<1x32xf32> to vector<64x32xf32>
    %209 = arith.mulf %207, %208 : vector<64x32xf32>
    %210 = vector.broadcast %189 : vector<1x32xf32> to vector<64x32xf32>
    %211 = arith.addf %209, %210 : vector<64x32xf32>
    %212 = tpu.concatenate %187, %211 in 1 : vector<64x32xf32>, vector<64x32xf32> -> vector<64x64xf32>
    %213 = vector.extract_strided_slice %212 {offsets = [0, 0], sizes = [32, 64], strides = [1, 1]} : vector<64x64xf32> to vector<32x64xf32>
    %c0_100 = arith.constant 0 : index
    %c32_101 = arith.constant 32 : index
    %c0_102 = arith.constant 0 : index
    %214 = vector.load %arg18[%c0_100, %c32_101, %c0_102] : memref<2x96x64xf32, #tpu.memory_space<vmem>>, vector<1x32x64xf32>
    %215 = vector.shape_cast %214 : vector<1x32x64xf32> to vector<32x64xf32>
    %216 = vector.shape_cast %213 : vector<32x64xf32> to vector<1x32x64xf32>
    tpu.vector_store %arg18[%c0_100, %c32_101, %c0_102], %216 {strides = array<i32>} : memref<2x96x64xf32, #tpu.memory_space<vmem>>, vector<1x32x64xf32>,
    %217 = vector.extract_strided_slice %212 {offsets = [32, 0], sizes = [32, 64], strides = [1, 1]} : vector<64x64xf32> to vector<32x64xf32>
    %c1_103 = arith.constant 1 : index
    %c32_104 = arith.constant 32 : index
    %c0_105 = arith.constant 0 : index
    %218 = vector.load %arg18[%c1_103, %c32_104, %c0_105] : memref<2x96x64xf32, #tpu.memory_space<vmem>>, vector<1x32x64xf32>
    %219 = vector.shape_cast %218 : vector<1x32x64xf32> to vector<32x64xf32>
    %220 = vector.shape_cast %217 : vector<32x64xf32> to vector<1x32x64xf32>
    tpu.vector_store %arg18[%c1_103, %c32_104, %c0_105], %220 {strides = array<i32>} : memref<2x96x64xf32, #tpu.memory_space<vmem>>, vector<1x32x64xf32>,
    %c0_106 = arith.constant 0 : index
    %c28_107 = arith.constant 28 : index
    %c0_108 = arith.constant 0 : index
    %221 = vector.load %arg18[%c0_106, %c28_107, %c0_108] : memref<2x96x64xf32, #tpu.memory_space<vmem>>, vector<1x32x64xf32>
    %222 = vector.shape_cast %221 : vector<1x32x64xf32> to vector<32x64xf32>
    %c1_109 = arith.constant 1 : index
    %c28_110 = arith.constant 28 : index
    %c0_111 = arith.constant 0 : index
    %223 = vector.load %arg18[%c1_109, %c28_110, %c0_111] : memref<2x96x64xf32, #tpu.memory_space<vmem>>, vector<1x32x64xf32>
    %224 = vector.shape_cast %223 : vector<1x32x64xf32> to vector<32x64xf32>
    %225 = tpu.concatenate %222, %224 in 0 : vector<32x64xf32>, vector<32x64xf32> -> vector<64x64xf32>
    %226 = arith.truncf %225 : vector<64x64xf32> to vector<64x64xbf16>
    %c0_112 = arith.constant 0 : index
    %c29_113 = arith.constant 29 : index
    %c0_114 = arith.constant 0 : index
    %227 = vector.load %arg18[%c0_112, %c29_113, %c0_114] : memref<2x96x64xf32, #tpu.memory_space<vmem>>, vector<1x32x64xf32>
    %228 = vector.shape_cast %227 : vector<1x32x64xf32> to vector<32x64xf32>
    %c1_115 = arith.constant 1 : index
    %c29_116 = arith.constant 29 : index
    %c0_117 = arith.constant 0 : index
    %229 = vector.load %arg18[%c1_115, %c29_116, %c0_117] : memref<2x96x64xf32, #tpu.memory_space<vmem>>, vector<1x32x64xf32>
    %230 = vector.shape_cast %229 : vector<1x32x64xf32> to vector<32x64xf32>
    %231 = tpu.concatenate %228, %230 in 0 : vector<32x64xf32>, vector<32x64xf32> -> vector<64x64xf32>
    %232 = arith.truncf %231 : vector<64x64xf32> to vector<64x64xbf16>
    %c0_118 = arith.constant 0 : index
    %c30_119 = arith.constant 30 : index
    %c0_120 = arith.constant 0 : index
    %233 = vector.load %arg18[%c0_118, %c30_119, %c0_120] : memref<2x96x64xf32, #tpu.memory_space<vmem>>, vector<1x32x64xf32>
    %234 = vector.shape_cast %233 : vector<1x32x64xf32> to vector<32x64xf32>
    %c1_121 = arith.constant 1 : index
    %c30_122 = arith.constant 30 : index
    %c0_123 = arith.constant 0 : index
    %235 = vector.load %arg18[%c1_121, %c30_122, %c0_123] : memref<2x96x64xf32, #tpu.memory_space<vmem>>, vector<1x32x64xf32>
    %236 = vector.shape_cast %235 : vector<1x32x64xf32> to vector<32x64xf32>
    %237 = tpu.concatenate %234, %236 in 0 : vector<32x64xf32>, vector<32x64xf32> -> vector<64x64xf32>
    %238 = arith.truncf %237 : vector<64x64xf32> to vector<64x64xbf16>
    %c0_124 = arith.constant 0 : index
    %c31_125 = arith.constant 31 : index
    %c0_126 = arith.constant 0 : index
    %239 = vector.load %arg18[%c0_124, %c31_125, %c0_126] : memref<2x96x64xf32, #tpu.memory_space<vmem>>, vector<1x32x64xf32>
    %240 = vector.shape_cast %239 : vector<1x32x64xf32> to vector<32x64xf32>
    %c1_127 = arith.constant 1 : index
    %c31_128 = arith.constant 31 : index
    %c0_129 = arith.constant 0 : index
    %241 = vector.load %arg18[%c1_127, %c31_128, %c0_129] : memref<2x96x64xf32, #tpu.memory_space<vmem>>, vector<1x32x64xf32>
    %242 = vector.shape_cast %241 : vector<1x32x64xf32> to vector<32x64xf32>
    %243 = tpu.concatenate %240, %242 in 0 : vector<32x64xf32>, vector<32x64xf32> -> vector<64x64xf32>
    %244 = arith.truncf %243 : vector<64x64xf32> to vector<64x64xbf16>
    %c0_130 = arith.constant 0 : index
    %c32_131 = arith.constant 32 : index
    %c0_132 = arith.constant 0 : index
    %245 = vector.load %arg18[%c0_130, %c32_131, %c0_132] : memref<2x96x64xf32, #tpu.memory_space<vmem>>, vector<1x32x64xf32>
    %246 = vector.shape_cast %245 : vector<1x32x64xf32> to vector<32x64xf32>
    %c1_133 = arith.constant 1 : index
    %c32_134 = arith.constant 32 : index
    %c0_135 = arith.constant 0 : index
    %247 = vector.load %arg18[%c1_133, %c32_134, %c0_135] : memref<2x96x64xf32, #tpu.memory_space<vmem>>, vector<1x32x64xf32>
    %248 = vector.shape_cast %247 : vector<1x32x64xf32> to vector<32x64xf32>
    %249 = tpu.concatenate %246, %248 in 0 : vector<32x64xf32>, vector<32x64xf32> -> vector<64x64xf32>
    %250 = arith.truncf %249 : vector<64x64xf32> to vector<64x64xbf16>
    %c0_136 = arith.constant 0 : index
    %c33_137 = arith.constant 33 : index
    %c0_138 = arith.constant 0 : index
    %251 = vector.load %arg18[%c0_136, %c33_137, %c0_138] : memref<2x96x64xf32, #tpu.memory_space<vmem>>, vector<1x32x64xf32>
    %252 = vector.shape_cast %251 : vector<1x32x64xf32> to vector<32x64xf32>
    %c1_139 = arith.constant 1 : index
    %c33_140 = arith.constant 33 : index
    %c0_141 = arith.constant 0 : index
    %253 = vector.load %arg18[%c1_139, %c33_140, %c0_141] : memref<2x96x64xf32, #tpu.memory_space<vmem>>, vector<1x32x64xf32>
    %254 = vector.shape_cast %253 : vector<1x32x64xf32> to vector<32x64xf32>
    %255 = tpu.concatenate %252, %254 in 0 : vector<32x64xf32>, vector<32x64xf32> -> vector<64x64xf32>
    %256 = arith.truncf %255 : vector<64x64xf32> to vector<64x64xbf16>
    %c0_142 = arith.constant 0 : index
    %c34_143 = arith.constant 34 : index
    %c0_144 = arith.constant 0 : index
    %257 = vector.load %arg18[%c0_142, %c34_143, %c0_144] : memref<2x96x64xf32, #tpu.memory_space<vmem>>, vector<1x32x64xf32>
    %258 = vector.shape_cast %257 : vector<1x32x64xf32> to vector<32x64xf32>
    %c1_145 = arith.constant 1 : index
    %c34_146 = arith.constant 34 : index
    %c0_147 = arith.constant 0 : index
    %259 = vector.load %arg18[%c1_145, %c34_146, %c0_147] : memref<2x96x64xf32, #tpu.memory_space<vmem>>, vector<1x32x64xf32>
    %260 = vector.shape_cast %259 : vector<1x32x64xf32> to vector<32x64xf32>
    %261 = tpu.concatenate %258, %260 in 0 : vector<32x64xf32>, vector<32x64xf32> -> vector<64x64xf32>
    %262 = arith.truncf %261 : vector<64x64xf32> to vector<64x64xbf16>
    %c0_148 = arith.constant 0 : index
    %c35_149 = arith.constant 35 : index
    %c0_150 = arith.constant 0 : index
    %263 = vector.load %arg18[%c0_148, %c35_149, %c0_150] : memref<2x96x64xf32, #tpu.memory_space<vmem>>, vector<1x32x64xf32>
    %264 = vector.shape_cast %263 : vector<1x32x64xf32> to vector<32x64xf32>
    %c1_151 = arith.constant 1 : index
    %c35_152 = arith.constant 35 : index
    %c0_153 = arith.constant 0 : index
    %265 = vector.load %arg18[%c1_151, %c35_152, %c0_153] : memref<2x96x64xf32, #tpu.memory_space<vmem>>, vector<1x32x64xf32>
    %266 = vector.shape_cast %265 : vector<1x32x64xf32> to vector<32x64xf32>
    %267 = tpu.concatenate %264, %266 in 0 : vector<32x64xf32>, vector<32x64xf32> -> vector<64x64xf32>
    %268 = arith.truncf %267 : vector<64x64xf32> to vector<64x64xbf16>
    %c0_154 = arith.constant 0 : index
    %c36_155 = arith.constant 36 : index
    %c0_156 = arith.constant 0 : index
    %269 = vector.load %arg18[%c0_154, %c36_155, %c0_156] : memref<2x96x64xf32, #tpu.memory_space<vmem>>, vector<1x32x64xf32>
    %270 = vector.shape_cast %269 : vector<1x32x64xf32> to vector<32x64xf32>
    %c1_157 = arith.constant 1 : index
    %c36_158 = arith.constant 36 : index
    %c0_159 = arith.constant 0 : index
    %271 = vector.load %arg18[%c1_157, %c36_158, %c0_159] : memref<2x96x64xf32, #tpu.memory_space<vmem>>, vector<1x32x64xf32>
    %272 = vector.shape_cast %271 : vector<1x32x64xf32> to vector<32x64xf32>
    %273 = tpu.concatenate %270, %272 in 0 : vector<32x64xf32>, vector<32x64xf32> -> vector<64x64xf32>
    %274 = arith.truncf %273 : vector<64x64xf32> to vector<64x64xbf16>
    %275 = tpu.concatenate %226, %232, %238, %244, %250, %256, %262, %268, %274 in 1 : vector<64x64xbf16>, vector<64x64xbf16>, vector<64x64xbf16>, vector<64x64xbf16>, vector<64x64xbf16>, vector<64x64xbf16>, vector<64x64xbf16>, vector<64x64xbf16>, vector<64x64xbf16> -> vector<64x576xbf16>
    %c1_160 = arith.constant 1 : index
    %c0_161 = arith.constant 0 : index
    %c0_162 = arith.constant 0 : index
    %276 = vector.load %arg5[%c1_160, %c0_161, %c0_162] : memref<5x576x64xbf16, #tpu.memory_space<vmem>>, vector<1x576x64xbf16>
    %277 = vector.shape_cast %276 : vector<1x576x64xbf16> to vector<576x64xbf16>
    %cst_163 = arith.constant dense<0.000000e+00> : vector<64x64xf32>
    %278 = tpu.matmul %275, %277, %cst_163 {dimension_numbers = #tpu.dot_dimension_numbers<[1], [0], [0], [1], [0, 0, 1, 1], [], []>} : vector<64x576xbf16>, vector<576x64xbf16>, vector<64x64xf32> -> vector<64x64xf32>
    %c1_164 = arith.constant 1 : index
    %c0_165 = arith.constant 0 : index
    %c0_166 = arith.constant 0 : index
    %279 = vector.load %arg6[%c1_164, %c0_165, %c0_166] : memref<5x1x64xf32, #tpu.memory_space<vmem>>, vector<1x1x64xf32>
    %280 = vector.shape_cast %279 : vector<1x1x64xf32> to vector<1x64xf32>
    %281 = vector.broadcast %280 : vector<1x64xf32> to vector<64x64xf32>
    %282 = arith.addf %278, %281 : vector<64x64xf32>
    %cst_167 = arith.constant 5.000000e-01 : f32
    %283 = vector.broadcast %cst_167 : f32 to vector<64x64xf32>
    %284 = arith.mulf %283, %282 : vector<64x64xf32>
    %cst_168 = arith.constant 4.471500e-02 : f32
    %285 = vector.broadcast %cst_168 : f32 to vector<64x64xf32>
    %286 = arith.mulf %285, %282 : vector<64x64xf32>
    %287 = arith.mulf %286, %282 : vector<64x64xf32>
    %288 = arith.mulf %287, %282 : vector<64x64xf32>
    %289 = arith.addf %282, %288 : vector<64x64xf32>
    %cst_169 = arith.constant 0.797884583 : f32
    %290 = vector.broadcast %cst_169 : f32 to vector<64x64xf32>
    %291 = arith.mulf %290, %289 : vector<64x64xf32>
    %292 = math.tanh %291 : vector<64x64xf32>
    %cst_170 = arith.constant 1.000000e+00 : f32
    %293 = vector.broadcast %cst_170 : f32 to vector<64x64xf32>
    %294 = arith.addf %293, %292 : vector<64x64xf32>
    %295 = arith.mulf %284, %294 : vector<64x64xf32>
    %296 = vector.extract_strided_slice %295 {offsets = [0, 0], sizes = [64, 32], strides = [1, 1]} : vector<64x64xf32> to vector<64x32xf32>
    %297 = vector.extract_strided_slice %295 {offsets = [0, 32], sizes = [64, 32], strides = [1, 1]} : vector<64x64xf32> to vector<64x32xf32>
    %298 = arith.addf %296, %297 : vector<64x32xf32>
    %299 = arith.addf %298, %160 : vector<64x32xf32>
    %300 = arith.addf %297, %161 : vector<64x32xf32>
    %c2 = arith.constant 2 : index
    %c0_171 = arith.constant 0 : index
    %c0_172 = arith.constant 0 : index
    %301 = vector.load %arg4[%c2, %c0_171, %c0_172] : memref<5x4x32xf32, #tpu.memory_space<vmem>>, vector<1x4x32xf32>
    %302 = vector.shape_cast %301 : vector<1x4x32xf32> to vector<4x32xf32>
    %303 = vector.extract_strided_slice %302 {offsets = [0, 0], sizes = [1, 32], strides = [1, 1]} : vector<4x32xf32> to vector<1x32xf32>
    %304 = vector.extract_strided_slice %302 {offsets = [1, 0], sizes = [1, 32], strides = [1, 1]} : vector<4x32xf32> to vector<1x32xf32>
    %cst_173 = arith.constant dense<0.000000e+00> : vector<64xf32>
    %305 = vector.multi_reduction <add>, %299, %cst_173 [1] : vector<64x32xf32> to vector<64xf32>
    %306 = vector.shape_cast %305 : vector<64xf32> to vector<64x1xf32>
    %cst_174 = arith.constant 3.200000e+01 : f32
    %307 = vector.broadcast %cst_174 : f32 to vector<64x1xf32>
    %308 = arith.divf %306, %307 : vector<64x1xf32>
    %309 = arith.mulf %299, %299 : vector<64x32xf32>
    %cst_175 = arith.constant dense<0.000000e+00> : vector<64xf32>
    %310 = vector.multi_reduction <add>, %309, %cst_175 [1] : vector<64x32xf32> to vector<64xf32>
    %311 = vector.shape_cast %310 : vector<64xf32> to vector<64x1xf32>
    %cst_176 = arith.constant 3.200000e+01 : f32
    %312 = vector.broadcast %cst_176 : f32 to vector<64x1xf32>
    %313 = arith.divf %311, %312 : vector<64x1xf32>
    %314 = arith.mulf %308, %308 : vector<64x1xf32>
    %315 = arith.subf %313, %314 : vector<64x1xf32>
    %316 = vector.broadcast %308 : vector<64x1xf32> to vector<64x32xf32>
    %317 = arith.subf %299, %316 : vector<64x32xf32>
    %cst_177 = arith.constant 9.99999974E-6 : f32
    %318 = vector.broadcast %cst_177 : f32 to vector<64x1xf32>
    %319 = arith.addf %315, %318 : vector<64x1xf32>
    %320 = math.rsqrt %319 : vector<64x1xf32>
    %321 = vector.broadcast %320 : vector<64x1xf32> to vector<64x32xf32>
    %322 = arith.mulf %317, %321 : vector<64x32xf32>
    %323 = vector.broadcast %303 : vector<1x32xf32> to vector<64x32xf32>
    %324 = arith.mulf %322, %323 : vector<64x32xf32>
    %325 = vector.broadcast %304 : vector<1x32xf32> to vector<64x32xf32>
    %326 = arith.addf %324, %325 : vector<64x32xf32>
    %327 = vector.extract_strided_slice %302 {offsets = [2, 0], sizes = [1, 32], strides = [1, 1]} : vector<4x32xf32> to vector<1x32xf32>
    %328 = vector.extract_strided_slice %302 {offsets = [3, 0], sizes = [1, 32], strides = [1, 1]} : vector<4x32xf32> to vector<1x32xf32>
    %cst_178 = arith.constant dense<0.000000e+00> : vector<64xf32>
    %329 = vector.multi_reduction <add>, %300, %cst_178 [1] : vector<64x32xf32> to vector<64xf32>
    %330 = vector.shape_cast %329 : vector<64xf32> to vector<64x1xf32>
    %cst_179 = arith.constant 3.200000e+01 : f32
    %331 = vector.broadcast %cst_179 : f32 to vector<64x1xf32>
    %332 = arith.divf %330, %331 : vector<64x1xf32>
    %333 = arith.mulf %300, %300 : vector<64x32xf32>
    %cst_180 = arith.constant dense<0.000000e+00> : vector<64xf32>
    %334 = vector.multi_reduction <add>, %333, %cst_180 [1] : vector<64x32xf32> to vector<64xf32>
    %335 = vector.shape_cast %334 : vector<64xf32> to vector<64x1xf32>
    %cst_181 = arith.constant 3.200000e+01 : f32
    %336 = vector.broadcast %cst_181 : f32 to vector<64x1xf32>
    %337 = arith.divf %335, %336 : vector<64x1xf32>
    %338 = arith.mulf %332, %332 : vector<64x1xf32>
    %339 = arith.subf %337, %338 : vector<64x1xf32>
    %340 = vector.broadcast %332 : vector<64x1xf32> to vector<64x32xf32>
    %341 = arith.subf %300, %340 : vector<64x32xf32>
    %cst_182 = arith.constant 9.99999974E-6 : f32
    %342 = vector.broadcast %cst_182 : f32 to vector<64x1xf32>
    %343 = arith.addf %339, %342 : vector<64x1xf32>
    %344 = math.rsqrt %343 : vector<64x1xf32>
    %345 = vector.broadcast %344 : vector<64x1xf32> to vector<64x32xf32>
    %346 = arith.mulf %341, %345 : vector<64x32xf32>
    %347 = vector.broadcast %327 : vector<1x32xf32> to vector<64x32xf32>
    %348 = arith.mulf %346, %347 : vector<64x32xf32>
    %349 = vector.broadcast %328 : vector<1x32xf32> to vector<64x32xf32>
    %350 = arith.addf %348, %349 : vector<64x32xf32>
    %351 = tpu.concatenate %326, %350 in 1 : vector<64x32xf32>, vector<64x32xf32> -> vector<64x64xf32>
    %352 = vector.extract_strided_slice %351 {offsets = [0, 0], sizes = [32, 64], strides = [1, 1]} : vector<64x64xf32> to vector<32x64xf32>
    %c0_183 = arith.constant 0 : index
    %c32_184 = arith.constant 32 : index
    %c0_185 = arith.constant 0 : index
    %353 = vector.load %arg18[%c0_183, %c32_184, %c0_185] : memref<2x96x64xf32, #tpu.memory_space<vmem>>, vector<1x32x64xf32>
    %354 = vector.shape_cast %353 : vector<1x32x64xf32> to vector<32x64xf32>
    %355 = vector.shape_cast %352 : vector<32x64xf32> to vector<1x32x64xf32>
    tpu.vector_store %arg18[%c0_183, %c32_184, %c0_185], %355 {strides = array<i32>} : memref<2x96x64xf32, #tpu.memory_space<vmem>>, vector<1x32x64xf32>,
    %356 = vector.extract_strided_slice %351 {offsets = [32, 0], sizes = [32, 64], strides = [1, 1]} : vector<64x64xf32> to vector<32x64xf32>
    %c1_186 = arith.constant 1 : index
    %c32_187 = arith.constant 32 : index
    %c0_188 = arith.constant 0 : index
    %357 = vector.load %arg18[%c1_186, %c32_187, %c0_188] : memref<2x96x64xf32, #tpu.memory_space<vmem>>, vector<1x32x64xf32>
    %358 = vector.shape_cast %357 : vector<1x32x64xf32> to vector<32x64xf32>
    %359 = vector.shape_cast %356 : vector<32x64xf32> to vector<1x32x64xf32>
    tpu.vector_store %arg18[%c1_186, %c32_187, %c0_188], %359 {strides = array<i32>} : memref<2x96x64xf32, #tpu.memory_space<vmem>>, vector<1x32x64xf32>,
    %c0_189 = arith.constant 0 : index
    %c24 = arith.constant 24 : index
    %c0_190 = arith.constant 0 : index
    %360 = vector.load %arg18[%c0_189, %c24, %c0_190] : memref<2x96x64xf32, #tpu.memory_space<vmem>>, vector<1x32x64xf32>
    %361 = vector.shape_cast %360 : vector<1x32x64xf32> to vector<32x64xf32>
    %c1_191 = arith.constant 1 : index
    %c24_192 = arith.constant 24 : index
    %c0_193 = arith.constant 0 : index
    %362 = vector.load %arg18[%c1_191, %c24_192, %c0_193] : memref<2x96x64xf32, #tpu.memory_space<vmem>>, vector<1x32x64xf32>
    %363 = vector.shape_cast %362 : vector<1x32x64xf32> to vector<32x64xf32>
    %364 = tpu.concatenate %361, %363 in 0 : vector<32x64xf32>, vector<32x64xf32> -> vector<64x64xf32>
    %365 = arith.truncf %364 : vector<64x64xf32> to vector<64x64xbf16>
    %c0_194 = arith.constant 0 : index
    %c26 = arith.constant 26 : index
    %c0_195 = arith.constant 0 : index
    %366 = vector.load %arg18[%c0_194, %c26, %c0_195] : memref<2x96x64xf32, #tpu.memory_space<vmem>>, vector<1x32x64xf32>
    %367 = vector.shape_cast %366 : vector<1x32x64xf32> to vector<32x64xf32>
    %c1_196 = arith.constant 1 : index
    %c26_197 = arith.constant 26 : index
    %c0_198 = arith.constant 0 : index
    %368 = vector.load %arg18[%c1_196, %c26_197, %c0_198] : memref<2x96x64xf32, #tpu.memory_space<vmem>>, vector<1x32x64xf32>
    %369 = vector.shape_cast %368 : vector<1x32x64xf32> to vector<32x64xf32>
    %370 = tpu.concatenate %367, %369 in 0 : vector<32x64xf32>, vector<32x64xf32> -> vector<64x64xf32>
    %371 = arith.truncf %370 : vector<64x64xf32> to vector<64x64xbf16>
    %c0_199 = arith.constant 0 : index
    %c28_200 = arith.constant 28 : index
    %c0_201 = arith.constant 0 : index
    %372 = vector.load %arg18[%c0_199, %c28_200, %c0_201] : memref<2x96x64xf32, #tpu.memory_space<vmem>>, vector<1x32x64xf32>
    %373 = vector.shape_cast %372 : vector<1x32x64xf32> to vector<32x64xf32>
    %c1_202 = arith.constant 1 : index
    %c28_203 = arith.constant 28 : index
    %c0_204 = arith.constant 0 : index
    %374 = vector.load %arg18[%c1_202, %c28_203, %c0_204] : memref<2x96x64xf32, #tpu.memory_space<vmem>>, vector<1x32x64xf32>
    %375 = vector.shape_cast %374 : vector<1x32x64xf32> to vector<32x64xf32>
    %376 = tpu.concatenate %373, %375 in 0 : vector<32x64xf32>, vector<32x64xf32> -> vector<64x64xf32>
    %377 = arith.truncf %376 : vector<64x64xf32> to vector<64x64xbf16>
    %c0_205 = arith.constant 0 : index
    %c30_206 = arith.constant 30 : index
    %c0_207 = arith.constant 0 : index
    %378 = vector.load %arg18[%c0_205, %c30_206, %c0_207] : memref<2x96x64xf32, #tpu.memory_space<vmem>>, vector<1x32x64xf32>
    %379 = vector.shape_cast %378 : vector<1x32x64xf32> to vector<32x64xf32>
    %c1_208 = arith.constant 1 : index
    %c30_209 = arith.constant 30 : index
    %c0_210 = arith.constant 0 : index
    %380 = vector.load %arg18[%c1_208, %c30_209, %c0_210] : memref<2x96x64xf32, #tpu.memory_space<vmem>>, vector<1x32x64xf32>
    %381 = vector.shape_cast %380 : vector<1x32x64xf32> to vector<32x64xf32>
    %382 = tpu.concatenate %379, %381 in 0 : vector<32x64xf32>, vector<32x64xf32> -> vector<64x64xf32>
    %383 = arith.truncf %382 : vector<64x64xf32> to vector<64x64xbf16>
    %c0_211 = arith.constant 0 : index
    %c32_212 = arith.constant 32 : index
    %c0_213 = arith.constant 0 : index
    %384 = vector.load %arg18[%c0_211, %c32_212, %c0_213] : memref<2x96x64xf32, #tpu.memory_space<vmem>>, vector<1x32x64xf32>
    %385 = vector.shape_cast %384 : vector<1x32x64xf32> to vector<32x64xf32>
    %c1_214 = arith.constant 1 : index
    %c32_215 = arith.constant 32 : index
    %c0_216 = arith.constant 0 : index
    %386 = vector.load %arg18[%c1_214, %c32_215, %c0_216] : memref<2x96x64xf32, #tpu.memory_space<vmem>>, vector<1x32x64xf32>
    %387 = vector.shape_cast %386 : vector<1x32x64xf32> to vector<32x64xf32>
    %388 = tpu.concatenate %385, %387 in 0 : vector<32x64xf32>, vector<32x64xf32> -> vector<64x64xf32>
    %389 = arith.truncf %388 : vector<64x64xf32> to vector<64x64xbf16>
    %c0_217 = arith.constant 0 : index
    %c34_218 = arith.constant 34 : index
    %c0_219 = arith.constant 0 : index
    %390 = vector.load %arg18[%c0_217, %c34_218, %c0_219] : memref<2x96x64xf32, #tpu.memory_space<vmem>>, vector<1x32x64xf32>
    %391 = vector.shape_cast %390 : vector<1x32x64xf32> to vector<32x64xf32>
    %c1_220 = arith.constant 1 : index
    %c34_221 = arith.constant 34 : index
    %c0_222 = arith.constant 0 : index
    %392 = vector.load %arg18[%c1_220, %c34_221, %c0_222] : memref<2x96x64xf32, #tpu.memory_space<vmem>>, vector<1x32x64xf32>
    %393 = vector.shape_cast %392 : vector<1x32x64xf32> to vector<32x64xf32>
    %394 = tpu.concatenate %391, %393 in 0 : vector<32x64xf32>, vector<32x64xf32> -> vector<64x64xf32>
    %395 = arith.truncf %394 : vector<64x64xf32> to vector<64x64xbf16>
    %c0_223 = arith.constant 0 : index
    %c36_224 = arith.constant 36 : index
    %c0_225 = arith.constant 0 : index
    %396 = vector.load %arg18[%c0_223, %c36_224, %c0_225] : memref<2x96x64xf32, #tpu.memory_space<vmem>>, vector<1x32x64xf32>
    %397 = vector.shape_cast %396 : vector<1x32x64xf32> to vector<32x64xf32>
    %c1_226 = arith.constant 1 : index
    %c36_227 = arith.constant 36 : index
    %c0_228 = arith.constant 0 : index
    %398 = vector.load %arg18[%c1_226, %c36_227, %c0_228] : memref<2x96x64xf32, #tpu.memory_space<vmem>>, vector<1x32x64xf32>
    %399 = vector.shape_cast %398 : vector<1x32x64xf32> to vector<32x64xf32>
    %400 = tpu.concatenate %397, %399 in 0 : vector<32x64xf32>, vector<32x64xf32> -> vector<64x64xf32>
    %401 = arith.truncf %400 : vector<64x64xf32> to vector<64x64xbf16>
    %c0_229 = arith.constant 0 : index
    %c38 = arith.constant 38 : index
    %c0_230 = arith.constant 0 : index
    %402 = vector.load %arg18[%c0_229, %c38, %c0_230] : memref<2x96x64xf32, #tpu.memory_space<vmem>>, vector<1x32x64xf32>
    %403 = vector.shape_cast %402 : vector<1x32x64xf32> to vector<32x64xf32>
    %c1_231 = arith.constant 1 : index
    %c38_232 = arith.constant 38 : index
    %c0_233 = arith.constant 0 : index
    %404 = vector.load %arg18[%c1_231, %c38_232, %c0_233] : memref<2x96x64xf32, #tpu.memory_space<vmem>>, vector<1x32x64xf32>
    %405 = vector.shape_cast %404 : vector<1x32x64xf32> to vector<32x64xf32>
    %406 = tpu.concatenate %403, %405 in 0 : vector<32x64xf32>, vector<32x64xf32> -> vector<64x64xf32>
    %407 = arith.truncf %406 : vector<64x64xf32> to vector<64x64xbf16>
    %c0_234 = arith.constant 0 : index
    %c40 = arith.constant 40 : index
    %c0_235 = arith.constant 0 : index
    %408 = vector.load %arg18[%c0_234, %c40, %c0_235] : memref<2x96x64xf32, #tpu.memory_space<vmem>>, vector<1x32x64xf32>
    %409 = vector.shape_cast %408 : vector<1x32x64xf32> to vector<32x64xf32>
    %c1_236 = arith.constant 1 : index
    %c40_237 = arith.constant 40 : index
    %c0_238 = arith.constant 0 : index
    %410 = vector.load %arg18[%c1_236, %c40_237, %c0_238] : memref<2x96x64xf32, #tpu.memory_space<vmem>>, vector<1x32x64xf32>
    %411 = vector.shape_cast %410 : vector<1x32x64xf32> to vector<32x64xf32>
    %412 = tpu.concatenate %409, %411 in 0 : vector<32x64xf32>, vector<32x64xf32> -> vector<64x64xf32>
    %413 = arith.truncf %412 : vector<64x64xf32> to vector<64x64xbf16>
    %414 = tpu.concatenate %365, %371, %377, %383, %389, %395, %401, %407, %413 in 1 : vector<64x64xbf16>, vector<64x64xbf16>, vector<64x64xbf16>, vector<64x64xbf16>, vector<64x64xbf16>, vector<64x64xbf16>, vector<64x64xbf16>, vector<64x64xbf16>, vector<64x64xbf16> -> vector<64x576xbf16>
    %c2_239 = arith.constant 2 : index
    %c0_240 = arith.constant 0 : index
    %c0_241 = arith.constant 0 : index
    %415 = vector.load %arg5[%c2_239, %c0_240, %c0_241] : memref<5x576x64xbf16, #tpu.memory_space<vmem>>, vector<1x576x64xbf16>
    %416 = vector.shape_cast %415 : vector<1x576x64xbf16> to vector<576x64xbf16>
    %cst_242 = arith.constant dense<0.000000e+00> : vector<64x64xf32>
    %417 = tpu.matmul %414, %416, %cst_242 {dimension_numbers = #tpu.dot_dimension_numbers<[1], [0], [0], [1], [0, 0, 1, 1], [], []>} : vector<64x576xbf16>, vector<576x64xbf16>, vector<64x64xf32> -> vector<64x64xf32>
    %c2_243 = arith.constant 2 : index
    %c0_244 = arith.constant 0 : index
    %c0_245 = arith.constant 0 : index
    %418 = vector.load %arg6[%c2_243, %c0_244, %c0_245] : memref<5x1x64xf32, #tpu.memory_space<vmem>>, vector<1x1x64xf32>
    %419 = vector.shape_cast %418 : vector<1x1x64xf32> to vector<1x64xf32>
    %420 = vector.broadcast %419 : vector<1x64xf32> to vector<64x64xf32>
    %421 = arith.addf %417, %420 : vector<64x64xf32>
    %cst_246 = arith.constant 5.000000e-01 : f32
    %422 = vector.broadcast %cst_246 : f32 to vector<64x64xf32>
    %423 = arith.mulf %422, %421 : vector<64x64xf32>
    %cst_247 = arith.constant 4.471500e-02 : f32
    %424 = vector.broadcast %cst_247 : f32 to vector<64x64xf32>
    %425 = arith.mulf %424, %421 : vector<64x64xf32>
    %426 = arith.mulf %425, %421 : vector<64x64xf32>
    %427 = arith.mulf %426, %421 : vector<64x64xf32>
    %428 = arith.addf %421, %427 : vector<64x64xf32>
    %cst_248 = arith.constant 0.797884583 : f32
    %429 = vector.broadcast %cst_248 : f32 to vector<64x64xf32>
    %430 = arith.mulf %429, %428 : vector<64x64xf32>
    %431 = math.tanh %430 : vector<64x64xf32>
    %cst_249 = arith.constant 1.000000e+00 : f32
    %432 = vector.broadcast %cst_249 : f32 to vector<64x64xf32>
    %433 = arith.addf %432, %431 : vector<64x64xf32>
    %434 = arith.mulf %423, %433 : vector<64x64xf32>
    %435 = vector.extract_strided_slice %434 {offsets = [0, 0], sizes = [64, 32], strides = [1, 1]} : vector<64x64xf32> to vector<64x32xf32>
    %436 = vector.extract_strided_slice %434 {offsets = [0, 32], sizes = [64, 32], strides = [1, 1]} : vector<64x64xf32> to vector<64x32xf32>
    %437 = arith.addf %435, %436 : vector<64x32xf32>
    %438 = arith.addf %437, %299 : vector<64x32xf32>
    %439 = arith.addf %436, %300 : vector<64x32xf32>
    %c3 = arith.constant 3 : index
    %c0_250 = arith.constant 0 : index
    %c0_251 = arith.constant 0 : index
    %440 = vector.load %arg4[%c3, %c0_250, %c0_251] : memref<5x4x32xf32, #tpu.memory_space<vmem>>, vector<1x4x32xf32>
    %441 = vector.shape_cast %440 : vector<1x4x32xf32> to vector<4x32xf32>
    %442 = vector.extract_strided_slice %441 {offsets = [0, 0], sizes = [1, 32], strides = [1, 1]} : vector<4x32xf32> to vector<1x32xf32>
    %443 = vector.extract_strided_slice %441 {offsets = [1, 0], sizes = [1, 32], strides = [1, 1]} : vector<4x32xf32> to vector<1x32xf32>
    %cst_252 = arith.constant dense<0.000000e+00> : vector<64xf32>
    %444 = vector.multi_reduction <add>, %438, %cst_252 [1] : vector<64x32xf32> to vector<64xf32>
    %445 = vector.shape_cast %444 : vector<64xf32> to vector<64x1xf32>
    %cst_253 = arith.constant 3.200000e+01 : f32
    %446 = vector.broadcast %cst_253 : f32 to vector<64x1xf32>
    %447 = arith.divf %445, %446 : vector<64x1xf32>
    %448 = arith.mulf %438, %438 : vector<64x32xf32>
    %cst_254 = arith.constant dense<0.000000e+00> : vector<64xf32>
    %449 = vector.multi_reduction <add>, %448, %cst_254 [1] : vector<64x32xf32> to vector<64xf32>
    %450 = vector.shape_cast %449 : vector<64xf32> to vector<64x1xf32>
    %cst_255 = arith.constant 3.200000e+01 : f32
    %451 = vector.broadcast %cst_255 : f32 to vector<64x1xf32>
    %452 = arith.divf %450, %451 : vector<64x1xf32>
    %453 = arith.mulf %447, %447 : vector<64x1xf32>
    %454 = arith.subf %452, %453 : vector<64x1xf32>
    %455 = vector.broadcast %447 : vector<64x1xf32> to vector<64x32xf32>
    %456 = arith.subf %438, %455 : vector<64x32xf32>
    %cst_256 = arith.constant 9.99999974E-6 : f32
    %457 = vector.broadcast %cst_256 : f32 to vector<64x1xf32>
    %458 = arith.addf %454, %457 : vector<64x1xf32>
    %459 = math.rsqrt %458 : vector<64x1xf32>
    %460 = vector.broadcast %459 : vector<64x1xf32> to vector<64x32xf32>
    %461 = arith.mulf %456, %460 : vector<64x32xf32>
    %462 = vector.broadcast %442 : vector<1x32xf32> to vector<64x32xf32>
    %463 = arith.mulf %461, %462 : vector<64x32xf32>
    %464 = vector.broadcast %443 : vector<1x32xf32> to vector<64x32xf32>
    %465 = arith.addf %463, %464 : vector<64x32xf32>
    %466 = vector.extract_strided_slice %441 {offsets = [2, 0], sizes = [1, 32], strides = [1, 1]} : vector<4x32xf32> to vector<1x32xf32>
    %467 = vector.extract_strided_slice %441 {offsets = [3, 0], sizes = [1, 32], strides = [1, 1]} : vector<4x32xf32> to vector<1x32xf32>
    %cst_257 = arith.constant dense<0.000000e+00> : vector<64xf32>
    %468 = vector.multi_reduction <add>, %439, %cst_257 [1] : vector<64x32xf32> to vector<64xf32>
    %469 = vector.shape_cast %468 : vector<64xf32> to vector<64x1xf32>
    %cst_258 = arith.constant 3.200000e+01 : f32
    %470 = vector.broadcast %cst_258 : f32 to vector<64x1xf32>
    %471 = arith.divf %469, %470 : vector<64x1xf32>
    %472 = arith.mulf %439, %439 : vector<64x32xf32>
    %cst_259 = arith.constant dense<0.000000e+00> : vector<64xf32>
    %473 = vector.multi_reduction <add>, %472, %cst_259 [1] : vector<64x32xf32> to vector<64xf32>
    %474 = vector.shape_cast %473 : vector<64xf32> to vector<64x1xf32>
    %cst_260 = arith.constant 3.200000e+01 : f32
    %475 = vector.broadcast %cst_260 : f32 to vector<64x1xf32>
    %476 = arith.divf %474, %475 : vector<64x1xf32>
    %477 = arith.mulf %471, %471 : vector<64x1xf32>
    %478 = arith.subf %476, %477 : vector<64x1xf32>
    %479 = vector.broadcast %471 : vector<64x1xf32> to vector<64x32xf32>
    %480 = arith.subf %439, %479 : vector<64x32xf32>
    %cst_261 = arith.constant 9.99999974E-6 : f32
    %481 = vector.broadcast %cst_261 : f32 to vector<64x1xf32>
    %482 = arith.addf %478, %481 : vector<64x1xf32>
    %483 = math.rsqrt %482 : vector<64x1xf32>
    %484 = vector.broadcast %483 : vector<64x1xf32> to vector<64x32xf32>
    %485 = arith.mulf %480, %484 : vector<64x32xf32>
    %486 = vector.broadcast %466 : vector<1x32xf32> to vector<64x32xf32>
    %487 = arith.mulf %485, %486 : vector<64x32xf32>
    %488 = vector.broadcast %467 : vector<1x32xf32> to vector<64x32xf32>
    %489 = arith.addf %487, %488 : vector<64x32xf32>
    %490 = tpu.concatenate %465, %489 in 1 : vector<64x32xf32>, vector<64x32xf32> -> vector<64x64xf32>
    %491 = vector.extract_strided_slice %490 {offsets = [0, 0], sizes = [32, 64], strides = [1, 1]} : vector<64x64xf32> to vector<32x64xf32>
    %c0_262 = arith.constant 0 : index
    %c32_263 = arith.constant 32 : index
    %c0_264 = arith.constant 0 : index
    %492 = vector.load %arg18[%c0_262, %c32_263, %c0_264] : memref<2x96x64xf32, #tpu.memory_space<vmem>>, vector<1x32x64xf32>
    %493 = vector.shape_cast %492 : vector<1x32x64xf32> to vector<32x64xf32>
    %494 = vector.shape_cast %491 : vector<32x64xf32> to vector<1x32x64xf32>
    tpu.vector_store %arg18[%c0_262, %c32_263, %c0_264], %494 {strides = array<i32>} : memref<2x96x64xf32, #tpu.memory_space<vmem>>, vector<1x32x64xf32>,
    %495 = vector.extract_strided_slice %490 {offsets = [32, 0], sizes = [32, 64], strides = [1, 1]} : vector<64x64xf32> to vector<32x64xf32>
    %c1_265 = arith.constant 1 : index
    %c32_266 = arith.constant 32 : index
    %c0_267 = arith.constant 0 : index
    %496 = vector.load %arg18[%c1_265, %c32_266, %c0_267] : memref<2x96x64xf32, #tpu.memory_space<vmem>>, vector<1x32x64xf32>
    %497 = vector.shape_cast %496 : vector<1x32x64xf32> to vector<32x64xf32>
    %498 = vector.shape_cast %495 : vector<32x64xf32> to vector<1x32x64xf32>
    tpu.vector_store %arg18[%c1_265, %c32_266, %c0_267], %498 {strides = array<i32>} : memref<2x96x64xf32, #tpu.memory_space<vmem>>, vector<1x32x64xf32>,
    %c0_268 = arith.constant 0 : index
    %c16 = arith.constant 16 : index
    %c0_269 = arith.constant 0 : index
    %499 = vector.load %arg18[%c0_268, %c16, %c0_269] : memref<2x96x64xf32, #tpu.memory_space<vmem>>, vector<1x32x64xf32>
    %500 = vector.shape_cast %499 : vector<1x32x64xf32> to vector<32x64xf32>
    %c1_270 = arith.constant 1 : index
    %c16_271 = arith.constant 16 : index
    %c0_272 = arith.constant 0 : index
    %501 = vector.load %arg18[%c1_270, %c16_271, %c0_272] : memref<2x96x64xf32, #tpu.memory_space<vmem>>, vector<1x32x64xf32>
    %502 = vector.shape_cast %501 : vector<1x32x64xf32> to vector<32x64xf32>
    %503 = tpu.concatenate %500, %502 in 0 : vector<32x64xf32>, vector<32x64xf32> -> vector<64x64xf32>
    %504 = arith.truncf %503 : vector<64x64xf32> to vector<64x64xbf16>
    %c0_273 = arith.constant 0 : index
    %c20 = arith.constant 20 : index
    %c0_274 = arith.constant 0 : index
    %505 = vector.load %arg18[%c0_273, %c20, %c0_274] : memref<2x96x64xf32, #tpu.memory_space<vmem>>, vector<1x32x64xf32>
    %506 = vector.shape_cast %505 : vector<1x32x64xf32> to vector<32x64xf32>
    %c1_275 = arith.constant 1 : index
    %c20_276 = arith.constant 20 : index
    %c0_277 = arith.constant 0 : index
    %507 = vector.load %arg18[%c1_275, %c20_276, %c0_277] : memref<2x96x64xf32, #tpu.memory_space<vmem>>, vector<1x32x64xf32>
    %508 = vector.shape_cast %507 : vector<1x32x64xf32> to vector<32x64xf32>
    %509 = tpu.concatenate %506, %508 in 0 : vector<32x64xf32>, vector<32x64xf32> -> vector<64x64xf32>
    %510 = arith.truncf %509 : vector<64x64xf32> to vector<64x64xbf16>
    %c0_278 = arith.constant 0 : index
    %c24_279 = arith.constant 24 : index
    %c0_280 = arith.constant 0 : index
    %511 = vector.load %arg18[%c0_278, %c24_279, %c0_280] : memref<2x96x64xf32, #tpu.memory_space<vmem>>, vector<1x32x64xf32>
    %512 = vector.shape_cast %511 : vector<1x32x64xf32> to vector<32x64xf32>
    %c1_281 = arith.constant 1 : index
    %c24_282 = arith.constant 24 : index
    %c0_283 = arith.constant 0 : index
    %513 = vector.load %arg18[%c1_281, %c24_282, %c0_283] : memref<2x96x64xf32, #tpu.memory_space<vmem>>, vector<1x32x64xf32>
    %514 = vector.shape_cast %513 : vector<1x32x64xf32> to vector<32x64xf32>
    %515 = tpu.concatenate %512, %514 in 0 : vector<32x64xf32>, vector<32x64xf32> -> vector<64x64xf32>
    %516 = arith.truncf %515 : vector<64x64xf32> to vector<64x64xbf16>
    %c0_284 = arith.constant 0 : index
    %c28_285 = arith.constant 28 : index
    %c0_286 = arith.constant 0 : index
    %517 = vector.load %arg18[%c0_284, %c28_285, %c0_286] : memref<2x96x64xf32, #tpu.memory_space<vmem>>, vector<1x32x64xf32>
    %518 = vector.shape_cast %517 : vector<1x32x64xf32> to vector<32x64xf32>
    %c1_287 = arith.constant 1 : index
    %c28_288 = arith.constant 28 : index
    %c0_289 = arith.constant 0 : index
    %519 = vector.load %arg18[%c1_287, %c28_288, %c0_289] : memref<2x96x64xf32, #tpu.memory_space<vmem>>, vector<1x32x64xf32>
    %520 = vector.shape_cast %519 : vector<1x32x64xf32> to vector<32x64xf32>
    %521 = tpu.concatenate %518, %520 in 0 : vector<32x64xf32>, vector<32x64xf32> -> vector<64x64xf32>
    %522 = arith.truncf %521 : vector<64x64xf32> to vector<64x64xbf16>
    %c0_290 = arith.constant 0 : index
    %c32_291 = arith.constant 32 : index
    %c0_292 = arith.constant 0 : index
    %523 = vector.load %arg18[%c0_290, %c32_291, %c0_292] : memref<2x96x64xf32, #tpu.memory_space<vmem>>, vector<1x32x64xf32>
    %524 = vector.shape_cast %523 : vector<1x32x64xf32> to vector<32x64xf32>
    %c1_293 = arith.constant 1 : index
    %c32_294 = arith.constant 32 : index
    %c0_295 = arith.constant 0 : index
    %525 = vector.load %arg18[%c1_293, %c32_294, %c0_295] : memref<2x96x64xf32, #tpu.memory_space<vmem>>, vector<1x32x64xf32>
    %526 = vector.shape_cast %525 : vector<1x32x64xf32> to vector<32x64xf32>
    %527 = tpu.concatenate %524, %526 in 0 : vector<32x64xf32>, vector<32x64xf32> -> vector<64x64xf32>
    %528 = arith.truncf %527 : vector<64x64xf32> to vector<64x64xbf16>
    %c0_296 = arith.constant 0 : index
    %c36_297 = arith.constant 36 : index
    %c0_298 = arith.constant 0 : index
    %529 = vector.load %arg18[%c0_296, %c36_297, %c0_298] : memref<2x96x64xf32, #tpu.memory_space<vmem>>, vector<1x32x64xf32>
    %530 = vector.shape_cast %529 : vector<1x32x64xf32> to vector<32x64xf32>
    %c1_299 = arith.constant 1 : index
    %c36_300 = arith.constant 36 : index
    %c0_301 = arith.constant 0 : index
    %531 = vector.load %arg18[%c1_299, %c36_300, %c0_301] : memref<2x96x64xf32, #tpu.memory_space<vmem>>, vector<1x32x64xf32>
    %532 = vector.shape_cast %531 : vector<1x32x64xf32> to vector<32x64xf32>
    %533 = tpu.concatenate %530, %532 in 0 : vector<32x64xf32>, vector<32x64xf32> -> vector<64x64xf32>
    %534 = arith.truncf %533 : vector<64x64xf32> to vector<64x64xbf16>
    %c0_302 = arith.constant 0 : index
    %c40_303 = arith.constant 40 : index
    %c0_304 = arith.constant 0 : index
    %535 = vector.load %arg18[%c0_302, %c40_303, %c0_304] : memref<2x96x64xf32, #tpu.memory_space<vmem>>, vector<1x32x64xf32>
    %536 = vector.shape_cast %535 : vector<1x32x64xf32> to vector<32x64xf32>
    %c1_305 = arith.constant 1 : index
    %c40_306 = arith.constant 40 : index
    %c0_307 = arith.constant 0 : index
    %537 = vector.load %arg18[%c1_305, %c40_306, %c0_307] : memref<2x96x64xf32, #tpu.memory_space<vmem>>, vector<1x32x64xf32>
    %538 = vector.shape_cast %537 : vector<1x32x64xf32> to vector<32x64xf32>
    %539 = tpu.concatenate %536, %538 in 0 : vector<32x64xf32>, vector<32x64xf32> -> vector<64x64xf32>
    %540 = arith.truncf %539 : vector<64x64xf32> to vector<64x64xbf16>
    %c0_308 = arith.constant 0 : index
    %c44 = arith.constant 44 : index
    %c0_309 = arith.constant 0 : index
    %541 = vector.load %arg18[%c0_308, %c44, %c0_309] : memref<2x96x64xf32, #tpu.memory_space<vmem>>, vector<1x32x64xf32>
    %542 = vector.shape_cast %541 : vector<1x32x64xf32> to vector<32x64xf32>
    %c1_310 = arith.constant 1 : index
    %c44_311 = arith.constant 44 : index
    %c0_312 = arith.constant 0 : index
    %543 = vector.load %arg18[%c1_310, %c44_311, %c0_312] : memref<2x96x64xf32, #tpu.memory_space<vmem>>, vector<1x32x64xf32>
    %544 = vector.shape_cast %543 : vector<1x32x64xf32> to vector<32x64xf32>
    %545 = tpu.concatenate %542, %544 in 0 : vector<32x64xf32>, vector<32x64xf32> -> vector<64x64xf32>
    %546 = arith.truncf %545 : vector<64x64xf32> to vector<64x64xbf16>
    %c0_313 = arith.constant 0 : index
    %c48 = arith.constant 48 : index
    %c0_314 = arith.constant 0 : index
    %547 = vector.load %arg18[%c0_313, %c48, %c0_314] : memref<2x96x64xf32, #tpu.memory_space<vmem>>, vector<1x32x64xf32>
    %548 = vector.shape_cast %547 : vector<1x32x64xf32> to vector<32x64xf32>
    %c1_315 = arith.constant 1 : index
    %c48_316 = arith.constant 48 : index
    %c0_317 = arith.constant 0 : index
    %549 = vector.load %arg18[%c1_315, %c48_316, %c0_317] : memref<2x96x64xf32, #tpu.memory_space<vmem>>, vector<1x32x64xf32>
    %550 = vector.shape_cast %549 : vector<1x32x64xf32> to vector<32x64xf32>
    %551 = tpu.concatenate %548, %550 in 0 : vector<32x64xf32>, vector<32x64xf32> -> vector<64x64xf32>
    %552 = arith.truncf %551 : vector<64x64xf32> to vector<64x64xbf16>
    %553 = tpu.concatenate %504, %510, %516, %522, %528, %534, %540, %546, %552 in 1 : vector<64x64xbf16>, vector<64x64xbf16>, vector<64x64xbf16>, vector<64x64xbf16>, vector<64x64xbf16>, vector<64x64xbf16>, vector<64x64xbf16>, vector<64x64xbf16>, vector<64x64xbf16> -> vector<64x576xbf16>
    %c3_318 = arith.constant 3 : index
    %c0_319 = arith.constant 0 : index
    %c0_320 = arith.constant 0 : index
    %554 = vector.load %arg5[%c3_318, %c0_319, %c0_320] : memref<5x576x64xbf16, #tpu.memory_space<vmem>>, vector<1x576x64xbf16>
    %555 = vector.shape_cast %554 : vector<1x576x64xbf16> to vector<576x64xbf16>
    %cst_321 = arith.constant dense<0.000000e+00> : vector<64x64xf32>
    %556 = tpu.matmul %553, %555, %cst_321 {dimension_numbers = #tpu.dot_dimension_numbers<[1], [0], [0], [1], [0, 0, 1, 1], [], []>} : vector<64x576xbf16>, vector<576x64xbf16>, vector<64x64xf32> -> vector<64x64xf32>
    %c3_322 = arith.constant 3 : index
    %c0_323 = arith.constant 0 : index
    %c0_324 = arith.constant 0 : index
    %557 = vector.load %arg6[%c3_322, %c0_323, %c0_324] : memref<5x1x64xf32, #tpu.memory_space<vmem>>, vector<1x1x64xf32>
    %558 = vector.shape_cast %557 : vector<1x1x64xf32> to vector<1x64xf32>
    %559 = vector.broadcast %558 : vector<1x64xf32> to vector<64x64xf32>
    %560 = arith.addf %556, %559 : vector<64x64xf32>
    %cst_325 = arith.constant 5.000000e-01 : f32
    %561 = vector.broadcast %cst_325 : f32 to vector<64x64xf32>
    %562 = arith.mulf %561, %560 : vector<64x64xf32>
    %cst_326 = arith.constant 4.471500e-02 : f32
    %563 = vector.broadcast %cst_326 : f32 to vector<64x64xf32>
    %564 = arith.mulf %563, %560 : vector<64x64xf32>
    %565 = arith.mulf %564, %560 : vector<64x64xf32>
    %566 = arith.mulf %565, %560 : vector<64x64xf32>
    %567 = arith.addf %560, %566 : vector<64x64xf32>
    %cst_327 = arith.constant 0.797884583 : f32
    %568 = vector.broadcast %cst_327 : f32 to vector<64x64xf32>
    %569 = arith.mulf %568, %567 : vector<64x64xf32>
    %570 = math.tanh %569 : vector<64x64xf32>
    %cst_328 = arith.constant 1.000000e+00 : f32
    %571 = vector.broadcast %cst_328 : f32 to vector<64x64xf32>
    %572 = arith.addf %571, %570 : vector<64x64xf32>
    %573 = arith.mulf %562, %572 : vector<64x64xf32>
    %574 = vector.extract_strided_slice %573 {offsets = [0, 0], sizes = [64, 32], strides = [1, 1]} : vector<64x64xf32> to vector<64x32xf32>
    %575 = vector.extract_strided_slice %573 {offsets = [0, 32], sizes = [64, 32], strides = [1, 1]} : vector<64x64xf32> to vector<64x32xf32>
    %576 = arith.addf %574, %575 : vector<64x32xf32>
    %577 = arith.addf %576, %438 : vector<64x32xf32>
    %578 = arith.addf %575, %439 : vector<64x32xf32>
    %c4 = arith.constant 4 : index
    %c0_329 = arith.constant 0 : index
    %c0_330 = arith.constant 0 : index
    %579 = vector.load %arg4[%c4, %c0_329, %c0_330] : memref<5x4x32xf32, #tpu.memory_space<vmem>>, vector<1x4x32xf32>
    %580 = vector.shape_cast %579 : vector<1x4x32xf32> to vector<4x32xf32>
    %581 = vector.extract_strided_slice %580 {offsets = [0, 0], sizes = [1, 32], strides = [1, 1]} : vector<4x32xf32> to vector<1x32xf32>
    %582 = vector.extract_strided_slice %580 {offsets = [1, 0], sizes = [1, 32], strides = [1, 1]} : vector<4x32xf32> to vector<1x32xf32>
    %cst_331 = arith.constant dense<0.000000e+00> : vector<64xf32>
    %583 = vector.multi_reduction <add>, %577, %cst_331 [1] : vector<64x32xf32> to vector<64xf32>
    %584 = vector.shape_cast %583 : vector<64xf32> to vector<64x1xf32>
    %cst_332 = arith.constant 3.200000e+01 : f32
    %585 = vector.broadcast %cst_332 : f32 to vector<64x1xf32>
    %586 = arith.divf %584, %585 : vector<64x1xf32>
    %587 = arith.mulf %577, %577 : vector<64x32xf32>
    %cst_333 = arith.constant dense<0.000000e+00> : vector<64xf32>
    %588 = vector.multi_reduction <add>, %587, %cst_333 [1] : vector<64x32xf32> to vector<64xf32>
    %589 = vector.shape_cast %588 : vector<64xf32> to vector<64x1xf32>
    %cst_334 = arith.constant 3.200000e+01 : f32
    %590 = vector.broadcast %cst_334 : f32 to vector<64x1xf32>
    %591 = arith.divf %589, %590 : vector<64x1xf32>
    %592 = arith.mulf %586, %586 : vector<64x1xf32>
    %593 = arith.subf %591, %592 : vector<64x1xf32>
    %594 = vector.broadcast %586 : vector<64x1xf32> to vector<64x32xf32>
    %595 = arith.subf %577, %594 : vector<64x32xf32>
    %cst_335 = arith.constant 9.99999974E-6 : f32
    %596 = vector.broadcast %cst_335 : f32 to vector<64x1xf32>
    %597 = arith.addf %593, %596 : vector<64x1xf32>
    %598 = math.rsqrt %597 : vector<64x1xf32>
    %599 = vector.broadcast %598 : vector<64x1xf32> to vector<64x32xf32>
    %600 = arith.mulf %595, %599 : vector<64x32xf32>
    %601 = vector.broadcast %581 : vector<1x32xf32> to vector<64x32xf32>
    %602 = arith.mulf %600, %601 : vector<64x32xf32>
    %603 = vector.broadcast %582 : vector<1x32xf32> to vector<64x32xf32>
    %604 = arith.addf %602, %603 : vector<64x32xf32>
    %605 = vector.extract_strided_slice %580 {offsets = [2, 0], sizes = [1, 32], strides = [1, 1]} : vector<4x32xf32> to vector<1x32xf32>
    %606 = vector.extract_strided_slice %580 {offsets = [3, 0], sizes = [1, 32], strides = [1, 1]} : vector<4x32xf32> to vector<1x32xf32>
    %cst_336 = arith.constant dense<0.000000e+00> : vector<64xf32>
    %607 = vector.multi_reduction <add>, %578, %cst_336 [1] : vector<64x32xf32> to vector<64xf32>
    %608 = vector.shape_cast %607 : vector<64xf32> to vector<64x1xf32>
    %cst_337 = arith.constant 3.200000e+01 : f32
    %609 = vector.broadcast %cst_337 : f32 to vector<64x1xf32>
    %610 = arith.divf %608, %609 : vector<64x1xf32>
    %611 = arith.mulf %578, %578 : vector<64x32xf32>
    %cst_338 = arith.constant dense<0.000000e+00> : vector<64xf32>
    %612 = vector.multi_reduction <add>, %611, %cst_338 [1] : vector<64x32xf32> to vector<64xf32>
    %613 = vector.shape_cast %612 : vector<64xf32> to vector<64x1xf32>
    %cst_339 = arith.constant 3.200000e+01 : f32
    %614 = vector.broadcast %cst_339 : f32 to vector<64x1xf32>
    %615 = arith.divf %613, %614 : vector<64x1xf32>
    %616 = arith.mulf %610, %610 : vector<64x1xf32>
    %617 = arith.subf %615, %616 : vector<64x1xf32>
    %618 = vector.broadcast %610 : vector<64x1xf32> to vector<64x32xf32>
    %619 = arith.subf %578, %618 : vector<64x32xf32>
    %cst_340 = arith.constant 9.99999974E-6 : f32
    %620 = vector.broadcast %cst_340 : f32 to vector<64x1xf32>
    %621 = arith.addf %617, %620 : vector<64x1xf32>
    %622 = math.rsqrt %621 : vector<64x1xf32>
    %623 = vector.broadcast %622 : vector<64x1xf32> to vector<64x32xf32>
    %624 = arith.mulf %619, %623 : vector<64x32xf32>
    %625 = vector.broadcast %605 : vector<1x32xf32> to vector<64x32xf32>
    %626 = arith.mulf %624, %625 : vector<64x32xf32>
    %627 = vector.broadcast %606 : vector<1x32xf32> to vector<64x32xf32>
    %628 = arith.addf %626, %627 : vector<64x32xf32>
    %629 = tpu.concatenate %604, %628 in 1 : vector<64x32xf32>, vector<64x32xf32> -> vector<64x64xf32>
    %630 = vector.extract_strided_slice %629 {offsets = [0, 0], sizes = [32, 64], strides = [1, 1]} : vector<64x64xf32> to vector<32x64xf32>
    %c0_341 = arith.constant 0 : index
    %c32_342 = arith.constant 32 : index
    %c0_343 = arith.constant 0 : index
    %631 = vector.load %arg18[%c0_341, %c32_342, %c0_343] : memref<2x96x64xf32, #tpu.memory_space<vmem>>, vector<1x32x64xf32>
    %632 = vector.shape_cast %631 : vector<1x32x64xf32> to vector<32x64xf32>
    %633 = vector.shape_cast %630 : vector<32x64xf32> to vector<1x32x64xf32>
    tpu.vector_store %arg18[%c0_341, %c32_342, %c0_343], %633 {strides = array<i32>} : memref<2x96x64xf32, #tpu.memory_space<vmem>>, vector<1x32x64xf32>,
    %634 = vector.extract_strided_slice %629 {offsets = [32, 0], sizes = [32, 64], strides = [1, 1]} : vector<64x64xf32> to vector<32x64xf32>
    %c1_344 = arith.constant 1 : index
    %c32_345 = arith.constant 32 : index
    %c0_346 = arith.constant 0 : index
    %635 = vector.load %arg18[%c1_344, %c32_345, %c0_346] : memref<2x96x64xf32, #tpu.memory_space<vmem>>, vector<1x32x64xf32>
    %636 = vector.shape_cast %635 : vector<1x32x64xf32> to vector<32x64xf32>
    %637 = vector.shape_cast %634 : vector<32x64xf32> to vector<1x32x64xf32>
    tpu.vector_store %arg18[%c1_344, %c32_345, %c0_346], %637 {strides = array<i32>} : memref<2x96x64xf32, #tpu.memory_space<vmem>>, vector<1x32x64xf32>,
    %c0_347 = arith.constant 0 : index
    %c0_348 = arith.constant 0 : index
    %c0_349 = arith.constant 0 : index
    %638 = vector.load %arg18[%c0_347, %c0_348, %c0_349] : memref<2x96x64xf32, #tpu.memory_space<vmem>>, vector<1x32x64xf32>
    %639 = vector.shape_cast %638 : vector<1x32x64xf32> to vector<32x64xf32>
    %c1_350 = arith.constant 1 : index
    %c0_351 = arith.constant 0 : index
    %c0_352 = arith.constant 0 : index
    %640 = vector.load %arg18[%c1_350, %c0_351, %c0_352] : memref<2x96x64xf32, #tpu.memory_space<vmem>>, vector<1x32x64xf32>
    %641 = vector.shape_cast %640 : vector<1x32x64xf32> to vector<32x64xf32>
    %642 = tpu.concatenate %639, %641 in 0 : vector<32x64xf32>, vector<32x64xf32> -> vector<64x64xf32>
    %643 = arith.truncf %642 : vector<64x64xf32> to vector<64x64xbf16>
    %c0_353 = arith.constant 0 : index
    %c8 = arith.constant 8 : index
    %c0_354 = arith.constant 0 : index
    %644 = vector.load %arg18[%c0_353, %c8, %c0_354] : memref<2x96x64xf32, #tpu.memory_space<vmem>>, vector<1x32x64xf32>
    %645 = vector.shape_cast %644 : vector<1x32x64xf32> to vector<32x64xf32>
    %c1_355 = arith.constant 1 : index
    %c8_356 = arith.constant 8 : index
    %c0_357 = arith.constant 0 : index
    %646 = vector.load %arg18[%c1_355, %c8_356, %c0_357] : memref<2x96x64xf32, #tpu.memory_space<vmem>>, vector<1x32x64xf32>
    %647 = vector.shape_cast %646 : vector<1x32x64xf32> to vector<32x64xf32>
    %648 = tpu.concatenate %645, %647 in 0 : vector<32x64xf32>, vector<32x64xf32> -> vector<64x64xf32>
    %649 = arith.truncf %648 : vector<64x64xf32> to vector<64x64xbf16>
    %c0_358 = arith.constant 0 : index
    %c16_359 = arith.constant 16 : index
    %c0_360 = arith.constant 0 : index
    %650 = vector.load %arg18[%c0_358, %c16_359, %c0_360] : memref<2x96x64xf32, #tpu.memory_space<vmem>>, vector<1x32x64xf32>
    %651 = vector.shape_cast %650 : vector<1x32x64xf32> to vector<32x64xf32>
    %c1_361 = arith.constant 1 : index
    %c16_362 = arith.constant 16 : index
    %c0_363 = arith.constant 0 : index
    %652 = vector.load %arg18[%c1_361, %c16_362, %c0_363] : memref<2x96x64xf32, #tpu.memory_space<vmem>>, vector<1x32x64xf32>
    %653 = vector.shape_cast %652 : vector<1x32x64xf32> to vector<32x64xf32>
    %654 = tpu.concatenate %651, %653 in 0 : vector<32x64xf32>, vector<32x64xf32> -> vector<64x64xf32>
    %655 = arith.truncf %654 : vector<64x64xf32> to vector<64x64xbf16>
    %c0_364 = arith.constant 0 : index
    %c24_365 = arith.constant 24 : index
    %c0_366 = arith.constant 0 : index
    %656 = vector.load %arg18[%c0_364, %c24_365, %c0_366] : memref<2x96x64xf32, #tpu.memory_space<vmem>>, vector<1x32x64xf32>
    %657 = vector.shape_cast %656 : vector<1x32x64xf32> to vector<32x64xf32>
    %c1_367 = arith.constant 1 : index
    %c24_368 = arith.constant 24 : index
    %c0_369 = arith.constant 0 : index
    %658 = vector.load %arg18[%c1_367, %c24_368, %c0_369] : memref<2x96x64xf32, #tpu.memory_space<vmem>>, vector<1x32x64xf32>
    %659 = vector.shape_cast %658 : vector<1x32x64xf32> to vector<32x64xf32>
    %660 = tpu.concatenate %657, %659 in 0 : vector<32x64xf32>, vector<32x64xf32> -> vector<64x64xf32>
    %661 = arith.truncf %660 : vector<64x64xf32> to vector<64x64xbf16>
    %c0_370 = arith.constant 0 : index
    %c32_371 = arith.constant 32 : index
    %c0_372 = arith.constant 0 : index
    %662 = vector.load %arg18[%c0_370, %c32_371, %c0_372] : memref<2x96x64xf32, #tpu.memory_space<vmem>>, vector<1x32x64xf32>
    %663 = vector.shape_cast %662 : vector<1x32x64xf32> to vector<32x64xf32>
    %c1_373 = arith.constant 1 : index
    %c32_374 = arith.constant 32 : index
    %c0_375 = arith.constant 0 : index
    %664 = vector.load %arg18[%c1_373, %c32_374, %c0_375] : memref<2x96x64xf32, #tpu.memory_space<vmem>>, vector<1x32x64xf32>
    %665 = vector.shape_cast %664 : vector<1x32x64xf32> to vector<32x64xf32>
    %666 = tpu.concatenate %663, %665 in 0 : vector<32x64xf32>, vector<32x64xf32> -> vector<64x64xf32>
    %667 = arith.truncf %666 : vector<64x64xf32> to vector<64x64xbf16>
    %c0_376 = arith.constant 0 : index
    %c40_377 = arith.constant 40 : index
    %c0_378 = arith.constant 0 : index
    %668 = vector.load %arg18[%c0_376, %c40_377, %c0_378] : memref<2x96x64xf32, #tpu.memory_space<vmem>>, vector<1x32x64xf32>
    %669 = vector.shape_cast %668 : vector<1x32x64xf32> to vector<32x64xf32>
    %c1_379 = arith.constant 1 : index
    %c40_380 = arith.constant 40 : index
    %c0_381 = arith.constant 0 : index
    %670 = vector.load %arg18[%c1_379, %c40_380, %c0_381] : memref<2x96x64xf32, #tpu.memory_space<vmem>>, vector<1x32x64xf32>
    %671 = vector.shape_cast %670 : vector<1x32x64xf32> to vector<32x64xf32>
    %672 = tpu.concatenate %669, %671 in 0 : vector<32x64xf32>, vector<32x64xf32> -> vector<64x64xf32>
    %673 = arith.truncf %672 : vector<64x64xf32> to vector<64x64xbf16>
    %c0_382 = arith.constant 0 : index
    %c48_383 = arith.constant 48 : index
    %c0_384 = arith.constant 0 : index
    %674 = vector.load %arg18[%c0_382, %c48_383, %c0_384] : memref<2x96x64xf32, #tpu.memory_space<vmem>>, vector<1x32x64xf32>
    %675 = vector.shape_cast %674 : vector<1x32x64xf32> to vector<32x64xf32>
    %c1_385 = arith.constant 1 : index
    %c48_386 = arith.constant 48 : index
    %c0_387 = arith.constant 0 : index
    %676 = vector.load %arg18[%c1_385, %c48_386, %c0_387] : memref<2x96x64xf32, #tpu.memory_space<vmem>>, vector<1x32x64xf32>
    %677 = vector.shape_cast %676 : vector<1x32x64xf32> to vector<32x64xf32>
    %678 = tpu.concatenate %675, %677 in 0 : vector<32x64xf32>, vector<32x64xf32> -> vector<64x64xf32>
    %679 = arith.truncf %678 : vector<64x64xf32> to vector<64x64xbf16>
    %c0_388 = arith.constant 0 : index
    %c56 = arith.constant 56 : index
    %c0_389 = arith.constant 0 : index
    %680 = vector.load %arg18[%c0_388, %c56, %c0_389] : memref<2x96x64xf32, #tpu.memory_space<vmem>>, vector<1x32x64xf32>
    %681 = vector.shape_cast %680 : vector<1x32x64xf32> to vector<32x64xf32>
    %c1_390 = arith.constant 1 : index
    %c56_391 = arith.constant 56 : index
    %c0_392 = arith.constant 0 : index
    %682 = vector.load %arg18[%c1_390, %c56_391, %c0_392] : memref<2x96x64xf32, #tpu.memory_space<vmem>>, vector<1x32x64xf32>
    %683 = vector.shape_cast %682 : vector<1x32x64xf32> to vector<32x64xf32>
    %684 = tpu.concatenate %681, %683 in 0 : vector<32x64xf32>, vector<32x64xf32> -> vector<64x64xf32>
    %685 = arith.truncf %684 : vector<64x64xf32> to vector<64x64xbf16>
    %c0_393 = arith.constant 0 : index
    %c64 = arith.constant 64 : index
    %c0_394 = arith.constant 0 : index
    %686 = vector.load %arg18[%c0_393, %c64, %c0_394] : memref<2x96x64xf32, #tpu.memory_space<vmem>>, vector<1x32x64xf32>
    %687 = vector.shape_cast %686 : vector<1x32x64xf32> to vector<32x64xf32>
    %c1_395 = arith.constant 1 : index
    %c64_396 = arith.constant 64 : index
    %c0_397 = arith.constant 0 : index
    %688 = vector.load %arg18[%c1_395, %c64_396, %c0_397] : memref<2x96x64xf32, #tpu.memory_space<vmem>>, vector<1x32x64xf32>
    %689 = vector.shape_cast %688 : vector<1x32x64xf32> to vector<32x64xf32>
    %690 = tpu.concatenate %687, %689 in 0 : vector<32x64xf32>, vector<32x64xf32> -> vector<64x64xf32>
    %691 = arith.truncf %690 : vector<64x64xf32> to vector<64x64xbf16>
    %692 = tpu.concatenate %643, %649, %655, %661, %667, %673, %679, %685, %691 in 1 : vector<64x64xbf16>, vector<64x64xbf16>, vector<64x64xbf16>, vector<64x64xbf16>, vector<64x64xbf16>, vector<64x64xbf16>, vector<64x64xbf16>, vector<64x64xbf16>, vector<64x64xbf16> -> vector<64x576xbf16>
    %c4_398 = arith.constant 4 : index
    %c0_399 = arith.constant 0 : index
    %c0_400 = arith.constant 0 : index
    %693 = vector.load %arg5[%c4_398, %c0_399, %c0_400] : memref<5x576x64xbf16, #tpu.memory_space<vmem>>, vector<1x576x64xbf16>
    %694 = vector.shape_cast %693 : vector<1x576x64xbf16> to vector<576x64xbf16>
    %cst_401 = arith.constant dense<0.000000e+00> : vector<64x64xf32>
    %695 = tpu.matmul %692, %694, %cst_401 {dimension_numbers = #tpu.dot_dimension_numbers<[1], [0], [0], [1], [0, 0, 1, 1], [], []>} : vector<64x576xbf16>, vector<576x64xbf16>, vector<64x64xf32> -> vector<64x64xf32>
    %c4_402 = arith.constant 4 : index
    %c0_403 = arith.constant 0 : index
    %c0_404 = arith.constant 0 : index
    %696 = vector.load %arg6[%c4_402, %c0_403, %c0_404] : memref<5x1x64xf32, #tpu.memory_space<vmem>>, vector<1x1x64xf32>
    %697 = vector.shape_cast %696 : vector<1x1x64xf32> to vector<1x64xf32>
    %698 = vector.broadcast %697 : vector<1x64xf32> to vector<64x64xf32>
    %699 = arith.addf %695, %698 : vector<64x64xf32>
    %cst_405 = arith.constant 5.000000e-01 : f32
    %700 = vector.broadcast %cst_405 : f32 to vector<64x64xf32>
    %701 = arith.mulf %700, %699 : vector<64x64xf32>
    %cst_406 = arith.constant 4.471500e-02 : f32
    %702 = vector.broadcast %cst_406 : f32 to vector<64x64xf32>
    %703 = arith.mulf %702, %699 : vector<64x64xf32>
    %704 = arith.mulf %703, %699 : vector<64x64xf32>
    %705 = arith.mulf %704, %699 : vector<64x64xf32>
    %706 = arith.addf %699, %705 : vector<64x64xf32>
    %cst_407 = arith.constant 0.797884583 : f32
    %707 = vector.broadcast %cst_407 : f32 to vector<64x64xf32>
    %708 = arith.mulf %707, %706 : vector<64x64xf32>
    %709 = math.tanh %708 : vector<64x64xf32>
    %cst_408 = arith.constant 1.000000e+00 : f32
    %710 = vector.broadcast %cst_408 : f32 to vector<64x64xf32>
    %711 = arith.addf %710, %709 : vector<64x64xf32>
    %712 = arith.mulf %701, %711 : vector<64x64xf32>
    %713 = vector.extract_strided_slice %712 {offsets = [0, 0], sizes = [64, 32], strides = [1, 1]} : vector<64x64xf32> to vector<64x32xf32>
    %714 = vector.extract_strided_slice %712 {offsets = [0, 32], sizes = [64, 32], strides = [1, 1]} : vector<64x64xf32> to vector<64x32xf32>
    %715 = arith.addf %713, %714 : vector<64x32xf32>
    %716 = arith.addf %715, %577 : vector<64x32xf32>
    %717 = arith.truncf %716 : vector<64x32xf32> to vector<64x32xbf16>
    %c0_409 = arith.constant 0 : index
    %c0_410 = arith.constant 0 : index
    %718 = vector.load %arg7[%c0_409, %c0_410] : memref<32x64xbf16, #tpu.memory_space<vmem>>, vector<32x64xbf16>
    %cst_411 = arith.constant dense<0.000000e+00> : vector<64x64xf32>
    %719 = tpu.matmul %717, %718, %cst_411 {dimension_numbers = #tpu.dot_dimension_numbers<[1], [0], [0], [1], [0, 0, 1, 1], [], []>} : vector<64x32xbf16>, vector<32x64xbf16>, vector<64x64xf32> -> vector<64x64xf32>
    %c0_412 = arith.constant 0 : index
    %c0_413 = arith.constant 0 : index
    %720 = vector.load %arg8[%c0_412, %c0_413] : memref<1x64xf32, #tpu.memory_space<vmem>>, vector<1x64xf32>
    %721 = vector.broadcast %720 : vector<1x64xf32> to vector<64x64xf32>
    %722 = arith.addf %719, %721 : vector<64x64xf32>
    %cst_414 = arith.constant 5.000000e-01 : f32
    %723 = vector.broadcast %cst_414 : f32 to vector<64x64xf32>
    %724 = arith.mulf %723, %722 : vector<64x64xf32>
    %cst_415 = arith.constant 4.471500e-02 : f32
    %725 = vector.broadcast %cst_415 : f32 to vector<64x64xf32>
    %726 = arith.mulf %725, %722 : vector<64x64xf32>
    %727 = arith.mulf %726, %722 : vector<64x64xf32>
    %728 = arith.mulf %727, %722 : vector<64x64xf32>
    %729 = arith.addf %722, %728 : vector<64x64xf32>
    %cst_416 = arith.constant 0.797884583 : f32
    %730 = vector.broadcast %cst_416 : f32 to vector<64x64xf32>
    %731 = arith.mulf %730, %729 : vector<64x64xf32>
    %732 = math.tanh %731 : vector<64x64xf32>
    %cst_417 = arith.constant 1.000000e+00 : f32
    %733 = vector.broadcast %cst_417 : f32 to vector<64x64xf32>
    %734 = arith.addf %733, %732 : vector<64x64xf32>
    %735 = arith.mulf %724, %734 : vector<64x64xf32>
    %736 = arith.truncf %735 : vector<64x64xf32> to vector<64x64xbf16>
    %c0_418 = arith.constant 0 : index
    %c0_419 = arith.constant 0 : index
    %737 = vector.load %arg9[%c0_418, %c0_419] : memref<64x64xbf16, #tpu.memory_space<vmem>>, vector<64x64xbf16>
    %cst_420 = arith.constant dense<0.000000e+00> : vector<64x64xf32>
    %738 = tpu.matmul %736, %737, %cst_420 {dimension_numbers = #tpu.dot_dimension_numbers<[1], [0], [0], [1], [0, 0, 1, 1], [], []>} : vector<64x64xbf16>, vector<64x64xbf16>, vector<64x64xf32> -> vector<64x64xf32>
    %c0_421 = arith.constant 0 : index
    %c0_422 = arith.constant 0 : index
    %739 = vector.load %arg10[%c0_421, %c0_422] : memref<1x64xf32, #tpu.memory_space<vmem>>, vector<1x64xf32>
    %740 = vector.broadcast %739 : vector<1x64xf32> to vector<64x64xf32>
    %741 = arith.addf %738, %740 : vector<64x64xf32>
    %c0_423 = arith.constant 0 : index
    %c0_424 = arith.constant 0 : index
    %742 = vector.load %arg11[%c0_423, %c0_424] : memref<2x64xf32, #tpu.memory_space<vmem>>, vector<1x64xf32>
    %c1_425 = arith.constant 1 : index
    %c0_426 = arith.constant 0 : index
    %743 = vector.load %arg11[%c1_425, %c0_426] : memref<2x64xf32, #tpu.memory_space<vmem>>, vector<1x64xf32>
    %cst_427 = arith.constant dense<0.000000e+00> : vector<64xf32>
    %744 = vector.multi_reduction <add>, %741, %cst_427 [1] : vector<64x64xf32> to vector<64xf32>
    %745 = vector.shape_cast %744 : vector<64xf32> to vector<64x1xf32>
    %cst_428 = arith.constant 6.400000e+01 : f32
    %746 = vector.broadcast %cst_428 : f32 to vector<64x1xf32>
    %747 = arith.divf %745, %746 : vector<64x1xf32>
    %748 = arith.mulf %741, %741 : vector<64x64xf32>
    %cst_429 = arith.constant dense<0.000000e+00> : vector<64xf32>
    %749 = vector.multi_reduction <add>, %748, %cst_429 [1] : vector<64x64xf32> to vector<64xf32>
    %750 = vector.shape_cast %749 : vector<64xf32> to vector<64x1xf32>
    %cst_430 = arith.constant 6.400000e+01 : f32
    %751 = vector.broadcast %cst_430 : f32 to vector<64x1xf32>
    %752 = arith.divf %750, %751 : vector<64x1xf32>
    %753 = arith.mulf %747, %747 : vector<64x1xf32>
    %754 = arith.subf %752, %753 : vector<64x1xf32>
    %755 = vector.broadcast %747 : vector<64x1xf32> to vector<64x64xf32>
    %756 = arith.subf %741, %755 : vector<64x64xf32>
    %cst_431 = arith.constant 9.99999974E-6 : f32
    %757 = vector.broadcast %cst_431 : f32 to vector<64x1xf32>
    %758 = arith.addf %754, %757 : vector<64x1xf32>
    %759 = math.rsqrt %758 : vector<64x1xf32>
    %760 = vector.broadcast %759 : vector<64x1xf32> to vector<64x64xf32>
    %761 = arith.mulf %756, %760 : vector<64x64xf32>
    %762 = vector.broadcast %742 : vector<1x64xf32> to vector<64x64xf32>
    %763 = arith.mulf %761, %762 : vector<64x64xf32>
    %764 = vector.broadcast %743 : vector<1x64xf32> to vector<64x64xf32>
    %765 = arith.addf %763, %764 : vector<64x64xf32>
    %766 = arith.truncf %765 : vector<64x64xf32> to vector<64x64xbf16>
    %c0_432 = arith.constant 0 : index
    %c0_433 = arith.constant 0 : index
    %767 = vector.load %arg12[%c0_432, %c0_433] : memref<64x64xbf16, #tpu.memory_space<vmem>>, vector<64x64xbf16>
    %cst_434 = arith.constant dense<0.000000e+00> : vector<64x64xf32>
    %768 = tpu.matmul %766, %767, %cst_434 {dimension_numbers = #tpu.dot_dimension_numbers<[1], [0], [0], [1], [0, 0, 1, 1], [], []>} : vector<64x64xbf16>, vector<64x64xbf16>, vector<64x64xf32> -> vector<64x64xf32>
    %c0_435 = arith.constant 0 : index
    %c0_436 = arith.constant 0 : index
    %769 = vector.load %arg13[%c0_435, %c0_436] : memref<1x64xf32, #tpu.memory_space<vmem>>, vector<1x64xf32>
    %770 = vector.broadcast %769 : vector<1x64xf32> to vector<64x64xf32>
    %771 = arith.addf %768, %770 : vector<64x64xf32>
    %cst_437 = arith.constant 5.000000e-01 : f32
    %772 = vector.broadcast %cst_437 : f32 to vector<64x64xf32>
    %773 = arith.mulf %772, %771 : vector<64x64xf32>
    %cst_438 = arith.constant 4.471500e-02 : f32
    %774 = vector.broadcast %cst_438 : f32 to vector<64x64xf32>
    %775 = arith.mulf %774, %771 : vector<64x64xf32>
    %776 = arith.mulf %775, %771 : vector<64x64xf32>
    %777 = arith.mulf %776, %771 : vector<64x64xf32>
    %778 = arith.addf %771, %777 : vector<64x64xf32>
    %cst_439 = arith.constant 0.797884583 : f32
    %779 = vector.broadcast %cst_439 : f32 to vector<64x64xf32>
    %780 = arith.mulf %779, %778 : vector<64x64xf32>
    %781 = math.tanh %780 : vector<64x64xf32>
    %cst_440 = arith.constant 1.000000e+00 : f32
    %782 = vector.broadcast %cst_440 : f32 to vector<64x64xf32>
    %783 = arith.addf %782, %781 : vector<64x64xf32>
    %784 = arith.mulf %773, %783 : vector<64x64xf32>
    %785 = arith.truncf %784 : vector<64x64xf32> to vector<64x64xbf16>
    %c0_441 = arith.constant 0 : index
    %c0_442 = arith.constant 0 : index
    %786 = vector.load %arg14[%c0_441, %c0_442] : memref<64x32xbf16, #tpu.memory_space<vmem>>, vector<64x32xbf16>
    %cst_443 = arith.constant dense<0.000000e+00> : vector<64x32xf32>
    %787 = tpu.matmul %785, %786, %cst_443 {dimension_numbers = #tpu.dot_dimension_numbers<[1], [0], [0], [1], [0, 0, 1, 1], [], []>} : vector<64x64xbf16>, vector<64x32xbf16>, vector<64x32xf32> -> vector<64x32xf32>
    %c0_444 = arith.constant 0 : index
    %c0_445 = arith.constant 0 : index
    %788 = vector.load %arg15[%c0_444, %c0_445] : memref<1x32xf32, #tpu.memory_space<vmem>>, vector<1x32xf32>
    %789 = vector.broadcast %788 : vector<1x32xf32> to vector<64x32xf32>
    %790 = arith.addf %787, %789 : vector<64x32xf32>
    %c0_446 = arith.constant 0 : index
    %c0_447 = arith.constant 0 : index
    %791 = vector.load %arg16[%c0_446, %c0_447] : memref<2x32xf32, #tpu.memory_space<vmem>>, vector<1x32xf32>
    %c1_448 = arith.constant 1 : index
    %c0_449 = arith.constant 0 : index
    %792 = vector.load %arg16[%c1_448, %c0_449] : memref<2x32xf32, #tpu.memory_space<vmem>>, vector<1x32xf32>
    %cst_450 = arith.constant dense<0.000000e+00> : vector<64xf32>
    %793 = vector.multi_reduction <add>, %790, %cst_450 [1] : vector<64x32xf32> to vector<64xf32>
    %794 = vector.shape_cast %793 : vector<64xf32> to vector<64x1xf32>
    %cst_451 = arith.constant 3.200000e+01 : f32
    %795 = vector.broadcast %cst_451 : f32 to vector<64x1xf32>
    %796 = arith.divf %794, %795 : vector<64x1xf32>
    %797 = arith.mulf %790, %790 : vector<64x32xf32>
    %cst_452 = arith.constant dense<0.000000e+00> : vector<64xf32>
    %798 = vector.multi_reduction <add>, %797, %cst_452 [1] : vector<64x32xf32> to vector<64xf32>
    %799 = vector.shape_cast %798 : vector<64xf32> to vector<64x1xf32>
    %cst_453 = arith.constant 3.200000e+01 : f32
    %800 = vector.broadcast %cst_453 : f32 to vector<64x1xf32>
    %801 = arith.divf %799, %800 : vector<64x1xf32>
    %802 = arith.mulf %796, %796 : vector<64x1xf32>
    %803 = arith.subf %801, %802 : vector<64x1xf32>
    %804 = vector.broadcast %796 : vector<64x1xf32> to vector<64x32xf32>
    %805 = arith.subf %790, %804 : vector<64x32xf32>
    %cst_454 = arith.constant 9.99999974E-6 : f32
    %806 = vector.broadcast %cst_454 : f32 to vector<64x1xf32>
    %807 = arith.addf %803, %806 : vector<64x1xf32>
    %808 = math.rsqrt %807 : vector<64x1xf32>
    %809 = vector.broadcast %808 : vector<64x1xf32> to vector<64x32xf32>
    %810 = arith.mulf %805, %809 : vector<64x32xf32>
    %811 = vector.broadcast %791 : vector<1x32xf32> to vector<64x32xf32>
    %812 = arith.mulf %810, %811 : vector<64x32xf32>
    %813 = vector.broadcast %792 : vector<1x32xf32> to vector<64x32xf32>
    %814 = arith.addf %812, %813 : vector<64x32xf32>
    %815 = arith.addf %814, %716 : vector<64x32xf32>
    %c0_455 = arith.constant 0 : index
    %c0_456 = arith.constant 0 : index
    %816 = vector.load %arg17[%c0_455, %c0_456] : memref<64x32xf32, #tpu.memory_space<vmem>>, vector<64x32xf32>
    tpu.vector_store %arg17[%c0_455, %c0_456], %815 {strides = array<i32>} : memref<64x32xf32, #tpu.memory_space<vmem>>, vector<64x32xf32>,
    return
  }
  func.func @transform_0(%arg0: i32) -> (i32, i32) {
    %c0_i32 = arith.constant 0 : i32
    %c0_i32_0 = arith.constant 0 : i32
    return %arg0, %c0_i32 : i32, i32
  }
  func.func @transform_1(%arg0: i32) -> (i32, i32) {
    %c0_i32 = arith.constant 0 : i32
    %c0_i32_0 = arith.constant 0 : i32
    %c0_i32_1 = arith.constant 0 : i32
    return %c0_i32, %c0_i32_0 : i32, i32
  }
  func.func @transform_2(%arg0: i32) -> (i32, i32) {
    %c0_i32 = arith.constant 0 : i32
    %c0_i32_0 = arith.constant 0 : i32
    %c0_i32_1 = arith.constant 0 : i32
    return %c0_i32, %c0_i32_0 : i32, i32
  }
  func.func @transform_3(%arg0: i32) -> (i32, i32, i32) {
    %c0_i32 = arith.constant 0 : i32
    %c0_i32_0 = arith.constant 0 : i32
    %c0_i32_1 = arith.constant 0 : i32
    %c0_i32_2 = arith.constant 0 : i32
    return %c0_i32, %c0_i32_0, %c0_i32_1 : i32, i32, i32
  }
  func.func @transform_4(%arg0: i32) -> (i32, i32, i32) {
    %c0_i32 = arith.constant 0 : i32
    %c0_i32_0 = arith.constant 0 : i32
    %c0_i32_1 = arith.constant 0 : i32
    %c0_i32_2 = arith.constant 0 : i32
    return %c0_i32, %c0_i32_0, %c0_i32_1 : i32, i32, i32
  }
  func.func @transform_5(%arg0: i32) -> (i32, i32, i32) {
    %c0_i32 = arith.constant 0 : i32
    %c0_i32_0 = arith.constant 0 : i32
    %c0_i32_1 = arith.constant 0 : i32
    %c0_i32_2 = arith.constant 0 : i32
    return %c0_i32, %c0_i32_0, %c0_i32_1 : i32, i32, i32
  }
  func.func @transform_6(%arg0: i32) -> (i32, i32) {
    %c0_i32 = arith.constant 0 : i32
    %c0_i32_0 = arith.constant 0 : i32
    %c0_i32_1 = arith.constant 0 : i32
    return %c0_i32, %c0_i32_0 : i32, i32
  }
  func.func @transform_7(%arg0: i32) -> (i32, i32) {
    %c0_i32 = arith.constant 0 : i32
    %c0_i32_0 = arith.constant 0 : i32
    %c0_i32_1 = arith.constant 0 : i32
    return %c0_i32, %c0_i32_0 : i32, i32
  }
  func.func @transform_8(%arg0: i32) -> (i32, i32) {
    %c0_i32 = arith.constant 0 : i32
    %c0_i32_0 = arith.constant 0 : i32
    %c0_i32_1 = arith.constant 0 : i32
    return %c0_i32, %c0_i32_0 : i32, i32
  }
  func.func @transform_9(%arg0: i32) -> (i32, i32) {
    %c0_i32 = arith.constant 0 : i32
    %c0_i32_0 = arith.constant 0 : i32
    %c0_i32_1 = arith.constant 0 : i32
    return %c0_i32, %c0_i32_0 : i32, i32
  }
  func.func @transform_10(%arg0: i32) -> (i32, i32) {
    %c0_i32 = arith.constant 0 : i32
    %c0_i32_0 = arith.constant 0 : i32
    %c0_i32_1 = arith.constant 0 : i32
    return %c0_i32, %c0_i32_0 : i32, i32
  }
  func.func @transform_11(%arg0: i32) -> (i32, i32) {
    %c0_i32 = arith.constant 0 : i32
    %c0_i32_0 = arith.constant 0 : i32
    %c0_i32_1 = arith.constant 0 : i32
    return %c0_i32, %c0_i32_0 : i32, i32
  }
  func.func @transform_12(%arg0: i32) -> (i32, i32) {
    %c0_i32 = arith.constant 0 : i32
    %c0_i32_0 = arith.constant 0 : i32
    %c0_i32_1 = arith.constant 0 : i32
    return %c0_i32, %c0_i32_0 : i32, i32
  }
  func.func @transform_13(%arg0: i32) -> (i32, i32) {
    %c0_i32 = arith.constant 0 : i32
    %c0_i32_0 = arith.constant 0 : i32
    %c0_i32_1 = arith.constant 0 : i32
    return %c0_i32, %c0_i32_0 : i32, i32
  }
  func.func @transform_14(%arg0: i32) -> (i32, i32) {
    %c0_i32 = arith.constant 0 : i32
    %c0_i32_0 = arith.constant 0 : i32
    %c0_i32_1 = arith.constant 0 : i32
    return %c0_i32, %c0_i32_0 : i32, i32
  }
  func.func @transform_15(%arg0: i32) -> (i32, i32) {
    %c0_i32 = arith.constant 0 : i32
    %c0_i32_0 = arith.constant 0 : i32
    %c0_i32_1 = arith.constant 0 : i32
    return %c0_i32, %c0_i32_0 : i32, i32
  }
  func.func @transform_16(%arg0: i32) -> (i32, i32) {
    %c0_i32 = arith.constant 0 : i32
    %c0_i32_0 = arith.constant 0 : i32
    return %arg0, %c0_i32 : i32, i32
  }
}

</mosaic_0001>

<bundles_post_ra>
// kernel: tpu_custom_call.1
= control target key start
LH: loop header
LB: loop body
LE: loop exit
PB: predicated region body
PF: predicated region fallthrough
CT: control target
= control target key end

     0   :  { %vm136_vm0 = vcmask 736256   ;;  %vm149_vm1 = vcmask 1044480   ;;  %vm316_vm2 = vcmask 261120   ;;  %s8860_s30 = smov 32   ;;  %vm290_vm3 = vcmask 523264   ;;  %s8862_s26 = smov 64   ;;  %s12342_s1 = inlined_call_operand.vmem [shape: bf16[90,64], index: 1, kind: input, shape index: {}]   ;;  %s12343_s0 = inlined_call_operand.vmem [shape: bf16[64,90], index: 0, kind: input, shape index: {}]   ;;  %s12344_s2 = inlined_call_operand.vmem [shape: f32[1,64], index: 2, kind: input, shape index: {}]   ;;  %s12345_s3 = inlined_call_operand.vmem [shape: f32[5,4,32], index: 3, kind: input, shape index: {}]   ;;  %s12346_s4 = inlined_call_operand.vmem [shape: bf16[5,576,64], index: 4, kind: input, shape index: {}]   ;;  %s12347_s5 = inlined_call_operand.vmem [shape: f32[5,1,64], index: 5, kind: input, shape index: {}]   ;;  %s12348_s6 = inlined_call_operand.vmem [shape: bf16[32,64], index: 6, kind: input, shape index: {}]   ;;  %s12349_s8 = inlined_call_operand.vmem [shape: bf16[64,64], index: 8, kind: input, shape index: {}]   ;;  %s12350_s7 = inlined_call_operand.vmem [shape: f32[1,64], index: 7, kind: input, shape index: {}]   ;;  %s12351_s9 = inlined_call_operand.vmem [shape: f32[1,64], index: 9, kind: input, shape index: {}]   ;;  %s12352_s11 = inlined_call_operand.vmem [shape: bf16[64,64], index: 11, kind: input, shape index: {}]   ;;  %s12353_s10 = inlined_call_operand.vmem [shape: f32[2,64], index: 10, kind: input, shape index: {}]   ;;  %s12354_s13 = inlined_call_operand.vmem [shape: bf16[64,32], index: 13, kind: input, shape index: {}]   ;;  %s12355_s12 = inlined_call_operand.vmem [shape: f32[1,64], index: 12, kind: input, shape index: {}]   ;;  %s12356_s14 = inlined_call_operand.vmem [shape: f32[1,32], index: 14, kind: input, shape index: {}]   ;;  %s12357_s15 = inlined_call_operand.vmem [shape: f32[2,32], index: 15, kind: input, shape index: {}]   ;;  %s12358_s16 = inlined_call_operand.vmem [shape: f32[64,32], index: 16, kind: output, shape index: {}]  }
   0x1   :  { %12360 = sst [smem:[#allocation3_spill]] %s12342_s1  ;;  %v8341_v3 = vld [vmem:[%s12343_s0] sm:$0xff]   ;;  %v8342_v8 = vld [vmem:[%s12343_s0 + $0x8] sm:$0xff]   ;;  %v8343_v9 = vld [vmem:[%s12343_s0 + $0x10] sm:$0xff]  }
   0x2   :  { %s12361_s23 = sld [smem:[#allocation3_spill]]  ;;  %8182 = vmatprep.mubr.msk.bf16.mxu0 %vm136_vm0, %v8341_v3  ;;  %v8344_v10 = vld [vmem:[%s12343_s0 + $0x18] sm:$0xff]   ;;  %v7136_v11 = vld [vmem:[%s12344_s2] ss:$0 sm:$0xff]  ;;  %s8859_s0 = smov 96  }
   0x8   :  { %v8335_v0 = vld [vmem:[%s12361_s23] sm:$0xff]   ;;  %v8336_v1 = vld [vmem:[%s12361_s23 + $0x8] sm:$0xff]   ;;  %v8337_v2 = vld [vmem:[%s12361_s23 + $0x10] sm:$0xff]  }
   0x9   :  { %8170 = vmatprep.subr.bf16.mxu0 %v8335_v0  ;;  %v8338_v4 = vld [vmem:[%s12361_s23 + $0x18] sm:$0xff]   ;;  %v8339_v5 = vld [vmem:[%s12361_s23 + $0x20] sm:$0xff]   ;;  %v8340_v6 = vld [vmem:[%s12361_s23 + $0x28] sm:$0x1f]  }
   0xa   :  { %8171 = vmatpush3.bf16.msra.mxu0 %v8335_v0  ;;  %v151_v7 = vsel %vm149_vm1, %v8340_v6, 0 }
   0xb   :  { %8172 = vmatprep.subr.bf16.mxu0 %v8336_v1 }
   0xe   :  { %8173 = vmatpush3.bf16.msra.mxu0 %v8336_v1 }
   0xf   :  { %8174 = vmatprep.subr.bf16.mxu0 %v8337_v2 }
  0x12   :  { %8175 = vmatpush3.bf16.msra.mxu0 %v8337_v2 }
  0x13   :  { %8176 = vmatprep.subr.bf16.mxu0 %v8338_v4 }
  0x16   :  { %8177 = vmatpush3.bf16.msra.mxu0 %v8338_v4 }
  0x17   :  { %8178 = vmatprep.subr.bf16.mxu0 %v8339_v5 }
  0x1a   :  { %8179 = vmatpush3.bf16.msra.mxu0 %v8339_v5 }
  0x1b   :  { %8330 = vmatprep.subr.msk.bf16.mxu0 %vm149_vm1, %v8340_v6 }
  0x1e   :  { %8181 = vmatpush3.bf16.msra.mxu0 %v151_v7 }
  0x21   :  { %8183 = vmatmul.mubr.msk.bf16.vlgmr.msra.gmra.mrb[0].mxu0 %vm136_vm0, %v8342_v8 }
  0x22   :  { %8186 = vmatprep.mubr.msk.bf16.mxu0 %vm136_vm0, %v8343_v9 }
  0x29   :  { %8187 = vmatmul.mubr.msk.bf16.gmra.mrb[4].mxu0 %vm136_vm0, %v8344_v10 }
  0xf4   :  { %v8184_v12 = vpop.f32.mrb[0].mxu0 }
  0xf5   :  { %v196_v13 = vadd.f32 %v8184_v12, %v7136_v11  ;;  %v187_v14 = vpop.f32.mrb[1].mxu0 }
  0xf6   :  { %v188_v15 = vadd.f32 %v7136_v11, %v187_v14  ;;  %v8185_v16 = vpop.f32.mrb[2].mxu0 }
  0xf7   :  { %v228_v17 = vmul.f32 0.044715, %v196_v13  ;;  %v199_v18 = vadd.f32 %v8185_v16, %v7136_v11  ;;  %v190_v19 = vpop.f32.mrb[3].mxu0  ;;  %v220_v44 = vmul.f32 0.5, %v196_v13 }
  0xf8   :  { %v226_v20 = vmul.f32 0.044715, %v188_v15  ;;  %v218_v48 = vmul.f32 0.5, %v188_v15  ;;  %v191_v56 = vadd.f32 %v7136_v11, %v190_v19 }
  0xf9   :  { %v236_v21 = vmul.f32 %v228_v17, %v196_v13  ;;  %v229_v24 = vmul.f32 0.044715, %v199_v18  ;;  %v221_v54 = vmul.f32 0.5, %v199_v18 }
  0xfa   :  { %v234_v22 = vmul.f32 %v226_v20, %v188_v15  ;;  %v227_v58 = vmul.f32 0.044715, %v191_v56  ;;  %v219_v2 = vmul.f32 0.5, %v191_v56 }
  0xfb   :  { %v244_v23 = vmul.f32 %v236_v21, %v196_v13  ;;  %v237_v33 = vmul.f32 %v229_v24, %v199_v18 }
  0xfc   :  { %v242_v25 = vmul.f32 %v234_v22, %v188_v15  ;;  %v8188_v26 = vpop.f32.mrb[4].mxu0  ;;  %v235_v59 = vmul.f32 %v227_v58, %v191_v56 }
  0xfd   :  { %v252_v27 = vadd.f32 %v244_v23, %v196_v13  ;;  %v8985_v28 = vadd.f32 %v8188_v26, %v7136_v11  ;;  %v203_v29 = vpop.f32.mrb[5].mxu0  ;;  %v245_v35 = vmul.f32 %v237_v33, %v199_v18 }
  0xfe   :  { %v250_v30 = vadd.f32 %v242_v25, %v188_v15  ;;  %v8987_v31 = vadd.f32 %v7136_v11, %v203_v29  ;;  %v8189_v36 = vpop.f32.mrb[6].mxu0  ;;  %v243_v60 = vmul.f32 %v235_v59, %v191_v56 }
  0xff   :  { %v260_v32 = vmul.f32 0.7978846, %v252_v27  ;;  %v8989_v37 = vadd.f32 %v8189_v36, %v7136_v11  ;;  %v206_v38 = vpop.f32.mrb[7].mxu0  ;;  %v253_v40 = vadd.f32 %v245_v35, %v199_v18  ;;  %v232_v6 = vmul.f32 0.044715, %v8985_v28 }
 0x100   :  { %v258_v34 = vmul.f32 0.7978846, %v250_v30  ;;  %v8991_v39 = vadd.f32 %v7136_v11, %v206_v38  ;;  %v251_v61 = vadd.f32 %v243_v60, %v191_v56  ;;  %v230_v8 = vmul.f32 0.044715, %v8987_v31 }
 0x101   :  { %8539 = vtanh.f32 %v260_v32  ;;  %v261_v42 = vmul.f32 0.7978846, %v253_v40  ;;  %v240_v7 = vmul.f32 %v232_v6, %v8985_v28  ;;  %v224_v22 = vmul.f32 0.5, %v8985_v28 }
 0x102   :  { %8541 = vtanh.f32 %v258_v34  ;;  %v259_v62 = vmul.f32 0.7978846, %v251_v61  ;;  %v238_v10 = vmul.f32 %v230_v8, %v8987_v31  ;;  %v222_v27 = vmul.f32 0.5, %v8987_v31 }
 0x103   :  { %8543 = vtanh.f32 %v261_v42  ;;  %v248_v9 = vmul.f32 %v240_v7, %v8985_v28  ;;  %v233_v32 = vmul.f32 0.044715, %v8989_v37  ;;  %v231_v34 = vmul.f32 0.044715, %v8991_v39 }
 0x104   :  { %8545 = vtanh.f32 %v259_v62  ;;  %v246_v13 = vmul.f32 %v238_v10, %v8987_v31 }
 0x105   :  { %v256_v12 = vadd.f32 %v248_v9, %v8985_v28  ;;  %v241_v33 = vmul.f32 %v233_v32, %v8989_v37  ;;  %v239_v36 = vmul.f32 %v231_v34, %v8991_v39 }
 0x106   :  { %v254_v17 = vadd.f32 %v246_v13, %v8987_v31 }
 0x107   :  { %v264_v16 = vmul.f32 0.7978846, %v256_v12  ;;  %v249_v35 = vmul.f32 %v241_v33, %v8989_v37  ;;  %v247_v40 = vmul.f32 %v239_v36, %v8991_v39 }
 0x108   :  { %v262_v19 = vmul.f32 0.7978846, %v254_v17 }
 0x109   :  { %8547 = vtanh.f32 %v264_v16  ;;  %v257_v38 = vadd.f32 %v249_v35, %v8989_v37  ;;  %v255_v42 = vadd.f32 %v247_v40, %v8991_v39 }
 0x10a   :  { %8549 = vtanh.f32 %v262_v19 }
 0x10b   :  { %v8540_v41 = vpop.eup %8539 }
 0x10c   :  { %v8542_v43 = vpop.eup %8541  ;;  %v276_v45 = vadd.f32 1.0, %v8540_v41  ;;  %v265_v41 = vmul.f32 0.7978846, %v257_v38 }
 0x10d   :  { %v274_v47 = vadd.f32 1.0, %v8542_v43  ;;  %v8544_v52 = vpop.eup %8543  ;;  %v263_v43 = vmul.f32 0.7978846, %v255_v42  ;;  %v438_v42 = vlaneseq }
 0x10e   :  { %v8993_v46 = vmul.f32 %v276_v45, %v220_v44  ;;  %v277_v53 = vadd.f32 1.0, %v8544_v52  ;;  %v8546_v0 = vpop.eup %8545  ;;  %8551 = vtanh.f32 %v265_v41  ;;  %v225_v45 = vmul.f32 0.5, %v8989_v37 }
 0x10f   :  { %v8999_v50 = vmul.f32 %v274_v47, %v218_v48  ;;  %v275_v1 = vadd.f32 1.0, %v8546_v0  ;;  %8553 = vtanh.f32 %v263_v43  ;;  %v9135_v43 = vshrl.u32 %v438_v42, 7 }
 0x110   :  { %474 = vrot.lane.b32.xlu0 %v8993_v46, %s8859_s0  ;;  %v323_v49 = vsel %vm316_vm2, %v8993_v46, 0.0  ;;  %v352_v51 = vmul.f32 %v8993_v46, %v8993_v46  ;;  %v9006_v55 = vmul.f32 %v277_v53, %v221_v54 }
 0x111   :  { %324 = vadd.xlane.f32.xlu1 %v323_v49  ;;  %v350_v57 = vmul.f32 %v8999_v50, %v8999_v50  ;;  %v317_v63 = vsel %vm316_vm2, %v8999_v50, 0.0  ;;  %v9016_v4 = vmul.f32 %v275_v1, %v219_v2 }
 0x112   :  { %v364_v3 = vsel %vm316_vm2, %v352_v51, 0.0  ;;  %v353_v5 = vmul.f32 %v9006_v55, %v9006_v55  ;;  %v326_v11 = vsel %vm316_vm2, %v9006_v55, 0.0 }
 0x113   :  { %v351_v15 = vmul.f32 %v9016_v4, %v9016_v4  ;;  %v320_v20 = vsel %vm316_vm2, %v9016_v4, 0.0  ;;  %v8548_v21 = vpop.eup %8547  ;;  %v358_v24 = vsel %vm316_vm2, %v350_v57, 0.0 }
 0x114   :  { %470 = vrot.lane.b32.xlu0 %v8999_v50, %s8859_s0  ;;  %v367_v14 = vsel %vm316_vm2, %v353_v5, 0.0  ;;  %v280_v23 = vadd.f32 1.0, %v8548_v21  ;;  %v8550_v25 = vpop.eup %8549 }
 0x115   :  { %v361_v18 = vsel %vm316_vm2, %v351_v15, 0.0  ;;  %v278_v29 = vadd.f32 1.0, %v8550_v25 }
 0x116   :  { %v9041_v26 = vmul.f32 %v280_v23, %v224_v22 }
 0x117   :  { %v9044_v30 = vmul.f32 %v278_v29, %v222_v27 }
 0x118   :  { %538 = vrot.lane.b32.xlu0 %v352_v51, %s8859_s0  ;;  %v9053_v28 = vmul.f32 %v9041_v26, %v9041_v26  ;;  %v8552_v44 = vpop.eup %8551  ;;  %v223_v51 = vmul.f32 0.5, %v8991_v39 }
 0x119   :  { %v9061_v31 = vmul.f32 %v9044_v30, %v9044_v30  ;;  %v281_v47 = vadd.f32 1.0, %v8552_v44  ;;  %v8554_v48 = vpop.eup %8553  ;;  %v9138_v44 = vsub.s32 2, %v9135_v43 }
 0x11a   :  { %v279_v52 = vadd.f32 1.0, %v8554_v48  ;;  %v376_v16 = vsel %vm316_vm2, %v9053_v28, 0.0 }
 0x11b   :  { %v9072_v49 = vmul.f32 %v281_v47, %v225_v45  ;;  %v9145_v47 = vld [vmem:[%s12345_s3] sm:$0xf] }
 0x11c   :  { %v9075_v54 = vmul.f32 %v279_v52, %v223_v51  ;;  %v641_v48 = vrot.slane %v9145_v47, %v9138_v44 }
 0x11d   :  { %v338_v56 = vsel %vm316_vm2, %v9072_v49, 0.0  ;;  %v357_v58 = vmul.f32 %v9072_v49, %v9072_v49 }
 0x11e   :  { %v332_v37 = vsel %vm316_vm2, %v9075_v54, 0.0  ;;  %v355_v60 = vmul.f32 %v9075_v54, %v9075_v54 }
 0x11f   :  { %v379_v59 = vsel %vm316_vm2, %v357_v58, 0.0 }
 0x122   :  { %476 = vrot.lane.b32.xlu1 %v9006_v55, %s8859_s0 }
 0x126   :  { %534 = vrot.lane.b32.xlu1 %v350_v57, %s8859_s0  ;;  %v335_v57 = vsel %vm316_vm2, %v9041_v26, 0.0 }
 0x137   :  { %318 = vadd.xlane.f32.xlu0 %v317_v63  ;;  %v373_v63 = vsel %vm316_vm2, %v355_v60, 0.0 }
 0x14a   :  { %365 = vadd.xlane.f32.xlu1 %v364_v3 }
 0x14d   :  { %472 = vrot.lane.b32.xlu0 %v9016_v4, %s8859_s0 }
 0x15b   :  { %540 = vrot.lane.b32.xlu1 %v353_v5, %s8859_s0 }
 0x16c   :  { %327 = vadd.xlane.f32.xlu0 %v326_v11  ;;  %v329_v11 = vsel %vm316_vm2, %v9044_v30, 0.0 }
 0x170   :  { %368 = vadd.xlane.f32.xlu0 %v367_v14 }
 0x174   :  { %362 = vadd.xlane.f32.xlu0 %v361_v18 }
 0x17f   :  { %321 = vadd.xlane.f32.xlu1 %v320_v20  ;;  %v370_v20 = vsel %vm316_vm2, %v9061_v31, 0.0 }
 0x182   :  { %v475_v53 = vpop.permute.xlu0 %474 }
 0x183   :  { %359 = vadd.xlane.f32.xlu1 %v358_v24  ;;  %v500_v29 = vsel %vm316_vm2, %v475_v53, 0.0 }
 0x186   :  { %v471_v39 = vpop.permute.xlu0 %470 }
 0x187   :  { %v494_v1 = vsel %vm316_vm2, %v471_v39, 0.0 }
 0x18a   :  { %482 = vrot.lane.b32.xlu0 %v9041_v26, %s8859_s0  ;;  %v539_v62 = vpop.permute.xlu0 %538 }
 0x18e   :  { %478 = vrot.lane.b32.xlu0 %v9044_v30, %s8859_s0 }
 0x192   :  { %546 = vrot.lane.b32.xlu0 %v9053_v28, %s8859_s0  ;;  %v564_v28 = vsel %vm316_vm2, %v539_v62, 0.0 }
 0x194   :  { %536 = vrot.lane.b32.xlu1 %v351_v15, %s8859_s0 }
 0x196   :  { %542 = vrot.lane.b32.xlu0 %v9061_v31, %s8859_s0 }
 0x19e   :  { %v9088_v61 = vpop.xlane.xlu1 %324 }
 0x1a2   :  { %v477_v2 = vpop.permute.xlu1 %476 }
 0x1a3   :  { %v503_v3 = vsel %vm316_vm2, %v477_v2, 0.0 }
 0x1a6   :  { %v535_v7 = vpop.permute.xlu1 %534 }
 0x1a7   :  { %v558_v33 = vsel %vm316_vm2, %v535_v7, 0.0 }
 0x1b5   :  { %339 = vadd.xlane.f32.xlu0 %v338_v56 }
 0x1b8   :  { %336 = vadd.xlane.f32.xlu1 %v335_v57 }
 0x1b9   :  { %333 = vadd.xlane.f32.xlu0 %v332_v37 }
 0x1bd   :  { %380 = vadd.xlane.f32.xlu0 %v379_v59 }
 0x1c1   :  { %374 = vadd.xlane.f32.xlu0 %v373_v63 }
 0x1c4   :  { %v9091_v0 = vpop.xlane.xlu0 %318 }
 0x1c5   :  { %495 = vadd.xlane.f32.xlu0 %v494_v1 }
 0x1c8   :  { %v473_v5 = vpop.permute.xlu0 %472 }
 0x1c9   :  { %484 = vrot.lane.b32.xlu1 %v9072_v49, %s8859_s0  ;;  %504 = vadd.xlane.f32.xlu0 %v503_v3  ;;  %v497_v6 = vsel %vm316_vm2, %v473_v5, 0.0 }
 0x1cd   :  { %498 = vadd.xlane.f32.xlu0 %v497_v6  ;;  %v9185_v6 = vmul.f32 0.03125, %v9088_v61 }
 0x1d7   :  { %v9098_v8 = vpop.xlane.xlu1 %365 }
 0x1db   :  { %v541_v9 = vpop.permute.xlu1 %540 }
 0x1dc   :  { %v567_v10 = vsel %vm316_vm2, %v541_v9, 0.0  ;;  %v9188_v9 = vmul.f32 0.03125, %v9091_v0 }
 0x1dd   :  { %568 = vadd.xlane.f32.xlu0 %v567_v10 }
 0x1de   :  { %v390_v61 = vmul.f32 %v9188_v9, %v9188_v9 }
 0x1ed   :  { %330 = vadd.xlane.f32.xlu1 %v329_v11 }
 0x1f9   :  { %v9121_v22 = vpop.xlane.xlu0 %327 }
 0x1fd   :  { %v9124_v25 = vpop.xlane.xlu0 %368 }
 0x1fe   :  { %480 = vrot.lane.b32.xlu1 %v9075_v54, %s8859_s0 }
 0x201   :  { %v9126_v27 = vpop.xlane.xlu0 %362 }
 0x205   :  { %v483_v32 = vpop.permute.xlu0 %482 }
 0x206   :  { %v512_v31 = vsel %vm316_vm2, %v483_v32, 0.0 }
 0x209   :  { %v479_v34 = vpop.permute.xlu0 %478 }
 0x20a   :  { %v506_v36 = vsel %vm316_vm2, %v479_v34, 0.0  ;;  %v383_v34 = vmul.f32 0.03125, %v9126_v27 }
 0x20c   :  { %v9105_v12 = vpop.xlane.xlu1 %321 }
 0x20d   :  { %v547_v35 = vpop.permute.xlu0 %546  ;;  %v9191_v11 = vmul.f32 0.03125, %v9105_v12 }
 0x20e   :  { %v576_v38 = vsel %vm316_vm2, %v547_v35, 0.0 }
 0x210   :  { %v9107_v13 = vpop.xlane.xlu1 %359 }
 0x211   :  { %v543_v40 = vpop.permute.xlu0 %542 }
 0x212   :  { %v570_v41 = vsel %vm316_vm2, %v543_v40, 0.0 }
 0x214   :  { %v537_v14 = vpop.permute.xlu1 %536 }
 0x215   :  { %v561_v15 = vsel %vm316_vm2, %v537_v14, 0.0  ;;  %v9194_v14 = vmul.f32 0.03125, %v9121_v22  ;;  %v391_v22 = vmul.f32 %v9191_v11, %v9191_v11 }
 0x216   :  { %562 = vadd.xlane.f32.xlu0 %v561_v15  ;;  %v392_v15 = vmul.f32 %v9185_v6, %v9185_v6 }
 0x217   :  { %v399_v42 = vsub.f32 %v383_v34, %v391_v22 }
 0x222   :  { %377 = vadd.xlane.f32.xlu1 %v376_v16  ;;  %v384_v16 = vmul.f32 0.03125, %v9098_v8  ;;  %v393_v8 = vmul.f32 %v9194_v14, %v9194_v14 }
 0x233   :  { %548 = vrot.lane.b32.xlu1 %v357_v58, %s8859_s0  ;;  %v9155_v58 = vsub.s32 3, %v9135_v43 }
 0x235   :  { %v657_v59 = vrot.slane %v9145_v47, %v9155_v58 }
 0x242   :  { %v340_v37 = vpop.xlane.xlu0 %339 }
 0x243   :  { %v9202_v0 = vmul.f32 0.03125, %v340_v37 }
 0x245   :  { %v9113_v17 = vpop.xlane.xlu1 %336 }
 0x246   :  { %v334_v39 = vpop.xlane.xlu0 %333  ;;  %v9216_v32 = vmul.f32 0.03125, %v9113_v17 }
 0x249   :  { %v485_v18 = vpop.permute.xlu1 %484 }
 0x24a   :  { %v515_v19 = vsel %vm316_vm2, %v485_v18, 0.0  ;;  %v381_v62 = vpop.xlane.xlu0 %380 }
 0x24b   :  { %516 = vadd.xlane.f32.xlu0 %v515_v19  ;;  %v385_v19 = vmul.f32 0.03125, %v9124_v25  ;;  %v389_v25 = vmul.f32 0.03125, %v381_v62 }
 0x24e   :  { %v375_v63 = vpop.xlane.xlu0 %374 }
 0x252   :  { %v496_v1 = vpop.xlane.xlu0 %495 }
 0x256   :  { %v505_v2 = vpop.xlane.xlu0 %504 }
 0x257   :  { %371 = vadd.xlane.f32.xlu1 %v370_v20  ;;  %v9204_v20 = vmul.f32 0.03125, %v334_v39 }
 0x259   :  { %v395_v40 = vmul.f32 %v9204_v20, %v9204_v20 }
 0x25a   :  { %v499_v5 = vpop.xlane.xlu0 %498 }
 0x268   :  { %544 = vrot.lane.b32.xlu1 %v355_v60, %s8859_s0  ;;  %v8861_v60 = vmov 0.0  }
 0x269   :  { %295 = vst.msk [vmem:[#allocation2 + $0x20] sm:$0xff] %vm290_vm3, %v8861_v60  ;;  %296 = vst.msk [vmem:[#allocation2 + $0x28] sm:$0xff] %vm290_vm3, %v8861_v60 }
 0x26a   :  { %307 = vst.msk [vmem:[#allocation2 + $0x80] sm:$0xff] %vm290_vm3, %v8861_v60  ;;  %308 = vst.msk [vmem:[#allocation2 + $0x88] sm:$0xff] %vm290_vm3, %v8861_v60  ;;  %v569_v10 = vpop.xlane.xlu0 %568 }
 0x26b   :  { %309 = vst.msk [vmem:[#allocation2 + $0x90] sm:$0xff] %vm290_vm3, %v8861_v60  ;;  %310 = vst.msk [vmem:[#allocation2 + $0x98] sm:$0xff] %vm290_vm3, %v8861_v60 }
 0x26c   :  { %291 = vst.msk [vmem:[#allocation2] sm:$0xff] %vm290_vm3, %v8861_v60  ;;  %292 = vst.msk [vmem:[#allocation2 + $0x8] sm:$0xff] %vm290_vm3, %v8861_v60 }
 0x26d   :  { %293 = vst.msk [vmem:[#allocation2 + $0x10] sm:$0xff] %vm290_vm3, %v8861_v60  ;;  %294 = vst.msk [vmem:[#allocation2 + $0x18] sm:$0xff] %vm290_vm3, %v8861_v60 }
 0x26e   :  { %297 = vst.msk [vmem:[#allocation2 + $0x30] sm:$0xff] %vm290_vm3, %v8861_v60  ;;  %298 = vst.msk [vmem:[#allocation2 + $0x38] sm:$0xff] %vm290_vm3, %v8861_v60 }
 0x26f   :  { %299 = vst.msk [vmem:[#allocation2 + $0x40] sm:$0xff] %vm290_vm3, %v8861_v60  ;;  %300 = vst.msk [vmem:[#allocation2 + $0x48] sm:$0xff] %vm290_vm3, %v8861_v60 }
 0x270   :  { %301 = vst.msk [vmem:[#allocation2 + $0x50] sm:$0xff] %vm290_vm3, %v8861_v60  ;;  %302 = vst.msk [vmem:[#allocation2 + $0x58] sm:$0xff] %vm290_vm3, %v8861_v60 }
 0x271   :  { %303 = vst.msk [vmem:[#allocation2 + $0x60] sm:$0xff] %vm290_vm3, %v8861_v60  ;;  %304 = vst.msk [vmem:[#allocation2 + $0x68] sm:$0xff] %vm290_vm3, %v8861_v60 }
 0x272   :  { %305 = vst.msk [vmem:[#allocation2 + $0x70] sm:$0xff] %vm290_vm3, %v8861_v60  ;;  %306 = vst.msk [vmem:[#allocation2 + $0x78] sm:$0xff] %vm290_vm3, %v8861_v60 }
 0x273   :  { %311 = vst.msk [vmem:[#allocation2 + $0xa0] sm:$0xff] %vm290_vm3, %v8861_v60  ;;  %312 = vst.msk [vmem:[#allocation2 + $0xa8] sm:$0xff] %vm290_vm3, %v8861_v60 }
 0x274   :  { %313 = vst.msk [vmem:[#allocation2 + $0xb0] sm:$0xff] %vm290_vm3, %v8861_v60  ;;  %314 = vst.msk [vmem:[#allocation2 + $0xb8] sm:$0xff] %vm290_vm3, %v8861_v60 }
 0x27a   :  { %v9119_v21 = vpop.xlane.xlu1 %330 }
 0x27e   :  { %v481_v23 = vpop.permute.xlu1 %480 }
 0x27f   :  { %v509_v24 = vsel %vm316_vm2, %v481_v23, 0.0  ;;  %v382_v23 = vmul.f32 0.03125, %v9107_v13  ;;  %v397_v13 = vmul.f32 %v9202_v0, %v9202_v0 }
 0x280   :  { %510 = vadd.xlane.f32.xlu0 %v509_v24  ;;  %v9209_v24 = vmul.f32 0.03125, %v505_v2  ;;  %v9238_v2 = vadd.f32 1e-05, %v399_v42  ;;  %v8348_v42 = vld [vmem:[%s12346_s4 + $0x8] sm:$0xff]  }
 0x281   :  { %v398_v17 = vsub.f32 %v382_v23, %v390_v61 }
 0x28c   :  { %501 = vadd.xlane.f32.xlu1 %v500_v29  ;;  %v9211_v29 = vmul.f32 0.03125, %v499_v5  ;;  %v9240_v5 = vadd.f32 1e-05, %v398_v17 }
 0x28e   :  { %v591_v27 = vmul.f32 %v9211_v29, %v9211_v29 }
 0x290   :  { %565 = vadd.xlane.f32.xlu1 %v564_v28  ;;  %v387_v28 = vmul.f32 0.03125, %v375_v63 }
 0x294   :  { %559 = vadd.xlane.f32.xlu1 %v558_v33  ;;  %v400_v33 = vsub.f32 %v384_v16, %v392_v15  ;;  %v9248_v16 = vmul.f32 0.03125, %v496_v1 }
 0x296   :  { %v590_v34 = vmul.f32 %v9248_v16, %v9248_v16 }
 0x298   :  { %513 = vadd.xlane.f32.xlu1 %v512_v31  ;;  %v585_v31 = vmul.f32 0.03125, %v569_v10 }
 0x29c   :  { %507 = vadd.xlane.f32.xlu1 %v506_v36 }
 0x2a0   :  { %577 = vadd.xlane.f32.xlu1 %v576_v38  ;;  %v401_v38 = vsub.f32 %v385_v19, %v393_v8 }
 0x2a2   :  { %v9235_v60 = vadd.f32 1e-05, %v401_v38 }
 0x2a3   :  { %v563_v12 = vpop.xlane.xlu0 %562 }
 0x2a4   :  { %571 = vadd.xlane.f32.xlu1 %v570_v41  ;;  %v583_v35 = vmul.f32 0.03125, %v563_v12 }
 0x2a6   :  { %v599_v39 = vsub.f32 %v583_v35, %v591_v27  ;;  %v8349_v27 = vld [vmem:[%s12346_s4 + $0x50] sm:$0xff]  }
 0x2a8   :  { %v9254_v12 = vadd.f32 1e-05, %v599_v39  ;;  %v8351_v39 = vld [vmem:[%s12346_s4 + $0x58] sm:$0xff]  }
 0x2af   :  { %v9140_v45 = vpop.xlane.xlu1 %377 }
 0x2b0   :  { %v388_v41 = vmul.f32 0.03125, %v9140_v45  ;;  %v9233_v45 = vadd.f32 1e-05, %v400_v33  ;;  %v8345_v33 = vld [vmem:[%s12346_s4 + $0x40] sm:$0xff]  }
 0x2b1   :  { %7700 = vmatprep.subr.bf16.mxu1 %v8345_v33  ;;  %v9309_v33 = vsub.s32 1, %v9135_v43 }
 0x2b2   :  { %8555 = vrsqrt.f32 %v9233_v45  ;;  %v408_v45 = vsub.f32 %v8993_v46, %v9185_v6 }
 0x2b3   :  { %v549_v51 = vpop.permute.xlu1 %548  ;;  %8557 = vrsqrt.f32 %v9235_v60  ;;  %v409_v60 = vsub.f32 %v9006_v55, %v9194_v14 }
 0x2b4   :  { %v579_v52 = vsel %vm316_vm2, %v549_v51, 0.0  ;;  %v396_v51 = vmul.f32 %v9216_v32, %v9216_v32  ;;  %8559 = vrsqrt.f32 %v9238_v2  ;;  %v407_v2 = vsub.f32 %v9016_v4, %v9191_v11 }
 0x2b5   :  { %580 = vadd.xlane.f32.xlu0 %v579_v52  ;;  %643 = vrot.lane.b32.xlu1 %v641_v48, %s8860_s30  ;;  %v593_v48 = vmul.f32 %v9209_v24, %v9209_v24  ;;  %v405_v52 = vsub.f32 %v389_v25, %v397_v13  ;;  %8561 = vrsqrt.f32 %v9240_v5  ;;  %v406_v5 = vsub.f32 %v8999_v50, %v9188_v9 }
 0x2b6   :  { %v404_v62 = vsub.f32 %v388_v41, %v396_v51  ;;  %v413_v9 = vsub.f32 %v9072_v49, %v9202_v0 }
 0x2b7   :  { %v601_v37 = vsub.f32 %v585_v31, %v593_v48  ;;  %v9244_v15 = vadd.f32 1e-05, %v405_v52  ;;  %v8346_v31 = vld [vmem:[%s12346_s4] sm:$0xff]  }
 0x2b8   :  { %v9256_v23 = vadd.f32 1e-05, %v404_v62  ;;  %7701 = vmatpush3.bf16.msra.mxu1 %v8346_v31  ;;  %v8355_v31 = vld [vmem:[%s12346_s4 + $0x68] sm:$0xff]  }
 0x2b9   :  { %v9252_v19 = vadd.f32 1e-05, %v601_v37  ;;  %v8350_v37 = vld [vmem:[%s12346_s4 + $0x10] sm:$0xff]   ;;  %8563 = vrsqrt.f32 %v9244_v15 }
 0x2ba   :  { %8565 = vrsqrt.f32 %v9256_v23 }
 0x2d8   :  { %v517_v62 = vpop.xlane.xlu0 %516 }
 0x2e4   :  { %v9151_v53 = vpop.xlane.xlu1 %371 }
 0x2e5   :  { %v386_v63 = vmul.f32 0.03125, %v9151_v53 }
 0x2e8   :  { %v545_v56 = vpop.permute.xlu1 %544 }
 0x2e9   :  { %v573_v57 = vsel %vm316_vm2, %v545_v56, 0.0  ;;  %v403_v56 = vsub.f32 %v387_v28, %v395_v40 }
 0x2ea   :  { %574 = vadd.xlane.f32.xlu0 %v573_v57  ;;  %v9231_v57 = vmul.f32 0.03125, %v9119_v21 }
 0x2eb   :  { %v9246_v21 = vadd.f32 1e-05, %v403_v56 }
 0x2ec   :  { %v394_v61 = vmul.f32 %v9231_v57, %v9231_v57 }
 0x2ee   :  { %v402_v8 = vsub.f32 %v386_v63, %v394_v61  ;;  %v8352_v61 = vld [vmem:[%s12346_s4 + $0x18] sm:$0xff]  }
 0x2f0   :  { %v418_v38 = vadd.f32 1e-05, %v402_v8  ;;  %v9303_v8 = vsub.s32 0, %v9135_v43  ;;  %v8356_v43 = vld [vmem:[%s12346_s4 + $0x28] sm:$0xff]  }
 0x2f2   :  { %8567 = vrsqrt.f32 %v418_v38  ;;  %v9352_v15 = vrot.slane %v9145_v47, %v9303_v8 }
 0x2f3   :  { %8569 = vrsqrt.f32 %v9254_v12 }
 0x300   :  { %659 = vrot.lane.b32.xlu0 %v657_v59, %s8860_s30 }
 0x319   :  { %v502_v3 = vpop.xlane.xlu1 %501 }
 0x31a   :  { %v9242_v10 = vmul.f32 0.03125, %v502_v3 }
 0x31c   :  { %v592_v28 = vmul.f32 %v9242_v10, %v9242_v10 }
 0x31d   :  { %v566_v7 = vpop.xlane.xlu1 %565 }
 0x31e   :  { %v584_v53 = vmul.f32 0.03125, %v566_v7 }
 0x321   :  { %v560_v18 = vpop.xlane.xlu1 %559 }
 0x322   :  { %v582_v3 = vmul.f32 0.03125, %v560_v18  ;;  %v600_v18 = vsub.f32 %v584_v53, %v592_v28  ;;  %v8353_v53 = vld [vmem:[%s12346_s4 + $0x60] sm:$0xff]  }
 0x323   :  { %v8358_v28 = vld [vmem:[%s12346_s4 + $0x80] sm:$0xff]  }
 0x324   :  { %v598_v13 = vsub.f32 %v582_v3, %v590_v34  ;;  %v9285_v51 = vadd.f32 1e-05, %v600_v18  ;;  %v511_v3 = vpop.xlane.xlu0 %510  ;;  %v8354_v34 = vld [vmem:[%s12346_s4 + $0x20] sm:$0xff]  }
 0x325   :  { %v514_v36 = vpop.xlane.xlu1 %513  ;;  %v9319_v18 = vmul.f32 0.03125, %v511_v3 }
 0x326   :  { %v9258_v25 = vmul.f32 0.03125, %v514_v36  ;;  %v8347_v36 = vld [vmem:[%s12346_s4 + $0x48] sm:$0xff]   ;;  %v614_v56 = vadd.f32 1e-05, %v598_v13 }
 0x327   :  { %7702 = vmatprep.subr.bf16.mxu1 %v8347_v36 }
 0x328   :  { %v596_v40 = vmul.f32 %v9258_v25, %v9258_v25  ;;  %7703 = vmatpush3.bf16.msra.mxu1 %v8348_v42  ;;  %v8360_v42 = vld [vmem:[%s12346_s4 + $0x30] sm:$0xff]   ;;  %8571 = vrsqrt.f32 %v614_v56 }
 0x329   :  { %v508_v59 = vpop.xlane.xlu1 %507  ;;  %7704 = vmatprep.subr.bf16.mxu1 %v8349_v27  ;;  %v8556_v27 = vpop.eup %8555 }
 0x32a   :  { %v9262_v1 = vmul.f32 0.03125, %v508_v59  ;;  %v432_v12 = vmul.f32 %v8556_v27, %v408_v45  ;;  %v612_v27 = vsub.f32 %v9041_v26, %v9258_v25 }
 0x32c   :  { %v594_v17 = vmul.f32 %v9262_v1, %v9262_v1  ;;  %7705 = vmatpush3.bf16.msra.mxu1 %v8350_v37 }
 0x32d   :  { %v578_v22 = vpop.xlane.xlu1 %577  ;;  %7706 = vmatprep.subr.bf16.mxu1 %v8351_v39 }
 0x32e   :  { %v588_v7 = vmul.f32 0.03125, %v578_v22  ;;  %v8357_v22 = vld [vmem:[%s12346_s4 + $0xc0] sm:$0xff]  }
 0x32f   :  { %7740 = vmatprep.subr.bf16.mxu0 %v8357_v22 }
 0x330   :  { %v604_v48 = vsub.f32 %v588_v7, %v596_v40  ;;  %7707 = vmatpush3.bf16.msra.mxu1 %v8352_v61  ;;  %v9314_v7 = vmul.f32 0.03125, %v517_v62  ;;  %7741 = vmatpush3.bf16.msra.mxu0 %v8358_v28  ;;  %v412_v62 = vsub.f32 %v9041_v26, %v9216_v32  ;;  %v444_v61 = vmul.f32 %v9352_v15, %v432_v12 }
 0x331   :  { %v572_v35 = vpop.xlane.xlu1 %571  ;;  %7708 = vmatprep.subr.bf16.mxu1 %v8353_v53 }
 0x332   :  { %v586_v41 = vmul.f32 0.03125, %v572_v35  ;;  %v620_v59 = vadd.f32 1e-05, %v604_v48  ;;  %v8361_v35 = vld [vmem:[%s12346_s4 + $0xc8] sm:$0xff]   ;;  %v597_v13 = vmul.f32 %v9314_v7, %v9314_v7 }
 0x333   :  { %7742 = vmatprep.subr.bf16.mxu0 %v8361_v35 }
 0x334   :  { %v602_v52 = vsub.f32 %v586_v41, %v594_v17  ;;  %7709 = vmatpush3.bf16.msra.mxu1 %v8354_v34  ;;  %v8359_v41 = vld [vmem:[%s12346_s4 + $0x70] sm:$0xff]   ;;  %8573 = vrsqrt.f32 %v620_v59  ;;  %v9358_v59 = vrot.slane %v9145_v47, %v9309_v33 }
 0x335   :  { %7710 = vmatprep.subr.bf16.mxu1 %v8355_v31 }
 0x336   :  { %v618_v63 = vadd.f32 1e-05, %v602_v52  ;;  %v8558_v52 = vpop.eup %8557 }
 0x337   :  { %v8560_v37 = vpop.eup %8559  ;;  %v433_v23 = vmul.f32 %v8558_v52, %v409_v60  ;;  %v610_v52 = vsub.f32 %v9044_v30, %v9262_v1 }
 0x338   :  { %7711 = vmatpush3.bf16.msra.mxu1 %v8356_v43  ;;  %v8562_v39 = vpop.eup %8561  ;;  %8575 = vrsqrt.f32 %v618_v63  ;;  %v431_v38 = vmul.f32 %v8560_v37, %v407_v2  ;;  %v456_v43 = vadd.f32 %v9358_v59, %v444_v61 }
 0x339   :  { %7712 = vmatprep.subr.bf16.mxu1 %v8359_v41  ;;  %v8564_v6 = vpop.eup %8563  ;;  %v430_v56 = vmul.f32 %v8562_v39, %v406_v5  ;;  %v608_v39 = vsub.f32 %v8993_v46, %v9242_v10  ;;  %v9394_v5 = vpop.permute.xlu1 %643 }
 0x33a   :  { %v8566_v14 = vpop.eup %8565  ;;  %v443_v63 = vmul.f32 %v9352_v15, %v431_v38  ;;  %v437_v47 = vmul.f32 %v8564_v6, %v413_v9 }
 0x33b   :  { %v8568_v11 = vpop.eup %8567  ;;  %v442_v22 = vmul.f32 %v9352_v15, %v430_v56  ;;  %v436_v3 = vmul.f32 %v8566_v14, %v412_v62 }
 0x33c   :  { %7713 = vmatpush3.bf16.msra.mxu1 %v8360_v42  ;;  %v8570_v53 = vpop.eup %8569  ;;  %v455_v32 = vadd.f32 %v9358_v59, %v443_v63 }
 0x33d   :  { %v8572_v28 = vpop.eup %8571  ;;  %v448_v41 = vmul.f32 %v9352_v15, %v436_v3 }
 0x33e   :  { %v8574_v0 = vpop.eup %8573 }
 0x33f   :  { %v636_v60 = vmul.f32 %v8574_v0, %v612_v27  ;;  %v460_v10 = vadd.f32 %v9358_v59, %v448_v41  ;;  %v8365_v41 = vld [vmem:[%s12346_s4 + $0xd0] sm:$0xff]  }
 0x342   :  { %v581_v36 = vpop.xlane.xlu0 %580  ;;  %v8576_v31 = vpop.eup %8575 }
 0x343   :  { %v589_v40 = vmul.f32 0.03125, %v581_v36  ;;  %v454_v36 = vadd.f32 %v9358_v59, %v442_v22  ;;  %v634_v2 = vmul.f32 %v8576_v31, %v610_v52 }
 0x345   :  { %v605_v17 = vsub.f32 %v589_v40, %v597_v13  ;;  %v449_v13 = vmul.f32 %v9352_v15, %v437_v47  ;;  %v606_v40 = vsub.f32 %v8999_v50, %v9248_v16  ;;  %v607_v16 = vsub.f32 %v9016_v4, %v9211_v29 }
 0x346   :  { %v650_v63 = vmul.f32 %v9394_v5, %v634_v2 }
 0x347   :  { %v621_v48 = vadd.f32 1e-05, %v605_v17  ;;  %v613_v17 = vsub.f32 %v9072_v49, %v9314_v7  ;;  %v630_v45 = vmul.f32 %v8572_v28, %v606_v40  ;;  %v609_v7 = vsub.f32 %v9006_v55, %v9209_v24  ;;  %v8362_v28 = vld [vmem:[%s12346_s4 + $0x88] sm:$0xff]   ;;  %v8364_v40 = vld [vmem:[%s12346_s4 + $0x38] sm:$0xff]  }
 0x348   :  { %v631_v1 = vmul.f32 %v8570_v53, %v607_v16  ;;  %v461_v29 = vadd.f32 %v9358_v59, %v449_v13  ;;  %7743 = vmatpush3.bf16.msra.mxu0 %v8362_v28 }
 0x349   :  { %8577 = vrsqrt.f32 %v621_v48  ;;  %v646_v24 = vmul.f32 %v9394_v5, %v630_v45  ;;  %7744 = vmatprep.subr.bf16.mxu0 %v8365_v41  ;;  %v8369_v45 = vld [vmem:[%s12346_s4 + $0x98] sm:$0xff]  }
 0x34a   :  { %8579 = vrsqrt.f32 %v9285_v51  ;;  %v410_v51 = vsub.f32 %v9044_v30, %v9231_v57  ;;  %v647_v14 = vmul.f32 %v9394_v5, %v631_v1 }
 0x34b   :  { %8581 = vrsqrt.f32 %v9252_v19  ;;  %v445_v19 = vmul.f32 %v9352_v15, %v433_v23 }
 0x34c   :  { %v434_v34 = vmul.f32 %v8568_v11, %v410_v51  ;;  %8583 = vrsqrt.f32 %v9246_v21  ;;  %v595_v21 = vmul.f32 %v9319_v18, %v9319_v18  ;;  %v652_v51 = vmul.f32 %v9394_v5, %v636_v60  ;;  %v8371_v60 = vld [vmem:[%s12346_s4 + $0xa0] sm:$0xff]  }
 0x34d   :  { %v9373_v35 = vadd.f32 %v9358_v59, %v445_v19 }
 0x34e   :  { %v446_v48 = vmul.f32 %v9352_v15, %v434_v34  ;;  %v8363_v34 = vld [vmem:[%s12346_s4 + $0x78] sm:$0xff]  }
 0x34f   :  { %7714 = vmatprep.subr.bf16.mxu1 %v8363_v34  ;;  %v8379_v34 = vld [vmem:[%s12346_s4 + $0xb8] sm:$0xff]  }
 0x350   :  { %v458_v56 = vadd.f32 %v9358_v59, %v446_v48  ;;  %7715 = vmatpush3.bf16.msra.mxu1 %v8364_v40 }
 0x353   :  { %v8578_v57 = vpop.eup %8577 }
 0x354   :  { %v8580_v42 = vpop.eup %8579  ;;  %v637_v25 = vmul.f32 %v8578_v57, %v613_v17 }
 0x355   :  { %v8582_v37 = vpop.eup %8581  ;;  %v632_v23 = vmul.f32 %v8580_v42, %v608_v39  ;;  %v411_v39 = vsub.f32 %v9075_v54, %v9204_v20  ;;  %v611_v20 = vsub.f32 %v9075_v54, %v9319_v18 }
 0x356   :  { %v633_v6 = vmul.f32 %v8582_v37, %v609_v7  ;;  %v653_v61 = vmul.f32 %v9394_v5, %v637_v25  ;;  %v8370_v7 = vld [vmem:[%s12346_s4 + $0xe0] sm:$0xff]  }
 0x357   :  { %v648_v11 = vmul.f32 %v9394_v5, %v632_v23 }
 0x358   :  { %v649_v62 = vmul.f32 %v9394_v5, %v633_v6 }
 0x377   :  { %v575_v12 = vpop.xlane.xlu0 %574 }
 0x378   :  { %v587_v38 = vmul.f32 0.03125, %v575_v12 }
 0x37a   :  { %v603_v9 = vsub.f32 %v587_v38, %v595_v21 }
 0x37b   :  { %v9408_v19 = vpop.permute.xlu0 %659 }
 0x37c   :  { %v619_v53 = vadd.f32 1e-05, %v603_v9  ;;  %v662_v22 = vadd.f32 %v9408_v19, %v646_v24  ;;  %v663_v47 = vadd.f32 %v9408_v19, %v647_v14  ;;  %v664_v3 = vadd.f32 %v9408_v19, %v648_v11 }
 0x37d   :  { %v665_v0 = vadd.f32 %v9408_v19, %v649_v62  ;;  %v666_v31 = vadd.f32 %v9408_v19, %v650_v63  ;;  %v668_v57 = vadd.f32 %v9408_v19, %v652_v51  ;;  %v669_v13 = vadd.f32 %v9408_v19, %v653_v61  ;;  %v8372_v61 = vld [vmem:[%s12346_s4 + $0xe8] sm:$0xff]  }
 0x37e   :  { %8585 = vrsqrt.f32 %v619_v53  ;;  %v670_v42 = vsel %vm316_vm2, %v454_v36, %v662_v22  ;;  %v671_v17 = vsel %vm316_vm2, %v455_v32, %v663_v47  ;;  %v672_v48 = vsel %vm316_vm2, %v456_v43, %v664_v3  ;;  %v8366_v32 = vld [vmem:[%s12346_s4 + $0x90] sm:$0xff]   ;;  %v8584_v43 = vpop.eup %8583  ;;  %v9453_v36 = vld [vmem:[%s12346_s4 + $0x100] sm:$0xff]   ;;  %v8377_v53 = vld [vmem:[%s12346_s4 + $0xf8] sm:$0xff]  }
 0x37f   :  { %v674_v27 = vsel %vm316_vm2, %v458_v56, %v666_v31  ;;  %v676_v52 = vsel %vm316_vm2, %v460_v10, %v668_v57  ;;  %v677_v37 = vsel %vm316_vm2, %v461_v29, %v669_v13  ;;  %678 = vst.msk [vmem:[#allocation2 + $0x20] sm:$0xff] %vm290_vm3, %v670_v42  ;;  %679 = vst.msk [vmem:[#allocation2 + $0x28] sm:$0xff] %vm290_vm3, %v671_v17  ;;  %7745 = vmatpush3.bf16.msra.mxu0 %v8366_v32 }
 0x380   :  { %v673_v16 = vsel %vm316_vm2, %v9373_v35, %v665_v0  ;;  %680 = vst.msk [vmem:[#allocation2 + $0x30] sm:$0xff] %vm290_vm3, %v672_v48  ;;  %683 = vst.msk [vmem:[#allocation2 + $0x80] sm:$0xff] %vm290_vm3, %v674_v27  ;;  %v8367_v35 = vld [vmem:[%s12346_s4 + $0xd8] sm:$0xff]   ;;  %8190 = vmatprep.subr.bf16.mxu1 %v9453_v36  ;;  %v435_v2 = vmul.f32 %v8584_v43, %v411_v39 }
 0x381   :  { %685 = vst.msk [vmem:[#allocation2 + $0x90] sm:$0xff] %vm290_vm3, %v676_v52  ;;  %686 = vst.msk [vmem:[#allocation2 + $0x98] sm:$0xff] %vm290_vm3, %v677_v37  ;;  %7746 = vmatprep.subr.bf16.mxu0 %v8367_v35 }
 0x382   :  { %681 = vst.msk [vmem:[#allocation2 + $0x38] sm:$0xff] %vm290_vm3, %v673_v16  ;;  %v447_v56 = vmul.f32 %v9352_v15, %v435_v2 }
 0x383   :  { %7747 = vmatpush3.bf16.msra.mxu0 %v8369_v45 }
 0x384   :  { %7748 = vmatprep.subr.bf16.mxu0 %v8370_v7  ;;  %v459_v62 = vadd.f32 %v9358_v59, %v447_v56  ;;  %v8375_v59 = vld [vmem:[%s12346_s4 + $0xf0] sm:$0xff]  }
 0x386   :  { %v723_v12 = vld [vmem:[#allocation2 + $0x1f] sm:$0xff]  ;;  %v724_v1 = vld [vmem:[#allocation2 + $0x27] sm:$0xff] }
 0x387   :  { %v725_v25 = vld [vmem:[#allocation2 + $0x2f] sm:$0xff]  ;;  %v731_v23 = vpack.c.bf16 %v724_v1, %v723_v12  ;;  %v699_v6 = vld [vmem:[#allocation2 + $0x1d] sm:$0xff]  ;;  %v700_v10 = vld [vmem:[#allocation2 + $0x25] sm:$0xff]  ;;  %7749 = vmatpush3.bf16.msra.mxu0 %v8371_v60 }
 0x388   :  { %v8586_v38 = vpop.eup %8585  ;;  %v707_v11 = vpack.c.bf16 %v700_v10, %v699_v6  ;;  %v701_v18 = vld [vmem:[#allocation2 + $0x2d] sm:$0xff]  ;;  %7750 = vmatprep.subr.bf16.mxu0 %v8372_v61  ;;  %v727_v22 = vld [vmem:[#allocation2 + $0x7f] sm:$0xff]  ;;  %v730_v40 = vld [vmem:[#allocation2 + $0x97] sm:$0xff] }
 0x389   :  { %v726_v21 = vld [vmem:[#allocation2 + $0x37] sm:$0xff]  ;;  %v635_v24 = vmul.f32 %v8586_v38, %v611_v20  ;;  %805 = vrot.lane.b32.xlu1 %v731_v23, %s8862_s26  ;;  %v771_v48 = vld [vmem:[#allocation2 + $0x23] sm:$0xff]  ;;  %v772_v27 = vld [vmem:[#allocation2 + $0x2b] sm:$0xff] }
 0x38a   :  { %v732_v29 = vpack.c.bf16 %v726_v21, %v725_v25  ;;  %v702_v9 = vld [vmem:[#allocation2 + $0x35] sm:$0xff]  ;;  %v703_v47 = vld [vmem:[#allocation2 + $0x7d] sm:$0xff]  ;;  %v748_v37 = vld [vmem:[#allocation2 + $0x29] sm:$0xff]  ;;  %v779_v39 = vpack.c.bf16 %v772_v27, %v771_v48 }
 0x38b   :  { %v651_v14 = vmul.f32 %v9394_v5, %v635_v24  ;;  %v708_v51 = vpack.c.bf16 %v702_v9, %v701_v18  ;;  %v8374_v5 = vld [vmem:[%s12346_s4 + $0xa8] sm:$0xff]   ;;  %v706_v41 = vld [vmem:[#allocation2 + $0x95] sm:$0xff]  ;;  %v711_v24 = vld [vmem:[#allocation2 + $0x1e] sm:$0xff] }
 0x38c   :  { %807 = vrot.lane.b32.xlu0 %v732_v29, %s8862_s26  ;;  %7751 = vmatpush3.bf16.msra.mxu0 %v8374_v5  ;;  %v747_v52 = vld [vmem:[#allocation2 + $0x21] sm:$0xff]  ;;  %v773_v16 = vld [vmem:[#allocation2 + $0x33] sm:$0xff] }
 0x38d   :  { %v667_v63 = vadd.f32 %v9408_v19, %v651_v14  ;;  %793 = vrot.lane.b32.xlu1 %v707_v11, %s8862_s26  ;;  %v8376_v19 = vld [vmem:[%s12346_s4 + $0xb0] sm:$0xff]   ;;  %7752 = vmatprep.subr.bf16.mxu0 %v8375_v59  ;;  %v774_v32 = vld [vmem:[#allocation2 + $0x3b] sm:$0xff]  ;;  %v755_v45 = vpack.c.bf16 %v748_v37, %v747_v52  ;;  %v712_v14 = vld [vmem:[#allocation2 + $0x26] sm:$0xff] }
 0x38e   :  { %v749_v43 = vld [vmem:[#allocation2 + $0x31] sm:$0xff]  ;;  %v750_v35 = vld [vmem:[#allocation2 + $0x39] sm:$0xff]  ;;  %v780_v12 = vpack.c.bf16 %v774_v32, %v773_v16  ;;  %v719_v11 = vpack.c.bf16 %v712_v14, %v711_v24 }
 0x38f   :  { %v675_v15 = vsel %vm316_vm2, %v459_v62, %v667_v63  ;;  %v756_v1 = vpack.c.bf16 %v750_v35, %v749_v43  ;;  %v777_v20 = vld [vmem:[#allocation2 + $0x93] sm:$0xff]  ;;  %v778_v21 = vld [vmem:[#allocation2 + $0x9b] sm:$0xff]  ;;  %v9509_v62 = vld [vmem:[#allocation2 + $0x24] sm:$0xff] }
 0x390   :  { %684 = vst.msk [vmem:[#allocation2 + $0x88] sm:$0xff] %vm290_vm3, %v675_v15  ;;  %7753 = vmatpush3.bf16.msra.mxu0 %v8376_v19  ;;  %v753_v23 = vld [vmem:[#allocation2 + $0x91] sm:$0xff]  ;;  %v754_v38 = vld [vmem:[#allocation2 + $0x99] sm:$0xff]  ;;  %v782_v10 = vpack.c.bf16 %v778_v21, %v777_v20 }
 0x391   :  { %795 = vrot.lane.b32.xlu1 %v708_v51, %s8862_s26  ;;  %7754 = vmatprep.subr.bf16.mxu0 %v8377_v53  ;;  %v758_v56 = vpack.c.bf16 %v754_v38, %v753_v23  ;;  %v687_v9 = vld [vmem:[#allocation2 + $0x1c] sm:$0xff]  ;;  %v713_v15 = vld [vmem:[#allocation2 + $0x2e] sm:$0xff] }
 0x392   :  { %v714_v51 = vld [vmem:[#allocation2 + $0x36] sm:$0xff]  ;;  %v695_v5 = vpack.c.bf16 %v9509_v62, %v687_v9  ;;  %v8373_v53 = vld [vmem:[%s12346_s4 + $0x108] sm:$0xff]   ;;  %v735_v35 = vld [vmem:[#allocation2 + $0x20] sm:$0xff] }
 0x393   :  { %v720_v19 = vpack.c.bf16 %v714_v51, %v713_v15  ;;  %v691_v37 = vld [vmem:[#allocation2 + $0x7c] sm:$0xff]  ;;  %v694_v24 = vld [vmem:[#allocation2 + $0x94] sm:$0xff] }
 0x394   :  { %7755 = vmatpush3.bf16.msra.mxu0 %v8379_v34  ;;  %v8378_v34 = vld [vmem:[%s12346_s4 + $0x110] sm:$0xff]  }
 0x395   :  { %v718_v32 = vld [vmem:[#allocation2 + $0x96] sm:$0xff] }
 0x396   :  { %v737_v51 = vld [vmem:[#allocation2 + $0x30] sm:$0xff] }
 0x397   :  { %v728_v3 = vld [vmem:[#allocation2 + $0x87] sm:$0xff]  ;;  %v729_v57 = vld [vmem:[#allocation2 + $0x8f] sm:$0xff] }
 0x398   :  { %v704_v28 = vld [vmem:[#allocation2 + $0x85] sm:$0xff]  ;;  %v733_v0 = vpack.c.bf16 %v728_v3, %v727_v22  ;;  %v705_v13 = vld [vmem:[#allocation2 + $0x8d] sm:$0xff]  ;;  %v734_v42 = vpack.c.bf16 %v730_v40, %v729_v57  ;;  %v8380_v57 = vld [vmem:[%s12346_s4 + $0x118] sm:$0xff]  }
 0x399   :  { %v709_v31 = vpack.c.bf16 %v704_v28, %v703_v47  ;;  %v710_v17 = vpack.c.bf16 %v706_v41, %v705_v13  ;;  %v775_v7 = vld [vmem:[#allocation2 + $0x83] sm:$0xff]  ;;  %v776_v60 = vld [vmem:[#allocation2 + $0x8b] sm:$0xff]  ;;  %v9519_v28 = vld [vmem:[#allocation2 + $0x34] sm:$0xff] }
 0x39a   :  { %809 = vrot.lane.b32.xlu0 %v733_v0, %s8862_s26  ;;  %v751_v2 = vld [vmem:[#allocation2 + $0x81] sm:$0xff]  ;;  %v752_v25 = vld [vmem:[#allocation2 + $0x89] sm:$0xff]  ;;  %v781_v29 = vpack.c.bf16 %v776_v60, %v775_v7 }
 0x39b   :  { %797 = vrot.lane.b32.xlu1 %v709_v31, %s8862_s26  ;;  %v757_v6 = vpack.c.bf16 %v752_v25, %v751_v2  ;;  %v689_v3 = vld [vmem:[#allocation2 + $0x2c] sm:$0xff]  ;;  %v715_v40 = vld [vmem:[#allocation2 + $0x7e] sm:$0xff] }
 0x39c   :  { %v696_v31 = vpack.c.bf16 %v9519_v28, %v689_v3  ;;  %v717_v27 = vld [vmem:[#allocation2 + $0x8e] sm:$0xff]  ;;  %v759_v2 = vld [vmem:[#allocation2 + $0x22] sm:$0xff] }
 0x39d   :  { %v722_v43 = vpack.c.bf16 %v718_v32, %v717_v27  ;;  %v736_v60 = vld [vmem:[#allocation2 + $0x28] sm:$0xff]  ;;  %v784_v27 = vld [vmem:[#allocation2 + $0x9c] sm:$0xff] }
 0x39e   :  { %811 = vrot.lane.b32.xlu0 %v734_v42, %s8862_s26  ;;  %v692_v42 = vld [vmem:[#allocation2 + $0x84] sm:$0xff]  ;;  %v693_v21 = vld [vmem:[#allocation2 + $0x8c] sm:$0xff]  ;;  %v742_v32 = vld [vmem:[#allocation2 + $0x98] sm:$0xff] }
 0x39f   :  { %799 = vrot.lane.b32.xlu1 %v710_v17, %s8862_s26  ;;  %v697_v16 = vpack.c.bf16 %v692_v42, %v691_v37  ;;  %v760_v25 = vld [vmem:[#allocation2 + $0x2a] sm:$0xff]  ;;  %v698_v14 = vpack.c.bf16 %v694_v24, %v693_v21 }
 0x3a0   :  { %v767_v20 = vpack.c.bf16 %v760_v25, %v759_v2 }
 0x3a2   :  { %829 = vrot.lane.b32.xlu0 %v779_v39, %s8862_s26 }
 0x3a3   :  { %817 = vrot.lane.b32.xlu1 %v755_v45, %s8862_s26 }
 0x3a6   :  { %831 = vrot.lane.b32.xlu0 %v780_v12, %s8862_s26 }
 0x3a7   :  { %819 = vrot.lane.b32.xlu1 %v756_v1, %s8862_s26  ;;  %v743_v1 = vpack.c.bf16 %v736_v60, %v735_v35 }
 0x3aa   :  { %833 = vrot.lane.b32.xlu0 %v781_v29, %s8862_s26  ;;  %v761_v29 = vld [vmem:[#allocation2 + $0x32] sm:$0xff] }
 0x3ab   :  { %821 = vrot.lane.b32.xlu1 %v757_v6, %s8862_s26  ;;  %v762_v6 = vld [vmem:[#allocation2 + $0x3a] sm:$0xff] }
 0x3ae   :  { %835 = vrot.lane.b32.xlu0 %v782_v10, %s8862_s26 }
 0x3af   :  { %823 = vrot.lane.b32.xlu1 %v758_v56, %s8862_s26 }
 0x3fb   :  { %v806_v18 = vpop.permute.xlu1 %805 }
 0x3fc   :  { %v855_v63 = vsel %vm290_vm3, %v719_v11, %v806_v18  ;;  %v768_v11 = vpack.c.bf16 %v762_v6, %v761_v29 }
 0x3fd   :  { %1240 = vmatprep.mubr.bf16.mxu1 %v855_v63  ;;  %v785_v63 = vpack.c.bf16 %v689_v3, %v9509_v62 }
 0x3fe   :  { %v808_v61 = vpop.permute.xlu0 %807 }
 0x3ff   :  { %v794_v59 = vpop.permute.xlu1 %793  ;;  %v859_v47 = vsel %vm290_vm3, %v720_v19, %v808_v61  ;;  %v738_v61 = vld [vmem:[#allocation2 + $0x38] sm:$0xff] }
 0x400   :  { %v839_v22 = vsel %vm290_vm3, %v695_v5, %v794_v59  ;;  %v763_v5 = vld [vmem:[#allocation2 + $0x82] sm:$0xff]  ;;  %v764_v59 = vld [vmem:[#allocation2 + $0x8a] sm:$0xff] }
 0x401   :  { %1241 = vmatmul.mubr.bf16.vlgmr.msra.gmra.mrb[0].mxu1 %v839_v22  ;;  %v744_v22 = vpack.c.bf16 %v738_v61, %v737_v51 }
 0x402   :  { %1248 = vmatprep.mubr.bf16.mxu1 %v859_v47  ;;  %8191 = vmatpush3.bf16.msra.mxu1 %v9453_v36  ;;  %v716_v36 = vld [vmem:[#allocation2 + $0x86] sm:$0xff]  ;;  %v783_v47 = vld [vmem:[#allocation2 + $0x3c] sm:$0xff] }
 0x403   :  { %8192 = vmatprep.subr.bf16.mxu1 %v8373_v53  ;;  %v796_v0 = vpop.permute.xlu1 %795  ;;  %v721_v41 = vpack.c.bf16 %v716_v36, %v715_v40  ;;  %v786_v3 = vpack.c.bf16 %v783_v47, %v9519_v28  ;;  %v766_v36 = vld [vmem:[#allocation2 + $0x9a] sm:$0xff] }
 0x404   :  { %v843_v13 = vsel %vm290_vm3, %v696_v31, %v796_v0  ;;  %v787_v31 = vpack.c.bf16 %v693_v21, %v692_v42  ;;  %v741_v42 = vld [vmem:[#allocation2 + $0x90] sm:$0xff] }
 0x405   :  { %v746_v35 = vpack.c.bf16 %v742_v32, %v741_v42 }
 0x406   :  { %8193 = vmatpush3.bf16.msra.mxu1 %v8373_v53 }
 0x407   :  { %8194 = vmatprep.subr.bf16.mxu1 %v8378_v34 }
 0x409   :  { %1249 = vmatmul.mubr.bf16.gmra.mrb[4].mxu1 %v843_v13  ;;  %v765_v13 = vld [vmem:[#allocation2 + $0x92] sm:$0xff] }
 0x40a   :  { %8195 = vmatpush3.bf16.msra.mxu1 %v8378_v34  ;;  %v769_v34 = vpack.c.bf16 %v764_v59, %v763_v5 }
 0x40b   :  { %8196 = vmatprep.subr.bf16.mxu1 %v8380_v57 }
 0x40c   :  { %v810_v17 = vpop.permute.xlu0 %809 }
 0x40d   :  { %v798_v48 = vpop.permute.xlu1 %797  ;;  %v863_v52 = vsel %vm290_vm3, %v721_v41, %v810_v17  ;;  %v739_v41 = vld [vmem:[#allocation2 + $0x80] sm:$0xff] }
 0x40e   :  { %1256 = vmatprep.mubr.bf16.mxu1 %v863_v52  ;;  %8197 = vmatpush3.bf16.msra.mxu1 %v8380_v57  ;;  %v847_v7 = vsel %vm290_vm3, %v697_v16, %v798_v48  ;;  %v740_v57 = vld [vmem:[#allocation2 + $0x88] sm:$0xff]  ;;  %v770_v52 = vpack.c.bf16 %v766_v36, %v765_v13  ;;  %v788_v16 = vpack.c.bf16 %v784_v27, %v694_v24 }
 0x40f   :  { %v745_v48 = vpack.c.bf16 %v740_v57, %v739_v41 }
 0x410   :  { %v812_v39 = vpop.permute.xlu0 %811 }
 0x411   :  { %v800_v45 = vpop.permute.xlu1 %799  ;;  %1257 = vmatmul.mubr.bf16.gmra.mrb[8].mxu1 %v847_v7  ;;  %v867_v12 = vsel %vm290_vm3, %v722_v43, %v812_v39 }
 0x412   :  { %1264 = vmatprep.mubr.bf16.mxu1 %v867_v12  ;;  %v851_v9 = vsel %vm290_vm3, %v698_v14, %v800_v45 }
 0x414   :  { %v830_v23 = vpop.permute.xlu0 %829 }
 0x415   :  { %v818_v38 = vpop.permute.xlu1 %817  ;;  %v887_v56 = vsel %vm290_vm3, %v767_v20, %v830_v23 }
 0x416   :  { %v871_v10 = vsel %vm290_vm3, %v743_v1, %v818_v38  ;;  %1305 = vmatprep.mubr.bf16.mxu0 %v887_v56 }
 0x417   :  { %1306 = vmatmul.mubr.bf16.vlgmr.msra.gmra.mrb[8].mxu0 %v871_v10 }
 0x418   :  { %v832_v18 = vpop.permute.xlu0 %831 }
 0x419   :  { %1265 = vmatmul.mubr.bf16.gmra.mrb[12].mxu1 %v851_v9  ;;  %v891_v15 = vsel %vm290_vm3, %v768_v11, %v832_v18  ;;  %v820_v19 = vpop.permute.xlu1 %819  ;;  %v9550_v18 = vld [vmem:[%s12347_s5] ss:$0 sm:$0xff] }
 0x41a   :  { %1313 = vmatprep.mubr.bf16.mxu0 %v891_v15  ;;  %8198 = vmatprep.mubr.msk.bf16.mxu1 %vm290_vm3, %v785_v63  ;;  %v875_v0 = vsel %vm290_vm3, %v744_v22, %v820_v19 }
 0x41c   :  { %v834_v53 = vpop.permute.xlu0 %833 }
 0x41d   :  { %v895_v62 = vsel %vm290_vm3, %v769_v34, %v834_v53  ;;  %v822_v40 = vpop.permute.xlu1 %821 }
 0x41e   :  { %v879_v37 = vsel %vm290_vm3, %v745_v48, %v822_v40 }
 0x41f   :  { %1314 = vmatmul.mubr.bf16.gmra.mrb[12].mxu0 %v875_v0 }
 0x420   :  { %1321 = vmatprep.mubr.bf16.mxu0 %v895_v62  ;;  %v836_v17 = vpop.permute.xlu0 %835 }
 0x421   :  { %8199 = vmatmul.mubr.msk.bf16.vlgmr.msra.gmra.mrb[16].mxu1 %vm290_vm3, %v786_v3  ;;  %v899_v28 = vsel %vm290_vm3, %v770_v52, %v836_v17  ;;  %v824_v43 = vpop.permute.xlu1 %823 }
 0x422   :  { %8202 = vmatprep.mubr.msk.bf16.mxu1 %vm290_vm3, %v787_v31  ;;  %v883_v39 = vsel %vm290_vm3, %v746_v35, %v824_v43 }
 0x427   :  { %1322 = vmatmul.mubr.bf16.gmra.mrb[16].mxu0 %v879_v37 }
 0x428   :  { %1329 = vmatprep.mubr.bf16.mxu0 %v899_v28 }
 0x429   :  { %8203 = vmatmul.mubr.msk.bf16.gmra.mrb[20].mxu1 %vm290_vm3, %v788_v16 }
 0x42f   :  { %1330 = vmatmul.mubr.bf16.gmra.mrb[20].mxu0 %v883_v39 }
 0x4d4   :  { %v7716_v45 = vpop.f32.mrb[0].mxu1 }
 0x4d5   :  { %v7717_v7 = vpop.f32.mrb[1].mxu1 }
 0x4d6   :  { %v7718_v60 = vadd.f32 %v7717_v7, %v7716_v45  ;;  %v7719_v2 = vpop.f32.mrb[2].mxu1 }
 0x4d7   :  { %v7720_v25 = vpop.f32.mrb[3].mxu1 }
 0x4d8   :  { %v7721_v12 = vadd.f32 %v7720_v25, %v7719_v2  ;;  %v1243_v15 = vadd.f32 %v7718_v60, %v9550_v18 }
 0x4da   :  { %v1246_v53 = vadd.f32 %v7721_v12, %v9550_v18 }
 0x4dc   :  { %v7722_v1 = vpop.f32.mrb[4].mxu1 }
 0x4dd   :  { %v7723_v20 = vpop.f32.mrb[5].mxu1 }
 0x4de   :  { %v7724_v21 = vadd.f32 %v7723_v20, %v7722_v1  ;;  %v7725_v23 = vpop.f32.mrb[6].mxu1 }
 0x4df   :  { %v7726_v38 = vpop.f32.mrb[7].mxu1 }
 0x4e0   :  { %v7727_v29 = vadd.f32 %v7726_v38, %v7725_v23  ;;  %v1251_v36 = vadd.f32 %v7724_v21, %v9550_v18 }
 0x4e2   :  { %v1254_v52 = vadd.f32 %v7727_v29, %v9550_v18 }
 0x4e4   :  { %v7728_v6 = vpop.f32.mrb[8].mxu1 }
 0x4e5   :  { %v7729_v10 = vpop.f32.mrb[9].mxu1 }
 0x4e6   :  { %v7730_v56 = vadd.f32 %v7729_v10, %v7728_v6  ;;  %v7731_v24 = vpop.f32.mrb[10].mxu1 }
 0x4e7   :  { %v7732_v14 = vpop.f32.mrb[11].mxu1 }
 0x4e8   :  { %v7733_v11 = vadd.f32 %v7732_v14, %v7731_v24  ;;  %v1259_v1 = vadd.f32 %v7730_v56, %v9550_v18 }
 0x4ea   :  { %v7756_v9 = vpop.f32.mrb[8].mxu0  ;;  %v1262_v24 = vadd.f32 %v7733_v11, %v9550_v18 }
 0x4eb   :  { %v7757_v63 = vpop.f32.mrb[9].mxu0 }
 0x4ec   :  { %v7758_v51 = vadd.f32 %v7757_v63, %v7756_v9  ;;  %v7734_v61 = vpop.f32.mrb[12].mxu1  ;;  %v7759_v5 = vpop.f32.mrb[10].mxu0 }
 0x4ed   :  { %v7735_v59 = vpop.f32.mrb[13].mxu1  ;;  %v7760_v19 = vpop.f32.mrb[11].mxu0 }
 0x4ee   :  { %v9554_v22 = vadd.f32 %v7735_v59, %v7734_v61  ;;  %v7761_v47 = vadd.f32 %v7760_v19, %v7759_v5  ;;  %v7737_v34 = vpop.f32.mrb[14].mxu1  ;;  %v1308_v0 = vadd.f32 %v7758_v51, %v1243_v15 }
 0x4ef   :  { %v7738_v62 = vpop.f32.mrb[15].mxu1 }
 0x4f0   :  { %v9556_v3 = vadd.f32 %v7738_v62, %v7737_v34  ;;  %v1311_v31 = vadd.f32 %v7761_v47, %v1246_v53 }
 0x4f2   :  { %v7762_v57 = vpop.f32.mrb[12].mxu0 }
 0x4f3   :  { %v7763_v13 = vpop.f32.mrb[13].mxu0 }
 0x4f4   :  { %v7764_v40 = vadd.f32 %v7763_v13, %v7762_v57  ;;  %v7765_v41 = vpop.f32.mrb[14].mxu0  ;;  %v8200_v17 = vpop.f32.mrb[16].mxu1 }
 0x4f5   :  { %v7766_v48 = vpop.f32.mrb[15].mxu0  ;;  %v1372_v27 = vpop.f32.mrb[17].mxu1 }
 0x4f6   :  { %v1316_v37 = vadd.f32 %v7764_v40, %v1251_v36  ;;  %v7767_v28 = vadd.f32 %v7766_v48, %v7765_v41  ;;  %v9560_v16 = vadd.f32 %v1372_v27, %v1308_v0  ;;  %v8201_v42 = vpop.f32.mrb[18].mxu1  ;;  %v1267_v48 = vadd.f32 %v9554_v22, %v9550_v18 }
 0x4f7   :  { %v1375_v32 = vpop.f32.mrb[19].mxu1 }
 0x4f8   :  { %v9562_v43 = vadd.f32 %v8200_v17, %v1316_v37  ;;  %v1411_v35 = vmul.f32 0.044715, %v9560_v16  ;;  %v1319_v39 = vadd.f32 %v7767_v28, %v1254_v52  ;;  %v9565_v45 = vadd.f32 %v1375_v32, %v1311_v31 }
 0x4fa   :  { %v1413_v7 = vmul.f32 0.044715, %v9562_v43  ;;  %v1419_v60 = vmul.f32 %v1411_v35, %v9560_v16  ;;  %v9569_v2 = vadd.f32 %v8201_v42, %v1319_v39  ;;  %v1412_v25 = vmul.f32 0.044715, %v9565_v45  ;;  %v7768_v12 = vpop.f32.mrb[16].mxu0 }
 0x4fb   :  { %v7769_v20 = vpop.f32.mrb[17].mxu0  ;;  %v1270_v42 = vadd.f32 %v9556_v3, %v9550_v18 }
 0x4fc   :  { %v1421_v21 = vmul.f32 %v1413_v7, %v9562_v43  ;;  %v1414_v23 = vmul.f32 0.044715, %v9569_v2  ;;  %v1420_v38 = vmul.f32 %v1412_v25, %v9565_v45  ;;  %v7770_v29 = vadd.f32 %v7769_v20, %v7768_v12  ;;  %v7771_v6 = vpop.f32.mrb[18].mxu0  ;;  %v8204_v10 = vpop.f32.mrb[20].mxu1 }
 0x4fd   :  { %v7772_v14 = vpop.f32.mrb[19].mxu0  ;;  %v1388_v9 = vpop.f32.mrb[21].mxu1  ;;  %v1427_v63 = vmul.f32 %v1419_v60, %v9560_v16 }
 0x4fe   :  { %v1422_v15 = vmul.f32 %v1414_v23, %v9569_v2  ;;  %v7773_v51 = vadd.f32 %v7772_v14, %v7771_v6  ;;  %v1324_v56 = vadd.f32 %v7770_v29, %v1259_v1  ;;  %v8205_v61 = vpop.f32.mrb[22].mxu1  ;;  %v1429_v5 = vmul.f32 %v1421_v21, %v9562_v43 }
 0x4ff   :  { %v1391_v59 = vpop.f32.mrb[23].mxu1  ;;  %v1435_v19 = vadd.f32 %v1427_v63, %v9560_v16  ;;  %v1428_v53 = vmul.f32 %v1420_v38, %v9565_v45  ;;  %v1405_v6 = vmul.f32 0.5, %v9562_v43 }
 0x500   :  { %v9582_v47 = vadd.f32 %v1388_v9, %v1324_v56  ;;  %v1327_v34 = vadd.f32 %v7773_v51, %v1262_v24  ;;  %v1437_v11 = vadd.f32 %v1429_v5, %v9562_v43  ;;  %v1430_v0 = vmul.f32 %v1422_v15, %v9569_v2 }
 0x501   :  { %v1443_v62 = vmul.f32 0.7978846, %v1435_v19  ;;  %v1436_v31 = vadd.f32 %v1428_v53, %v9565_v45  ;;  %v1403_v43 = vmul.f32 0.5, %v9560_v16 }
 0x502   :  { %v9587_v57 = vadd.f32 %v1391_v59, %v1327_v34  ;;  %v7774_v13 = vpop.f32.mrb[20].mxu0  ;;  %v1445_v36 = vmul.f32 0.7978846, %v1437_v11  ;;  %v1438_v40 = vadd.f32 %v1430_v0, %v9569_v2  ;;  %v1415_v39 = vmul.f32 0.044715, %v9582_v47 }
 0x503   :  { %v7775_v41 = vpop.f32.mrb[21].mxu0  ;;  %8587 = vtanh.f32 %v1443_v62  ;;  %v1444_v17 = vmul.f32 0.7978846, %v1436_v31 }
 0x504   :  { %v7776_v27 = vadd.f32 %v7775_v41, %v7774_v13  ;;  %v7777_v52 = vpop.f32.mrb[22].mxu0  ;;  %8589 = vtanh.f32 %v1445_v36  ;;  %v1446_v28 = vmul.f32 0.7978846, %v1438_v40  ;;  %v1416_v12 = vmul.f32 0.044715, %v9587_v57 }
 0x505   :  { %v7778_v37 = vpop.f32.mrb[23].mxu0  ;;  %8591 = vtanh.f32 %v1444_v17  ;;  %v1423_v1 = vmul.f32 %v1415_v39, %v9582_v47 }
 0x506   :  { %v1332_v32 = vadd.f32 %v7776_v27, %v1267_v48  ;;  %v7779_v35 = vadd.f32 %v7778_v37, %v7777_v52  ;;  %8593 = vtanh.f32 %v1446_v28  ;;  %v1424_v29 = vmul.f32 %v1416_v12, %v9587_v57 }
 0x507   :  { %v1431_v63 = vmul.f32 %v1423_v1, %v9582_v47 }
 0x508   :  { %v9595_v7 = vadd.f32 %v8204_v10, %v1332_v32  ;;  %v1335_v60 = vadd.f32 %v7779_v35, %v1270_v42  ;;  %v1432_v19 = vmul.f32 %v1424_v29, %v9587_v57 }
 0x509   :  { %v1439_v0 = vadd.f32 %v1431_v63, %v9582_v47 }
 0x50a   :  { %v9597_v25 = vadd.f32 %v8205_v61, %v1335_v60  ;;  %v1417_v22 = vmul.f32 0.044715, %v9595_v7  ;;  %v1406_v61 = vmul.f32 0.5, %v9569_v2  ;;  %v1404_v2 = vmul.f32 0.5, %v9565_v45 }
 0x50b   :  { %v1440_v31 = vadd.f32 %v1432_v19, %v9587_v57  ;;  %v1447_v36 = vmul.f32 0.7978846, %v1439_v0  ;;  %v1409_v39 = vmul.f32 0.5, %v9595_v7 }
 0x50c   :  { %v1425_v20 = vmul.f32 %v1417_v22, %v9595_v7  ;;  %v1418_v18 = vmul.f32 0.044715, %v9597_v25 }
 0x50d   :  { %v8588_v3 = vpop.eup %8587  ;;  %v1448_v45 = vmul.f32 0.7978846, %v1440_v31 }
 0x50e   :  { %v8590_v21 = vpop.eup %8589  ;;  %v1433_v23 = vmul.f32 %v1425_v20, %v9595_v7  ;;  %v1426_v38 = vmul.f32 %v1418_v18, %v9597_v25  ;;  %v1459_v56 = vadd.f32 1.0, %v8588_v3  ;;  %v1410_v18 = vmul.f32 0.5, %v9597_v25 }
 0x50f   :  { %v1461_v10 = vadd.f32 1.0, %v8590_v21  ;;  %v8592_v24 = vpop.eup %8591  ;;  %v1407_v3 = vmul.f32 0.5, %v9582_v47 }
 0x510   :  { %v1441_v14 = vadd.f32 %v1433_v23, %v9595_v7  ;;  %v1434_v9 = vmul.f32 %v1426_v38, %v9597_v25  ;;  %v8594_v15 = vpop.eup %8593  ;;  %v1460_v34 = vadd.f32 1.0, %v8592_v24  ;;  %v9622_v62 = vmul.f32 %v1459_v56, %v1403_v43 }
 0x511   :  { %v9611_v51 = vmul.f32 %v1461_v10, %v1405_v6  ;;  %v1462_v5 = vadd.f32 1.0, %v8594_v15  ;;  %v1408_v38 = vmul.f32 0.5, %v9587_v57 }
 0x512   :  { %v1442_v59 = vadd.f32 %v1434_v9, %v9597_v25  ;;  %v1449_v11 = vmul.f32 0.7978846, %v1441_v14  ;;  %v9630_v13 = vmul.f32 %v1460_v34, %v1404_v2  ;;  %v9646_v17 = vadd.f32 %v9622_v62, %v8999_v50 }
 0x513   :  { %1487 = vrot.lane.b32.xlu0 %v9611_v51, %s8859_s0  ;;  %v9619_v53 = vmul.f32 %v1462_v5, %v1406_v61  ;;  %v9634_v40 = vadd.f32 %v9611_v51, %v8993_v46 }
 0x514   :  { %v1450_v16 = vmul.f32 0.7978846, %v1442_v59  ;;  %8595 = vtanh.f32 %v1449_v11  ;;  %v9654_v48 = vadd.f32 %v9630_v13, %v9016_v4  ;;  %v1741_v42 = vmul.f32 %v9646_v17, %v9646_v17 }
 0x515   :  { %1489 = vrot.lane.b32.xlu1 %v9619_v53, %s8859_s0  ;;  %v9642_v41 = vadd.f32 %v9619_v53, %v9006_v55  ;;  %v1743_v27 = vmul.f32 %v9634_v40, %v9634_v40 }
 0x516   :  { %8597 = vtanh.f32 %v1450_v16  ;;  %v1742_v60 = vmul.f32 %v9654_v48, %v9654_v48 }
 0x517   :  { %1483 = vrot.lane.b32.xlu0 %v9622_v62, %s8859_s0  ;;  %8599 = vtanh.f32 %v1447_v36  ;;  %v1744_v37 = vmul.f32 %v9642_v41, %v9642_v41 }
 0x518   :  { %8601 = vtanh.f32 %v1448_v45 }
 0x519   :  { %1485 = vrot.lane.b32.xlu1 %v9630_v13, %s8859_s0 }
 0x51b   :  { %1689 = vrot.lane.b32.xlu0 %v9634_v40, %s8859_s0 }
 0x51d   :  { %1691 = vrot.lane.b32.xlu1 %v9642_v41, %s8859_s0 }
 0x51e   :  { %v8596_v52 = vpop.eup %8595 }
 0x51f   :  { %1685 = vrot.lane.b32.xlu0 %v9646_v17, %s8859_s0  ;;  %v1465_v32 = vadd.f32 1.0, %v8596_v52 }
 0x520   :  { %v8598_v28 = vpop.eup %8597 }
 0x521   :  { %1687 = vrot.lane.b32.xlu1 %v9654_v48, %s8859_s0  ;;  %v8600_v35 = vpop.eup %8599  ;;  %v1466_v22 = vadd.f32 1.0, %v8598_v28  ;;  %v9670_v1 = vmul.f32 %v1465_v32, %v1409_v39 }
 0x522   :  { %v8602_v12 = vpop.eup %8601  ;;  %v1463_v20 = vadd.f32 1.0, %v8600_v35 }
 0x523   :  { %1761 = vrot.lane.b32.xlu0 %v1743_v27, %s8859_s0  ;;  %v9677_v21 = vmul.f32 %v1466_v22, %v1410_v18  ;;  %v1464_v7 = vadd.f32 1.0, %v8602_v12  ;;  %v9690_v25 = vadd.f32 %v9670_v1, %v9041_v26 }
 0x524   :  { %v9679_v23 = vmul.f32 %v1463_v20, %v1407_v3 }
 0x525   :  { %1763 = vrot.lane.b32.xlu1 %v1744_v37, %s8859_s0  ;;  %v9686_v29 = vmul.f32 %v1464_v7, %v1408_v38  ;;  %v9698_v47 = vadd.f32 %v9677_v21, %v9072_v49  ;;  %v1747_v10 = vmul.f32 %v9690_v25, %v9690_v25 }
 0x526   :  { %v9702_v57 = vadd.f32 %v9679_v23, %v9044_v30 }
 0x527   :  { %1757 = vrot.lane.b32.xlu0 %v1741_v42, %s8859_s0  ;;  %v9710_v6 = vadd.f32 %v9686_v29, %v9075_v54  ;;  %v1748_v24 = vmul.f32 %v9698_v47, %v9698_v47 }
 0x528   :  { %v1745_v14 = vmul.f32 %v9702_v57, %v9702_v57 }
 0x529   :  { %1759 = vrot.lane.b32.xlu1 %v1742_v60, %s8859_s0  ;;  %v1746_v9 = vmul.f32 %v9710_v6, %v9710_v6 }
 0x52b   :  { %1495 = vrot.lane.b32.xlu0 %v9670_v1, %s8859_s0 }
 0x52d   :  { %1497 = vrot.lane.b32.xlu1 %v9677_v21, %s8859_s0 }
 0x52f   :  { %1491 = vrot.lane.b32.xlu0 %v9679_v23, %s8859_s0 }
 0x531   :  { %1493 = vrot.lane.b32.xlu1 %v9686_v29, %s8859_s0 }
 0x533   :  { %1697 = vrot.lane.b32.xlu0 %v9690_v25, %s8859_s0 }
 0x535   :  { %1699 = vrot.lane.b32.xlu1 %v9698_v47, %s8859_s0 }
 0x537   :  { %1693 = vrot.lane.b32.xlu0 %v9702_v57, %s8859_s0 }
 0x539   :  { %1695 = vrot.lane.b32.xlu1 %v9710_v6, %s8859_s0 }
 0x53b   :  { %1769 = vrot.lane.b32.xlu0 %v1747_v10, %s8859_s0 }
 0x53d   :  { %1771 = vrot.lane.b32.xlu1 %v1748_v24, %s8859_s0 }
 0x53f   :  { %1765 = vrot.lane.b32.xlu0 %v1745_v14, %s8859_s0 }
 0x541   :  { %1767 = vrot.lane.b32.xlu1 %v1746_v9, %s8859_s0 }
 0x585   :  { %v1488_v63 = vpop.permute.xlu0 %1487 }
 0x586   :  { %v1509_v61 = vadd.f32 %v1488_v63, %v9611_v51 }
 0x587   :  { %v1490_v15 = vpop.permute.xlu1 %1489 }
 0x588   :  { %v9728_v59 = vadd.f32 %v1509_v61, %v8993_v46 }
 0x589   :  { %v1484_v56 = vpop.permute.xlu0 %1483 }
 0x58a   :  { %v1507_v0 = vadd.f32 %v1484_v56, %v9622_v62  ;;  %v1539_v2 = vsel %vm316_vm2, %v9728_v59, 0.0  ;;  %v1510_v62 = vadd.f32 %v1490_v15, %v9619_v53 }
 0x58b   :  { %v1486_v5 = vpop.permute.xlu1 %1485 }
 0x58c   :  { %v9736_v36 = vadd.f32 %v1507_v0, %v8999_v50  ;;  %v1508_v37 = vadd.f32 %v1486_v5, %v9630_v13  ;;  %v1567_v50 = vmul.f32 %v9728_v59, %v9728_v59  ;;  %v9748_v35 = vadd.f32 %v1510_v62, %v9006_v55 }
 0x58d   :  { %v1690_v43 = vpop.permute.xlu0 %1689 }
 0x58e   :  { %v1715_v19 = vsel %vm316_vm2, %v1690_v43, 0.0  ;;  %v1533_v28 = vsel %vm316_vm2, %v9736_v36, 0.0  ;;  %v9751_v53 = vadd.f32 %v1508_v37, %v9016_v4  ;;  %v1579_v13 = vsel %vm316_vm2, %v1567_v50, 0.0 }
 0x58f   :  { %1716 = vadd.xlane.f32.xlu1 %v1715_v19  ;;  %v1692_v34 = vpop.permute.xlu1 %1691  ;;  %v1542_v12 = vsel %vm316_vm2, %v9748_v35, 0.0  ;;  %v1565_v55 = vmul.f32 %v9736_v36, %v9736_v36  ;;  %v1568_v14 = vmul.f32 %v9748_v35, %v9748_v35 }
 0x590   :  { %v1718_v45 = vsel %vm316_vm2, %v1692_v34, 0.0  ;;  %v1536_v20 = vsel %vm316_vm2, %v9751_v53, 0.0 }
 0x591   :  { %v1686_v11 = vpop.permute.xlu0 %1685  ;;  %v1573_v7 = vsel %vm316_vm2, %v1565_v55, 0.0  ;;  %v1582_v56 = vsel %vm316_vm2, %v1568_v14, 0.0 }
 0x592   :  { %v1709_v16 = vsel %vm316_vm2, %v1686_v11, 0.0 }
 0x593   :  { %1540 = vadd.xlane.f32.xlu1 %v1539_v2  ;;  %1710 = vadd.xlane.f32.xlu0 %v1709_v16  ;;  %v1688_v51 = vpop.permute.xlu1 %1687 }
 0x594   :  { %v1712_v39 = vsel %vm316_vm2, %v1688_v51, 0.0 }
 0x595   :  { %v1762_v31 = vpop.permute.xlu0 %1761 }
 0x596   :  { %v1787_v46 = vsel %vm316_vm2, %v1762_v31, 0.0 }
 0x597   :  { %1788 = vadd.xlane.f32.xlu1 %v1787_v46  ;;  %1719 = vadd.xlane.f32.xlu0 %v1718_v45  ;;  %v1764_v27 = vpop.permute.xlu1 %1763 }
 0x598   :  { %v1790_v3 = vsel %vm316_vm2, %v1764_v27, 0.0 }
 0x599   :  { %v1758_v52 = vpop.permute.xlu0 %1757 }
 0x59a   :  { %v1781_v42 = vsel %vm316_vm2, %v1758_v52, 0.0 }
 0x59b   :  { %1534 = vadd.xlane.f32.xlu0 %v1533_v28  ;;  %1782 = vadd.xlane.f32.xlu1 %v1781_v42  ;;  %v1760_v60 = vpop.permute.xlu1 %1759 }
 0x59c   :  { %v1784_v10 = vsel %vm316_vm2, %v1760_v60, 0.0 }
 0x59d   :  { %v1496_v32 = vpop.permute.xlu0 %1495 }
 0x59e   :  { %v1513_v38 = vadd.f32 %v1496_v32, %v9670_v1  ;;  %v1566_v1 = vmul.f32 %v9751_v53, %v9751_v53 }
 0x59f   :  { %1713 = vadd.xlane.f32.xlu0 %v1712_v39  ;;  %1580 = vadd.xlane.f32.xlu1 %v1579_v13  ;;  %v1498_v4 = vpop.permute.xlu1 %1497 }
 0x5a0   :  { %v9769_v15 = vadd.f32 %v1513_v38, %v9041_v26  ;;  %v1576_v19 = vsel %vm316_vm2, %v1566_v1, 0.0  ;;  %v1514_v26 = vadd.f32 %v1498_v4, %v9677_v21  ;;  %v8381_v4 = vld [vmem:[%s12346_s4 + $0x160] sm:$0xff]   ;;  %v8385_v38 = vld [vmem:[%s12346_s4 + $0x170] sm:$0xff]  }
 0x5a1   :  { %v1492_v22 = vpop.permute.xlu0 %1491  ;;  %7788 = vmatprep.subr.bf16.mxu0 %v8381_v4 }
 0x5a2   :  { %v1511_v43 = vadd.f32 %v1492_v22, %v9679_v23  ;;  %v1551_v34 = vsel %vm316_vm2, %v9769_v15, 0.0  ;;  %v9786_v23 = vadd.f32 %v1514_v26, %v9072_v49  ;;  %v1571_v27 = vmul.f32 %v9769_v15, %v9769_v15  ;;  %v9816_v22 = vld [vmem:[%s12345_s3 + $0x4] sm:$0xf]  ;;  %v8391_v26 = vld [vmem:[%s12346_s4 + $0x188] sm:$0xff]  }
 0x5a3   :  { %1543 = vadd.xlane.f32.xlu0 %v1542_v12  ;;  %1537 = vadd.xlane.f32.xlu1 %v1536_v20  ;;  %v1494_v9 = vpop.permute.xlu1 %1493  ;;  %v1864_v20 = vrot.slane %v9816_v22, %v9138_v44  ;;  %v1880_v55 = vrot.slane %v9816_v22, %v9155_v58 }
 0x5a4   :  { %v9781_v0 = vadd.f32 %v1511_v43, %v9044_v30  ;;  %v1512_v30 = vadd.f32 %v1494_v9, %v9686_v29  ;;  %v1554_v21 = vsel %vm316_vm2, %v9786_v23, 0.0  ;;  %v1591_v28 = vsel %vm316_vm2, %v1571_v27, 0.0  ;;  %v8397_v9 = vld [vmem:[%s12346_s4 + $0x1e8] sm:$0xff]   ;;  %v8389_v43 = vld [vmem:[%s12346_s4 + $0x180] sm:$0xff]  }
 0x5a5   :  { %v1698_v18 = vpop.permute.xlu0 %1697  ;;  %v1572_v39 = vmul.f32 %v9786_v23, %v9786_v23 }
 0x5a6   :  { %v1727_v24 = vsel %vm316_vm2, %v1698_v18, 0.0  ;;  %v1545_v46 = vsel %vm316_vm2, %v9781_v0, 0.0  ;;  %v9798_v52 = vadd.f32 %v1512_v30, %v9075_v54  ;;  %v1569_v29 = vmul.f32 %v9781_v0, %v9781_v0  ;;  %v8382_v18 = vld [vmem:[%s12346_s4 + $0x120] sm:$0xff]   ;;  %v8396_v30 = vld [vmem:[%s12346_s4 + $0x150] sm:$0xff]  }
 0x5a7   :  { %1791 = vadd.xlane.f32.xlu0 %v1790_v3  ;;  %1574 = vadd.xlane.f32.xlu1 %v1573_v7  ;;  %v1700_v5 = vpop.permute.xlu1 %1699  ;;  %v1594_v13 = vsel %vm316_vm2, %v1572_v39, 0.0  ;;  %v8383_v3 = vld [vmem:[%s12346_s4 + $0x168] sm:$0xff]  }
 0x5a8   :  { %v1730_v2 = vsel %vm316_vm2, %v1700_v5, 0.0  ;;  %v1548_v42 = vsel %vm316_vm2, %v9798_v52, 0.0  ;;  %v1585_v50 = vsel %vm316_vm2, %v1569_v29, 0.0  ;;  %v1570_v60 = vmul.f32 %v9798_v52, %v9798_v52  ;;  %7789 = vmatpush3.bf16.msra.mxu0 %v8382_v18  ;;  %v8384_v7 = vld [vmem:[%s12346_s4 + $0x128] sm:$0xff]   ;;  %v8388_v5 = vld [vmem:[%s12346_s4 + $0x138] sm:$0xff]  }
 0x5a9   :  { %v1694_v63 = vpop.permute.xlu0 %1693  ;;  %7790 = vmatprep.subr.bf16.mxu0 %v8383_v3 }
 0x5aa   :  { %v1721_v61 = vsel %vm316_vm2, %v1694_v63, 0.0  ;;  %v1588_v12 = vsel %vm316_vm2, %v1570_v60, 0.0  ;;  %v8386_v63 = vld [vmem:[%s12346_s4 + $0x130] sm:$0xff]  }
 0x5ab   :  { %1785 = vadd.xlane.f32.xlu0 %v1784_v10  ;;  %1728 = vadd.xlane.f32.xlu1 %v1727_v24  ;;  %v1696_v51 = vpop.permute.xlu1 %1695  ;;  %v8393_v10 = vld [vmem:[%s12346_s4 + $0x1e0] sm:$0xff]  }
 0x5ac   :  { %v1724_v31 = vsel %vm316_vm2, %v1696_v51, 0.0  ;;  %v8394_v24 = vld [vmem:[%s12346_s4 + $0x1a0] sm:$0xff]   ;;  %7828 = vmatprep.subr.bf16.mxu1 %v8393_v10  ;;  %7791 = vmatpush3.bf16.msra.mxu0 %v8384_v7  ;;  %v8392_v51 = vld [vmem:[%s12346_s4 + $0x148] sm:$0xff]  }
 0x5ad   :  { %v1770_v11 = vpop.permute.xlu0 %1769  ;;  %7829 = vmatpush3.bf16.msra.mxu1 %v8394_v24  ;;  %7792 = vmatprep.subr.bf16.mxu0 %v8385_v38 }
 0x5ae   :  { %v1799_v16 = vsel %vm316_vm2, %v1770_v11, 0.0  ;;  %7830 = vmatprep.subr.bf16.mxu1 %v8397_v9  ;;  %v8390_v11 = vld [vmem:[%s12346_s4 + $0x140] sm:$0xff]  }
 0x5af   :  { %1583 = vadd.xlane.f32.xlu0 %v1582_v56  ;;  %1722 = vadd.xlane.f32.xlu1 %v1721_v61  ;;  %v1772_v49 = vpop.permute.xlu1 %1771  ;;  %v8387_v56 = vld [vmem:[%s12346_s4 + $0x178] sm:$0xff]  }
 0x5b0   :  { %v1802_v37 = vsel %vm316_vm2, %v1772_v49, 0.0  ;;  %7793 = vmatpush3.bf16.msra.mxu0 %v8386_v63 }
 0x5b1   :  { %v1766_v45 = vpop.permute.xlu0 %1765  ;;  %7794 = vmatprep.subr.bf16.mxu0 %v8387_v56 }
 0x5b2   :  { %v1793_v62 = vsel %vm316_vm2, %v1766_v45, 0.0 }
 0x5b3   :  { %1577 = vadd.xlane.f32.xlu0 %v1576_v19  ;;  %1552 = vadd.xlane.f32.xlu1 %v1551_v34  ;;  %v1768_v32 = vpop.permute.xlu1 %1767 }
 0x5b4   :  { %v1796_v54 = vsel %vm316_vm2, %v1768_v32, 0.0  ;;  %7795 = vmatpush3.bf16.msra.mxu0 %v8388_v5 }
 0x5b5   :  { %7796 = vmatprep.subr.bf16.mxu0 %v8389_v43 }
 0x5b7   :  { %1731 = vadd.xlane.f32.xlu0 %v1730_v2  ;;  %1800 = vadd.xlane.f32.xlu1 %v1799_v16 }
 0x5b8   :  { %7797 = vmatpush3.bf16.msra.mxu0 %v8390_v11 }
 0x5b9   :  { %7798 = vmatprep.subr.bf16.mxu0 %v8391_v26 }
 0x5bb   :  { %1725 = vadd.xlane.f32.xlu0 %v1724_v31  ;;  %1546 = vadd.xlane.f32.xlu1 %v1545_v46  ;;  %v8395_v31 = vld [vmem:[%s12346_s4 + $0x190] sm:$0xff]  }
 0x5bc   :  { %7799 = vmatpush3.bf16.msra.mxu0 %v8392_v51 }
 0x5bd   :  { %7800 = vmatprep.subr.bf16.mxu0 %v8395_v31 }
 0x5bf   :  { %1555 = vadd.xlane.f32.xlu0 %v1554_v21  ;;  %1794 = vadd.xlane.f32.xlu1 %v1793_v62 }
 0x5c0   :  { %7801 = vmatpush3.bf16.msra.mxu0 %v8396_v30 }
 0x5c3   :  { %1803 = vadd.xlane.f32.xlu0 %v1802_v37  ;;  %1592 = vadd.xlane.f32.xlu1 %v1591_v28 }
 0x5c7   :  { %1549 = vadd.xlane.f32.xlu0 %v1548_v42  ;;  %1586 = vadd.xlane.f32.xlu1 %v1585_v50 }
 0x5cb   :  { %1797 = vadd.xlane.f32.xlu0 %v1796_v54 }
 0x5cf   :  { %1595 = vadd.xlane.f32.xlu0 %v1594_v13 }
 0x5d3   :  { %1589 = vadd.xlane.f32.xlu0 %v1588_v12 }
 0x5d8   :  { %1866 = vrot.lane.b32.xlu1 %v1864_v20, %s8860_s30 }
 0x5e9   :  { %1882 = vrot.lane.b32.xlu0 %v1880_v55, %s8860_s30 }
 0x61c   :  { %v1717_v14 = vpop.xlane.xlu1 %1716 }
 0x61d   :  { %v9880_v39 = vmul.f32 0.03125, %v1717_v14 }
 0x61f   :  { %v1815_v24 = vmul.f32 %v9880_v39, %v9880_v39 }
 0x620   :  { %v1541_v61 = vpop.xlane.xlu1 %1540  ;;  %v1711_v1 = vpop.xlane.xlu0 %1710 }
 0x621   :  { %v9876_v29 = vmul.f32 0.03125, %v1541_v61  ;;  %v9884_v60 = vmul.f32 0.03125, %v1711_v1 }
 0x623   :  { %v1607_v13 = vmul.f32 %v9876_v29, %v9876_v29  ;;  %v1813_v63 = vmul.f32 %v9884_v60, %v9884_v60 }
 0x624   :  { %v1789_v19 = vpop.xlane.xlu1 %1788  ;;  %v1720_v34 = vpop.xlane.xlu0 %1719 }
 0x625   :  { %v1807_v20 = vmul.f32 0.03125, %v1789_v19  ;;  %v9886_v55 = vmul.f32 0.03125, %v1720_v34 }
 0x627   :  { %v1823_v1 = vsub.f32 %v1807_v20, %v1815_v24  ;;  %v1816_v5 = vmul.f32 %v9886_v55, %v9886_v55 }
 0x628   :  { %v1783_v2 = vpop.xlane.xlu1 %1782  ;;  %v1535_v16 = vpop.xlane.xlu0 %1534 }
 0x629   :  { %v9878_v32 = vmul.f32 0.03125, %v1535_v16  ;;  %v1805_v3 = vmul.f32 0.03125, %v1783_v2 }
 0x62b   :  { %v1605_v7 = vmul.f32 %v9878_v32, %v9878_v32  ;;  %v1821_v26 = vsub.f32 %v1805_v3, %v1813_v63 }
 0x62c   :  { %v1581_v46 = vpop.xlane.xlu1 %1580  ;;  %v1714_v45 = vpop.xlane.xlu0 %1713 }
 0x62d   :  { %v1599_v54 = vmul.f32 0.03125, %v1581_v46  ;;  %v9900_v43 = vmul.f32 0.03125, %v1714_v45  ;;  %v1839_v45 = vadd.f32 1e-05, %v1823_v1 }
 0x62f   :  { %v1615_v38 = vsub.f32 %v1599_v54, %v1607_v13 }
 0x630   :  { %v1538_v21 = vpop.xlane.xlu1 %1537  ;;  %v1544_v62 = vpop.xlane.xlu0 %1543 }
 0x631   :  { %v9890_v10 = vmul.f32 0.03125, %v1538_v21  ;;  %v9894_v14 = vmul.f32 0.03125, %v1544_v62  ;;  %v1631_v2 = vadd.f32 1e-05, %v1615_v38 }
 0x633   :  { %v1606_v16 = vmul.f32 %v9890_v10, %v9890_v10  ;;  %v1608_v31 = vmul.f32 %v9894_v14, %v9894_v14  ;;  %8603 = vrsqrt.f32 %v1631_v2 }
 0x634   :  { %v1575_v27 = vpop.xlane.xlu1 %1574  ;;  %v1792_v49 = vpop.xlane.xlu0 %1791 }
 0x635   :  { %v1597_v12 = vmul.f32 0.03125, %v1575_v27  ;;  %v1808_v9 = vmul.f32 0.03125, %v1792_v49  ;;  %v1814_v49 = vmul.f32 %v9900_v43, %v9900_v43 }
 0x637   :  { %v1613_v56 = vsub.f32 %v1597_v12, %v1605_v7  ;;  %v1824_v46 = vsub.f32 %v1808_v9, %v1816_v5  ;;  %v1837_v12 = vadd.f32 1e-05, %v1821_v26 }
 0x638   :  { %v1729_v37 = vpop.xlane.xlu1 %1728  ;;  %v1786_v28 = vpop.xlane.xlu0 %1785 }
 0x639   :  { %v9904_v51 = vmul.f32 0.03125, %v1729_v37  ;;  %v1806_v30 = vmul.f32 0.03125, %v1786_v28  ;;  %v1629_v21 = vadd.f32 1e-05, %v1613_v56 }
 0x63b   :  { %v1819_v37 = vmul.f32 %v9904_v51, %v9904_v51  ;;  %v1822_v3 = vsub.f32 %v1806_v30, %v1814_v49  ;;  %8605 = vrsqrt.f32 %v1629_v21 }
 0x63c   :  { %v1723_v42 = vpop.xlane.xlu1 %1722  ;;  %v1584_v50 = vpop.xlane.xlu0 %1583  ;;  %8607 = vrsqrt.f32 %v1839_v45 }
 0x63d   :  { %v1600_v19 = vmul.f32 0.03125, %v1584_v50  ;;  %v9912_v20 = vmul.f32 0.03125, %v1723_v42  ;;  %8609 = vrsqrt.f32 %v1837_v12  ;;  %v1838_v1 = vadd.f32 1e-05, %v1822_v3 }
 0x63f   :  { %v1616_v50 = vsub.f32 %v1600_v19, %v1608_v31  ;;  %v1817_v63 = vmul.f32 %v9912_v20, %v9912_v20 }
 0x640   :  { %v1553_v4 = vpop.xlane.xlu1 %1552  ;;  %v1578_v18 = vpop.xlane.xlu0 %1577 }
 0x641   :  { %v1598_v61 = vmul.f32 0.03125, %v1578_v18  ;;  %v1840_v18 = vadd.f32 1e-05, %v1824_v46  ;;  %v1632_v38 = vadd.f32 1e-05, %v1616_v50  ;;  %v9916_v56 = vmul.f32 0.03125, %v1553_v4 }
 0x643   :  { %v1614_v62 = vsub.f32 %v1598_v61, %v1606_v16  ;;  %8611 = vrsqrt.f32 %v1840_v18  ;;  %v1611_v2 = vmul.f32 %v9916_v56, %v9916_v56 }
 0x644   :  { %v1801_v34 = vpop.xlane.xlu1 %1800  ;;  %v1732_v11 = vpop.xlane.xlu0 %1731 }
 0x645   :  { %v1811_v27 = vmul.f32 0.03125, %v1801_v34  ;;  %v1630_v28 = vadd.f32 1e-05, %v1614_v62  ;;  %v9918_v42 = vmul.f32 0.03125, %v1732_v11  ;;  %v8604_v11 = vpop.eup %8603  ;;  %v1623_v62 = vsub.f32 %v9728_v59, %v9876_v29 }
 0x646   :  { %v8606_v50 = vpop.eup %8605 }
 0x647   :  { %v1827_v7 = vsub.f32 %v1811_v27, %v1819_v37  ;;  %8613 = vrsqrt.f32 %v1630_v28  ;;  %v1820_v4 = vmul.f32 %v9918_v42, %v9918_v42  ;;  %v8608_v3 = vpop.eup %8607  ;;  %v1621_v28 = vsub.f32 %v9736_v36, %v9878_v32 }
 0x648   :  { %v1547_v54 = vpop.xlane.xlu1 %1546  ;;  %v1726_v13 = vpop.xlane.xlu0 %1725  ;;  %8615 = vrsqrt.f32 %v1632_v38 }
 0x649   :  { %v1843_v5 = vadd.f32 1e-05, %v1827_v7  ;;  %v9922_v16 = vmul.f32 0.03125, %v1547_v54  ;;  %8617 = vrsqrt.f32 %v1838_v1  ;;  %v9930_v54 = vrot.slane %v9816_v22, %v9303_v8  ;;  %v8610_v29 = vpop.eup %8609 }
 0x64a   :  { %v1647_v7 = vmul.f32 %v8604_v11, %v1623_v62  ;;  %v9936_v38 = vmul.f32 0.03125, %v1726_v13  ;;  %v1831_v1 = vsub.f32 %v9634_v40, %v9880_v39  ;;  %v1622_v39 = vsub.f32 %v9751_v53, %v9890_v10 }
 0x64b   :  { %8619 = vrsqrt.f32 %v1843_v5  ;;  %v1609_v12 = vmul.f32 %v9922_v16, %v9922_v16  ;;  %v1829_v5 = vsub.f32 %v9646_v17, %v9884_v60  ;;  %v1835_v10 = vsub.f32 %v9690_v25, %v9904_v51 }
 0x64c   :  { %v1795_v24 = vpop.xlane.xlu1 %1794  ;;  %v1556_v9 = vpop.xlane.xlu0 %1555  ;;  %v1818_v60 = vmul.f32 %v9936_v38, %v9936_v38  ;;  %v1855_v11 = vmul.f32 %v8608_v3, %v1831_v1  ;;  %v1833_v3 = vsub.f32 %v9702_v57, %v9912_v20  ;;  %v1836_v51 = vsub.f32 %v9698_v47, %v9918_v42 }
 0x64d   :  { %v1809_v61 = vmul.f32 0.03125, %v1795_v24  ;;  %v9940_v24 = vrot.slane %v9816_v22, %v9309_v33  ;;  %v1830_v22 = vsub.f32 %v9654_v48, %v9900_v43 }
 0x64f   :  { %v1825_v19 = vsub.f32 %v1809_v61, %v1817_v63  ;;  %v8612_v61 = vpop.eup %8611 }
 0x650   :  { %v1593_v34 = vpop.xlane.xlu1 %1592  ;;  %v1804_v26 = vpop.xlane.xlu0 %1803 }
 0x651   :  { %v1603_v31 = vmul.f32 0.03125, %v1593_v34  ;;  %v1812_v46 = vmul.f32 0.03125, %v1804_v26  ;;  %v1841_v30 = vadd.f32 1e-05, %v1825_v19  ;;  %v1645_v19 = vmul.f32 %v8606_v50, %v1621_v28  ;;  %v8614_v13 = vpop.eup %8613 }
 0x652   :  { %v1832_v26 = vsub.f32 %v9642_v41, %v9886_v55  ;;  %v1624_v55 = vsub.f32 %v9748_v35, %v9894_v14  ;;  %v1646_v62 = vmul.f32 %v8614_v13, %v1622_v39 }
 0x653   :  { %v1619_v21 = vsub.f32 %v1603_v31, %v1611_v2  ;;  %v1828_v27 = vsub.f32 %v1812_v46, %v1820_v4  ;;  %8621 = vrsqrt.f32 %v1841_v30  ;;  %v9950_v2 = vmul.f32 0.03125, %v1556_v9  ;;  %v8616_v46 = vpop.eup %8615 }
 0x654   :  { %v1587_v45 = vpop.xlane.xlu1 %1586  ;;  %v1550_v49 = vpop.xlane.xlu0 %1549  ;;  %v1659_v4 = vmul.f32 %v9930_v54, %v1647_v7  ;;  %v1657_v9 = vmul.f32 %v9930_v54, %v1645_v19  ;;  %v1648_v28 = vmul.f32 %v8616_v46, %v1624_v55  ;;  %v1625_v46 = vsub.f32 %v9781_v0, %v9922_v16 }
 0x655   :  { %v1635_v37 = vadd.f32 1e-05, %v1619_v21  ;;  %v1601_v18 = vmul.f32 0.03125, %v1587_v45  ;;  %v1844_v32 = vadd.f32 1e-05, %v1828_v27  ;;  %v1853_v21 = vmul.f32 %v8610_v29, %v1829_v5  ;;  %v8618_v43 = vpop.eup %8617 }
 0x656   :  { %v8620_v50 = vpop.eup %8619  ;;  %v1671_v14 = vadd.f32 %v9940_v24, %v1659_v4  ;;  %v1856_v29 = vmul.f32 %v8612_v61, %v1832_v26  ;;  %v1669_v19 = vadd.f32 %v9940_v24, %v1657_v9  ;;  %v1660_v42 = vmul.f32 %v9930_v54, %v1648_v28 }
 0x657   :  { %8623 = vrsqrt.f32 %v1635_v37  ;;  %v1617_v63 = vsub.f32 %v1601_v18, %v1609_v12  ;;  %v1612_v12 = vmul.f32 %v9950_v2, %v9950_v2  ;;  %v9964_v37 = vmul.f32 0.03125, %v1550_v49 }
 0x658   :  { %v1798_v34 = vpop.xlane.xlu0 %1797  ;;  %v9973_v1 = vpop.permute.xlu1 %1866  ;;  %v1859_v13 = vmul.f32 %v8620_v50, %v1835_v10 }
 0x659   :  { %v1633_v31 = vadd.f32 1e-05, %v1617_v63  ;;  %v1810_v30 = vmul.f32 0.03125, %v1798_v34  ;;  %v1627_v63 = vsub.f32 %v9769_v15, %v9916_v56  ;;  %v1658_v34 = vmul.f32 %v9930_v54, %v1646_v62 }
 0x65a   :  { %v1610_v61 = vmul.f32 %v9964_v37, %v9964_v37  ;;  %v1869_v39 = vmul.f32 %v9973_v1, %v1853_v21  ;;  %v1871_v9 = vmul.f32 %v9973_v1, %v1855_v11  ;;  %v1872_v62 = vmul.f32 %v9973_v1, %v1856_v29  ;;  %v8399_v29 = vld [vmem:[%s12346_s4 + $0x198] sm:$0xff]  }
 0x65b   :  { %8625 = vrsqrt.f32 %v1633_v31  ;;  %v1826_v27 = vsub.f32 %v1810_v30, %v1818_v60  ;;  %v1670_v55 = vadd.f32 %v9940_v24, %v1658_v34  ;;  %v1875_v16 = vmul.f32 %v9973_v1, %v1859_v13  ;;  %v8401_v34 = vld [vmem:[%s12346_s4 + $0x1f0] sm:$0xff]   ;;  %7802 = vmatprep.subr.bf16.mxu0 %v8399_v29 }
 0x65c   :  { %8627 = vrsqrt.f32 %v1844_v32  ;;  %v1596_v45 = vpop.xlane.xlu0 %1595  ;;  %v1854_v32 = vmul.f32 %v8618_v43, %v1830_v22 }
 0x65d   :  { %v1604_v18 = vmul.f32 0.03125, %v1596_v45  ;;  %v1842_v7 = vadd.f32 1e-05, %v1826_v27  ;;  %v8622_v49 = vpop.eup %8621 }
 0x65e   :  { %v1857_v22 = vmul.f32 %v8622_v49, %v1833_v3  ;;  %v1870_v60 = vmul.f32 %v9973_v1, %v1854_v32  ;;  %v8400_v32 = vld [vmem:[%s12346_s4 + $0x158] sm:$0xff]  }
 0x65f   :  { %v1620_v5 = vsub.f32 %v1604_v18, %v1612_v12  ;;  %8629 = vrsqrt.f32 %v1842_v7  ;;  %v8398_v7 = vld [vmem:[%s12346_s4 + $0x1a8] sm:$0xff]   ;;  %7803 = vmatpush3.bf16.msra.mxu0 %v8400_v32 }
 0x660   :  { %v1590_v20 = vpop.xlane.xlu0 %1589  ;;  %7831 = vmatpush3.bf16.msra.mxu1 %v8398_v7 }
 0x661   :  { %v8624_v31 = vpop.eup %8623  ;;  %v1636_v56 = vadd.f32 1e-05, %v1620_v5  ;;  %v1602_v26 = vmul.f32 0.03125, %v1590_v20  ;;  %v1873_v5 = vmul.f32 %v9973_v1, %v1857_v22  ;;  %7832 = vmatprep.subr.bf16.mxu1 %v8401_v34 }
 0x662   :  { %v1651_v4 = vmul.f32 %v8624_v31, %v1627_v63  ;;  %v1672_v63 = vadd.f32 %v9940_v24, %v1660_v42 }
 0x663   :  { %8631 = vrsqrt.f32 %v1636_v56  ;;  %v1618_v30 = vsub.f32 %v1602_v26, %v1610_v61 }
 0x664   :  { %v1663_v43 = vmul.f32 %v9930_v54, %v1651_v4  ;;  %v9988_v27 = vpop.permute.xlu0 %1882  ;;  %v1834_v4 = vsub.f32 %v9710_v6, %v9936_v38  ;;  %v8405_v38 = vld [vmem:[%s12346_s4 + $0x1b8] sm:$0xff]  }
 0x665   :  { %v8626_v45 = vpop.eup %8625  ;;  %v1634_v50 = vadd.f32 1e-05, %v1618_v30  ;;  %v1885_v21 = vadd.f32 %v9988_v27, %v1869_v39  ;;  %v1886_v10 = vadd.f32 %v9988_v27, %v1870_v60  ;;  %v1887_v28 = vadd.f32 %v9988_v27, %v1871_v9  ;;  %v8403_v60 = vld [vmem:[%s12346_s4 + $0x1f8] sm:$0xff]   ;;  %v10038_v30 = vld [vmem:[%s12346_s4 + $0x220] sm:$0xff]  }
 0x666   :  { %v8628_v12 = vpop.eup %8627  ;;  %v1675_v18 = vadd.f32 %v9940_v24, %v1663_v43  ;;  %v1649_v3 = vmul.f32 %v8626_v45, %v1625_v46  ;;  %v1888_v11 = vadd.f32 %v9988_v27, %v1872_v62  ;;  %v1891_v49 = vadd.f32 %v9988_v27, %v1875_v16  ;;  %8206 = vmatprep.subr.bf16.mxu0 %v10038_v30 }
 0x667   :  { %8633 = vrsqrt.f32 %v1634_v50  ;;  %v1893_v20 = vsel %vm316_vm2, %v1669_v19, %v1885_v21  ;;  %v1894_v31 = vsel %vm316_vm2, %v1670_v55, %v1886_v10  ;;  %v1895_v61 = vsel %vm316_vm2, %v1671_v14, %v1887_v28  ;;  %v8402_v14 = vld [vmem:[%s12346_s4 + $0x1b0] sm:$0xff]  }
 0x668   :  { %v1661_v13 = vmul.f32 %v9930_v54, %v1649_v3  ;;  %v1860_v56 = vmul.f32 %v8628_v12, %v1836_v51  ;;  %v1896_v26 = vsel %vm316_vm2, %v1672_v63, %v1888_v11  ;;  %v1899_v42 = vsel %vm316_vm2, %v1675_v18, %v1891_v49  ;;  %1901 = vst.msk [vmem:[#allocation2 + $0x20] sm:$0xff] %vm290_vm3, %v1893_v20  ;;  %v8407_v11 = vld [vmem:[%s12346_s4 + $0x1c0] sm:$0xff]  }
 0x669   :  { %1902 = vst.msk [vmem:[#allocation2 + $0x28] sm:$0xff] %vm290_vm3, %v1894_v31  ;;  %1903 = vst.msk [vmem:[#allocation2 + $0x30] sm:$0xff] %vm290_vm3, %v1895_v61  ;;  %v1889_v46 = vadd.f32 %v9988_v27, %v1873_v5  ;;  %v8630_v51 = vpop.eup %8629  ;;  %v1628_v39 = vsub.f32 %v9786_v23, %v9950_v2  ;;  %7833 = vmatpush3.bf16.msra.mxu1 %v8402_v14  ;;  %v8406_v2 = vld [vmem:[%s12346_s4 + $0x200] sm:$0xff]   ;;  %v1626_v45 = vsub.f32 %v9798_v52, %v9964_v37 }
 0x66a   :  { %v1673_v19 = vadd.f32 %v9940_v24, %v1661_v13  ;;  %1904 = vst.msk [vmem:[#allocation2 + $0x38] sm:$0xff] %vm290_vm3, %v1896_v26  ;;  %1907 = vst.msk [vmem:[#allocation2 + $0x90] sm:$0xff] %vm290_vm3, %v1899_v42  ;;  %v1876_v43 = vmul.f32 %v9973_v1, %v1860_v56  ;;  %v1858_v9 = vmul.f32 %v8630_v51, %v1834_v4  ;;  %7834 = vmatprep.subr.bf16.mxu1 %v8403_v60  ;;  %v8410_v42 = vld [vmem:[%s12346_s4 + $0x1c8] sm:$0xff]  }
 0x66c   :  { %v1897_v22 = vsel %vm316_vm2, %v1673_v19, %v1889_v46  ;;  %v1892_v18 = vadd.f32 %v9988_v27, %v1876_v43  ;;  %v1874_v7 = vmul.f32 %v9973_v1, %v1858_v9  ;;  %v8413_v19 = vld [vmem:[%s12346_s4 + $0x218] sm:$0xff]  }
 0x66d   :  { %v8632_v55 = vpop.eup %8631  ;;  %1905 = vst.msk [vmem:[#allocation2 + $0x80] sm:$0xff] %vm290_vm3, %v1897_v22  ;;  %7835 = vmatpush3.bf16.msra.mxu1 %v8405_v38 }
 0x66e   :  { %v1652_v62 = vmul.f32 %v8632_v55, %v1628_v39  ;;  %7836 = vmatprep.subr.bf16.mxu1 %v8406_v2  ;;  %v1890_v20 = vadd.f32 %v9988_v27, %v1874_v7  ;;  %v8412_v27 = vld [vmem:[%s12346_s4 + $0x1d0] sm:$0xff]   ;;  %v8415_v39 = vld [vmem:[%s12346_s4 + $0x1d8] sm:$0xff]  }
 0x66f   :  { %v1945_v21 = vld [vmem:[#allocation2 + $0x1f] sm:$0xff] }
 0x670   :  { %v1664_v16 = vmul.f32 %v9930_v54, %v1652_v62  ;;  %v1947_v50 = vld [vmem:[#allocation2 + $0x2f] sm:$0xff]  ;;  %v1946_v10 = vld [vmem:[#allocation2 + $0x27] sm:$0xff]  ;;  %v1921_v5 = vld [vmem:[#allocation2 + $0x1d] sm:$0xff] }
 0x671   :  { %v8634_v12 = vpop.eup %8633  ;;  %v1948_v3 = vld [vmem:[#allocation2 + $0x37] sm:$0xff]  ;;  %v1953_v28 = vpack.c.bf16 %v1946_v10, %v1945_v21  ;;  %v1922_v49 = vld [vmem:[#allocation2 + $0x25] sm:$0xff]  ;;  %7837 = vmatpush3.bf16.msra.mxu1 %v8407_v11  ;;  %v1923_v31 = vld [vmem:[#allocation2 + $0x2d] sm:$0xff] }
 0x672   :  { %v1676_v37 = vadd.f32 %v9940_v24, %v1664_v16  ;;  %v1650_v29 = vmul.f32 %v8634_v12, %v1626_v45  ;;  %v1954_v63 = vpack.c.bf16 %v1948_v3, %v1947_v50  ;;  %v1929_v13 = vpack.c.bf16 %v1922_v49, %v1921_v5  ;;  %v1924_v61 = vld [vmem:[#allocation2 + $0x35] sm:$0xff]  ;;  %v1993_v45 = vld [vmem:[#allocation2 + $0x23] sm:$0xff]  ;;  %v1994_v16 = vld [vmem:[#allocation2 + $0x2b] sm:$0xff] }
 0x673   :  { %2027 = vrot.lane.b32.xlu1 %v1953_v28, %s8862_s26  ;;  %v1930_v26 = vpack.c.bf16 %v1924_v61, %v1923_v31  ;;  %v1969_v50 = vld [vmem:[#allocation2 + $0x21] sm:$0xff]  ;;  %v1970_v21 = vld [vmem:[#allocation2 + $0x29] sm:$0xff]  ;;  %v2001_v10 = vpack.c.bf16 %v1994_v16, %v1993_v45  ;;  %v1971_v28 = vld [vmem:[#allocation2 + $0x31] sm:$0xff] }
 0x674   :  { %v1662_v32 = vmul.f32 %v9930_v54, %v1650_v29  ;;  %v1900_v34 = vsel %vm316_vm2, %v1676_v37, %v1892_v18  ;;  %2029 = vrot.lane.b32.xlu0 %v1954_v63, %s8862_s26  ;;  %v8408_v54 = vld [vmem:[%s12346_s4 + $0x208] sm:$0xff]   ;;  %v1949_v46 = vld [vmem:[#allocation2 + $0x7f] sm:$0xff]  ;;  %v1977_v12 = vpack.c.bf16 %v1970_v21, %v1969_v50  ;;  %v1995_v18 = vld [vmem:[#allocation2 + $0x33] sm:$0xff] }
 0x675   :  { %1908 = vst.msk [vmem:[#allocation2 + $0x98] sm:$0xff] %vm290_vm3, %v1900_v34  ;;  %7838 = vmatprep.subr.bf16.mxu1 %v8408_v54  ;;  %v1925_v14 = vld [vmem:[#allocation2 + $0x7d] sm:$0xff] }
 0x676   :  { %v1674_v1 = vadd.f32 %v9940_v24, %v1662_v32  ;;  %v8411_v24 = vld [vmem:[%s12346_s4 + $0x210] sm:$0xff]   ;;  %7839 = vmatpush3.bf16.msra.mxu1 %v8410_v42  ;;  %v1996_v3 = vld [vmem:[#allocation2 + $0x3b] sm:$0xff] }
 0x677   :  { %2015 = vrot.lane.b32.xlu1 %v1929_v13, %s8862_s26  ;;  %7840 = vmatprep.subr.bf16.mxu1 %v8411_v24  ;;  %v1972_v11 = vld [vmem:[#allocation2 + $0x39] sm:$0xff]  ;;  %v2002_v7 = vpack.c.bf16 %v1996_v3, %v1995_v18 }
 0x678   :  { %v1898_v56 = vsel %vm316_vm2, %v1674_v1, %v1890_v20  ;;  %v1978_v37 = vpack.c.bf16 %v1972_v11, %v1971_v28  ;;  %v1933_v54 = vld [vmem:[#allocation2 + $0x1e] sm:$0xff] }
 0x679   :  { %1906 = vst.msk [vmem:[#allocation2 + $0x88] sm:$0xff] %vm290_vm3, %v1898_v56 }
 0x67a   :  { %7841 = vmatpush3.bf16.msra.mxu1 %v8412_v27  ;;  %v1909_v27 = vld [vmem:[#allocation2 + $0x1c] sm:$0xff] }
 0x67b   :  { %2017 = vrot.lane.b32.xlu1 %v1930_v26, %s8862_s26  ;;  %7842 = vmatprep.subr.bf16.mxu1 %v8413_v19  ;;  %v1934_v26 = vld [vmem:[#allocation2 + $0x26] sm:$0xff] }
 0x67c   :  { %v1952_v38 = vld [vmem:[#allocation2 + $0x97] sm:$0xff]  ;;  %v1941_v42 = vpack.c.bf16 %v1934_v26, %v1933_v54  ;;  %v10099_v19 = vld [vmem:[#allocation2 + $0x24] sm:$0xff] }
 0x67d   :  { %v1928_v2 = vld [vmem:[#allocation2 + $0x95] sm:$0xff] }
 0x67e   :  { %7843 = vmatpush3.bf16.msra.mxu1 %v8415_v39  ;;  %v1999_v13 = vld [vmem:[#allocation2 + $0x93] sm:$0xff]  ;;  %v2000_v1 = vld [vmem:[#allocation2 + $0x9b] sm:$0xff]  ;;  %v1917_v39 = vpack.c.bf16 %v10099_v19, %v1909_v27 }
 0x67f   :  { %v1975_v20 = vld [vmem:[#allocation2 + $0x91] sm:$0xff]  ;;  %v1976_v31 = vld [vmem:[#allocation2 + $0x99] sm:$0xff]  ;;  %v2004_v61 = vpack.c.bf16 %v2000_v1, %v1999_v13  ;;  %v1958_v13 = vld [vmem:[#allocation2 + $0x28] sm:$0xff] }
 0x680   :  { %v1950_v51 = vld [vmem:[#allocation2 + $0x87] sm:$0xff]  ;;  %v1951_v55 = vld [vmem:[#allocation2 + $0x8f] sm:$0xff]  ;;  %v1980_v56 = vpack.c.bf16 %v1976_v31, %v1975_v20 }
 0x681   :  { %v1926_v4 = vld [vmem:[#allocation2 + $0x85] sm:$0xff]  ;;  %v1955_v22 = vpack.c.bf16 %v1950_v51, %v1949_v46  ;;  %v1927_v43 = vld [vmem:[#allocation2 + $0x8d] sm:$0xff]  ;;  %v1956_v9 = vpack.c.bf16 %v1952_v38, %v1951_v55  ;;  %v1936_v51 = vld [vmem:[#allocation2 + $0x36] sm:$0xff] }
 0x682   :  { %v1931_v60 = vpack.c.bf16 %v1926_v4, %v1925_v14  ;;  %v1932_v62 = vpack.c.bf16 %v1928_v2, %v1927_v43  ;;  %v1997_v29 = vld [vmem:[#allocation2 + $0x83] sm:$0xff]  ;;  %v1998_v63 = vld [vmem:[#allocation2 + $0x8b] sm:$0xff] }
 0x683   :  { %2031 = vrot.lane.b32.xlu0 %v1955_v22, %s8862_s26  ;;  %v1973_v5 = vld [vmem:[#allocation2 + $0x81] sm:$0xff]  ;;  %v1974_v49 = vld [vmem:[#allocation2 + $0x89] sm:$0xff]  ;;  %v2003_v32 = vpack.c.bf16 %v1998_v63, %v1997_v29  ;;  %v1940_v29 = vld [vmem:[#allocation2 + $0x96] sm:$0xff] }
 0x684   :  { %2019 = vrot.lane.b32.xlu1 %v1931_v60, %s8862_s26  ;;  %v1979_v34 = vpack.c.bf16 %v1974_v49, %v1973_v5  ;;  %v1935_v14 = vld [vmem:[#allocation2 + $0x2e] sm:$0xff]  ;;  %v1938_v50 = vld [vmem:[#allocation2 + $0x86] sm:$0xff] }
 0x685   :  { %v1942_v60 = vpack.c.bf16 %v1936_v51, %v1935_v14  ;;  %v8409_v55 = vld [vmem:[%s12346_s4 + $0x228] sm:$0xff]   ;;  %v1957_v49 = vld [vmem:[#allocation2 + $0x20] sm:$0xff]  ;;  %v1983_v27 = vld [vmem:[#allocation2 + $0x32] sm:$0xff] }
 0x686   :  { %v10109_v2 = vld [vmem:[#allocation2 + $0x2c] sm:$0xff]  ;;  %v1914_v28 = vld [vmem:[#allocation2 + $0x84] sm:$0xff] }
 0x687   :  { %2033 = vrot.lane.b32.xlu0 %v1956_v9, %s8862_s26  ;;  %v10111_v9 = vld [vmem:[#allocation2 + $0x34] sm:$0xff]  ;;  %v1981_v1 = vld [vmem:[#allocation2 + $0x22] sm:$0xff]  ;;  %v1982_v20 = vld [vmem:[#allocation2 + $0x2a] sm:$0xff] }
 0x688   :  { %2021 = vrot.lane.b32.xlu1 %v1932_v62, %s8862_s26  ;;  %v8414_v62 = vld [vmem:[%s12346_s4 + $0x230] sm:$0xff]   ;;  %v1918_v16 = vpack.c.bf16 %v10111_v9, %v10109_v2  ;;  %v1989_v54 = vpack.c.bf16 %v1982_v20, %v1981_v1 }
 0x689   :  { %v1939_v11 = vld [vmem:[#allocation2 + $0x8e] sm:$0xff] }
 0x68a   :  { %v1944_v5 = vpack.c.bf16 %v1940_v29, %v1939_v11  ;;  %v1988_v29 = vld [vmem:[#allocation2 + $0x9a] sm:$0xff] }
 0x68b   :  { %2051 = vrot.lane.b32.xlu0 %v2001_v10, %s8862_s26  ;;  %v1937_v10 = vld [vmem:[#allocation2 + $0x7e] sm:$0xff] }
 0x68c   :  { %2039 = vrot.lane.b32.xlu1 %v1977_v12, %s8862_s26  ;;  %v1943_v12 = vpack.c.bf16 %v1938_v50, %v1937_v10  ;;  %v1986_v50 = vld [vmem:[#allocation2 + $0x8a] sm:$0xff] }
 0x68f   :  { %2053 = vrot.lane.b32.xlu0 %v2002_v7, %s8862_s26 }
 0x690   :  { %2041 = vrot.lane.b32.xlu1 %v1978_v37, %s8862_s26  ;;  %v1913_v37 = vld [vmem:[#allocation2 + $0x7c] sm:$0xff] }
 0x691   :  { %v1919_v63 = vpack.c.bf16 %v1914_v28, %v1913_v37  ;;  %v1987_v37 = vld [vmem:[#allocation2 + $0x92] sm:$0xff] }
 0x693   :  { %2055 = vrot.lane.b32.xlu0 %v2003_v32, %s8862_s26 }
 0x694   :  { %2043 = vrot.lane.b32.xlu1 %v1979_v34, %s8862_s26 }
 0x697   :  { %2057 = vrot.lane.b32.xlu0 %v2004_v61, %s8862_s26 }
 0x698   :  { %2045 = vrot.lane.b32.xlu1 %v1980_v56, %s8862_s26  ;;  %v1965_v56 = vpack.c.bf16 %v1958_v13, %v1957_v49  ;;  %v2006_v13 = vld [vmem:[#allocation2 + $0x9c] sm:$0xff] }
 0x6e5   :  { %v2028_v24 = vpop.permute.xlu1 %2027 }
 0x6e6   :  { %v2077_v46 = vsel %vm290_vm3, %v1941_v42, %v2028_v24  ;;  %v2030_v4 = vpop.permute.xlu0 %2029  ;;  %v1915_v24 = vld [vmem:[#allocation2 + $0x8c] sm:$0xff] }
 0x6e7   :  { %2464 = vmatprep.mubr.bf16.mxu0 %v2077_v46  ;;  %v2081_v38 = vsel %vm290_vm3, %v1942_v60, %v2030_v4  ;;  %v1984_v46 = vld [vmem:[#allocation2 + $0x3a] sm:$0xff] }
 0x6e8   :  { %v1916_v4 = vld [vmem:[#allocation2 + $0x94] sm:$0xff] }
 0x6e9   :  { %v2016_v22 = vpop.permute.xlu1 %2015 }
 0x6ea   :  { %v2061_v43 = vsel %vm290_vm3, %v1917_v39, %v2016_v22  ;;  %v1920_v39 = vpack.c.bf16 %v1916_v4, %v1915_v24  ;;  %v1990_v22 = vpack.c.bf16 %v1984_v46, %v1983_v27 }
 0x6eb   :  { %2465 = vmatmul.mubr.bf16.vlgmr.msra.gmra.mrb[24].mxu0 %v2061_v43 }
 0x6ec   :  { %2472 = vmatprep.mubr.bf16.mxu0 %v2081_v38  ;;  %8207 = vmatpush3.bf16.msra.mxu0 %v10038_v30  ;;  %v8416_v30 = vld [vmem:[%s12346_s4 + $0x238] sm:$0xff]   ;;  %v2007_v38 = vpack.c.bf16 %v10109_v2, %v10099_v19  ;;  %v2009_v2 = vpack.c.bf16 %v1915_v24, %v1914_v28 }
 0x6ed   :  { %8208 = vmatprep.subr.bf16.mxu0 %v8409_v55  ;;  %v2018_v45 = vpop.permute.xlu1 %2017  ;;  %v1964_v28 = vld [vmem:[#allocation2 + $0x98] sm:$0xff] }
 0x6ee   :  { %v2065_v21 = vsel %vm290_vm3, %v1918_v16, %v2018_v45  ;;  %v1960_v45 = vld [vmem:[#allocation2 + $0x38] sm:$0xff]  ;;  %v1985_v16 = vld [vmem:[#allocation2 + $0x82] sm:$0xff] }
 0x6f0   :  { %8209 = vmatpush3.bf16.msra.mxu0 %v8409_v55 }
 0x6f1   :  { %8210 = vmatprep.subr.bf16.mxu0 %v8414_v62 }
 0x6f3   :  { %2473 = vmatmul.mubr.bf16.gmra.mrb[28].mxu0 %v2065_v21 }
 0x6f4   :  { %8211 = vmatpush3.bf16.msra.mxu0 %v8414_v62  ;;  %v1959_v62 = vld [vmem:[#allocation2 + $0x30] sm:$0xff] }
 0x6f5   :  { %v2032_v18 = vpop.permute.xlu0 %2031  ;;  %8212 = vmatprep.subr.bf16.mxu0 %v8416_v30  ;;  %v1966_v10 = vpack.c.bf16 %v1960_v45, %v1959_v62 }
 0x6f6   :  { %v2020_v3 = vpop.permute.xlu1 %2019  ;;  %v2085_v7 = vsel %vm290_vm3, %v1943_v12, %v2032_v18  ;;  %v1991_v12 = vpack.c.bf16 %v1986_v50, %v1985_v16  ;;  %v2005_v18 = vld [vmem:[#allocation2 + $0x3c] sm:$0xff] }
 0x6f7   :  { %2480 = vmatprep.mubr.bf16.mxu0 %v2085_v7  ;;  %v2069_v31 = vsel %vm290_vm3, %v1919_v63, %v2020_v3  ;;  %v2008_v19 = vpack.c.bf16 %v2005_v18, %v10111_v9  ;;  %v1962_v7 = vld [vmem:[#allocation2 + $0x88] sm:$0xff]  ;;  %v2010_v9 = vpack.c.bf16 %v2006_v13, %v1916_v4  ;;  %v10144_v50 = vld [vmem:[%s12347_s5 + $0x1] ss:$0 sm:$0xff] }
 0x6f8   :  { %8213 = vmatpush3.bf16.msra.mxu0 %v8416_v30 }
 0x6f9   :  { %v2034_v32 = vpop.permute.xlu0 %2033 }
 0x6fa   :  { %v2022_v34 = vpop.permute.xlu1 %2021  ;;  %v2089_v61 = vsel %vm290_vm3, %v1944_v5, %v2034_v32  ;;  %v1961_v5 = vld [vmem:[#allocation2 + $0x80] sm:$0xff] }
 0x6fb   :  { %2481 = vmatmul.mubr.bf16.gmra.mrb[32].mxu0 %v2069_v31  ;;  %v2073_v55 = vsel %vm290_vm3, %v1920_v39, %v2022_v34  ;;  %v1967_v32 = vpack.c.bf16 %v1962_v7, %v1961_v5  ;;  %v1992_v34 = vpack.c.bf16 %v1988_v29, %v1987_v37 }
 0x6fc   :  { %2488 = vmatprep.mubr.bf16.mxu0 %v2089_v61  ;;  %v1963_v61 = vld [vmem:[#allocation2 + $0x90] sm:$0xff] }
 0x6fd   :  { %v2052_v26 = vpop.permute.xlu0 %2051 }
 0x6fe   :  { %v2040_v42 = vpop.permute.xlu1 %2039  ;;  %v2109_v51 = vsel %vm290_vm3, %v1989_v54, %v2052_v26 }
 0x6ff   :  { %v2093_v14 = vsel %vm290_vm3, %v1965_v56, %v2040_v42  ;;  %2529 = vmatprep.mubr.bf16.mxu1 %v2109_v51  ;;  %v1968_v56 = vpack.c.bf16 %v1964_v28, %v1963_v61 }
 0x700   :  { %2530 = vmatmul.mubr.bf16.vlgmr.msra.gmra.mrb[24].mxu1 %v2093_v14 }
 0x701   :  { %v2054_v60 = vpop.permute.xlu0 %2053 }
 0x702   :  { %v2113_v43 = vsel %vm290_vm3, %v1990_v22, %v2054_v60  ;;  %v2042_v30 = vpop.permute.xlu1 %2041 }
 0x703   :  { %2489 = vmatmul.mubr.bf16.gmra.mrb[36].mxu0 %v2073_v55  ;;  %2537 = vmatprep.mubr.bf16.mxu1 %v2113_v43  ;;  %v2097_v3 = vsel %vm290_vm3, %v1966_v10, %v2042_v30 }
 0x704   :  { %8214 = vmatprep.mubr.msk.bf16.mxu0 %vm290_vm3, %v2007_v38 }
 0x705   :  { %v2056_v21 = vpop.permute.xlu0 %2055 }
 0x706   :  { %v2117_v11 = vsel %vm290_vm3, %v1991_v12, %v2056_v21  ;;  %v2044_v63 = vpop.permute.xlu1 %2043 }
 0x707   :  { %v2101_v1 = vsel %vm290_vm3, %v1967_v32, %v2044_v63 }
 0x708   :  { %2538 = vmatmul.mubr.bf16.gmra.mrb[28].mxu1 %v2097_v3 }
 0x709   :  { %2545 = vmatprep.mubr.bf16.mxu1 %v2117_v11  ;;  %v2058_v49 = vpop.permute.xlu0 %2057 }
 0x70a   :  { %v2121_v20 = vsel %vm290_vm3, %v1992_v34, %v2058_v49  ;;  %v2046_v31 = vpop.permute.xlu1 %2045 }
 0x70b   :  { %8215 = vmatmul.mubr.msk.bf16.vlgmr.msra.gmra.mrb[40].mxu0 %vm290_vm3, %v2008_v19  ;;  %v2105_v54 = vsel %vm290_vm3, %v1968_v56, %v2046_v31 }
 0x70c   :  { %8218 = vmatprep.mubr.msk.bf16.mxu0 %vm290_vm3, %v2009_v2 }
 0x710   :  { %2546 = vmatmul.mubr.bf16.gmra.mrb[32].mxu1 %v2101_v1 }
 0x711   :  { %2553 = vmatprep.mubr.bf16.mxu1 %v2121_v20 }
 0x713   :  { %8219 = vmatmul.mubr.msk.bf16.gmra.mrb[44].mxu0 %vm290_vm3, %v2010_v9 }
 0x718   :  { %2554 = vmatmul.mubr.bf16.gmra.mrb[36].mxu1 %v2105_v54 }
 0x7be   :  { %v7804_v26 = vpop.f32.mrb[24].mxu0 }
 0x7bf   :  { %v7805_v42 = vpop.f32.mrb[25].mxu0 }
 0x7c0   :  { %v7806_v24 = vadd.f32 %v7805_v42, %v7804_v26  ;;  %v7807_v27 = vpop.f32.mrb[26].mxu0 }
 0x7c1   :  { %v7808_v46 = vpop.f32.mrb[27].mxu0 }
 0x7c2   :  { %v7809_v14 = vadd.f32 %v7808_v46, %v7807_v27  ;;  %v2467_v12 = vadd.f32 %v7806_v24, %v10144_v50 }
 0x7c4   :  { %v2470_v2 = vadd.f32 %v7809_v14, %v10144_v50 }
 0x7c6   :  { %v7810_v51 = vpop.f32.mrb[28].mxu0 }
 0x7c7   :  { %v7811_v39 = vpop.f32.mrb[29].mxu0 }
 0x7c8   :  { %v7812_v22 = vadd.f32 %v7811_v39, %v7810_v51  ;;  %v7813_v60 = vpop.f32.mrb[30].mxu0 }
 0x7c9   :  { %v7814_v4 = vpop.f32.mrb[31].mxu0 }
 0x7ca   :  { %v7815_v55 = vadd.f32 %v7814_v4, %v7813_v60  ;;  %v2475_v20 = vadd.f32 %v7812_v22, %v10144_v50 }
 0x7cc   :  { %v2478_v56 = vadd.f32 %v7815_v55, %v10144_v50 }
 0x7ce   :  { %v7816_v43 = vpop.f32.mrb[32].mxu0 }
 0x7cf   :  { %v7817_v38 = vpop.f32.mrb[33].mxu0 }
 0x7d0   :  { %v7818_v62 = vadd.f32 %v7817_v38, %v7816_v43  ;;  %v7819_v45 = vpop.f32.mrb[34].mxu0 }
 0x7d1   :  { %v7820_v16 = vpop.f32.mrb[35].mxu0 }
 0x7d2   :  { %v7821_v30 = vadd.f32 %v7820_v16, %v7819_v45  ;;  %v2483_v16 = vadd.f32 %v7818_v62, %v10144_v50 }
 0x7d3   :  { %v7844_v21 = vpop.f32.mrb[24].mxu1 }
 0x7d4   :  { %v7845_v10 = vpop.f32.mrb[25].mxu1 }
 0x7d5   :  { %v7846_v18 = vadd.f32 %v7845_v10, %v7844_v21  ;;  %v7847_v3 = vpop.f32.mrb[26].mxu1 }
 0x7d6   :  { %v7822_v11 = vpop.f32.mrb[36].mxu0  ;;  %v7848_v19 = vpop.f32.mrb[27].mxu1 }
 0x7d7   :  { %v7823_v7 = vpop.f32.mrb[37].mxu0  ;;  %v7849_v37 = vadd.f32 %v7848_v19, %v7847_v3  ;;  %v2532_v29 = vadd.f32 %v7846_v18, %v2467_v12  ;;  %v2486_v3 = vadd.f32 %v7821_v30, %v10144_v50 }
 0x7d8   :  { %v7824_v63 = vadd.f32 %v7823_v7, %v7822_v11  ;;  %v7825_v5 = vpop.f32.mrb[38].mxu0 }
 0x7d9   :  { %v7826_v49 = vpop.f32.mrb[39].mxu0  ;;  %v2535_v32 = vadd.f32 %v7849_v37, %v2470_v2 }
 0x7da   :  { %v10148_v34 = vadd.f32 %v7826_v49, %v7825_v5 }
 0x7db   :  { %v7850_v13 = vpop.f32.mrb[28].mxu1 }
 0x7dc   :  { %v7851_v1 = vpop.f32.mrb[29].mxu1 }
 0x7dd   :  { %v7852_v9 = vadd.f32 %v7851_v1, %v7850_v13  ;;  %v7853_v28 = vpop.f32.mrb[30].mxu1 }
 0x7de   :  { %v8216_v31 = vpop.f32.mrb[40].mxu0  ;;  %v7854_v61 = vpop.f32.mrb[31].mxu1 }
 0x7df   :  { %v2540_v54 = vadd.f32 %v7852_v9, %v2475_v20  ;;  %v7855_v26 = vadd.f32 %v7854_v61, %v7853_v28  ;;  %v2596_v42 = vpop.f32.mrb[41].mxu0 }
 0x7e0   :  { %v10152_v24 = vadd.f32 %v2596_v42, %v2532_v29  ;;  %v8217_v27 = vpop.f32.mrb[42].mxu0 }
 0x7e1   :  { %v10154_v46 = vadd.f32 %v8216_v31, %v2540_v54  ;;  %v2543_v14 = vadd.f32 %v7855_v26, %v2478_v56  ;;  %v2599_v51 = vpop.f32.mrb[43].mxu0 }
 0x7e2   :  { %v2635_v39 = vmul.f32 0.044715, %v10152_v24  ;;  %v10157_v60 = vadd.f32 %v2599_v51, %v2535_v32 }
 0x7e3   :  { %v2637_v22 = vmul.f32 0.044715, %v10154_v46  ;;  %v10160_v4 = vadd.f32 %v8217_v27, %v2543_v14  ;;  %v7856_v43 = vpop.f32.mrb[32].mxu1 }
 0x7e4   :  { %v2643_v55 = vmul.f32 %v2635_v39, %v10152_v24  ;;  %v2636_v38 = vmul.f32 0.044715, %v10157_v60  ;;  %v7857_v45 = vpop.f32.mrb[33].mxu1  ;;  %v2491_v39 = vadd.f32 %v7824_v63, %v10144_v50 }
 0x7e5   :  { %v2645_v21 = vmul.f32 %v2637_v22, %v10154_v46  ;;  %v2638_v10 = vmul.f32 0.044715, %v10160_v4  ;;  %v7858_v12 = vadd.f32 %v7857_v45, %v7856_v43  ;;  %v7859_v18 = vpop.f32.mrb[34].mxu1  ;;  %v2494_v45 = vadd.f32 %v10148_v34, %v10144_v50 }
 0x7e6   :  { %v2651_v11 = vmul.f32 %v2643_v55, %v10152_v24  ;;  %v2644_v19 = vmul.f32 %v2636_v38, %v10157_v60  ;;  %v8220_v2 = vpop.f32.mrb[44].mxu0  ;;  %v7860_v7 = vpop.f32.mrb[35].mxu1 }
 0x7e7   :  { %v2653_v37 = vmul.f32 %v2645_v21, %v10154_v46  ;;  %v2646_v29 = vmul.f32 %v2638_v10, %v10160_v4  ;;  %v7861_v5 = vadd.f32 %v7860_v7, %v7859_v18  ;;  %v2548_v62 = vadd.f32 %v7858_v12, %v2483_v16  ;;  %v2612_v49 = vpop.f32.mrb[45].mxu0 }
 0x7e8   :  { %v2659_v32 = vadd.f32 %v2651_v11, %v10152_v24  ;;  %v2652_v13 = vmul.f32 %v2644_v19, %v10157_v60  ;;  %v8221_v1 = vpop.f32.mrb[46].mxu0 }
 0x7e9   :  { %v2661_v30 = vadd.f32 %v2653_v37, %v10154_v46  ;;  %v2654_v20 = vmul.f32 %v2646_v29, %v10160_v4  ;;  %v10176_v9 = vadd.f32 %v2612_v49, %v2548_v62  ;;  %v2551_v28 = vadd.f32 %v7861_v5, %v2486_v3  ;;  %v2615_v31 = vpop.f32.mrb[47].mxu0 }
 0x7ea   :  { %v2660_v61 = vadd.f32 %v2652_v13, %v10157_v60  ;;  %v2667_v56 = vmul.f32 0.7978846, %v2659_v32  ;;  %v2629_v62 = vmul.f32 0.5, %v10154_v46  ;;  %v2627_v46 = vmul.f32 0.5, %v10152_v24 }
 0x7eb   :  { %v2662_v54 = vadd.f32 %v2654_v20, %v10160_v4  ;;  %v10180_v26 = vadd.f32 %v2615_v31, %v2551_v28  ;;  %v7862_v42 = vpop.f32.mrb[36].mxu1  ;;  %v2669_v27 = vmul.f32 0.7978846, %v2661_v30  ;;  %v2639_v10 = vmul.f32 0.044715, %v10176_v9 }
 0x7ec   :  { %v7863_v14 = vpop.f32.mrb[37].mxu1  ;;  %8635 = vtanh.f32 %v2667_v56  ;;  %v2668_v51 = vmul.f32 0.7978846, %v2660_v61  ;;  %v2630_v61 = vmul.f32 0.5, %v10160_v4  ;;  %v2628_v4 = vmul.f32 0.5, %v10157_v60 }
 0x7ed   :  { %v7864_v22 = vadd.f32 %v7863_v14, %v7862_v42  ;;  %v7865_v43 = vpop.f32.mrb[38].mxu1  ;;  %8637 = vtanh.f32 %v2669_v27  ;;  %v2670_v38 = vmul.f32 0.7978846, %v2662_v54  ;;  %v2640_v11 = vmul.f32 0.044715, %v10180_v26 }
 0x7ee   :  { %v7866_v55 = vpop.f32.mrb[39].mxu1  ;;  %8639 = vtanh.f32 %v2668_v51  ;;  %v2647_v19 = vmul.f32 %v2639_v10, %v10176_v9 }
 0x7ef   :  { %v2556_v16 = vadd.f32 %v7864_v22, %v2491_v39  ;;  %v7867_v21 = vadd.f32 %v7866_v55, %v7865_v43  ;;  %8641 = vtanh.f32 %v2670_v38  ;;  %v2648_v5 = vmul.f32 %v2640_v11, %v10180_v26 }
 0x7f0   :  { %v2655_v13 = vmul.f32 %v2647_v19, %v10176_v9 }
 0x7f1   :  { %v10186_v12 = vadd.f32 %v8220_v2, %v2556_v16  ;;  %v2559_v18 = vadd.f32 %v7867_v21, %v2494_v45  ;;  %v2656_v54 = vmul.f32 %v2648_v5, %v10180_v26  ;;  %v2631_v5 = vmul.f32 0.5, %v10176_v9 }
 0x7f2   :  { %v2663_v27 = vadd.f32 %v2655_v13, %v10176_v9 }
 0x7f3   :  { %v2641_v3 = vmul.f32 0.044715, %v10186_v12  ;;  %v10189_v63 = vadd.f32 %v8221_v1, %v2559_v18  ;;  %v2664_v43 = vadd.f32 %v2656_v54, %v10180_v26 }
 0x7f4   :  { %v2671_v38 = vmul.f32 0.7978846, %v2663_v27 }
 0x7f5   :  { %v2649_v7 = vmul.f32 %v2641_v3, %v10186_v12  ;;  %v2642_v50 = vmul.f32 0.044715, %v10189_v63  ;;  %v2672_v60 = vmul.f32 0.7978846, %v2664_v43 }
 0x7f6   :  { %v8636_v34 = vpop.eup %8635 }
 0x7f7   :  { %v8638_v37 = vpop.eup %8637  ;;  %v2650_v29 = vmul.f32 %v2642_v50, %v10189_v63  ;;  %v2657_v2 = vmul.f32 %v2649_v7, %v10186_v12  ;;  %v2683_v31 = vadd.f32 1.0, %v8636_v34 }
 0x7f8   :  { %v2685_v49 = vadd.f32 1.0, %v8638_v37  ;;  %v8640_v32 = vpop.eup %8639 }
 0x7f9   :  { %v2665_v1 = vadd.f32 %v2657_v2, %v10186_v12  ;;  %v2658_v30 = vmul.f32 %v2650_v29, %v10189_v63  ;;  %v8642_v20 = vpop.eup %8641  ;;  %v2684_v51 = vadd.f32 1.0, %v8640_v32  ;;  %v10213_v22 = vmul.f32 %v2683_v31, %v2627_v46 }
 0x7fa   :  { %v10202_v28 = vmul.f32 %v2685_v49, %v2629_v62  ;;  %v2686_v56 = vadd.f32 1.0, %v8642_v20  ;;  %v2634_v2 = vmul.f32 0.5, %v10189_v63  ;;  %v2632_v32 = vmul.f32 0.5, %v10180_v26 }
 0x7fb   :  { %v2666_v42 = vadd.f32 %v2658_v30, %v10189_v63  ;;  %v2673_v39 = vmul.f32 0.7978846, %v2665_v1  ;;  %v10221_v55 = vmul.f32 %v2684_v51, %v2628_v4  ;;  %v10237_v21 = vadd.f32 %v10213_v22, %v9646_v17 }
 0x7fc   :  { %2711 = vrot.lane.b32.xlu0 %v10202_v28, %s8859_s0  ;;  %v10211_v14 = vmul.f32 %v2686_v56, %v2630_v61  ;;  %v10225_v45 = vadd.f32 %v10202_v28, %v9634_v40 }
 0x7fd   :  { %v2674_v24 = vmul.f32 0.7978846, %v2666_v42  ;;  %8643 = vtanh.f32 %v2673_v39  ;;  %v10245_v40 = vadd.f32 %v10221_v55, %v9654_v48  ;;  %v2965_v3 = vmul.f32 %v10237_v21, %v10237_v21 }
 0x7fe   :  { %2713 = vrot.lane.b32.xlu1 %v10211_v14, %s8859_s0  ;;  %v10233_v16 = vadd.f32 %v10211_v14, %v9642_v41  ;;  %v2967_v41 = vmul.f32 %v10225_v45, %v10225_v45  ;;  %v2633_v48 = vmul.f32 0.5, %v10186_v12 }
 0x7ff   :  { %8645 = vtanh.f32 %v2674_v24  ;;  %v2966_v7 = vmul.f32 %v10245_v40, %v10245_v40 }
 0x800   :  { %2707 = vrot.lane.b32.xlu0 %v10213_v22, %s8859_s0  ;;  %8647 = vtanh.f32 %v2671_v38  ;;  %v2968_v17 = vmul.f32 %v10233_v16, %v10233_v16 }
 0x801   :  { %8649 = vtanh.f32 %v2672_v60 }
 0x802   :  { %2709 = vrot.lane.b32.xlu1 %v10221_v55, %s8859_s0 }
 0x804   :  { %2913 = vrot.lane.b32.xlu0 %v10225_v45, %s8859_s0 }
 0x806   :  { %2915 = vrot.lane.b32.xlu1 %v10233_v16, %s8859_s0 }
 0x807   :  { %v8644_v10 = vpop.eup %8643 }
 0x808   :  { %2909 = vrot.lane.b32.xlu0 %v10237_v21, %s8859_s0  ;;  %v2689_v11 = vadd.f32 1.0, %v8644_v10 }
 0x809   :  { %v8646_v18 = vpop.eup %8645 }
 0x80a   :  { %2911 = vrot.lane.b32.xlu1 %v10245_v40, %s8859_s0  ;;  %v8648_v19 = vpop.eup %8647  ;;  %v2690_v50 = vadd.f32 1.0, %v8646_v18  ;;  %v10261_v37 = vmul.f32 %v2689_v11, %v2633_v48 }
 0x80b   :  { %v8650_v34 = vpop.eup %8649  ;;  %v2687_v29 = vadd.f32 1.0, %v8648_v19 }
 0x80c   :  { %2985 = vrot.lane.b32.xlu0 %v2967_v41, %s8859_s0  ;;  %v10268_v62 = vmul.f32 %v2690_v50, %v2634_v2  ;;  %v2688_v12 = vadd.f32 1.0, %v8650_v34  ;;  %v10281_v63 = vadd.f32 %v10261_v37, %v9690_v25 }
 0x80d   :  { %v10270_v49 = vmul.f32 %v2687_v29, %v2631_v5 }
 0x80e   :  { %2987 = vrot.lane.b32.xlu1 %v2968_v17, %s8859_s0  ;;  %v10277_v13 = vmul.f32 %v2688_v12, %v2632_v32  ;;  %v10289_v9 = vadd.f32 %v10268_v62, %v9698_v47  ;;  %v2971_v1 = vmul.f32 %v10281_v63, %v10281_v63 }
 0x80f   :  { %v10293_v26 = vadd.f32 %v10270_v49, %v9702_v57 }
 0x810   :  { %2981 = vrot.lane.b32.xlu0 %v2965_v3, %s8859_s0  ;;  %v10301_v25 = vadd.f32 %v10277_v13, %v9710_v6  ;;  %v2972_v47 = vmul.f32 %v10289_v9, %v10289_v9 }
 0x811   :  { %v2969_v57 = vmul.f32 %v10293_v26, %v10293_v26 }
 0x812   :  { %2983 = vrot.lane.b32.xlu1 %v2966_v7, %s8859_s0  ;;  %v2970_v6 = vmul.f32 %v10301_v25, %v10301_v25 }
 0x814   :  { %2719 = vrot.lane.b32.xlu0 %v10261_v37, %s8859_s0 }
 0x816   :  { %2721 = vrot.lane.b32.xlu1 %v10268_v62, %s8859_s0 }
 0x818   :  { %2715 = vrot.lane.b32.xlu0 %v10270_v49, %s8859_s0 }
 0x81a   :  { %2717 = vrot.lane.b32.xlu1 %v10277_v13, %s8859_s0 }
 0x81c   :  { %2921 = vrot.lane.b32.xlu0 %v10281_v63, %s8859_s0 }
 0x81e   :  { %2923 = vrot.lane.b32.xlu1 %v10289_v9, %s8859_s0 }
 0x820   :  { %2917 = vrot.lane.b32.xlu0 %v10293_v26, %s8859_s0 }
 0x822   :  { %2919 = vrot.lane.b32.xlu1 %v10301_v25, %s8859_s0 }
 0x824   :  { %2993 = vrot.lane.b32.xlu0 %v2971_v1, %s8859_s0 }
 0x826   :  { %2995 = vrot.lane.b32.xlu1 %v2972_v47, %s8859_s0 }
 0x828   :  { %2989 = vrot.lane.b32.xlu0 %v2969_v57, %s8859_s0 }
 0x82a   :  { %2991 = vrot.lane.b32.xlu1 %v2970_v6, %s8859_s0 }
 0x86e   :  { %v2712_v30 = vpop.permute.xlu0 %2711 }
 0x86f   :  { %v2733_v61 = vadd.f32 %v2712_v30, %v10202_v28 }
 0x870   :  { %v2714_v20 = vpop.permute.xlu1 %2713 }
 0x871   :  { %v10319_v46 = vadd.f32 %v2733_v61, %v9728_v59 }
 0x872   :  { %v2708_v31 = vpop.permute.xlu0 %2707 }
 0x873   :  { %v2731_v39 = vadd.f32 %v2708_v31, %v10213_v22  ;;  %v2763_v4 = vsel %vm316_vm2, %v10319_v46, 0.0  ;;  %v2734_v22 = vadd.f32 %v2714_v20, %v10211_v14 }
 0x874   :  { %v2710_v56 = vpop.permute.xlu1 %2709 }
 0x875   :  { %v10327_v38 = vadd.f32 %v2731_v39, %v9736_v36  ;;  %v2732_v17 = vadd.f32 %v2710_v56, %v10221_v55  ;;  %v2791_v36 = vmul.f32 %v10319_v46, %v10319_v46  ;;  %v10339_v19 = vadd.f32 %v2734_v22, %v9748_v35 }
 0x876   :  { %v2914_v54 = vpop.permute.xlu0 %2913 }
 0x877   :  { %v2939_v42 = vsel %vm316_vm2, %v2914_v54, 0.0  ;;  %v2757_v18 = vsel %vm316_vm2, %v10327_v38, 0.0  ;;  %v10342_v14 = vadd.f32 %v2732_v17, %v9751_v53  ;;  %v2803_v55 = vsel %vm316_vm2, %v2791_v36, 0.0 }
 0x878   :  { %2940 = vadd.xlane.f32.xlu1 %v2939_v42  ;;  %v2916_v27 = vpop.permute.xlu1 %2915  ;;  %v2766_v34 = vsel %vm316_vm2, %v10339_v19, 0.0  ;;  %v2789_v35 = vmul.f32 %v10327_v38, %v10327_v38  ;;  %v2792_v57 = vmul.f32 %v10339_v19, %v10339_v19 }
 0x879   :  { %v2942_v60 = vsel %vm316_vm2, %v2916_v27, 0.0  ;;  %v2760_v29 = vsel %vm316_vm2, %v10342_v14, 0.0 }
 0x87a   :  { %v2910_v51 = vpop.permute.xlu0 %2909  ;;  %v2797_v12 = vsel %vm316_vm2, %v2789_v35, 0.0  ;;  %v2806_v31 = vsel %vm316_vm2, %v2792_v57, 0.0 }
 0x87b   :  { %v2933_v43 = vsel %vm316_vm2, %v2910_v51, 0.0 }
 0x87c   :  { %2764 = vadd.xlane.f32.xlu1 %v2763_v4  ;;  %2934 = vadd.xlane.f32.xlu0 %v2933_v43  ;;  %v2912_v28 = vpop.permute.xlu1 %2911 }
 0x87d   :  { %v2936_v48 = vsel %vm316_vm2, %v2912_v28, 0.0 }
 0x87e   :  { %v2986_v24 = vpop.permute.xlu0 %2985 }
 0x87f   :  { %v3011_v59 = vsel %vm316_vm2, %v2986_v24, 0.0 }
 0x880   :  { %3012 = vadd.xlane.f32.xlu1 %v3011_v59  ;;  %2943 = vadd.xlane.f32.xlu0 %v2942_v60  ;;  %v2988_v41 = vpop.permute.xlu1 %2987 }
 0x881   :  { %v3014_v5 = vsel %vm316_vm2, %v2988_v41, 0.0 }
 0x882   :  { %v2982_v10 = vpop.permute.xlu0 %2981 }
 0x883   :  { %v3005_v3 = vsel %vm316_vm2, %v2982_v10, 0.0 }
 0x884   :  { %2758 = vadd.xlane.f32.xlu0 %v2757_v18  ;;  %3006 = vadd.xlane.f32.xlu1 %v3005_v3  ;;  %v2984_v7 = vpop.permute.xlu1 %2983 }
 0x885   :  { %v3008_v1 = vsel %vm316_vm2, %v2984_v7, 0.0 }
 0x886   :  { %v2720_v11 = vpop.permute.xlu0 %2719 }
 0x887   :  { %v2737_v32 = vadd.f32 %v2720_v11, %v10261_v37  ;;  %v2790_v37 = vmul.f32 %v10342_v14, %v10342_v14 }
 0x888   :  { %2937 = vadd.xlane.f32.xlu0 %v2936_v48  ;;  %2804 = vadd.xlane.f32.xlu1 %v2803_v55  ;;  %v2722_v53 = vpop.permute.xlu1 %2721 }
 0x889   :  { %v10360_v20 = vadd.f32 %v2737_v32, %v9769_v15  ;;  %v2800_v42 = vsel %vm316_vm2, %v2790_v37, 0.0  ;;  %v2738_v15 = vadd.f32 %v2722_v53, %v10268_v62  ;;  %v8417_v53 = vld [vmem:[%s12346_s4 + $0x280] sm:$0xff]   ;;  %v8421_v32 = vld [vmem:[%s12346_s4 + $0x290] sm:$0xff]  }
 0x88a   :  { %v2716_v50 = vpop.permute.xlu0 %2715  ;;  %7876 = vmatprep.subr.bf16.mxu1 %v8417_v53 }
 0x88b   :  { %v2735_v54 = vadd.f32 %v2716_v50, %v10270_v49  ;;  %v2775_v27 = vsel %vm316_vm2, %v10360_v20, 0.0  ;;  %v10377_v49 = vadd.f32 %v2738_v15, %v9786_v23  ;;  %v2795_v41 = vmul.f32 %v10360_v20, %v10360_v20  ;;  %v10407_v50 = vld [vmem:[%s12345_s3 + $0x8] sm:$0xf] }
 0x88c   :  { %2767 = vadd.xlane.f32.xlu0 %v2766_v34  ;;  %2761 = vadd.xlane.f32.xlu1 %v2760_v29  ;;  %v2718_v6 = vpop.permute.xlu1 %2717  ;;  %v3088_v29 = vrot.slane %v10407_v50, %v9138_v44  ;;  %v3104_v35 = vrot.slane %v10407_v50, %v9155_v58  ;;  %v8427_v15 = vld [vmem:[%s12346_s4 + $0x2a8] sm:$0xff]  }
 0x88d   :  { %v10372_v39 = vadd.f32 %v2735_v54, %v9781_v0  ;;  %v2736_v0 = vadd.f32 %v2718_v6, %v10277_v13  ;;  %v2778_v62 = vsel %vm316_vm2, %v10377_v49, 0.0  ;;  %v2815_v18 = vsel %vm316_vm2, %v2795_v41, 0.0  ;;  %v8433_v6 = vld [vmem:[%s12346_s4 + $0x308] sm:$0xff]   ;;  %v8425_v54 = vld [vmem:[%s12346_s4 + $0x2a0] sm:$0xff]  }
 0x88e   :  { %v2922_v2 = vpop.permute.xlu0 %2921  ;;  %v2796_v48 = vmul.f32 %v10377_v49, %v10377_v49 }
 0x88f   :  { %v2951_v47 = vsel %vm316_vm2, %v2922_v2, 0.0  ;;  %v2769_v59 = vsel %vm316_vm2, %v10372_v39, 0.0  ;;  %v10389_v10 = vadd.f32 %v2736_v0, %v9798_v52  ;;  %v2793_v13 = vmul.f32 %v10372_v39, %v10372_v39  ;;  %v8418_v2 = vld [vmem:[%s12346_s4 + $0x240] sm:$0xff]   ;;  %v8432_v0 = vld [vmem:[%s12346_s4 + $0x270] sm:$0xff]  }
 0x890   :  { %3015 = vadd.xlane.f32.xlu0 %v3014_v5  ;;  %2798 = vadd.xlane.f32.xlu1 %v2797_v12  ;;  %v2924_v56 = vpop.permute.xlu1 %2923  ;;  %v2818_v55 = vsel %vm316_vm2, %v2796_v48, 0.0  ;;  %v8419_v5 = vld [vmem:[%s12346_s4 + $0x288] sm:$0xff]  }
 0x891   :  { %v2954_v4 = vsel %vm316_vm2, %v2924_v56, 0.0  ;;  %v2772_v3 = vsel %vm316_vm2, %v10389_v10, 0.0  ;;  %v2809_v36 = vsel %vm316_vm2, %v2793_v13, 0.0  ;;  %v2794_v7 = vmul.f32 %v10389_v10, %v10389_v10  ;;  %7877 = vmatpush3.bf16.msra.mxu1 %v8418_v2  ;;  %v8420_v12 = vld [vmem:[%s12346_s4 + $0x248] sm:$0xff]   ;;  %v8424_v56 = vld [vmem:[%s12346_s4 + $0x258] sm:$0xff]  }
 0x892   :  { %v2918_v30 = vpop.permute.xlu0 %2917  ;;  %7878 = vmatprep.subr.bf16.mxu1 %v8419_v5 }
 0x893   :  { %v2945_v61 = vsel %vm316_vm2, %v2918_v30, 0.0  ;;  %v2812_v34 = vsel %vm316_vm2, %v2794_v7, 0.0  ;;  %v8422_v30 = vld [vmem:[%s12346_s4 + $0x250] sm:$0xff]  }
 0x894   :  { %3009 = vadd.xlane.f32.xlu0 %v3008_v1  ;;  %2952 = vadd.xlane.f32.xlu1 %v2951_v47  ;;  %v2920_v28 = vpop.permute.xlu1 %2919  ;;  %v8429_v1 = vld [vmem:[%s12346_s4 + $0x300] sm:$0xff]  }
 0x895   :  { %v2948_v24 = vsel %vm316_vm2, %v2920_v28, 0.0  ;;  %v8430_v47 = vld [vmem:[%s12346_s4 + $0x2c0] sm:$0xff]   ;;  %7916 = vmatprep.subr.bf16.mxu0 %v8429_v1  ;;  %7879 = vmatpush3.bf16.msra.mxu1 %v8420_v12  ;;  %v8428_v28 = vld [vmem:[%s12346_s4 + $0x268] sm:$0xff]  }
 0x896   :  { %v2994_v51 = vpop.permute.xlu0 %2993  ;;  %7917 = vmatpush3.bf16.msra.mxu0 %v8430_v47  ;;  %7880 = vmatprep.subr.bf16.mxu1 %v8421_v32 }
 0x897   :  { %v3023_v43 = vsel %vm316_vm2, %v2994_v51, 0.0  ;;  %7918 = vmatprep.subr.bf16.mxu0 %v8433_v6  ;;  %v8426_v51 = vld [vmem:[%s12346_s4 + $0x260] sm:$0xff]  }
 0x898   :  { %2807 = vadd.xlane.f32.xlu0 %v2806_v31  ;;  %2946 = vadd.xlane.f32.xlu1 %v2945_v61  ;;  %v2996_v23 = vpop.permute.xlu1 %2995  ;;  %v8423_v31 = vld [vmem:[%s12346_s4 + $0x298] sm:$0xff]  }
 0x899   :  { %v3026_v17 = vsel %vm316_vm2, %v2996_v23, 0.0  ;;  %7881 = vmatpush3.bf16.msra.mxu1 %v8422_v30 }
 0x89a   :  { %v2990_v60 = vpop.permute.xlu0 %2989  ;;  %7882 = vmatprep.subr.bf16.mxu1 %v8423_v31 }
 0x89b   :  { %v3017_v22 = vsel %vm316_vm2, %v2990_v60, 0.0 }
 0x89c   :  { %2801 = vadd.xlane.f32.xlu0 %v2800_v42  ;;  %2776 = vadd.xlane.f32.xlu1 %v2775_v27  ;;  %v2992_v11 = vpop.permute.xlu1 %2991 }
 0x89d   :  { %v3020_v52 = vsel %vm316_vm2, %v2992_v11, 0.0  ;;  %7883 = vmatpush3.bf16.msra.mxu1 %v8424_v56 }
 0x89e   :  { %7884 = vmatprep.subr.bf16.mxu1 %v8425_v54 }
 0x8a0   :  { %2955 = vadd.xlane.f32.xlu0 %v2954_v4  ;;  %3024 = vadd.xlane.f32.xlu1 %v3023_v43 }
 0x8a1   :  { %7885 = vmatpush3.bf16.msra.mxu1 %v8426_v51 }
 0x8a2   :  { %7886 = vmatprep.subr.bf16.mxu1 %v8427_v15 }
 0x8a4   :  { %2949 = vadd.xlane.f32.xlu0 %v2948_v24  ;;  %2770 = vadd.xlane.f32.xlu1 %v2769_v59  ;;  %v8431_v24 = vld [vmem:[%s12346_s4 + $0x2b0] sm:$0xff]  }
 0x8a5   :  { %7887 = vmatpush3.bf16.msra.mxu1 %v8428_v28 }
 0x8a6   :  { %7888 = vmatprep.subr.bf16.mxu1 %v8431_v24 }
 0x8a8   :  { %2779 = vadd.xlane.f32.xlu0 %v2778_v62  ;;  %3018 = vadd.xlane.f32.xlu1 %v3017_v22 }
 0x8a9   :  { %7889 = vmatpush3.bf16.msra.mxu1 %v8432_v0 }
 0x8ac   :  { %3027 = vadd.xlane.f32.xlu0 %v3026_v17  ;;  %2816 = vadd.xlane.f32.xlu1 %v2815_v18 }
 0x8b0   :  { %2773 = vadd.xlane.f32.xlu0 %v2772_v3  ;;  %2810 = vadd.xlane.f32.xlu1 %v2809_v36 }
 0x8b4   :  { %3021 = vadd.xlane.f32.xlu0 %v3020_v52 }
 0x8b8   :  { %2819 = vadd.xlane.f32.xlu0 %v2818_v55 }
 0x8bc   :  { %2813 = vadd.xlane.f32.xlu0 %v2812_v34 }
 0x8c1   :  { %3090 = vrot.lane.b32.xlu1 %v3088_v29, %s8860_s30 }
 0x8d2   :  { %3106 = vrot.lane.b32.xlu0 %v3104_v35, %s8860_s30 }
 0x905   :  { %v2941_v57 = vpop.xlane.xlu1 %2940 }
 0x906   :  { %v10471_v48 = vmul.f32 0.03125, %v2941_v57 }
 0x908   :  { %v3039_v47 = vmul.f32 %v10471_v48, %v10471_v48 }
 0x909   :  { %v2765_v61 = vpop.xlane.xlu1 %2764  ;;  %v2935_v37 = vpop.xlane.xlu0 %2934 }
 0x90a   :  { %v10467_v13 = vmul.f32 0.03125, %v2765_v61  ;;  %v10475_v7 = vmul.f32 0.03125, %v2935_v37 }
 0x90c   :  { %v2831_v55 = vmul.f32 %v10467_v13, %v10467_v13  ;;  %v3037_v30 = vmul.f32 %v10475_v7, %v10475_v7 }
 0x90d   :  { %v3013_v42 = vpop.xlane.xlu1 %3012  ;;  %v2944_v27 = vpop.xlane.xlu0 %2943 }
 0x90e   :  { %v3031_v29 = vmul.f32 0.03125, %v3013_v42  ;;  %v10477_v35 = vmul.f32 0.03125, %v2944_v27 }
 0x910   :  { %v3047_v37 = vsub.f32 %v3031_v29, %v3039_v47  ;;  %v3040_v56 = vmul.f32 %v10477_v35, %v10477_v35 }
 0x911   :  { %v3007_v4 = vpop.xlane.xlu1 %3006  ;;  %v2759_v43 = vpop.xlane.xlu0 %2758 }
 0x912   :  { %v10469_v11 = vmul.f32 0.03125, %v2759_v43  ;;  %v3029_v5 = vmul.f32 0.03125, %v3007_v4 }
 0x914   :  { %v2829_v12 = vmul.f32 %v10469_v11, %v10469_v11  ;;  %v3045_v15 = vsub.f32 %v3029_v5, %v3037_v30 }
 0x915   :  { %v2805_v59 = vpop.xlane.xlu1 %2804  ;;  %v2938_v60 = vpop.xlane.xlu0 %2937 }
 0x916   :  { %v2823_v52 = vmul.f32 0.03125, %v2805_v59  ;;  %v10491_v54 = vmul.f32 0.03125, %v2938_v60  ;;  %v3063_v60 = vadd.f32 1e-05, %v3047_v37 }
 0x918   :  { %v2839_v32 = vsub.f32 %v2823_v52, %v2831_v55 }
 0x919   :  { %v2762_v62 = vpop.xlane.xlu1 %2761  ;;  %v2768_v22 = vpop.xlane.xlu0 %2767 }
 0x91a   :  { %v10481_v1 = vmul.f32 0.03125, %v2762_v62  ;;  %v10485_v57 = vmul.f32 0.03125, %v2768_v22  ;;  %v2855_v4 = vadd.f32 1e-05, %v2839_v32 }
 0x91c   :  { %v2830_v43 = vmul.f32 %v10481_v1, %v10481_v1  ;;  %v2832_v24 = vmul.f32 %v10485_v57, %v10485_v57  ;;  %8651 = vrsqrt.f32 %v2855_v4 }
 0x91d   :  { %v2799_v41 = vpop.xlane.xlu1 %2798  ;;  %v3016_v23 = vpop.xlane.xlu0 %3015 }
 0x91e   :  { %v2821_v34 = vmul.f32 0.03125, %v2799_v41  ;;  %v3032_v6 = vmul.f32 0.03125, %v3016_v23  ;;  %v3038_v23 = vmul.f32 %v10491_v54, %v10491_v54 }
 0x920   :  { %v2837_v31 = vsub.f32 %v2821_v34, %v2829_v12  ;;  %v3048_v59 = vsub.f32 %v3032_v6, %v3040_v56  ;;  %v3061_v34 = vadd.f32 1e-05, %v3045_v15 }
 0x921   :  { %v2953_v17 = vpop.xlane.xlu1 %2952  ;;  %v3010_v18 = vpop.xlane.xlu0 %3009 }
 0x922   :  { %v10495_v28 = vmul.f32 0.03125, %v2953_v17  ;;  %v3030_v0 = vmul.f32 0.03125, %v3010_v18  ;;  %v2853_v62 = vadd.f32 1e-05, %v2837_v31 }
 0x924   :  { %v3043_v17 = vmul.f32 %v10495_v28, %v10495_v28  ;;  %v3046_v5 = vsub.f32 %v3030_v0, %v3038_v23  ;;  %8653 = vrsqrt.f32 %v2853_v62 }
 0x925   :  { %v2947_v3 = vpop.xlane.xlu1 %2946  ;;  %v2808_v36 = vpop.xlane.xlu0 %2807  ;;  %8655 = vrsqrt.f32 %v3063_v60 }
 0x926   :  { %v2824_v42 = vmul.f32 0.03125, %v2808_v36  ;;  %v10503_v29 = vmul.f32 0.03125, %v2947_v3  ;;  %8657 = vrsqrt.f32 %v3061_v34  ;;  %v3062_v37 = vadd.f32 1e-05, %v3046_v5 }
 0x928   :  { %v2840_v36 = vsub.f32 %v2824_v42, %v2832_v24  ;;  %v3041_v30 = vmul.f32 %v10503_v29, %v10503_v29 }
 0x929   :  { %v2777_v53 = vpop.xlane.xlu1 %2776  ;;  %v2802_v2 = vpop.xlane.xlu0 %2801 }
 0x92a   :  { %v2822_v61 = vmul.f32 0.03125, %v2802_v2  ;;  %v3064_v2 = vadd.f32 1e-05, %v3048_v59  ;;  %v2856_v32 = vadd.f32 1e-05, %v2840_v36  ;;  %v10507_v31 = vmul.f32 0.03125, %v2777_v53 }
 0x92c   :  { %v2838_v22 = vsub.f32 %v2822_v61, %v2830_v43  ;;  %8659 = vrsqrt.f32 %v3064_v2  ;;  %v2835_v4 = vmul.f32 %v10507_v31, %v10507_v31 }
 0x92d   :  { %v3025_v27 = vpop.xlane.xlu1 %3024  ;;  %v2956_v51 = vpop.xlane.xlu0 %2955 }
 0x92e   :  { %v3035_v41 = vmul.f32 0.03125, %v3025_v27  ;;  %v2854_v18 = vadd.f32 1e-05, %v2838_v22  ;;  %v10509_v3 = vmul.f32 0.03125, %v2956_v51  ;;  %v8652_v51 = vpop.eup %8651  ;;  %v2847_v22 = vsub.f32 %v10319_v46, %v10467_v13 }
 0x92f   :  { %v8654_v36 = vpop.eup %8653 }
 0x930   :  { %v3051_v12 = vsub.f32 %v3035_v41, %v3043_v17  ;;  %8661 = vrsqrt.f32 %v2854_v18  ;;  %v3044_v53 = vmul.f32 %v10509_v3, %v10509_v3  ;;  %v8656_v5 = vpop.eup %8655  ;;  %v2845_v18 = vsub.f32 %v10327_v38, %v10469_v11 }
 0x931   :  { %v2771_v52 = vpop.xlane.xlu1 %2770  ;;  %v2950_v55 = vpop.xlane.xlu0 %2949  ;;  %8663 = vrsqrt.f32 %v2856_v32 }
 0x932   :  { %v3067_v56 = vadd.f32 1e-05, %v3051_v12  ;;  %v10513_v43 = vmul.f32 0.03125, %v2771_v52  ;;  %8665 = vrsqrt.f32 %v3062_v37  ;;  %v10521_v52 = vrot.slane %v10407_v50, %v9303_v8  ;;  %v8658_v13 = vpop.eup %8657 }
 0x933   :  { %v2871_v12 = vmul.f32 %v8652_v51, %v2847_v22  ;;  %v10527_v32 = vmul.f32 0.03125, %v2950_v55  ;;  %v3055_v37 = vsub.f32 %v10225_v45, %v10471_v48  ;;  %v2846_v48 = vsub.f32 %v10342_v14, %v10481_v1 }
 0x934   :  { %8667 = vrsqrt.f32 %v3067_v56  ;;  %v2833_v34 = vmul.f32 %v10513_v43, %v10513_v43  ;;  %v3053_v56 = vsub.f32 %v10237_v21, %v10475_v7  ;;  %v3059_v1 = vsub.f32 %v10281_v63, %v10495_v28 }
 0x935   :  { %v3019_v47 = vpop.xlane.xlu1 %3018  ;;  %v2780_v6 = vpop.xlane.xlu0 %2779  ;;  %v3042_v7 = vmul.f32 %v10527_v32, %v10527_v32  ;;  %v3079_v51 = vmul.f32 %v8656_v5, %v3055_v37  ;;  %v3057_v5 = vsub.f32 %v10293_v26, %v10503_v29  ;;  %v3060_v28 = vsub.f32 %v10289_v9, %v10509_v3 }
 0x936   :  { %v3033_v61 = vmul.f32 0.03125, %v3019_v47  ;;  %v10531_v47 = vrot.slane %v10407_v50, %v9309_v33  ;;  %v3054_v50 = vsub.f32 %v10245_v40, %v10491_v54 }
 0x938   :  { %v3049_v42 = vsub.f32 %v3033_v61, %v3041_v30  ;;  %v8660_v61 = vpop.eup %8659 }
 0x939   :  { %v2817_v27 = vpop.xlane.xlu1 %2816  ;;  %v3028_v15 = vpop.xlane.xlu0 %3027 }
 0x93a   :  { %v2827_v24 = vmul.f32 0.03125, %v2817_v27  ;;  %v3036_v59 = vmul.f32 0.03125, %v3028_v15  ;;  %v3065_v0 = vadd.f32 1e-05, %v3049_v42  ;;  %v2869_v42 = vmul.f32 %v8654_v36, %v2845_v18  ;;  %v8662_v55 = vpop.eup %8661 }
 0x93b   :  { %v3056_v15 = vsub.f32 %v10233_v16, %v10477_v35  ;;  %v2848_v35 = vsub.f32 %v10339_v19, %v10485_v57  ;;  %v2870_v22 = vmul.f32 %v8662_v55, %v2846_v48 }
 0x93c   :  { %v2843_v62 = vsub.f32 %v2827_v24, %v2835_v4  ;;  %v3052_v41 = vsub.f32 %v3036_v59, %v3044_v53  ;;  %8669 = vrsqrt.f32 %v3065_v0  ;;  %v10541_v4 = vmul.f32 0.03125, %v2780_v6  ;;  %v8664_v59 = vpop.eup %8663 }
 0x93d   :  { %v2811_v60 = vpop.xlane.xlu1 %2810  ;;  %v2774_v23 = vpop.xlane.xlu0 %2773  ;;  %v2883_v53 = vmul.f32 %v10521_v52, %v2871_v12  ;;  %v2881_v6 = vmul.f32 %v10521_v52, %v2869_v42  ;;  %v2872_v18 = vmul.f32 %v8664_v59, %v2848_v35  ;;  %v2849_v59 = vsub.f32 %v10372_v39, %v10513_v43 }
 0x93e   :  { %v2859_v17 = vadd.f32 1e-05, %v2843_v62  ;;  %v2825_v2 = vmul.f32 0.03125, %v2811_v60  ;;  %v3068_v11 = vadd.f32 1e-05, %v3052_v41  ;;  %v3077_v62 = vmul.f32 %v8658_v13, %v3053_v56  ;;  %v8666_v54 = vpop.eup %8665 }
 0x93f   :  { %v8668_v36 = vpop.eup %8667  ;;  %v2895_v57 = vadd.f32 %v10531_v47, %v2883_v53  ;;  %v3080_v13 = vmul.f32 %v8660_v61, %v3056_v15  ;;  %v2893_v42 = vadd.f32 %v10531_v47, %v2881_v6  ;;  %v2884_v3 = vmul.f32 %v10521_v52, %v2872_v18 }
 0x940   :  { %8671 = vrsqrt.f32 %v2859_v17  ;;  %v2841_v30 = vsub.f32 %v2825_v2, %v2833_v34  ;;  %v2836_v34 = vmul.f32 %v10541_v4, %v10541_v4  ;;  %v10555_v17 = vmul.f32 0.03125, %v2774_v23 }
 0x941   :  { %v3022_v27 = vpop.xlane.xlu0 %3021  ;;  %v10564_v37 = vpop.permute.xlu1 %3090  ;;  %v3083_v55 = vmul.f32 %v8668_v36, %v3059_v1 }
 0x942   :  { %v2857_v24 = vadd.f32 1e-05, %v2841_v30  ;;  %v3034_v0 = vmul.f32 0.03125, %v3022_v27  ;;  %v2851_v30 = vsub.f32 %v10360_v20, %v10507_v31  ;;  %v2882_v27 = vmul.f32 %v10521_v52, %v2870_v22 }
 0x943   :  { %v2834_v61 = vmul.f32 %v10555_v17, %v10555_v17  ;;  %v3093_v48 = vmul.f32 %v10564_v37, %v3077_v62  ;;  %v3095_v6 = vmul.f32 %v10564_v37, %v3079_v51  ;;  %v3096_v22 = vmul.f32 %v10564_v37, %v3080_v13  ;;  %v8435_v13 = vld [vmem:[%s12346_s4 + $0x2b8] sm:$0xff]  }
 0x944   :  { %8673 = vrsqrt.f32 %v2857_v24  ;;  %v3050_v41 = vsub.f32 %v3034_v0, %v3042_v7  ;;  %v2894_v35 = vadd.f32 %v10531_v47, %v2882_v27  ;;  %v3099_v43 = vmul.f32 %v10564_v37, %v3083_v55  ;;  %v8437_v27 = vld [vmem:[%s12346_s4 + $0x310] sm:$0xff]   ;;  %7890 = vmatprep.subr.bf16.mxu1 %v8435_v13 }
 0x945   :  { %8675 = vrsqrt.f32 %v3068_v11  ;;  %v2820_v60 = vpop.xlane.xlu0 %2819  ;;  %v3078_v11 = vmul.f32 %v8666_v54, %v3054_v50 }
 0x946   :  { %v2828_v2 = vmul.f32 0.03125, %v2820_v60  ;;  %v3066_v12 = vadd.f32 1e-05, %v3050_v41  ;;  %v8670_v23 = vpop.eup %8669 }
 0x947   :  { %v3081_v50 = vmul.f32 %v8670_v23, %v3057_v5  ;;  %v3094_v7 = vmul.f32 %v10564_v37, %v3078_v11  ;;  %v8436_v11 = vld [vmem:[%s12346_s4 + $0x278] sm:$0xff]  }
 0x948   :  { %v2844_v56 = vsub.f32 %v2828_v2, %v2836_v34  ;;  %8677 = vrsqrt.f32 %v3066_v12  ;;  %v8434_v12 = vld [vmem:[%s12346_s4 + $0x2c8] sm:$0xff]   ;;  %7891 = vmatpush3.bf16.msra.mxu1 %v8436_v11 }
 0x949   :  { %v2814_v29 = vpop.xlane.xlu0 %2813  ;;  %7919 = vmatpush3.bf16.msra.mxu0 %v8434_v12 }
 0x94a   :  { %v8672_v24 = vpop.eup %8671  ;;  %v2860_v31 = vadd.f32 1e-05, %v2844_v56  ;;  %v2826_v15 = vmul.f32 0.03125, %v2814_v29  ;;  %v3097_v56 = vmul.f32 %v10564_v37, %v3081_v50  ;;  %7920 = vmatprep.subr.bf16.mxu0 %v8437_v27 }
 0x94b   :  { %v2875_v53 = vmul.f32 %v8672_v24, %v2851_v30  ;;  %v2896_v30 = vadd.f32 %v10531_v47, %v2884_v3 }
 0x94c   :  { %8679 = vrsqrt.f32 %v2860_v31  ;;  %v2842_v0 = vsub.f32 %v2826_v15, %v2834_v61 }
 0x94d   :  { %v2887_v54 = vmul.f32 %v10521_v52, %v2875_v53  ;;  %v10579_v41 = vpop.permute.xlu0 %3106  ;;  %v3058_v53 = vsub.f32 %v10301_v25, %v10527_v32  ;;  %v8441_v32 = vld [vmem:[%s12346_s4 + $0x2d8] sm:$0xff]  }
 0x94e   :  { %v8674_v60 = vpop.eup %8673  ;;  %v2858_v36 = vadd.f32 1e-05, %v2842_v0  ;;  %v3109_v62 = vadd.f32 %v10579_v41, %v3093_v48  ;;  %v3110_v1 = vadd.f32 %v10579_v41, %v3094_v7  ;;  %v3111_v18 = vadd.f32 %v10579_v41, %v3095_v6  ;;  %v8439_v7 = vld [vmem:[%s12346_s4 + $0x318] sm:$0xff]   ;;  %v10629_v0 = vld [vmem:[%s12346_s4 + $0x340] sm:$0xff]  }
 0x94f   :  { %v8676_v34 = vpop.eup %8675  ;;  %v2899_v2 = vadd.f32 %v10531_v47, %v2887_v54  ;;  %v2873_v5 = vmul.f32 %v8674_v60, %v2849_v59  ;;  %v3112_v51 = vadd.f32 %v10579_v41, %v3096_v22  ;;  %v3115_v23 = vadd.f32 %v10579_v41, %v3099_v43  ;;  %8222 = vmatprep.subr.bf16.mxu1 %v10629_v0 }
 0x950   :  { %8681 = vrsqrt.f32 %v2858_v36  ;;  %v3117_v29 = vsel %vm316_vm2, %v2893_v42, %v3109_v62  ;;  %v3118_v24 = vsel %vm316_vm2, %v2894_v35, %v3110_v1  ;;  %v3119_v61 = vsel %vm316_vm2, %v2895_v57, %v3111_v18  ;;  %v8438_v57 = vld [vmem:[%s12346_s4 + $0x2d0] sm:$0xff]  }
 0x951   :  { %v2885_v55 = vmul.f32 %v10521_v52, %v2873_v5  ;;  %v3084_v31 = vmul.f32 %v8676_v34, %v3060_v28  ;;  %v3120_v15 = vsel %vm316_vm2, %v2896_v30, %v3112_v51  ;;  %v3123_v3 = vsel %vm316_vm2, %v2899_v2, %v3115_v23  ;;  %3125 = vst.msk [vmem:[#allocation2 + $0x20] sm:$0xff] %vm290_vm3, %v3117_v29  ;;  %v8443_v51 = vld [vmem:[%s12346_s4 + $0x2e0] sm:$0xff]  }
 0x952   :  { %3126 = vst.msk [vmem:[#allocation2 + $0x28] sm:$0xff] %vm290_vm3, %v3118_v24  ;;  %3127 = vst.msk [vmem:[#allocation2 + $0x30] sm:$0xff] %vm290_vm3, %v3119_v61  ;;  %v3113_v59 = vadd.f32 %v10579_v41, %v3097_v56  ;;  %v8678_v28 = vpop.eup %8677  ;;  %v2852_v48 = vsub.f32 %v10377_v49, %v10541_v4  ;;  %7921 = vmatpush3.bf16.msra.mxu0 %v8438_v57  ;;  %v8442_v4 = vld [vmem:[%s12346_s4 + $0x320] sm:$0xff]   ;;  %v2850_v60 = vsub.f32 %v10389_v10, %v10555_v17 }
 0x953   :  { %v2897_v42 = vadd.f32 %v10531_v47, %v2885_v55  ;;  %3128 = vst.msk [vmem:[#allocation2 + $0x38] sm:$0xff] %vm290_vm3, %v3120_v15  ;;  %3131 = vst.msk [vmem:[#allocation2 + $0x90] sm:$0xff] %vm290_vm3, %v3123_v3  ;;  %v3100_v54 = vmul.f32 %v10564_v37, %v3084_v31  ;;  %v3082_v6 = vmul.f32 %v8678_v28, %v3058_v53  ;;  %7922 = vmatprep.subr.bf16.mxu0 %v8439_v7  ;;  %v8444_v31 = vld [vmem:[%s12346_s4 + $0x328] sm:$0xff]   ;;  %v8447_v15 = vld [vmem:[%s12346_s4 + $0x330] sm:$0xff]  }
 0x954   :  { %v8448_v3 = vld [vmem:[%s12346_s4 + $0x2f0] sm:$0xff]  }
 0x955   :  { %v3121_v50 = vsel %vm316_vm2, %v2897_v42, %v3113_v59  ;;  %v3116_v2 = vadd.f32 %v10579_v41, %v3100_v54  ;;  %v3098_v12 = vmul.f32 %v10564_v37, %v3082_v6  ;;  %v8449_v42 = vld [vmem:[%s12346_s4 + $0x338] sm:$0xff]  }
 0x956   :  { %v8680_v35 = vpop.eup %8679  ;;  %3129 = vst.msk [vmem:[#allocation2 + $0x80] sm:$0xff] %vm290_vm3, %v3121_v50  ;;  %7923 = vmatpush3.bf16.msra.mxu0 %v8441_v32  ;;  %v8451_v59 = vld [vmem:[%s12346_s4 + $0x2f8] sm:$0xff]  }
 0x957   :  { %v2876_v22 = vmul.f32 %v8680_v35, %v2852_v48  ;;  %7924 = vmatprep.subr.bf16.mxu0 %v8442_v4  ;;  %v3114_v29 = vadd.f32 %v10579_v41, %v3098_v12 }
 0x958   :  { %v3169_v62 = vld [vmem:[#allocation2 + $0x1e] sm:$0xff] }
 0x959   :  { %v2888_v43 = vmul.f32 %v10521_v52, %v2876_v22  ;;  %v10643_v36 = vld [vmem:[#allocation2 + $0x2e] sm:$0xff]  ;;  %v3170_v1 = vld [vmem:[#allocation2 + $0x26] sm:$0xff]  ;;  %v3145_v56 = vld [vmem:[#allocation2 + $0x1a] sm:$0xff] }
 0x95a   :  { %v8682_v34 = vpop.eup %8681  ;;  %v3172_v5 = vld [vmem:[#allocation2 + $0x36] sm:$0xff]  ;;  %v3177_v18 = vpack.c.bf16 %v3170_v1, %v3169_v62  ;;  %v3146_v23 = vld [vmem:[#allocation2 + $0x22] sm:$0xff]  ;;  %7925 = vmatpush3.bf16.msra.mxu0 %v8443_v51  ;;  %v3147_v24 = vld [vmem:[#allocation2 + $0x2a] sm:$0xff] }
 0x95b   :  { %v2900_v17 = vadd.f32 %v10531_v47, %v2888_v43  ;;  %v2874_v13 = vmul.f32 %v8682_v34, %v2850_v60  ;;  %v3178_v30 = vpack.c.bf16 %v3172_v5, %v10643_v36  ;;  %v3153_v55 = vpack.c.bf16 %v3146_v23, %v3145_v56  ;;  %v3148_v61 = vld [vmem:[#allocation2 + $0x32] sm:$0xff]  ;;  %7926 = vmatprep.subr.bf16.mxu0 %v8444_v31  ;;  %v3199_v62 = vld [vmem:[#allocation2 + $0x3e] sm:$0xff] }
 0x95c   :  { %3225 = vrot.lane.b32.xlu1 %v3177_v18, %s8862_s26  ;;  %v3154_v41 = vpack.c.bf16 %v3148_v61, %v3147_v24  ;;  %v3201_v60 = vpack.c.bf16 %v10643_v36, %v3170_v1  ;;  %v3189_v43 = vpack.c.bf16 %v3147_v24, %v3146_v23  ;;  %v3187_v34 = vld [vmem:[#allocation2 + $0x3a] sm:$0xff] }
 0x95d   :  { %v2886_v11 = vmul.f32 %v10521_v52, %v2874_v13  ;;  %v3124_v27 = vsel %vm316_vm2, %v2900_v17, %v3116_v2  ;;  %3227 = vrot.lane.b32.xlu0 %v3178_v30, %s8862_s26  ;;  %v8446_v52 = vld [vmem:[%s12346_s4 + $0x2e8] sm:$0xff]   ;;  %v3173_v57 = vld [vmem:[#allocation2 + $0x7e] sm:$0xff]  ;;  %v3202_v2 = vpack.c.bf16 %v3199_v62, %v3172_v5  ;;  %v3190_v18 = vpack.c.bf16 %v3187_v34, %v3148_v61 }
 0x95e   :  { %3132 = vst.msk [vmem:[#allocation2 + $0x98] sm:$0xff] %vm290_vm3, %v3124_v27  ;;  %7927 = vmatpush3.bf16.msra.mxu0 %v8446_v52  ;;  %v3149_v53 = vld [vmem:[#allocation2 + $0x7a] sm:$0xff]  ;;  %v3158_v30 = vld [vmem:[#allocation2 + $0x24] sm:$0xff] }
 0x95f   :  { %v2898_v37 = vadd.f32 %v10531_v47, %v2886_v11  ;;  %7928 = vmatprep.subr.bf16.mxu0 %v8447_v15  ;;  %v3157_v5 = vld [vmem:[#allocation2 + $0x1c] sm:$0xff]  ;;  %v8445_v15 = vld [vmem:[%s12346_s4 + $0x348] sm:$0xff]  }
 0x960   :  { %3213 = vrot.lane.b32.xlu1 %v3153_v55, %s8862_s26  ;;  %v3165_v56 = vpack.c.bf16 %v3158_v30, %v3157_v5  ;;  %v3133_v11 = vld [vmem:[#allocation2 + $0x18] sm:$0xff]  ;;  %v3134_v27 = vld [vmem:[#allocation2 + $0x20] sm:$0xff] }
 0x961   :  { %v3122_v47 = vsel %vm316_vm2, %v2898_v37, %v3114_v29  ;;  %v3159_v37 = vld [vmem:[#allocation2 + $0x2c] sm:$0xff]  ;;  %v3160_v29 = vld [vmem:[#allocation2 + $0x34] sm:$0xff]  ;;  %v3141_v61 = vpack.c.bf16 %v3134_v27, %v3133_v11  ;;  %v3193_v5 = vld [vmem:[#allocation2 + $0x3c] sm:$0xff] }
 0x962   :  { %3130 = vst.msk [vmem:[#allocation2 + $0x88] sm:$0xff] %vm290_vm3, %v3122_v47  ;;  %7929 = vmatpush3.bf16.msra.mxu0 %v8448_v3  ;;  %v3166_v52 = vpack.c.bf16 %v3160_v29, %v3159_v37  ;;  %v3135_v3 = vld [vmem:[#allocation2 + $0x28] sm:$0xff]  ;;  %v3140_v11 = vld [vmem:[#allocation2 + $0x90] sm:$0xff] }
 0x963   :  { %7930 = vmatprep.subr.bf16.mxu0 %v8449_v42  ;;  %v3136_v42 = vld [vmem:[#allocation2 + $0x30] sm:$0xff] }
 0x964   :  { %3215 = vrot.lane.b32.xlu1 %v3154_v41, %s8862_s26 }
 0x965   :  { %v3176_v32 = vld [vmem:[#allocation2 + $0x96] sm:$0xff]  ;;  %v3200_v17 = vld [vmem:[#allocation2 + $0x9e] sm:$0xff] }
 0x966   :  { %7931 = vmatpush3.bf16.msra.mxu0 %v8451_v59  ;;  %v3152_v4 = vld [vmem:[#allocation2 + $0x92] sm:$0xff]  ;;  %v3188_v13 = vld [vmem:[#allocation2 + $0x9a] sm:$0xff]  ;;  %v3204_v36 = vpack.c.bf16 %v3200_v17, %v3176_v32  ;;  %v3195_v17 = vpack.c.bf16 %v3159_v37, %v3158_v30 }
 0x967   :  { %v3192_v1 = vpack.c.bf16 %v3188_v13, %v3152_v4  ;;  %v8450_v59 = vld [vmem:[%s12346_s4 + $0x350] sm:$0xff]  }
 0x969   :  { %v3174_v28 = vld [vmem:[#allocation2 + $0x86] sm:$0xff]  ;;  %v3175_v35 = vld [vmem:[#allocation2 + $0x8e] sm:$0xff] }
 0x96a   :  { %v3150_v48 = vld [vmem:[#allocation2 + $0x82] sm:$0xff]  ;;  %v3179_v50 = vpack.c.bf16 %v3174_v28, %v3173_v57  ;;  %v3151_v54 = vld [vmem:[#allocation2 + $0x8a] sm:$0xff]  ;;  %v3180_v6 = vpack.c.bf16 %v3176_v32, %v3175_v35  ;;  %v3203_v51 = vpack.c.bf16 %v3175_v35, %v3174_v28  ;;  %v3142_v28 = vpack.c.bf16 %v3136_v42, %v3135_v3  ;;  %v3137_v32 = vld [vmem:[#allocation2 + $0x78] sm:$0xff] }
 0x96b   :  { %v3155_v7 = vpack.c.bf16 %v3150_v48, %v3149_v53  ;;  %v3156_v22 = vpack.c.bf16 %v3152_v4, %v3151_v54  ;;  %v3191_v12 = vpack.c.bf16 %v3151_v54, %v3150_v48  ;;  %v3162_v53 = vld [vmem:[#allocation2 + $0x84] sm:$0xff]  ;;  %v8452_v48 = vld [vmem:[%s12346_s4 + $0x358] sm:$0xff]  }
 0x96c   :  { %3229 = vrot.lane.b32.xlu0 %v3179_v50, %s8862_s26  ;;  %v3138_v4 = vld [vmem:[#allocation2 + $0x80] sm:$0xff] }
 0x96d   :  { %3217 = vrot.lane.b32.xlu1 %v3155_v7, %s8862_s26 }
 0x970   :  { %3231 = vrot.lane.b32.xlu0 %v3180_v6, %s8862_s26  ;;  %v3163_v6 = vld [vmem:[#allocation2 + $0x8c] sm:$0xff] }
 0x971   :  { %3219 = vrot.lane.b32.xlu1 %v3156_v22, %s8862_s26 }
 0x974   :  { %3249 = vrot.lane.b32.xlu0 %v3201_v60, %s8862_s26  ;;  %v3164_v60 = vld [vmem:[#allocation2 + $0x94] sm:$0xff] }
 0x975   :  { %3237 = vrot.lane.b32.xlu1 %v3189_v43, %s8862_s26  ;;  %v3143_v43 = vpack.c.bf16 %v3138_v4, %v3137_v32  ;;  %v3168_v62 = vpack.c.bf16 %v3164_v60, %v3163_v6 }
 0x978   :  { %3251 = vrot.lane.b32.xlu0 %v3202_v2, %s8862_s26 }
 0x979   :  { %3239 = vrot.lane.b32.xlu1 %v3190_v18, %s8862_s26 }
 0x97c   :  { %3253 = vrot.lane.b32.xlu0 %v3203_v51, %s8862_s26 }
 0x97d   :  { %3241 = vrot.lane.b32.xlu1 %v3191_v12, %s8862_s26  ;;  %v3183_v12 = vpack.c.bf16 %v3135_v3, %v3134_v27  ;;  %v3181_v27 = vld [vmem:[#allocation2 + $0x38] sm:$0xff] }
 0x980   :  { %3255 = vrot.lane.b32.xlu0 %v3204_v36, %s8862_s26 }
 0x981   :  { %3243 = vrot.lane.b32.xlu1 %v3192_v1, %s8862_s26  ;;  %v3139_v1 = vld [vmem:[#allocation2 + $0x88] sm:$0xff] }
 0x9ce   :  { %v3226_v23 = vpop.permute.xlu1 %3225 }
 0x9cf   :  { %v3275_v55 = vsel %vm290_vm3, %v3165_v56, %v3226_v23  ;;  %v3228_v24 = vpop.permute.xlu0 %3227 }
 0x9d0   :  { %3660 = vmatprep.mubr.bf16.mxu1 %v3275_v55  ;;  %v3279_v41 = vsel %vm290_vm3, %v3166_v52, %v3228_v24  ;;  %v3144_v55 = vpack.c.bf16 %v3140_v11, %v3139_v1  ;;  %v3196_v24 = vpack.c.bf16 %v3193_v5, %v3160_v29 }
 0x9d2   :  { %v3214_v31 = vpop.permute.xlu1 %3213 }
 0x9d3   :  { %v3259_v47 = vsel %vm290_vm3, %v3141_v61, %v3214_v31 }
 0x9d4   :  { %3661 = vmatmul.mubr.bf16.vlgmr.msra.gmra.mrb[40].mxu1 %v3259_v47  ;;  %v3205_v47 = vld [vmem:[#allocation2 + $0x40] sm:$0xff] }
 0x9d5   :  { %3668 = vmatprep.mubr.bf16.mxu1 %v3279_v41  ;;  %8223 = vmatpush3.bf16.msra.mxu1 %v10629_v0  ;;  %v3161_v0 = vld [vmem:[#allocation2 + $0x7c] sm:$0xff]  ;;  %v3197_v41 = vpack.c.bf16 %v3163_v6, %v3162_v53 }
 0x9d6   :  { %8224 = vmatprep.subr.bf16.mxu1 %v8445_v15  ;;  %v3216_v57 = vpop.permute.xlu1 %3215  ;;  %v3167_v7 = vpack.c.bf16 %v3162_v53, %v3161_v0  ;;  %v3185_v0 = vpack.c.bf16 %v3139_v1, %v3138_v4 }
 0x9d7   :  { %v3263_v50 = vsel %vm290_vm3, %v3142_v28, %v3216_v57  ;;  %v3194_v57 = vld [vmem:[#allocation2 + $0x9c] sm:$0xff] }
 0x9d9   :  { %8225 = vmatpush3.bf16.msra.mxu1 %v8445_v15  ;;  %v3184_v15 = vpack.c.bf16 %v3181_v27, %v3136_v42  ;;  %v3206_v42 = vld [vmem:[#allocation2 + $0xa0] sm:$0xff] }
 0x9da   :  { %8226 = vmatprep.subr.bf16.mxu1 %v8450_v59 }
 0x9dc   :  { %3669 = vmatmul.mubr.bf16.gmra.mrb[44].mxu1 %v3263_v50 }
 0x9dd   :  { %8227 = vmatpush3.bf16.msra.mxu1 %v8450_v59  ;;  %v3207_v59 = vpack.c.bf16 %v3205_v47, %v3181_v27 }
 0x9de   :  { %v3230_v35 = vpop.permute.xlu0 %3229  ;;  %8228 = vmatprep.subr.bf16.mxu1 %v8452_v48 }
 0x9df   :  { %v3218_v54 = vpop.permute.xlu1 %3217  ;;  %v3283_v22 = vsel %vm290_vm3, %v3167_v7, %v3230_v35  ;;  %v3182_v7 = vld [vmem:[#allocation2 + $0x98] sm:$0xff] }
 0x9e0   :  { %3676 = vmatprep.mubr.bf16.mxu1 %v3283_v22  ;;  %v3267_v18 = vsel %vm290_vm3, %v3143_v43, %v3218_v54  ;;  %v3208_v54 = vpack.c.bf16 %v3206_v42, %v3182_v7  ;;  %v3186_v6 = vpack.c.bf16 %v3182_v7, %v3140_v11 }
 0x9e1   :  { %8229 = vmatpush3.bf16.msra.mxu1 %v8452_v48 }
 0x9e2   :  { %v3232_v34 = vpop.permute.xlu0 %3231 }
 0x9e3   :  { %v3220_v2 = vpop.permute.xlu1 %3219  ;;  %v3287_v51 = vsel %vm290_vm3, %v3168_v62, %v3232_v34 }
 0x9e4   :  { %3677 = vmatmul.mubr.bf16.gmra.mrb[48].mxu1 %v3267_v18  ;;  %v3271_v31 = vsel %vm290_vm3, %v3144_v55, %v3220_v2 }
 0x9e5   :  { %3684 = vmatprep.mubr.bf16.mxu1 %v3287_v51 }
 0x9e6   :  { %v3250_v13 = vpop.permute.xlu0 %3249 }
 0x9e7   :  { %v3238_v36 = vpop.permute.xlu1 %3237  ;;  %v3307_v23 = vsel %vm290_vm3, %v3195_v17, %v3250_v13 }
 0x9e8   :  { %v3291_v56 = vsel %vm290_vm3, %v3183_v12, %v3238_v36  ;;  %3725 = vmatprep.mubr.bf16.mxu0 %v3307_v23 }
 0x9e9   :  { %3726 = vmatmul.mubr.bf16.vlgmr.msra.gmra.mrb[48].mxu0 %v3291_v56 }
 0x9ea   :  { %v3252_v61 = vpop.permute.xlu0 %3251 }
 0x9eb   :  { %v3311_v52 = vsel %vm290_vm3, %v3196_v24, %v3252_v61  ;;  %v3240_v30 = vpop.permute.xlu1 %3239 }
 0x9ec   :  { %3685 = vmatmul.mubr.bf16.gmra.mrb[52].mxu1 %v3271_v31  ;;  %3733 = vmatprep.mubr.bf16.mxu0 %v3311_v52  ;;  %v3295_v3 = vsel %vm290_vm3, %v3184_v15, %v3240_v30 }
 0x9ed   :  { %8230 = vmatprep.mubr.msk.bf16.mxu1 %vm290_vm3, %v3142_v28  ;;  %v3198_v28 = vpack.c.bf16 %v3194_v57, %v3164_v60 }
 0x9ee   :  { %v3254_v37 = vpop.permute.xlu0 %3253 }
 0x9ef   :  { %v3315_v29 = vsel %vm290_vm3, %v3197_v41, %v3254_v37  ;;  %v3242_v48 = vpop.permute.xlu1 %3241 }
 0x9f0   :  { %v3299_v53 = vsel %vm290_vm3, %v3185_v0, %v3242_v48 }
 0x9f1   :  { %3734 = vmatmul.mubr.bf16.gmra.mrb[52].mxu0 %v3295_v3 }
 0x9f2   :  { %3741 = vmatprep.mubr.bf16.mxu0 %v3315_v29  ;;  %v3256_v50 = vpop.permute.xlu0 %3255 }
 0x9f3   :  { %v3319_v35 = vsel %vm290_vm3, %v3198_v28, %v3256_v50  ;;  %v3244_v32 = vpop.permute.xlu1 %3243 }
 0x9f4   :  { %8231 = vmatmul.mubr.msk.bf16.vlgmr.msra.gmra.mrb[56].mxu1 %vm290_vm3, %v3207_v59  ;;  %v3303_v22 = vsel %vm290_vm3, %v3186_v6, %v3244_v32 }
 0x9f5   :  { %8234 = vmatprep.mubr.msk.bf16.mxu1 %vm290_vm3, %v3144_v55  ;;  %v10727_v55 = vld [vmem:[%s12347_s5 + $0x2] ss:$0 sm:$0xff] }
 0x9f9   :  { %3742 = vmatmul.mubr.bf16.gmra.mrb[56].mxu0 %v3299_v53 }
 0x9fa   :  { %3749 = vmatprep.mubr.bf16.mxu0 %v3319_v35 }
 0x9fc   :  { %8235 = vmatmul.mubr.msk.bf16.gmra.mrb[60].mxu1 %vm290_vm3, %v3208_v54 }
 0xa01   :  { %3750 = vmatmul.mubr.bf16.gmra.mrb[60].mxu0 %v3303_v22 }
 0xaa7   :  { %v7892_v43 = vpop.f32.mrb[40].mxu1 }
 0xaa8   :  { %v7893_v62 = vpop.f32.mrb[41].mxu1 }
 0xaa9   :  { %v7894_v4 = vadd.f32 %v7893_v62, %v7892_v43  ;;  %v7895_v60 = vpop.f32.mrb[42].mxu1 }
 0xaaa   :  { %v7896_v34 = vpop.f32.mrb[43].mxu1 }
 0xaab   :  { %v7897_v2 = vadd.f32 %v7896_v34, %v7895_v60  ;;  %v3663_v52 = vadd.f32 %v7894_v4, %v10727_v55 }
 0xaad   :  { %v3666_v47 = vadd.f32 %v7897_v2, %v10727_v55 }
 0xaaf   :  { %v7898_v18 = vpop.f32.mrb[44].mxu1 }
 0xab0   :  { %v7899_v51 = vpop.f32.mrb[45].mxu1 }
 0xab1   :  { %v7900_v12 = vadd.f32 %v7899_v51, %v7898_v18  ;;  %v7901_v17 = vpop.f32.mrb[46].mxu1 }
 0xab2   :  { %v7902_v13 = vpop.f32.mrb[47].mxu1 }
 0xab3   :  { %v7903_v36 = vadd.f32 %v7902_v13, %v7901_v17  ;;  %v3671_v42 = vadd.f32 %v7900_v12, %v10727_v55 }
 0xab5   :  { %v3674_v6 = vadd.f32 %v7903_v36, %v10727_v55 }
 0xab7   :  { %v7904_v1 = vpop.f32.mrb[48].mxu1 }
 0xab8   :  { %v7905_v5 = vpop.f32.mrb[49].mxu1 }
 0xab9   :  { %v7906_v56 = vadd.f32 %v7905_v5, %v7904_v1  ;;  %v7907_v23 = vpop.f32.mrb[50].mxu1 }
 0xaba   :  { %v7908_v11 = vpop.f32.mrb[51].mxu1 }
 0xabb   :  { %v7909_v24 = vadd.f32 %v7908_v11, %v7907_v23  ;;  %v3679_v11 = vadd.f32 %v7906_v56, %v10727_v55 }
 0xabc   :  { %v7932_v61 = vpop.f32.mrb[48].mxu0 }
 0xabd   :  { %v7933_v31 = vpop.f32.mrb[49].mxu0 }
 0xabe   :  { %v7934_v27 = vadd.f32 %v7933_v31, %v7932_v61  ;;  %v7935_v30 = vpop.f32.mrb[50].mxu0 }
 0xabf   :  { %v7910_v37 = vpop.f32.mrb[52].mxu1  ;;  %v7936_v15 = vpop.f32.mrb[51].mxu0 }
 0xac0   :  { %v7911_v41 = vpop.f32.mrb[53].mxu1  ;;  %v7937_v3 = vadd.f32 %v7936_v15, %v7935_v30  ;;  %v3728_v29 = vadd.f32 %v7934_v27, %v3663_v52  ;;  %v3682_v30 = vadd.f32 %v7909_v24, %v10727_v55 }
 0xac1   :  { %v7912_v59 = vadd.f32 %v7911_v41, %v7910_v37  ;;  %v7913_v57 = vpop.f32.mrb[54].mxu1 }
 0xac2   :  { %v7914_v48 = vpop.f32.mrb[55].mxu1  ;;  %v3731_v50 = vadd.f32 %v7937_v3, %v3666_v47 }
 0xac3   :  { %v10731_v0 = vadd.f32 %v7914_v48, %v7913_v57 }
 0xac4   :  { %v7938_v28 = vpop.f32.mrb[52].mxu0 }
 0xac5   :  { %v7939_v7 = vpop.f32.mrb[53].mxu0 }
 0xac6   :  { %v7940_v53 = vadd.f32 %v7939_v7, %v7938_v28  ;;  %v7941_v35 = vpop.f32.mrb[54].mxu0 }
 0xac7   :  { %v8232_v54 = vpop.f32.mrb[56].mxu1  ;;  %v7942_v32 = vpop.f32.mrb[55].mxu0 }
 0xac8   :  { %v3736_v22 = vadd.f32 %v7940_v53, %v3671_v42  ;;  %v7943_v43 = vadd.f32 %v7942_v32, %v7941_v35  ;;  %v3792_v62 = vpop.f32.mrb[57].mxu1 }
 0xac9   :  { %v10735_v4 = vadd.f32 %v3792_v62, %v3728_v29  ;;  %v8233_v60 = vpop.f32.mrb[58].mxu1 }
 0xaca   :  { %v10737_v34 = vadd.f32 %v8232_v54, %v3736_v22  ;;  %v3739_v2 = vadd.f32 %v7943_v43, %v3674_v6  ;;  %v3795_v18 = vpop.f32.mrb[59].mxu1 }
 0xacb   :  { %v3831_v51 = vmul.f32 0.044715, %v10735_v4  ;;  %v10740_v17 = vadd.f32 %v3795_v18, %v3731_v50 }
 0xacc   :  { %v3833_v12 = vmul.f32 0.044715, %v10737_v34  ;;  %v10743_v13 = vadd.f32 %v8233_v60, %v3739_v2  ;;  %v7944_v1 = vpop.f32.mrb[56].mxu0 }
 0xacd   :  { %v3839_v36 = vmul.f32 %v3831_v51, %v10735_v4  ;;  %v3832_v5 = vmul.f32 0.044715, %v10740_v17  ;;  %v7945_v23 = vpop.f32.mrb[57].mxu0  ;;  %v3687_v51 = vadd.f32 %v7912_v59, %v10727_v55 }
 0xace   :  { %v3841_v61 = vmul.f32 %v3833_v12, %v10737_v34  ;;  %v3834_v31 = vmul.f32 0.044715, %v10743_v13  ;;  %v7946_v52 = vadd.f32 %v7945_v23, %v7944_v1  ;;  %v7947_v27 = vpop.f32.mrb[58].mxu0  ;;  %v3690_v23 = vadd.f32 %v10731_v0, %v10727_v55 }
 0xacf   :  { %v3847_v37 = vmul.f32 %v3839_v36, %v10735_v4  ;;  %v3840_v15 = vmul.f32 %v3832_v5, %v10740_v17  ;;  %v8236_v47 = vpop.f32.mrb[60].mxu1  ;;  %v7948_v41 = vpop.f32.mrb[59].mxu0 }
 0xad0   :  { %v3849_v3 = vmul.f32 %v3841_v61, %v10737_v34  ;;  %v3842_v29 = vmul.f32 %v3834_v31, %v10743_v13  ;;  %v7949_v57 = vadd.f32 %v7948_v41, %v7947_v27  ;;  %v3744_v56 = vadd.f32 %v7946_v52, %v3679_v11  ;;  %v3808_v48 = vpop.f32.mrb[61].mxu1 }
 0xad1   :  { %v3855_v50 = vadd.f32 %v3847_v37, %v10735_v4  ;;  %v3848_v28 = vmul.f32 %v3840_v15, %v10740_v17  ;;  %v8237_v7 = vpop.f32.mrb[62].mxu1 }
 0xad2   :  { %v3857_v24 = vadd.f32 %v3849_v3, %v10737_v34  ;;  %v3850_v42 = vmul.f32 %v3842_v29, %v10743_v13  ;;  %v10759_v53 = vadd.f32 %v3808_v48, %v3744_v56  ;;  %v3747_v35 = vadd.f32 %v7949_v57, %v3682_v30  ;;  %v3811_v54 = vpop.f32.mrb[63].mxu1 }
 0xad3   :  { %v3856_v32 = vadd.f32 %v3848_v28, %v10740_v17  ;;  %v3863_v6 = vmul.f32 0.7978846, %v3855_v50  ;;  %v3825_v56 = vmul.f32 0.5, %v10737_v34  ;;  %v3823_v34 = vmul.f32 0.5, %v10735_v4 }
 0xad4   :  { %v3858_v22 = vadd.f32 %v3850_v42, %v10743_v13  ;;  %v10763_v43 = vadd.f32 %v3811_v54, %v3747_v35  ;;  %v7950_v62 = vpop.f32.mrb[60].mxu0  ;;  %v3865_v60 = vmul.f32 0.7978846, %v3857_v24  ;;  %v3835_v31 = vmul.f32 0.044715, %v10759_v53 }
 0xad5   :  { %v7951_v2 = vpop.f32.mrb[61].mxu0  ;;  %8683 = vtanh.f32 %v3863_v6  ;;  %v3864_v18 = vmul.f32 0.7978846, %v3856_v32  ;;  %v3826_v32 = vmul.f32 0.5, %v10743_v13  ;;  %v3824_v13 = vmul.f32 0.5, %v10740_v17 }
 0xad6   :  { %v7952_v12 = vadd.f32 %v7951_v2, %v7950_v62  ;;  %v7953_v1 = vpop.f32.mrb[62].mxu0  ;;  %8685 = vtanh.f32 %v3865_v60  ;;  %v3866_v5 = vmul.f32 0.7978846, %v3858_v22  ;;  %v3836_v37 = vmul.f32 0.044715, %v10763_v43 }
 0xad7   :  { %v7954_v36 = vpop.f32.mrb[63].mxu0  ;;  %8687 = vtanh.f32 %v3864_v18  ;;  %v3843_v15 = vmul.f32 %v3835_v31, %v10759_v53 }
 0xad8   :  { %v3752_v11 = vadd.f32 %v7952_v12, %v3687_v51  ;;  %v7955_v61 = vadd.f32 %v7954_v36, %v7953_v1  ;;  %8689 = vtanh.f32 %v3866_v5  ;;  %v3844_v57 = vmul.f32 %v3836_v37, %v10763_v43 }
 0xad9   :  { %v3851_v28 = vmul.f32 %v3843_v15, %v10759_v53 }
 0xada   :  { %v10769_v52 = vadd.f32 %v8236_v47, %v3752_v11  ;;  %v3755_v27 = vadd.f32 %v7955_v61, %v3690_v23  ;;  %v3852_v22 = vmul.f32 %v3844_v57, %v10763_v43  ;;  %v3827_v57 = vmul.f32 0.5, %v10759_v53 }
 0xadb   :  { %v3859_v60 = vadd.f32 %v3851_v28, %v10759_v53 }
 0xadc   :  { %v3837_v30 = vmul.f32 0.044715, %v10769_v52  ;;  %v10772_v59 = vadd.f32 %v8237_v7, %v3755_v27  ;;  %v3860_v1 = vadd.f32 %v3852_v22, %v10763_v43 }
 0xadd   :  { %v3867_v5 = vmul.f32 0.7978846, %v3859_v60 }
 0xade   :  { %v3845_v41 = vmul.f32 %v3837_v30, %v10769_v52  ;;  %v3838_v55 = vmul.f32 0.044715, %v10772_v59  ;;  %v3868_v17 = vmul.f32 0.7978846, %v3860_v1 }
 0xadf   :  { %v8684_v0 = vpop.eup %8683 }
 0xae0   :  { %v8686_v3 = vpop.eup %8685  ;;  %v3846_v29 = vmul.f32 %v3838_v55, %v10772_v59  ;;  %v3853_v47 = vmul.f32 %v3845_v41, %v10769_v52  ;;  %v3879_v54 = vadd.f32 1.0, %v8684_v0 }
 0xae1   :  { %v3881_v48 = vadd.f32 1.0, %v8686_v3  ;;  %v8688_v50 = vpop.eup %8687 }
 0xae2   :  { %v3861_v7 = vadd.f32 %v3853_v47, %v10769_v52  ;;  %v3854_v24 = vmul.f32 %v3846_v29, %v10772_v59  ;;  %v8690_v42 = vpop.eup %8689  ;;  %v3880_v18 = vadd.f32 1.0, %v8688_v50  ;;  %v10796_v12 = vmul.f32 %v3879_v54, %v3823_v34 }
 0xae3   :  { %v10785_v35 = vmul.f32 %v3881_v48, %v3825_v56  ;;  %v3882_v6 = vadd.f32 1.0, %v8690_v42  ;;  %v3830_v47 = vmul.f32 0.5, %v10772_v59  ;;  %v3828_v50 = vmul.f32 0.5, %v10763_v43 }
 0xae4   :  { %v3862_v62 = vadd.f32 %v3854_v24, %v10772_v59  ;;  %v3869_v51 = vmul.f32 0.7978846, %v3861_v7  ;;  %v10804_v36 = vmul.f32 %v3880_v18, %v3824_v13  ;;  %v10820_v61 = vadd.f32 %v10796_v12, %v10237_v21 }
 0xae5   :  { %3907 = vrot.lane.b32.xlu0 %v10785_v35, %s8859_s0  ;;  %v10794_v2 = vmul.f32 %v3882_v6, %v3826_v32  ;;  %v10808_v23 = vadd.f32 %v10785_v35, %v10225_v45 }
 0xae6   :  { %v3870_v4 = vmul.f32 0.7978846, %v3862_v62  ;;  %8691 = vtanh.f32 %v3869_v51  ;;  %v10828_v45 = vadd.f32 %v10804_v36, %v10245_v40  ;;  %v4161_v30 = vmul.f32 %v10820_v61, %v10820_v61 }
 0xae7   :  { %3909 = vrot.lane.b32.xlu1 %v10794_v2, %s8859_s0  ;;  %v10816_v11 = vadd.f32 %v10794_v2, %v10233_v16  ;;  %v4163_v16 = vmul.f32 %v10808_v23, %v10808_v23  ;;  %v3829_v40 = vmul.f32 0.5, %v10769_v52 }
 0xae8   :  { %8693 = vtanh.f32 %v3870_v4  ;;  %v4162_v41 = vmul.f32 %v10828_v45, %v10828_v45 }
 0xae9   :  { %3903 = vrot.lane.b32.xlu0 %v10796_v12, %s8859_s0  ;;  %8695 = vtanh.f32 %v3867_v5  ;;  %v4164_v21 = vmul.f32 %v10816_v11, %v10816_v11 }
 0xaea   :  { %8697 = vtanh.f32 %v3868_v17 }
 0xaeb   :  { %3905 = vrot.lane.b32.xlu1 %v10804_v36, %s8859_s0 }
 0xaed   :  { %4109 = vrot.lane.b32.xlu0 %v10808_v23, %s8859_s0 }
 0xaef   :  { %4111 = vrot.lane.b32.xlu1 %v10816_v11, %s8859_s0 }
 0xaf0   :  { %v8692_v31 = vpop.eup %8691 }
 0xaf1   :  { %4105 = vrot.lane.b32.xlu0 %v10820_v61, %s8859_s0  ;;  %v3885_v37 = vadd.f32 1.0, %v8692_v31 }
 0xaf2   :  { %v8694_v27 = vpop.eup %8693 }
 0xaf3   :  { %4107 = vrot.lane.b32.xlu1 %v10828_v45, %s8859_s0  ;;  %v8696_v15 = vpop.eup %8695  ;;  %v3886_v55 = vadd.f32 1.0, %v8694_v27  ;;  %v10844_v3 = vmul.f32 %v3885_v37, %v3829_v40 }
 0xaf4   :  { %v8698_v0 = vpop.eup %8697  ;;  %v3883_v29 = vadd.f32 1.0, %v8696_v15 }
 0xaf5   :  { %4181 = vrot.lane.b32.xlu0 %v4163_v16, %s8859_s0  ;;  %v10851_v56 = vmul.f32 %v3886_v55, %v3830_v47  ;;  %v3884_v52 = vadd.f32 1.0, %v8698_v0  ;;  %v10864_v59 = vadd.f32 %v10844_v3, %v10281_v63 }
 0xaf6   :  { %v10853_v48 = vmul.f32 %v3883_v29, %v3827_v57 }
 0xaf7   :  { %4183 = vrot.lane.b32.xlu1 %v4164_v21, %s8859_s0  ;;  %v10860_v28 = vmul.f32 %v3884_v52, %v3828_v50  ;;  %v10872_v53 = vadd.f32 %v10851_v56, %v10289_v9  ;;  %v4167_v7 = vmul.f32 %v10864_v59, %v10864_v59 }
 0xaf8   :  { %v10876_v43 = vadd.f32 %v10853_v48, %v10293_v26 }
 0xaf9   :  { %4177 = vrot.lane.b32.xlu0 %v4161_v30, %s8859_s0  ;;  %v10884_v63 = vadd.f32 %v10860_v28, %v10301_v25  ;;  %v4168_v9 = vmul.f32 %v10872_v53, %v10872_v53 }
 0xafa   :  { %v4165_v26 = vmul.f32 %v10876_v43, %v10876_v43 }
 0xafb   :  { %4179 = vrot.lane.b32.xlu1 %v4162_v41, %s8859_s0  ;;  %v4166_v25 = vmul.f32 %v10884_v63, %v10884_v63 }
 0xafd   :  { %3915 = vrot.lane.b32.xlu0 %v10844_v3, %s8859_s0 }
 0xaff   :  { %3917 = vrot.lane.b32.xlu1 %v10851_v56, %s8859_s0 }
 0xb01   :  { %3911 = vrot.lane.b32.xlu0 %v10853_v48, %s8859_s0 }
 0xb03   :  { %3913 = vrot.lane.b32.xlu1 %v10860_v28, %s8859_s0 }
 0xb05   :  { %4117 = vrot.lane.b32.xlu0 %v10864_v59, %s8859_s0 }
 0xb07   :  { %4119 = vrot.lane.b32.xlu1 %v10872_v53, %s8859_s0 }
 0xb09   :  { %4113 = vrot.lane.b32.xlu0 %v10876_v43, %s8859_s0 }
 0xb0b   :  { %4115 = vrot.lane.b32.xlu1 %v10884_v63, %s8859_s0 }
 0xb0d   :  { %4189 = vrot.lane.b32.xlu0 %v4167_v7, %s8859_s0 }
 0xb0f   :  { %4191 = vrot.lane.b32.xlu1 %v4168_v9, %s8859_s0 }
 0xb11   :  { %4185 = vrot.lane.b32.xlu0 %v4165_v26, %s8859_s0 }
 0xb13   :  { %4187 = vrot.lane.b32.xlu1 %v4166_v25, %s8859_s0 }
 0xb57   :  { %v3908_v24 = vpop.permute.xlu0 %3907 }
 0xb58   :  { %v3929_v32 = vadd.f32 %v3908_v24, %v10785_v35 }
 0xb59   :  { %v3910_v42 = vpop.permute.xlu1 %3909 }
 0xb5a   :  { %v10902_v34 = vadd.f32 %v3929_v32, %v10319_v46 }
 0xb5b   :  { %v3904_v54 = vpop.permute.xlu0 %3903 }
 0xb5c   :  { %v3927_v51 = vadd.f32 %v3904_v54, %v10796_v12  ;;  %v3959_v13 = vsel %vm316_vm2, %v10902_v34, 0.0  ;;  %v3930_v12 = vadd.f32 %v3910_v42, %v10794_v2 }
 0xb5d   :  { %v3906_v6 = vpop.permute.xlu1 %3905 }
 0xb5e   :  { %v10910_v5 = vadd.f32 %v3927_v51, %v10327_v38  ;;  %v3928_v21 = vadd.f32 %v3906_v6, %v10804_v36  ;;  %v3987_v38 = vmul.f32 %v10902_v34, %v10902_v34  ;;  %v10922_v15 = vadd.f32 %v3930_v12, %v10339_v19 }
 0xb5f   :  { %v4110_v22 = vpop.permute.xlu0 %4109 }
 0xb60   :  { %v4135_v62 = vsel %vm316_vm2, %v4110_v22, 0.0  ;;  %v3953_v27 = vsel %vm316_vm2, %v10910_v5, 0.0  ;;  %v10925_v2 = vadd.f32 %v3928_v21, %v10342_v14  ;;  %v3999_v36 = vsel %vm316_vm2, %v3987_v38, 0.0 }
 0xb61   :  { %4136 = vadd.xlane.f32.xlu1 %v4135_v62  ;;  %v4112_v60 = vpop.permute.xlu1 %4111  ;;  %v3962_v0 = vsel %vm316_vm2, %v10922_v15, 0.0  ;;  %v3985_v19 = vmul.f32 %v10910_v5, %v10910_v5  ;;  %v3988_v26 = vmul.f32 %v10922_v15, %v10922_v15 }
 0xb62   :  { %v4138_v17 = vsel %vm316_vm2, %v4112_v60, 0.0  ;;  %v3956_v29 = vsel %vm316_vm2, %v10925_v2, 0.0 }
 0xb63   :  { %v4106_v18 = vpop.permute.xlu0 %4105  ;;  %v3993_v52 = vsel %vm316_vm2, %v3985_v19, 0.0  ;;  %v4002_v54 = vsel %vm316_vm2, %v3988_v26, 0.0  ;;  %v8459_v26 = vld [vmem:[%s12346_s4 + $0x3b0] sm:$0xff]  }
 0xb64   :  { %v4129_v1 = vsel %vm316_vm2, %v4106_v18, 0.0 }
 0xb65   :  { %3960 = vadd.xlane.f32.xlu1 %v3959_v13  ;;  %4130 = vadd.xlane.f32.xlu0 %v4129_v1  ;;  %v4108_v35 = vpop.permute.xlu1 %4107 }
 0xb66   :  { %v4132_v40 = vsel %vm316_vm2, %v4108_v35, 0.0 }
 0xb67   :  { %v4182_v4 = vpop.permute.xlu0 %4181 }
 0xb68   :  { %v4207_v46 = vsel %vm316_vm2, %v4182_v4, 0.0 }
 0xb69   :  { %4208 = vadd.xlane.f32.xlu1 %v4207_v46  ;;  %4139 = vadd.xlane.f32.xlu0 %v4138_v17  ;;  %v4184_v16 = vpop.permute.xlu1 %4183 }
 0xb6a   :  { %v4210_v57 = vsel %vm316_vm2, %v4184_v16, 0.0 }
 0xb6b   :  { %v4178_v31 = vpop.permute.xlu0 %4177 }
 0xb6c   :  { %v4201_v30 = vsel %vm316_vm2, %v4178_v31, 0.0 }
 0xb6d   :  { %3954 = vadd.xlane.f32.xlu0 %v3953_v27  ;;  %4202 = vadd.xlane.f32.xlu1 %v4201_v30  ;;  %v4180_v41 = vpop.permute.xlu1 %4179 }
 0xb6e   :  { %v4204_v7 = vsel %vm316_vm2, %v4180_v41, 0.0 }
 0xb6f   :  { %v3916_v37 = vpop.permute.xlu0 %3915 }
 0xb70   :  { %v3933_v50 = vadd.f32 %v3916_v37, %v10844_v3  ;;  %v3986_v3 = vmul.f32 %v10925_v2, %v10925_v2 }
 0xb71   :  { %4133 = vadd.xlane.f32.xlu0 %v4132_v40  ;;  %4000 = vadd.xlane.f32.xlu1 %v3999_v36  ;;  %v3918_v14 = vpop.permute.xlu1 %3917 }
 0xb72   :  { %v10943_v42 = vadd.f32 %v3933_v50, %v10360_v20  ;;  %v3996_v62 = vsel %vm316_vm2, %v3986_v3, 0.0  ;;  %v3934_v20 = vadd.f32 %v3918_v14, %v10851_v56  ;;  %v8453_v14 = vld [vmem:[%s12346_s4 + $0x3a0] sm:$0xff]   ;;  %v8466_v3 = vld [vmem:[%s12346_s4 + $0x3f0] sm:$0xff]  }
 0xb73   :  { %v3912_v55 = vpop.permute.xlu0 %3911  ;;  %v8458_v50 = vld [vmem:[%s12346_s4 + $0x3e0] sm:$0xff]   ;;  %7964 = vmatprep.subr.bf16.mxu0 %v8453_v14 }
 0xb74   :  { %v3931_v22 = vadd.f32 %v3912_v55, %v10853_v48  ;;  %v3971_v60 = vsel %vm316_vm2, %v10943_v42, 0.0  ;;  %v10960_v48 = vadd.f32 %v3934_v20, %v10377_v49  ;;  %v3991_v16 = vmul.f32 %v10943_v42, %v10943_v42  ;;  %v10990_v55 = vld [vmem:[%s12345_s3 + $0xc] sm:$0xf]  ;;  %v8473_v20 = vld [vmem:[%s12346_s4 + $0x440] sm:$0xff]  }
 0xb75   :  { %3963 = vadd.xlane.f32.xlu0 %v3962_v0  ;;  %3957 = vadd.xlane.f32.xlu1 %v3956_v29  ;;  %v3914_v25 = vpop.permute.xlu1 %3913  ;;  %v4284_v29 = vrot.slane %v10990_v55, %v9138_v44  ;;  %v4300_v19 = vrot.slane %v10990_v55, %v9155_v58 }
 0xb76   :  { %v10955_v51 = vadd.f32 %v3931_v22, %v10372_v39  ;;  %v3932_v39 = vadd.f32 %v3914_v25, %v10860_v28  ;;  %v3974_v56 = vsel %vm316_vm2, %v10960_v48, 0.0  ;;  %v4011_v27 = vsel %vm316_vm2, %v3991_v16, 0.0  ;;  %v8462_v25 = vld [vmem:[%s12346_s4 + $0x3e8] sm:$0xff]   ;;  %v8464_v22 = vld [vmem:[%s12346_s4 + $0x378] sm:$0xff]  }
 0xb77   :  { %v4118_v47 = vpop.permute.xlu0 %4117  ;;  %v3992_v40 = vmul.f32 %v10960_v48, %v10960_v48 }
 0xb78   :  { %v4147_v9 = vsel %vm316_vm2, %v4118_v47, 0.0  ;;  %v3965_v46 = vsel %vm316_vm2, %v10955_v51, 0.0  ;;  %v10972_v31 = vadd.f32 %v3932_v39, %v10389_v10  ;;  %v3989_v28 = vmul.f32 %v10955_v51, %v10955_v51  ;;  %v8454_v47 = vld [vmem:[%s12346_s4 + $0x360] sm:$0xff]   ;;  %v8472_v39 = vld [vmem:[%s12346_s4 + $0x388] sm:$0xff]  }
 0xb79   :  { %4211 = vadd.xlane.f32.xlu0 %v4210_v57  ;;  %3994 = vadd.xlane.f32.xlu1 %v3993_v52  ;;  %v4120_v6 = vpop.permute.xlu1 %4119  ;;  %v4014_v36 = vsel %vm316_vm2, %v3992_v40, 0.0  ;;  %v8455_v57 = vld [vmem:[%s12346_s4 + $0x3a8] sm:$0xff]   ;;  %v8457_v52 = vld [vmem:[%s12346_s4 + $0x420] sm:$0xff]  }
 0xb7a   :  { %v4150_v13 = vsel %vm316_vm2, %v4120_v6, 0.0  ;;  %v3968_v30 = vsel %vm316_vm2, %v10972_v31, 0.0  ;;  %v4005_v38 = vsel %vm316_vm2, %v3989_v28, 0.0  ;;  %v3990_v41 = vmul.f32 %v10972_v31, %v10972_v31  ;;  %7965 = vmatpush3.bf16.msra.mxu0 %v8454_v47  ;;  %8004 = vmatprep.subr.bf16.mxu1 %v8457_v52  ;;  %v8469_v6 = vld [vmem:[%s12346_s4 + $0x438] sm:$0xff]  }
 0xb7b   :  { %v4114_v24 = vpop.permute.xlu0 %4113  ;;  %7966 = vmatprep.subr.bf16.mxu0 %v8455_v57  ;;  %8005 = vmatpush3.bf16.msra.mxu1 %v8458_v50 }
 0xb7c   :  { %v4141_v32 = vsel %vm316_vm2, %v4114_v24, 0.0  ;;  %v4008_v0 = vsel %vm316_vm2, %v3990_v41, 0.0  ;;  %v8465_v24 = vld [vmem:[%s12346_s4 + $0x430] sm:$0xff]  }
 0xb7d   :  { %4205 = vadd.xlane.f32.xlu0 %v4204_v7  ;;  %4148 = vadd.xlane.f32.xlu1 %v4147_v9  ;;  %v4116_v35 = vpop.permute.xlu1 %4115  ;;  %v8461_v7 = vld [vmem:[%s12346_s4 + $0x428] sm:$0xff]  }
 0xb7e   :  { %v4144_v4 = vsel %vm316_vm2, %v4116_v35, 0.0  ;;  %v8456_v9 = vld [vmem:[%s12346_s4 + $0x368] sm:$0xff]   ;;  %8006 = vmatprep.subr.bf16.mxu1 %v8461_v7 }
 0xb7f   :  { %v4190_v18 = vpop.permute.xlu0 %4189  ;;  %7967 = vmatpush3.bf16.msra.mxu0 %v8456_v9  ;;  %8007 = vmatpush3.bf16.msra.mxu1 %v8462_v25 }
 0xb80   :  { %v4219_v1 = vsel %vm316_vm2, %v4190_v18, 0.0  ;;  %7968 = vmatprep.subr.bf16.mxu0 %v8459_v26  ;;  %8008 = vmatprep.subr.bf16.mxu1 %v8465_v24 }
 0xb81   :  { %4003 = vadd.xlane.f32.xlu0 %v4002_v54  ;;  %4142 = vadd.xlane.f32.xlu1 %v4141_v32  ;;  %v4192_v49 = vpop.permute.xlu1 %4191  ;;  %v8460_v54 = vld [vmem:[%s12346_s4 + $0x370] sm:$0xff]   ;;  %v8463_v32 = vld [vmem:[%s12346_s4 + $0x3b8] sm:$0xff]  }
 0xb82   :  { %v4222_v21 = vsel %vm316_vm2, %v4192_v49, 0.0  ;;  %v8478_v49 = vld [vmem:[%s12346_s4 + $0x408] sm:$0xff]  }
 0xb83   :  { %v4186_v17 = vpop.permute.xlu0 %4185  ;;  %7969 = vmatpush3.bf16.msra.mxu0 %v8460_v54  ;;  %8009 = vmatpush3.bf16.msra.mxu1 %v8466_v3 }
 0xb84   :  { %v4213_v12 = vsel %vm316_vm2, %v4186_v17, 0.0  ;;  %7970 = vmatprep.subr.bf16.mxu0 %v8463_v32  ;;  %8010 = vmatprep.subr.bf16.mxu1 %v8469_v6  ;;  %v8477_v17 = vld [vmem:[%s12346_s4 + $0x448] sm:$0xff]  }
 0xb85   :  { %3997 = vadd.xlane.f32.xlu0 %v3996_v62  ;;  %3972 = vadd.xlane.f32.xlu1 %v3971_v60  ;;  %v4188_v37 = vpop.permute.xlu1 %4187  ;;  %v8467_v62 = vld [vmem:[%s12346_s4 + $0x3c0] sm:$0xff]   ;;  %v8470_v60 = vld [vmem:[%s12346_s4 + $0x3f8] sm:$0xff]  }
 0xb86   :  { %v4216_v10 = vsel %vm316_vm2, %v4188_v37, 0.0 }
 0xb87   :  { %7971 = vmatpush3.bf16.msra.mxu0 %v8464_v22  ;;  %8011 = vmatpush3.bf16.msra.mxu1 %v8470_v60 }
 0xb88   :  { %7972 = vmatprep.subr.bf16.mxu0 %v8467_v62  ;;  %8012 = vmatprep.subr.bf16.mxu1 %v8473_v20 }
 0xb89   :  { %4151 = vadd.xlane.f32.xlu0 %v4150_v13  ;;  %4220 = vadd.xlane.f32.xlu1 %v4219_v1  ;;  %v8468_v13 = vld [vmem:[%s12346_s4 + $0x380] sm:$0xff]   ;;  %v8471_v1 = vld [vmem:[%s12346_s4 + $0x3c8] sm:$0xff]  }
 0xb8b   :  { %7973 = vmatpush3.bf16.msra.mxu0 %v8468_v13 }
 0xb8c   :  { %7974 = vmatprep.subr.bf16.mxu0 %v8471_v1 }
 0xb8d   :  { %4145 = vadd.xlane.f32.xlu0 %v4144_v4  ;;  %3966 = vadd.xlane.f32.xlu1 %v3965_v46  ;;  %v8474_v46 = vld [vmem:[%s12346_s4 + $0x400] sm:$0xff]  }
 0xb8e   :  { %8013 = vmatpush3.bf16.msra.mxu1 %v8474_v46 }
 0xb8f   :  { %8014 = vmatprep.subr.bf16.mxu1 %v8477_v17  ;;  %7975 = vmatpush3.bf16.msra.mxu0 %v8472_v39 }
 0xb91   :  { %3975 = vadd.xlane.f32.xlu0 %v3974_v56  ;;  %4214 = vadd.xlane.f32.xlu1 %v4213_v12  ;;  %v8475_v56 = vld [vmem:[%s12346_s4 + $0x3d0] sm:$0xff]  }
 0xb92   :  { %7976 = vmatprep.subr.bf16.mxu0 %v8475_v56  ;;  %8015 = vmatpush3.bf16.msra.mxu1 %v8478_v49 }
 0xb95   :  { %4223 = vadd.xlane.f32.xlu0 %v4222_v21  ;;  %4012 = vadd.xlane.f32.xlu1 %v4011_v27  ;;  %v8476_v21 = vld [vmem:[%s12346_s4 + $0x390] sm:$0xff]  }
 0xb96   :  { %7977 = vmatpush3.bf16.msra.mxu0 %v8476_v21 }
 0xb99   :  { %3969 = vadd.xlane.f32.xlu0 %v3968_v30  ;;  %4006 = vadd.xlane.f32.xlu1 %v4005_v38 }
 0xb9d   :  { %4217 = vadd.xlane.f32.xlu0 %v4216_v10 }
 0xba1   :  { %4015 = vadd.xlane.f32.xlu0 %v4014_v36 }
 0xba5   :  { %4009 = vadd.xlane.f32.xlu0 %v4008_v0 }
 0xbaa   :  { %4286 = vrot.lane.b32.xlu1 %v4284_v29, %s8860_s30 }
 0xbbb   :  { %4302 = vrot.lane.b32.xlu0 %v4300_v19, %s8860_s30 }
 0xbee   :  { %v4137_v18 = vpop.xlane.xlu1 %4136 }
 0xbef   :  { %v11081_v52 = vmul.f32 0.03125, %v4137_v18 }
 0xbf1   :  { %v4235_v62 = vmul.f32 %v11081_v52, %v11081_v52 }
 0xbf2   :  { %v3961_v35 = vpop.xlane.xlu1 %3960  ;;  %v4131_v4 = vpop.xlane.xlu0 %4130 }
 0xbf3   :  { %v11077_v29 = vmul.f32 0.03125, %v3961_v35  ;;  %v11085_v7 = vmul.f32 0.03125, %v4131_v4 }
 0xbf5   :  { %v4027_v50 = vmul.f32 %v11077_v29, %v11077_v29  ;;  %v4233_v20 = vmul.f32 %v11085_v7, %v11085_v7 }
 0xbf6   :  { %v4209_v12 = vpop.xlane.xlu1 %4208  ;;  %v4140_v16 = vpop.xlane.xlu0 %4139 }
 0xbf7   :  { %v4227_v26 = vmul.f32 0.03125, %v4209_v12  ;;  %v11087_v25 = vmul.f32 0.03125, %v4140_v16 }
 0xbf9   :  { %v4243_v35 = vsub.f32 %v4227_v26, %v4235_v62  ;;  %v4236_v4 = vmul.f32 %v11087_v25, %v11087_v25 }
 0xbfa   :  { %v4203_v27 = vpop.xlane.xlu1 %4202  ;;  %v3955_v28 = vpop.xlane.xlu0 %3954 }
 0xbfb   :  { %v11079_v47 = vmul.f32 0.03125, %v3955_v28  ;;  %v4225_v32 = vmul.f32 0.03125, %v4203_v27 }
 0xbfd   :  { %v4025_v3 = vmul.f32 %v11079_v47, %v11079_v47  ;;  %v4241_v12 = vsub.f32 %v4225_v32, %v4233_v20 }
 0xbfe   :  { %v4001_v30 = vpop.xlane.xlu1 %4000  ;;  %v4134_v38 = vpop.xlane.xlu0 %4133 }
 0xbff   :  { %v4019_v57 = vmul.f32 0.03125, %v4001_v30  ;;  %v11101_v46 = vmul.f32 0.03125, %v4134_v38  ;;  %v4259_v38 = vadd.f32 1e-05, %v4243_v35 }
 0xc01   :  { %v4035_v6 = vsub.f32 %v4019_v57, %v4027_v50 }
 0xc02   :  { %v3958_v37 = vpop.xlane.xlu1 %3957  ;;  %v3964_v10 = vpop.xlane.xlu0 %3963 }
 0xc03   :  { %v11091_v22 = vmul.f32 0.03125, %v3958_v37  ;;  %v11095_v60 = vmul.f32 0.03125, %v3964_v10  ;;  %v4051_v16 = vadd.f32 1e-05, %v4035_v6 }
 0xc05   :  { %v4026_v49 = vmul.f32 %v11091_v22, %v11091_v22  ;;  %v4028_v27 = vmul.f32 %v11095_v60, %v11095_v60  ;;  %8699 = vrsqrt.f32 %v4051_v16 }
 0xc06   :  { %v3995_v40 = vpop.xlane.xlu1 %3994  ;;  %v4212_v36 = vpop.xlane.xlu0 %4211 }
 0xc07   :  { %v4017_v9 = vmul.f32 0.03125, %v3995_v40  ;;  %v4228_v18 = vmul.f32 0.03125, %v4212_v36  ;;  %v4234_v36 = vmul.f32 %v11101_v46, %v11101_v46 }
 0xc09   :  { %v4033_v13 = vsub.f32 %v4017_v9, %v4025_v3  ;;  %v4244_v28 = vsub.f32 %v4228_v18, %v4236_v4  ;;  %v4257_v9 = vadd.f32 1e-05, %v4241_v12 }
 0xc0a   :  { %v4149_v41 = vpop.xlane.xlu1 %4148  ;;  %v4206_v0 = vpop.xlane.xlu0 %4205 }
 0xc0b   :  { %v11105_v21 = vmul.f32 0.03125, %v4149_v41  ;;  %v4226_v30 = vmul.f32 0.03125, %v4206_v0  ;;  %v4049_v37 = vadd.f32 1e-05, %v4033_v13 }
 0xc0d   :  { %v4239_v41 = vmul.f32 %v11105_v21, %v11105_v21  ;;  %v4242_v32 = vsub.f32 %v4226_v30, %v4234_v36  ;;  %8701 = vrsqrt.f32 %v4049_v37 }
 0xc0e   :  { %v4143_v19 = vpop.xlane.xlu1 %4142  ;;  %v4004_v14 = vpop.xlane.xlu0 %4003  ;;  %8703 = vrsqrt.f32 %v4259_v38 }
 0xc0f   :  { %v4020_v17 = vmul.f32 0.03125, %v4004_v14  ;;  %v11113_v26 = vmul.f32 0.03125, %v4143_v19  ;;  %8705 = vrsqrt.f32 %v4257_v9  ;;  %v4258_v35 = vadd.f32 1e-05, %v4242_v32 }
 0xc11   :  { %v4036_v14 = vsub.f32 %v4020_v17, %v4028_v27  ;;  %v4237_v20 = vmul.f32 %v11113_v26, %v11113_v26 }
 0xc12   :  { %v3973_v24 = vpop.xlane.xlu1 %3972  ;;  %v3998_v54 = vpop.xlane.xlu0 %3997 }
 0xc13   :  { %v4018_v1 = vmul.f32 0.03125, %v3998_v54  ;;  %v4260_v54 = vadd.f32 1e-05, %v4244_v28  ;;  %v4052_v6 = vadd.f32 1e-05, %v4036_v14  ;;  %v11117_v13 = vmul.f32 0.03125, %v3973_v24 }
 0xc15   :  { %v4034_v10 = vsub.f32 %v4018_v1, %v4026_v49  ;;  %8707 = vrsqrt.f32 %v4260_v54  ;;  %v4031_v16 = vmul.f32 %v11117_v13, %v11117_v13 }
 0xc16   :  { %v4221_v39 = vpop.xlane.xlu1 %4220  ;;  %v4152_v56 = vpop.xlane.xlu0 %4151 }
 0xc17   :  { %v4231_v40 = vmul.f32 0.03125, %v4221_v39  ;;  %v4050_v0 = vadd.f32 1e-05, %v4034_v10  ;;  %v11119_v19 = vmul.f32 0.03125, %v4152_v56  ;;  %v8700_v56 = vpop.eup %8699  ;;  %v4043_v10 = vsub.f32 %v10902_v34, %v11077_v29 }
 0xc18   :  { %v8702_v14 = vpop.eup %8701 }
 0xc19   :  { %v4247_v3 = vsub.f32 %v4231_v40, %v4239_v41  ;;  %8709 = vrsqrt.f32 %v4050_v0  ;;  %v4240_v24 = vmul.f32 %v11119_v19, %v11119_v19  ;;  %v8704_v32 = vpop.eup %8703  ;;  %v4041_v0 = vsub.f32 %v10910_v5, %v11079_v47 }
 0xc1a   :  { %v3967_v57 = vpop.xlane.xlu1 %3966  ;;  %v4146_v50 = vpop.xlane.xlu0 %4145  ;;  %8711 = vrsqrt.f32 %v4052_v6 }
 0xc1b   :  { %v4263_v4 = vadd.f32 1e-05, %v4247_v3  ;;  %v11123_v49 = vmul.f32 0.03125, %v3967_v57  ;;  %8713 = vrsqrt.f32 %v4258_v35  ;;  %v11131_v57 = vrot.slane %v10990_v55, %v9303_v8  ;;  %v8706_v29 = vpop.eup %8705 }
 0xc1c   :  { %v4067_v3 = vmul.f32 %v8700_v56, %v4043_v10  ;;  %v11137_v6 = vmul.f32 0.03125, %v4146_v50  ;;  %v4251_v35 = vsub.f32 %v10808_v23, %v11081_v52  ;;  %v4042_v52 = vsub.f32 %v10925_v2, %v11091_v22 }
 0xc1d   :  { %8715 = vrsqrt.f32 %v4263_v4  ;;  %v4029_v9 = vmul.f32 %v11123_v49, %v11123_v49  ;;  %v4249_v4 = vsub.f32 %v10820_v61, %v11085_v7  ;;  %v4255_v22 = vsub.f32 %v10864_v59, %v11105_v21 }
 0xc1e   :  { %v4215_v62 = vpop.xlane.xlu1 %4214  ;;  %v3976_v18 = vpop.xlane.xlu0 %3975  ;;  %v4238_v7 = vmul.f32 %v11137_v6, %v11137_v6  ;;  %v4275_v56 = vmul.f32 %v8704_v32, %v4251_v35  ;;  %v4253_v32 = vsub.f32 %v10876_v43, %v11113_v26  ;;  %v4256_v21 = vsub.f32 %v10872_v53, %v11119_v19 }
 0xc1f   :  { %v4229_v1 = vmul.f32 0.03125, %v4215_v62  ;;  %v11141_v62 = vrot.slane %v10990_v55, %v9309_v33  ;;  %v4250_v55 = vsub.f32 %v10828_v45, %v11101_v46 }
 0xc21   :  { %v4245_v17 = vsub.f32 %v4229_v1, %v4237_v20  ;;  %v8708_v1 = vpop.eup %8707 }
 0xc22   :  { %v4013_v39 = vpop.xlane.xlu1 %4012  ;;  %v4224_v12 = vpop.xlane.xlu0 %4223 }
 0xc23   :  { %v4023_v27 = vmul.f32 0.03125, %v4013_v39  ;;  %v4232_v28 = vmul.f32 0.03125, %v4224_v12  ;;  %v4261_v30 = vadd.f32 1e-05, %v4245_v17  ;;  %v4065_v17 = vmul.f32 %v8702_v14, %v4041_v0  ;;  %v8710_v50 = vpop.eup %8709 }
 0xc24   :  { %v4252_v12 = vsub.f32 %v10816_v11, %v11087_v25  ;;  %v4044_v25 = vsub.f32 %v10922_v15, %v11095_v60  ;;  %v4066_v10 = vmul.f32 %v8710_v50, %v4042_v52 }
 0xc25   :  { %v4039_v37 = vsub.f32 %v4023_v27, %v4031_v16  ;;  %v4248_v40 = vsub.f32 %v4232_v28, %v4240_v24  ;;  %8717 = vrsqrt.f32 %v4261_v30  ;;  %v11151_v16 = vmul.f32 0.03125, %v3976_v18  ;;  %v8712_v28 = vpop.eup %8711 }
 0xc26   :  { %v4007_v38 = vpop.xlane.xlu1 %4006  ;;  %v3970_v36 = vpop.xlane.xlu0 %3969  ;;  %v4079_v24 = vmul.f32 %v11131_v57, %v4067_v3  ;;  %v4077_v18 = vmul.f32 %v11131_v57, %v4065_v17  ;;  %v4068_v0 = vmul.f32 %v8712_v28, %v4044_v25  ;;  %v4045_v28 = vsub.f32 %v10955_v51, %v11123_v49 }
 0xc27   :  { %v4055_v41 = vadd.f32 1e-05, %v4039_v37  ;;  %v4021_v54 = vmul.f32 0.03125, %v4007_v38  ;;  %v4264_v47 = vadd.f32 1e-05, %v4248_v40  ;;  %v4273_v37 = vmul.f32 %v8706_v29, %v4249_v4  ;;  %v8714_v46 = vpop.eup %8713 }
 0xc28   :  { %v8716_v14 = vpop.eup %8715  ;;  %v4091_v60 = vadd.f32 %v11141_v62, %v4079_v24  ;;  %v4276_v29 = vmul.f32 %v8708_v1, %v4252_v12  ;;  %v4089_v17 = vadd.f32 %v11141_v62, %v4077_v18  ;;  %v4080_v19 = vmul.f32 %v11131_v57, %v4068_v0 }
 0xc29   :  { %8719 = vrsqrt.f32 %v4055_v41  ;;  %v4037_v20 = vsub.f32 %v4021_v54, %v4029_v9  ;;  %v4032_v9 = vmul.f32 %v11151_v16, %v11151_v16  ;;  %v11165_v41 = vmul.f32 0.03125, %v3970_v36 }
 0xc2a   :  { %v4218_v39 = vpop.xlane.xlu0 %4217  ;;  %v11174_v35 = vpop.permute.xlu1 %4286  ;;  %v4279_v50 = vmul.f32 %v8716_v14, %v4255_v22 }
 0xc2b   :  { %v4053_v27 = vadd.f32 1e-05, %v4037_v20  ;;  %v4230_v30 = vmul.f32 0.03125, %v4218_v39  ;;  %v4047_v20 = vsub.f32 %v10943_v42, %v11117_v13  ;;  %v4078_v39 = vmul.f32 %v11131_v57, %v4066_v10 }
 0xc2c   :  { %v4030_v1 = vmul.f32 %v11165_v41, %v11165_v41  ;;  %v4289_v52 = vmul.f32 %v11174_v35, %v4273_v37  ;;  %v4291_v18 = vmul.f32 %v11174_v35, %v4275_v56  ;;  %v4292_v10 = vmul.f32 %v11174_v35, %v4276_v29  ;;  %v8480_v29 = vld [vmem:[%s12346_s4 + $0x398] sm:$0xff]  }
 0xc2d   :  { %8721 = vrsqrt.f32 %v4053_v27  ;;  %v4246_v40 = vsub.f32 %v4230_v30, %v4238_v7  ;;  %v4090_v25 = vadd.f32 %v11141_v62, %v4078_v39  ;;  %v4295_v49 = vmul.f32 %v11174_v35, %v4279_v50 }
 0xc2e   :  { %8723 = vrsqrt.f32 %v4264_v47  ;;  %v4016_v38 = vpop.xlane.xlu0 %4015  ;;  %v4274_v47 = vmul.f32 %v8714_v46, %v4250_v55 }
 0xc2f   :  { %v4024_v54 = vmul.f32 0.03125, %v4016_v38  ;;  %v4262_v3 = vadd.f32 1e-05, %v4246_v40  ;;  %v8718_v36 = vpop.eup %8717 }
 0xc30   :  { %v4277_v55 = vmul.f32 %v8718_v36, %v4253_v32  ;;  %v4290_v7 = vmul.f32 %v11174_v35, %v4274_v47  ;;  %v8481_v47 = vld [vmem:[%s12346_s4 + $0x450] sm:$0xff]  }
 0xc31   :  { %v4040_v4 = vsub.f32 %v4024_v54, %v4032_v9  ;;  %8725 = vrsqrt.f32 %v4262_v3  ;;  %v8479_v3 = vld [vmem:[%s12346_s4 + $0x3d8] sm:$0xff]   ;;  %8016 = vmatprep.subr.bf16.mxu1 %v8481_v47 }
 0xc32   :  { %v4010_v26 = vpop.xlane.xlu0 %4009  ;;  %7978 = vmatprep.subr.bf16.mxu0 %v8479_v3 }
 0xc33   :  { %v8720_v27 = vpop.eup %8719  ;;  %v4056_v13 = vadd.f32 1e-05, %v4040_v4  ;;  %v4022_v12 = vmul.f32 0.03125, %v4010_v26  ;;  %v4293_v4 = vmul.f32 %v11174_v35, %v4277_v55  ;;  %7979 = vmatpush3.bf16.msra.mxu0 %v8480_v29  ;;  %v4048_v55 = vsub.f32 %v10960_v48, %v11151_v16  ;;  %v4341_v29 = vld [vmem:[#allocation2 + $0x14] sm:$0xff] }
 0xc34   :  { %v4071_v24 = vmul.f32 %v8720_v27, %v4047_v20  ;;  %v4092_v20 = vadd.f32 %v11141_v62, %v4080_v19 }
 0xc35   :  { %8727 = vrsqrt.f32 %v4056_v13  ;;  %v4038_v30 = vsub.f32 %v4022_v12, %v4030_v1  ;;  %v8482_v1 = vld [vmem:[%s12346_s4 + $0x410] sm:$0xff]  }
 0xc36   :  { %v4083_v46 = vmul.f32 %v11131_v57, %v4071_v24  ;;  %v11189_v40 = vpop.permute.xlu0 %4302  ;;  %8017 = vmatpush3.bf16.msra.mxu1 %v8482_v1  ;;  %v8484_v24 = vld [vmem:[%s12346_s4 + $0x458] sm:$0xff]  }
 0xc37   :  { %v8722_v38 = vpop.eup %8721  ;;  %v4054_v14 = vadd.f32 1e-05, %v4038_v30  ;;  %v4305_v37 = vadd.f32 %v11189_v40, %v4289_v52  ;;  %v4306_v22 = vadd.f32 %v11189_v40, %v4290_v7  ;;  %v4307_v0 = vadd.f32 %v11189_v40, %v4291_v18  ;;  %v8485_v30 = vld [vmem:[%s12346_s4 + $0x418] sm:$0xff]   ;;  %8018 = vmatprep.subr.bf16.mxu1 %v8484_v24 }
 0xc38   :  { %v8724_v9 = vpop.eup %8723  ;;  %v4095_v54 = vadd.f32 %v11141_v62, %v4083_v46  ;;  %v4069_v32 = vmul.f32 %v8722_v38, %v4045_v28  ;;  %v4308_v56 = vadd.f32 %v11189_v40, %v4292_v10  ;;  %v4311_v36 = vadd.f32 %v11189_v40, %v4295_v49 }
 0xc39   :  { %8729 = vrsqrt.f32 %v4054_v14  ;;  %v4313_v50 = vsel %vm316_vm2, %v4089_v17, %v4305_v37  ;;  %v4314_v26 = vsel %vm316_vm2, %v4090_v25, %v4306_v22  ;;  %v4315_v27 = vsel %vm316_vm2, %v4091_v60, %v4307_v0 }
 0xc3a   :  { %v4081_v39 = vmul.f32 %v11131_v57, %v4069_v32  ;;  %v4280_v13 = vmul.f32 %v8724_v9, %v4256_v21  ;;  %v4316_v12 = vsel %vm316_vm2, %v4092_v20, %v4308_v56  ;;  %v4319_v19 = vsel %vm316_vm2, %v4095_v54, %v4311_v36  ;;  %4321 = vst.msk [vmem:[#allocation2 + $0x20] sm:$0xff] %vm290_vm3, %v4313_v50  ;;  %v11228_v21 = vld [vmem:[%s12346_s4 + $0x460] sm:$0xff]   ;;  %v4345_v50 = vld [vmem:[#allocation2 + $0x74] sm:$0xff] }
 0xc3b   :  { %4322 = vst.msk [vmem:[#allocation2 + $0x28] sm:$0xff] %vm290_vm3, %v4314_v26  ;;  %4323 = vst.msk [vmem:[#allocation2 + $0x30] sm:$0xff] %vm290_vm3, %v4315_v27  ;;  %v4309_v17 = vadd.f32 %v11189_v40, %v4293_v4  ;;  %v8726_v28 = vpop.eup %8725  ;;  %v4254_v52 = vsub.f32 %v10884_v63, %v11137_v6  ;;  %8238 = vmatprep.subr.bf16.mxu0 %v11228_v21  ;;  %8019 = vmatpush3.bf16.msra.mxu1 %v8485_v30  ;;  %v4330_v30 = vld [vmem:[#allocation2 + $0x18] sm:$0xff] }
 0xc3c   :  { %v4093_v60 = vadd.f32 %v11141_v62, %v4081_v39  ;;  %4324 = vst.msk [vmem:[#allocation2 + $0x38] sm:$0xff] %vm290_vm3, %v4316_v12  ;;  %4327 = vst.msk [vmem:[#allocation2 + $0x90] sm:$0xff] %vm290_vm3, %v4319_v19  ;;  %v4296_v46 = vmul.f32 %v11174_v35, %v4280_v13  ;;  %v4046_v6 = vsub.f32 %v10972_v31, %v11165_v41 }
 0xc3d   :  { %v4278_v18 = vmul.f32 %v8726_v28, %v4254_v52 }
 0xc3e   :  { %v4317_v7 = vsel %vm316_vm2, %v4093_v60, %v4309_v17  ;;  %v4312_v22 = vadd.f32 %v11189_v40, %v4296_v46  ;;  %v4377_v17 = vld [vmem:[#allocation2 + $0x44] sm:$0xff] }
 0xc3f   :  { %v8728_v25 = vpop.eup %8727  ;;  %4325 = vst.msk [vmem:[#allocation2 + $0x80] sm:$0xff] %vm290_vm3, %v4317_v7  ;;  %v4294_v32 = vmul.f32 %v11174_v35, %v4278_v18 }
 0xc40   :  { %v4072_v10 = vmul.f32 %v8728_v25, %v4048_v55  ;;  %v4378_v55 = vld [vmem:[#allocation2 + $0xa4] sm:$0xff] }
 0xc41   :  { %v4342_v49 = vld [vmem:[#allocation2 + $0x1c] sm:$0xff]  ;;  %v4310_v35 = vadd.f32 %v11189_v40, %v4294_v32 }
 0xc42   :  { %v4084_v16 = vmul.f32 %v11131_v57, %v4072_v10  ;;  %v4344_v38 = vld [vmem:[#allocation2 + $0x2c] sm:$0xff]  ;;  %v4343_v14 = vld [vmem:[#allocation2 + $0x24] sm:$0xff]  ;;  %v4349_v4 = vpack.c.bf16 %v4342_v49, %v4341_v29 }
 0xc43   :  { %v8730_v37 = vpop.eup %8729  ;;  %v4359_v9 = vld [vmem:[#allocation2 + $0x34] sm:$0xff]  ;;  %v4361_v54 = vpack.c.bf16 %v4343_v14, %v4342_v49  ;;  %v4350_v39 = vpack.c.bf16 %v4344_v38, %v4343_v14  ;;  %v4369_v12 = vld [vmem:[#allocation2 + $0x3c] sm:$0xff]  ;;  %v4332_v46 = vld [vmem:[#allocation2 + $0x28] sm:$0xff] }
 0xc44   :  { %v4096_v0 = vadd.f32 %v11141_v62, %v4084_v16  ;;  %v4070_v56 = vmul.f32 %v8730_v37, %v4046_v6  ;;  %v4362_v3 = vpack.c.bf16 %v4359_v9, %v4344_v38  ;;  %v4371_v60 = vpack.c.bf16 %v4369_v12, %v4359_v9  ;;  %v4331_v25 = vld [vmem:[#allocation2 + $0x20] sm:$0xff]  ;;  %v4353_v18 = vld [vmem:[#allocation2 + $0x30] sm:$0xff] }
 0xc45   :  { %4401 = vrot.lane.b32.xlu1 %v4361_v54, %s8862_s26  ;;  %v4379_v24 = vpack.c.bf16 %v4377_v17, %v4369_v12  ;;  %v4329_v10 = vld [vmem:[#allocation2 + $0x10] sm:$0xff]  ;;  %v4355_v6 = vpack.c.bf16 %v4331_v25, %v4330_v30  ;;  %v4356_v38 = vpack.c.bf16 %v4353_v18, %v4332_v46  ;;  %v8486_v54 = vld [vmem:[%s12346_s4 + $0x468] sm:$0xff]   ;;  %v4373_v12 = vld [vmem:[#allocation2 + $0x40] sm:$0xff] }
 0xc46   :  { %v4082_v41 = vmul.f32 %v11131_v57, %v4070_v56  ;;  %v4320_v20 = vsel %vm316_vm2, %v4096_v0, %v4312_v22  ;;  %4403 = vrot.lane.b32.xlu0 %v4362_v3, %s8862_s26  ;;  %v4346_v57 = vld [vmem:[#allocation2 + $0x7c] sm:$0xff]  ;;  %v4337_v37 = vpack.c.bf16 %v4330_v30, %v4329_v10  ;;  %v4338_v0 = vpack.c.bf16 %v4332_v46, %v4331_v25  ;;  %v8487_v3 = vld [vmem:[%s12346_s4 + $0x470] sm:$0xff]   ;;  %v4381_v10 = vld [vmem:[#allocation2 + $0x48] sm:$0xff] }
 0xc47   :  { %4328 = vst.msk [vmem:[#allocation2 + $0x98] sm:$0xff] %vm290_vm3, %v4320_v20  ;;  %v4351_v26 = vpack.c.bf16 %v4346_v57, %v4345_v50  ;;  %v4334_v20 = vld [vmem:[#allocation2 + $0x78] sm:$0xff]  ;;  %v4374_v46 = vld [vmem:[#allocation2 + $0xa0] sm:$0xff] }
 0xc48   :  { %v4094_v36 = vadd.f32 %v11141_v62, %v4082_v41 }
 0xc49   :  { %4389 = vrot.lane.b32.xlu1 %v4349_v4, %s8862_s26  ;;  %v4335_v4 = vld [vmem:[#allocation2 + $0x80] sm:$0xff] }
 0xc4a   :  { %v4318_v47 = vsel %vm316_vm2, %v4094_v36, %v4310_v35  ;;  %v4333_v36 = vld [vmem:[#allocation2 + $0x70] sm:$0xff]  ;;  %v4357_v35 = vpack.c.bf16 %v4335_v4, %v4334_v20 }
 0xc4b   :  { %4326 = vst.msk [vmem:[#allocation2 + $0x88] sm:$0xff] %vm290_vm3, %v4318_v47 }
 0xc4d   :  { %4391 = vrot.lane.b32.xlu1 %v4350_v39, %s8862_s26 }
 0xc4e   :  { %v4360_v40 = vld [vmem:[#allocation2 + $0x94] sm:$0xff]  ;;  %v4370_v28 = vld [vmem:[#allocation2 + $0x9c] sm:$0xff] }
 0xc4f   :  { %v4372_v52 = vpack.c.bf16 %v4370_v28, %v4360_v40  ;;  %v4380_v7 = vpack.c.bf16 %v4378_v55, %v4370_v28  ;;  %v4366_v25 = vld [vmem:[#allocation2 + $0x98] sm:$0xff] }
 0xc51   :  { %4393 = vrot.lane.b32.xlu1 %v4351_v26, %s8862_s26  ;;  %v4339_v26 = vpack.c.bf16 %v4334_v20, %v4333_v36 }
 0xc52   :  { %v4347_v27 = vld [vmem:[#allocation2 + $0x84] sm:$0xff]  ;;  %v4348_v1 = vld [vmem:[#allocation2 + $0x8c] sm:$0xff] }
 0xc53   :  { %v4363_v13 = vpack.c.bf16 %v4347_v27, %v4346_v57  ;;  %v4352_v62 = vpack.c.bf16 %v4348_v1, %v4347_v27  ;;  %v4364_v19 = vpack.c.bf16 %v4360_v40, %v4348_v1  ;;  %v4336_v39 = vld [vmem:[#allocation2 + $0x88] sm:$0xff]  ;;  %v4354_v27 = vld [vmem:[#allocation2 + $0x90] sm:$0xff] }
 0xc54   :  { %v4358_v1 = vpack.c.bf16 %v4354_v27, %v4336_v39 }
 0xc55   :  { %4405 = vrot.lane.b32.xlu0 %v4363_v13, %s8862_s26  ;;  %4395 = vrot.lane.b32.xlu1 %v4352_v62, %s8862_s26  ;;  %v4365_v62 = vld [vmem:[#allocation2 + $0x38] sm:$0xff] }
 0xc56   :  { %v4375_v17 = vpack.c.bf16 %v4373_v12, %v4365_v62 }
 0xc59   :  { %4407 = vrot.lane.b32.xlu0 %v4364_v19, %s8862_s26  ;;  %4411 = vrot.lane.b32.xlu1 %v4371_v60, %s8862_s26 }
 0xc5d   :  { %4417 = vrot.lane.b32.xlu0 %v4379_v24, %s8862_s26  ;;  %4413 = vrot.lane.b32.xlu1 %v4372_v52, %s8862_s26  ;;  %v4367_v24 = vpack.c.bf16 %v4365_v62, %v4353_v18 }
 0xc61   :  { %4419 = vrot.lane.b32.xlu0 %v4380_v7, %s8862_s26  ;;  %v4340_v7 = vpack.c.bf16 %v4336_v39, %v4335_v4 }
 0xcb7   :  { %v4402_v16 = vpop.permute.xlu1 %4401 }
 0xcb8   :  { %v4404_v49 = vpop.permute.xlu0 %4403  ;;  %v4439_v14 = vsel %vm290_vm3, %v4355_v6, %v4402_v16  ;;  %v4376_v16 = vpack.c.bf16 %v4374_v46, %v4366_v25 }
 0xcb9   :  { %4808 = vmatprep.mubr.bf16.mxu0 %v4439_v14  ;;  %v4443_v22 = vsel %vm290_vm3, %v4356_v38, %v4404_v49  ;;  %v4383_v38 = vpack.c.bf16 %v4381_v10, %v4373_v12  ;;  %v4368_v49 = vpack.c.bf16 %v4366_v25, %v4354_v27 }
 0xcba   :  { %4873 = vmatprep.mubr.bf16.mxu1 %v4443_v22 }
 0xcbb   :  { %v4390_v9 = vpop.permute.xlu1 %4389 }
 0xcbc   :  { %v4423_v32 = vsel %vm290_vm3, %v4337_v37, %v4390_v9  ;;  %v4382_v37 = vld [vmem:[#allocation2 + $0xa8] sm:$0xff] }
 0xcbd   :  { %4809 = vmatmul.mubr.bf16.vlgmr.msra.gmra.mrb[64].mxu0 %v4423_v32  ;;  %v4384_v9 = vpack.c.bf16 %v4382_v37, %v4374_v46 }
 0xcbe   :  { %8239 = vmatpush3.bf16.msra.mxu0 %v11228_v21  ;;  %4816 = vmatprep.mubr.bf16.mxu0 %v4443_v22  ;;  %v8488_v21 = vld [vmem:[%s12346_s4 + $0x478] sm:$0xff]  }
 0xcbf   :  { %v4392_v56 = vpop.permute.xlu1 %4391  ;;  %8240 = vmatprep.subr.bf16.mxu0 %v8486_v54 }
 0xcc0   :  { %v4427_v29 = vsel %vm290_vm3, %v4338_v0, %v4392_v56 }
 0xcc1   :  { %4874 = vmatmul.mubr.bf16.vlgmr.msra.gmra.mrb[64].mxu1 %v4427_v29 }
 0xcc2   :  { %8241 = vmatpush3.bf16.msra.mxu0 %v8486_v54 }
 0xcc3   :  { %v4394_v41 = vpop.permute.xlu1 %4393  ;;  %8242 = vmatprep.subr.bf16.mxu0 %v8487_v3 }
 0xcc4   :  { %v4431_v40 = vsel %vm290_vm3, %v4339_v26, %v4394_v41 }
 0xcc5   :  { %4817 = vmatmul.mubr.bf16.gmra.mrb[68].mxu0 %v4427_v29 }
 0xcc6   :  { %8243 = vmatpush3.bf16.msra.mxu0 %v8487_v3  ;;  %v11298_v3 = vld [vmem:[%s12347_s5 + $0x3] ss:$0 sm:$0xff] }
 0xcc7   :  { %v4406_v47 = vpop.permute.xlu0 %4405  ;;  %8244 = vmatprep.subr.bf16.mxu0 %v8488_v21  ;;  %v4396_v50 = vpop.permute.xlu1 %4395 }
 0xcc8   :  { %v4447_v57 = vsel %vm290_vm3, %v4357_v35, %v4406_v47  ;;  %v4435_v30 = vsel %vm290_vm3, %v4340_v7, %v4396_v50 }
 0xcc9   :  { %4824 = vmatprep.mubr.bf16.mxu0 %v4447_v57 }
 0xcca   :  { %8245 = vmatpush3.bf16.msra.mxu0 %v8488_v21 }
 0xccb   :  { %v4408_v13 = vpop.permute.xlu0 %4407  ;;  %v4412_v60 = vpop.permute.xlu1 %4411 }
 0xccc   :  { %v4451_v19 = vsel %vm290_vm3, %v4358_v1, %v4408_v13  ;;  %v4455_v55 = vsel %vm290_vm3, %v4367_v24, %v4412_v60 }
 0xccd   :  { %4825 = vmatmul.mubr.bf16.gmra.mrb[72].mxu0 %v4431_v40 }
 0xcce   :  { %4832 = vmatprep.mubr.bf16.mxu0 %v4451_v19 }
 0xccf   :  { %v4418_v28 = vpop.permute.xlu0 %4417  ;;  %v4414_v14 = vpop.permute.xlu1 %4413 }
 0xcd0   :  { %v4463_v52 = vsel %vm290_vm3, %v4375_v17, %v4418_v28  ;;  %v4459_v22 = vsel %vm290_vm3, %v4368_v49, %v4414_v14 }
 0xcd1   :  { %4881 = vmatprep.mubr.bf16.mxu1 %v4463_v52 }
 0xcd2   :  { %4882 = vmatmul.mubr.bf16.gmra.mrb[68].mxu1 %v4455_v55 }
 0xcd3   :  { %4889 = vmatprep.mubr.bf16.mxu1 %v4451_v19  ;;  %v4420_v6 = vpop.permute.xlu0 %4419 }
 0xcd4   :  { %v4467_v18 = vsel %vm290_vm3, %v4376_v16, %v4420_v6 }
 0xcd5   :  { %4833 = vmatmul.mubr.bf16.gmra.mrb[76].mxu0 %v4435_v30 }
 0xcd6   :  { %8246 = vmatprep.mubr.msk.bf16.mxu0 %vm290_vm3, %v4367_v24 }
 0xcda   :  { %4890 = vmatmul.mubr.bf16.gmra.mrb[72].mxu1 %v4435_v30 }
 0xcdb   :  { %4897 = vmatprep.mubr.bf16.mxu1 %v4467_v18 }
 0xcdd   :  { %8247 = vmatmul.mubr.msk.bf16.vlgmr.msra.gmra.mrb[80].mxu0 %vm290_vm3, %v4383_v38 }
 0xcde   :  { %8250 = vmatprep.mubr.msk.bf16.mxu0 %vm290_vm3, %v4368_v49 }
 0xce2   :  { %4898 = vmatmul.mubr.bf16.gmra.mrb[76].mxu1 %v4459_v22 }
 0xce5   :  { %8251 = vmatmul.mubr.msk.bf16.gmra.mrb[84].mxu0 %vm290_vm3, %v4384_v9 }
 0xd90   :  { %v7980_v54 = vpop.f32.mrb[64].mxu0 }
 0xd91   :  { %v7981_v32 = vpop.f32.mrb[65].mxu0 }
 0xd92   :  { %v7982_v0 = vadd.f32 %v7981_v32, %v7980_v54  ;;  %v7983_v56 = vpop.f32.mrb[66].mxu0 }
 0xd93   :  { %v7984_v29 = vpop.f32.mrb[67].mxu0 }
 0xd94   :  { %v7985_v41 = vadd.f32 %v7984_v29, %v7983_v56  ;;  %v8020_v20 = vpop.f32.mrb[64].mxu1  ;;  %v4811_v21 = vadd.f32 %v7982_v0, %v11298_v3 }
 0xd95   :  { %v8021_v4 = vpop.f32.mrb[65].mxu1 }
 0xd96   :  { %v8022_v36 = vadd.f32 %v8021_v4, %v8020_v20  ;;  %v8023_v35 = vpop.f32.mrb[66].mxu1  ;;  %v4814_v39 = vadd.f32 %v7985_v41, %v11298_v3 }
 0xd97   :  { %v8024_v47 = vpop.f32.mrb[67].mxu1 }
 0xd98   :  { %v8025_v50 = vadd.f32 %v8024_v47, %v8023_v35  ;;  %v7986_v57 = vpop.f32.mrb[68].mxu0  ;;  %v4876_v26 = vadd.f32 %v8022_v36, %v4811_v21 }
 0xd99   :  { %v7987_v27 = vpop.f32.mrb[69].mxu0 }
 0xd9a   :  { %v7988_v1 = vadd.f32 %v7987_v27, %v7986_v57  ;;  %v7989_v13 = vpop.f32.mrb[70].mxu0  ;;  %v4879_v62 = vadd.f32 %v8025_v50, %v4814_v39 }
 0xd9b   :  { %v7990_v12 = vpop.f32.mrb[71].mxu0 }
 0xd9c   :  { %v7991_v40 = vadd.f32 %v7990_v12, %v7989_v13  ;;  %v4819_v30 = vadd.f32 %v7988_v1, %v11298_v3 }
 0xd9e   :  { %v4822_v16 = vadd.f32 %v7991_v40, %v11298_v3 }
 0xda0   :  { %v7992_v19 = vpop.f32.mrb[72].mxu0 }
 0xda1   :  { %v7993_v60 = vpop.f32.mrb[73].mxu0 }
 0xda2   :  { %v7994_v17 = vadd.f32 %v7993_v60, %v7992_v19  ;;  %v7995_v28 = vpop.f32.mrb[74].mxu0 }
 0xda3   :  { %v7996_v24 = vpop.f32.mrb[75].mxu0 }
 0xda4   :  { %v7997_v52 = vadd.f32 %v7996_v24, %v7995_v28  ;;  %v4827_v56 = vadd.f32 %v7994_v17, %v11298_v3 }
 0xda5   :  { %v8026_v55 = vpop.f32.mrb[68].mxu1 }
 0xda6   :  { %v8027_v7 = vpop.f32.mrb[69].mxu1  ;;  %v4830_v21 = vadd.f32 %v7997_v52, %v11298_v3 }
 0xda7   :  { %v8028_v25 = vadd.f32 %v8027_v7, %v8026_v55  ;;  %v8029_v46 = vpop.f32.mrb[70].mxu1 }
 0xda8   :  { %v7998_v10 = vpop.f32.mrb[76].mxu0  ;;  %v8030_v6 = vpop.f32.mrb[71].mxu1 }
 0xda9   :  { %v7999_v38 = vpop.f32.mrb[77].mxu0  ;;  %v8031_v18 = vadd.f32 %v8030_v6, %v8029_v46  ;;  %v4884_v49 = vadd.f32 %v8028_v25, %v4819_v30 }
 0xdaa   :  { %v8000_v14 = vadd.f32 %v7999_v38, %v7998_v10  ;;  %v8001_v37 = vpop.f32.mrb[78].mxu0 }
 0xdab   :  { %v8002_v22 = vpop.f32.mrb[79].mxu0  ;;  %v4887_v9 = vadd.f32 %v8031_v18, %v4822_v16 }
 0xdac   :  { %v8003_v54 = vadd.f32 %v8002_v22, %v8001_v37  ;;  %v4835_v55 = vadd.f32 %v8000_v14, %v11298_v3 }
 0xdad   :  { %v8032_v32 = vpop.f32.mrb[72].mxu1 }
 0xdae   :  { %v8033_v0 = vpop.f32.mrb[73].mxu1 }
 0xdaf   :  { %v8034_v29 = vadd.f32 %v8033_v0, %v8032_v32  ;;  %v8035_v41 = vpop.f32.mrb[74].mxu1 }
 0xdb0   :  { %v8248_v20 = vpop.f32.mrb[80].mxu0  ;;  %v8036_v4 = vpop.f32.mrb[75].mxu1 }
 0xdb1   :  { %v11306_v36 = vadd.f32 %v8248_v20, %v4884_v49  ;;  %v8037_v35 = vadd.f32 %v8036_v4, %v8035_v41  ;;  %v4940_v47 = vpop.f32.mrb[81].mxu0  ;;  %v4892_v39 = vadd.f32 %v8034_v29, %v4827_v56 }
 0xdb2   :  { %v11308_v50 = vadd.f32 %v4940_v47, %v4876_v26  ;;  %v8249_v57 = vpop.f32.mrb[82].mxu0 }
 0xdb3   :  { %v4981_v27 = vmul.f32 0.044715, %v11306_v36  ;;  %v11311_v1 = vadd.f32 %v8249_v57, %v4887_v9  ;;  %v4943_v13 = vpop.f32.mrb[83].mxu0  ;;  %v4895_v12 = vadd.f32 %v8037_v35, %v4830_v21 }
 0xdb4   :  { %v4979_v40 = vmul.f32 0.044715, %v11308_v50  ;;  %v11314_v19 = vadd.f32 %v4943_v13, %v4879_v62  ;;  %v4838_v62 = vadd.f32 %v8003_v54, %v11298_v3 }
 0xdb5   :  { %v4989_v60 = vmul.f32 %v4981_v27, %v11306_v36  ;;  %v4982_v17 = vmul.f32 0.044715, %v11311_v1  ;;  %v8038_v28 = vpop.f32.mrb[76].mxu1 }
 0xdb6   :  { %v4987_v24 = vmul.f32 %v4979_v40, %v11308_v50  ;;  %v4980_v26 = vmul.f32 0.044715, %v11314_v19  ;;  %v8039_v52 = vpop.f32.mrb[77].mxu1 }
 0xdb7   :  { %v4997_v7 = vmul.f32 %v4989_v60, %v11306_v36  ;;  %v4990_v30 = vmul.f32 %v4982_v17, %v11311_v1  ;;  %v8040_v25 = vadd.f32 %v8039_v52, %v8038_v28  ;;  %v8041_v46 = vpop.f32.mrb[78].mxu1 }
 0xdb8   :  { %v4995_v10 = vmul.f32 %v4987_v24, %v11308_v50  ;;  %v4988_v6 = vmul.f32 %v4980_v26, %v11314_v19  ;;  %v8252_v16 = vpop.f32.mrb[84].mxu0  ;;  %v8042_v38 = vpop.f32.mrb[79].mxu1 }
 0xdb9   :  { %v5005_v18 = vadd.f32 %v4997_v7, %v11306_v36  ;;  %v4998_v49 = vmul.f32 %v4990_v30, %v11311_v1  ;;  %v4900_v37 = vadd.f32 %v8040_v25, %v4835_v55  ;;  %v8043_v14 = vadd.f32 %v8042_v38, %v8041_v46  ;;  %v4956_v22 = vpop.f32.mrb[85].mxu0 }
 0xdba   :  { %v5003_v9 = vadd.f32 %v4995_v10, %v11308_v50  ;;  %v4996_v32 = vmul.f32 %v4988_v6, %v11314_v19  ;;  %v11330_v0 = vadd.f32 %v4956_v22, %v4892_v39  ;;  %v8253_v3 = vpop.f32.mrb[86].mxu0  ;;  %v4973_v30 = vmul.f32 0.5, %v11306_v36 }
 0xdbb   :  { %v5006_v54 = vadd.f32 %v4998_v49, %v11311_v1  ;;  %v11333_v56 = vadd.f32 %v8252_v16, %v4900_v37  ;;  %v4903_v29 = vadd.f32 %v8043_v14, %v4838_v62  ;;  %v4959_v41 = vpop.f32.mrb[87].mxu0  ;;  %v5013_v20 = vmul.f32 0.7978846, %v5005_v18 }
 0xdbc   :  { %v5004_v4 = vadd.f32 %v4996_v32, %v11314_v19  ;;  %v11336_v21 = vadd.f32 %v4959_v41, %v4895_v12  ;;  %v5011_v35 = vmul.f32 0.7978846, %v5003_v9  ;;  %v4983_v27 = vmul.f32 0.044715, %v11330_v0 }
 0xdbd   :  { %v4985_v47 = vmul.f32 0.044715, %v11333_v56  ;;  %v11339_v57 = vadd.f32 %v8253_v3, %v4903_v29  ;;  %8731 = vtanh.f32 %v5013_v20  ;;  %v5014_v39 = vmul.f32 0.7978846, %v5006_v54 }
 0xdbe   :  { %8733 = vtanh.f32 %v5011_v35  ;;  %v5012_v40 = vmul.f32 0.7978846, %v5004_v4  ;;  %v4991_v17 = vmul.f32 %v4983_v27, %v11330_v0  ;;  %v4984_v55 = vmul.f32 0.044715, %v11336_v21 }
 0xdbf   :  { %v4986_v13 = vmul.f32 0.044715, %v11339_v57  ;;  %8735 = vtanh.f32 %v5014_v39  ;;  %v4993_v60 = vmul.f32 %v4985_v47, %v11333_v56  ;;  %v4971_v10 = vmul.f32 0.5, %v11308_v50 }
 0xdc0   :  { %8737 = vtanh.f32 %v5012_v40  ;;  %v4999_v24 = vmul.f32 %v4991_v17, %v11330_v0  ;;  %v4974_v18 = vmul.f32 0.5, %v11311_v1  ;;  %v4992_v14 = vmul.f32 %v4984_v55, %v11336_v21 }
 0xdc1   :  { %v4994_v12 = vmul.f32 %v4986_v13, %v11339_v57  ;;  %v5001_v28 = vmul.f32 %v4993_v60, %v11333_v56  ;;  %v4972_v20 = vmul.f32 0.5, %v11314_v19 }
 0xdc2   :  { %v5007_v16 = vadd.f32 %v4999_v24, %v11330_v0  ;;  %v5000_v1 = vmul.f32 %v4992_v14, %v11336_v21 }
 0xdc3   :  { %v5002_v52 = vmul.f32 %v4994_v12, %v11339_v57  ;;  %v5009_v62 = vadd.f32 %v5001_v28, %v11333_v56  ;;  %v4977_v12 = vmul.f32 0.5, %v11333_v56 }
 0xdc4   :  { %v5015_v32 = vmul.f32 0.7978846, %v5007_v16  ;;  %v5008_v4 = vadd.f32 %v5000_v1, %v11336_v21 }
 0xdc5   :  { %v5010_v37 = vadd.f32 %v5002_v52, %v11339_v57  ;;  %v5017_v9 = vmul.f32 0.7978846, %v5009_v62  ;;  %v4975_v52 = vmul.f32 0.5, %v11330_v0 }
 0xdc6   :  { %v5016_v19 = vmul.f32 0.7978846, %v5008_v4 }
 0xdc7   :  { %v8732_v26 = vpop.eup %8731  ;;  %v5018_v3 = vmul.f32 0.7978846, %v5010_v37  ;;  %8739 = vtanh.f32 %v5017_v9 }
 0xdc8   :  { %v8734_v7 = vpop.eup %8733  ;;  %v5029_v25 = vadd.f32 1.0, %v8732_v26  ;;  %8741 = vtanh.f32 %v5015_v32  ;;  %v4978_v26 = vmul.f32 0.5, %v11339_v57 }
 0xdc9   :  { %v8736_v46 = vpop.eup %8735  ;;  %v5027_v6 = vadd.f32 1.0, %v8734_v7  ;;  %8743 = vtanh.f32 %v5018_v3 }
 0xdca   :  { %v11354_v38 = vmul.f32 %v5029_v25, %v4973_v30  ;;  %v5030_v49 = vadd.f32 1.0, %v8736_v46  ;;  %v8738_v50 = vpop.eup %8737  ;;  %8745 = vtanh.f32 %v5016_v19  ;;  %v4976_v25 = vmul.f32 0.5, %v11336_v21 }
 0xdcb   :  { %v11363_v22 = vmul.f32 %v5027_v6, %v4971_v10  ;;  %v5028_v29 = vadd.f32 1.0, %v8738_v50 }
 0xdcc   :  { %5055 = vrot.lane.b32.xlu0 %v11354_v38, %s8859_s0  ;;  %v11361_v36 = vmul.f32 %v5030_v49, %v4974_v18  ;;  %v11378_v41 = vadd.f32 %v11354_v38, %v10808_v23 }
 0xdcd   :  { %v11372_v54 = vadd.f32 %v11363_v22, %v10820_v61  ;;  %v11384_v61 = vmul.f32 %v5028_v29, %v4972_v20 }
 0xdce   :  { %5057 = vrot.lane.b32.xlu1 %v11361_v36, %s8859_s0  ;;  %v11392_v23 = vadd.f32 %v11361_v36, %v10816_v11  ;;  %v5311_v47 = vmul.f32 %v11378_v41, %v11378_v41 }
 0xdcf   :  { %v5309_v35 = vmul.f32 %v11372_v54, %v11372_v54  ;;  %v11402_v27 = vadd.f32 %v11384_v61, %v10828_v45 }
 0xdd0   :  { %5051 = vrot.lane.b32.xlu0 %v11363_v22, %s8859_s0  ;;  %v5312_v39 = vmul.f32 %v11392_v23, %v11392_v23 }
 0xdd1   :  { %v8740_v13 = vpop.eup %8739  ;;  %v5310_v60 = vmul.f32 %v11402_v27, %v11402_v27 }
 0xdd2   :  { %5253 = vrot.lane.b32.xlu1 %v11372_v54, %s8859_s0  ;;  %v8742_v40 = vpop.eup %8741  ;;  %v5033_v17 = vadd.f32 1.0, %v8740_v13 }
 0xdd3   :  { %v8744_v11 = vpop.eup %8743  ;;  %v5031_v45 = vadd.f32 1.0, %v8742_v40 }
 0xdd4   :  { %5257 = vrot.lane.b32.xlu0 %v11378_v41, %s8859_s0  ;;  %v5034_v28 = vadd.f32 1.0, %v8744_v11  ;;  %v11413_v24 = vmul.f32 %v5033_v17, %v4977_v12  ;;  %v8746_v30 = vpop.eup %8745 }
 0xdd5   :  { %v11421_v7 = vmul.f32 %v5031_v45, %v4975_v52  ;;  %v5032_v57 = vadd.f32 1.0, %v8746_v30 }
 0xdd6   :  { %5053 = vrot.lane.b32.xlu1 %v11384_v61, %s8859_s0  ;;  %v11419_v55 = vmul.f32 %v5034_v28, %v4978_v26  ;;  %v11435_v0 = vadd.f32 %v11413_v24, %v10864_v59 }
 0xdd7   :  { %v11429_v56 = vadd.f32 %v11421_v7, %v10876_v43  ;;  %v11440_v46 = vmul.f32 %v5032_v57, %v4976_v25 }
 0xdd8   :  { %5325 = vrot.lane.b32.xlu0 %v5309_v35, %s8859_s0  ;;  %v11446_v43 = vadd.f32 %v11419_v55, %v10872_v53  ;;  %v5315_v59 = vmul.f32 %v11435_v0, %v11435_v0 }
 0xdd9   :  { %v5313_v21 = vmul.f32 %v11429_v56, %v11429_v56  ;;  %v11457_v62 = vadd.f32 %v11440_v46, %v10884_v63 }
 0xdda   :  { %5329 = vrot.lane.b32.xlu1 %v5311_v47, %s8859_s0  ;;  %v5316_v10 = vmul.f32 %v11446_v43, %v11446_v43 }
 0xddb   :  { %v5314_v53 = vmul.f32 %v11457_v62, %v11457_v62 }
 0xddc   :  { %5331 = vrot.lane.b32.xlu0 %v5312_v39, %s8859_s0 }
 0xdde   :  { %5259 = vrot.lane.b32.xlu1 %v11392_v23, %s8859_s0 }
 0xde0   :  { %5327 = vrot.lane.b32.xlu0 %v5310_v60, %s8859_s0 }
 0xde2   :  { %5255 = vrot.lane.b32.xlu1 %v11402_v27, %s8859_s0 }
 0xde4   :  { %5063 = vrot.lane.b32.xlu0 %v11413_v24, %s8859_s0 }
 0xde6   :  { %5065 = vrot.lane.b32.xlu1 %v11419_v55, %s8859_s0 }
 0xde8   :  { %5059 = vrot.lane.b32.xlu0 %v11421_v7, %s8859_s0 }
 0xdea   :  { %5261 = vrot.lane.b32.xlu1 %v11429_v56, %s8859_s0 }
 0xdec   :  { %5265 = vrot.lane.b32.xlu0 %v11435_v0, %s8859_s0 }
 0xdee   :  { %5061 = vrot.lane.b32.xlu1 %v11440_v46, %s8859_s0 }
 0xdf0   :  { %5267 = vrot.lane.b32.xlu0 %v11446_v43, %s8859_s0 }
 0xdf2   :  { %5337 = vrot.lane.b32.xlu1 %v5315_v59, %s8859_s0 }
 0xdf4   :  { %5333 = vrot.lane.b32.xlu0 %v5313_v21, %s8859_s0 }
 0xdf6   :  { %5263 = vrot.lane.b32.xlu1 %v11457_v62, %s8859_s0 }
 0xdf8   :  { %5335 = vrot.lane.b32.xlu0 %v5314_v53, %s8859_s0 }
 0xdfa   :  { %5339 = vrot.lane.b32.xlu1 %v5316_v10, %s8859_s0 }
 0xe3e   :  { %v5056_v6 = vpop.permute.xlu0 %5055 }
 0xe3f   :  { %v5077_v63 = vadd.f32 %v5056_v6, %v11354_v38 }
 0xe40   :  { %v5058_v16 = vpop.permute.xlu1 %5057 }
 0xe41   :  { %v11471_v50 = vadd.f32 %v5077_v63, %v10902_v34  ;;  %v5078_v34 = vadd.f32 %v5058_v16, %v11361_v36 }
 0xe42   :  { %v5052_v18 = vpop.permute.xlu0 %5051 }
 0xe43   :  { %v5107_v3 = vsel %vm316_vm2, %v11471_v50, 0.0  ;;  %v5075_v38 = vadd.f32 %v5052_v18, %v11363_v22  ;;  %v11484_v13 = vadd.f32 %v5078_v34, %v10922_v15 }
 0xe44   :  { %v5254_v49 = vpop.permute.xlu1 %5253 }
 0xe45   :  { %v5277_v37 = vsel %vm316_vm2, %v5254_v49, 0.0  ;;  %v11480_v19 = vadd.f32 %v5075_v38, %v10910_v5  ;;  %v5110_v17 = vsel %vm316_vm2, %v11484_v13, 0.0  ;;  %v5136_v52 = vmul.f32 %v11484_v13, %v11484_v13 }
 0xe46   :  { %v5258_v14 = vpop.permute.xlu0 %5257  ;;  %5278 = vadd.xlane.f32.xlu1 %v5277_v37 }
 0xe47   :  { %v5283_v9 = vsel %vm316_vm2, %v5258_v14, 0.0  ;;  %v5101_v60 = vsel %vm316_vm2, %v11480_v19, 0.0  ;;  %v5133_v59 = vmul.f32 %v11480_v19, %v11480_v19  ;;  %v5150_v53 = vsel %vm316_vm2, %v5136_v52, 0.0  ;;  %v8490_v52 = vld [vmem:[%s12346_s4 + $0x480] sm:$0xff]  }
 0xe48   :  { %v5054_v32 = vpop.permute.xlu1 %5053  ;;  %5284 = vadd.xlane.f32.xlu0 %v5283_v9 }
 0xe49   :  { %v5076_v40 = vadd.f32 %v5054_v32, %v11384_v61  ;;  %v5135_v61 = vmul.f32 %v11471_v50, %v11471_v50  ;;  %v5141_v6 = vsel %vm316_vm2, %v5133_v59, 0.0  ;;  %v8495_v59 = vld [vmem:[%s12346_s4 + $0x4d0] sm:$0xff]  }
 0xe4a   :  { %v5326_v1 = vpop.permute.xlu0 %5325 }
 0xe4b   :  { %v11491_v5 = vadd.f32 %v5076_v40, %v10925_v2  ;;  %v5349_v15 = vsel %vm316_vm2, %v5326_v1, 0.0  ;;  %v5147_v26 = vsel %vm316_vm2, %v5135_v61, 0.0 }
 0xe4c   :  { %5108 = vadd.xlane.f32.xlu0 %v5107_v3  ;;  %v5330_v29 = vpop.permute.xlu1 %5329 }
 0xe4d   :  { %v5355_v20 = vsel %vm316_vm2, %v5330_v29, 0.0  ;;  %v5104_v45 = vsel %vm316_vm2, %v11491_v5, 0.0  ;;  %v5134_v10 = vmul.f32 %v11491_v5, %v11491_v5 }
 0xe4e   :  { %v5332_v4 = vpop.permute.xlu0 %5331 }
 0xe4f   :  { %v5358_v25 = vsel %vm316_vm2, %v5332_v4, 0.0  ;;  %v5144_v49 = vsel %vm316_vm2, %v5134_v10, 0.0  ;;  %v8496_v10 = vld [vmem:[%s12346_s4 + $0x490] sm:$0xff]  }
 0xe50   :  { %5356 = vadd.xlane.f32.xlu0 %v5355_v20  ;;  %v5260_v35 = vpop.permute.xlu1 %5259 }
 0xe51   :  { %v5286_v47 = vsel %vm316_vm2, %v5260_v35, 0.0 }
 0xe52   :  { %v5328_v11 = vpop.permute.xlu0 %5327 }
 0xe53   :  { %v5352_v2 = vsel %vm316_vm2, %v5328_v11, 0.0 }
 0xe54   :  { %5287 = vadd.xlane.f32.xlu0 %v5286_v47  ;;  %v5256_v39 = vpop.permute.xlu1 %5255 }
 0xe55   :  { %v5280_v22 = vsel %vm316_vm2, %v5256_v39, 0.0 }
 0xe56   :  { %5281 = vadd.xlane.f32.xlu1 %v5280_v22  ;;  %v5064_v12 = vpop.permute.xlu0 %5063 }
 0xe57   :  { %v5081_v37 = vadd.f32 %v5064_v12, %v11413_v24 }
 0xe58   :  { %5102 = vadd.xlane.f32.xlu0 %v5101_v60  ;;  %v5066_v36 = vpop.permute.xlu1 %5065 }
 0xe59   :  { %v5082_v14 = vadd.f32 %v5066_v36, %v11419_v55  ;;  %v11522_v1 = vadd.f32 %v5081_v37, %v10943_v42  ;;  %v8503_v37 = vld [vmem:[%s12346_s4 + $0x4e0] sm:$0xff]  }
 0xe5a   :  { %5111 = vadd.xlane.f32.xlu1 %v5110_v17  ;;  %v5060_v30 = vpop.permute.xlu0 %5059 }
 0xe5b   :  { %v5079_v21 = vadd.f32 %v5060_v30, %v11421_v7  ;;  %v11526_v3 = vadd.f32 %v5082_v14, %v10960_v48  ;;  %v5119_v55 = vsel %vm316_vm2, %v11522_v1, 0.0  ;;  %v5139_v22 = vmul.f32 %v11522_v1, %v11522_v1  ;;  %v8491_v30 = vld [vmem:[%s12346_s4 + $0x4c8] sm:$0xff]   ;;  %v8509_v14 = vld [vmem:[%s12346_s4 + $0x560] sm:$0xff]  }
 0xe5c   :  { %5350 = vadd.xlane.f32.xlu0 %v5349_v15  ;;  %v5262_v28 = vpop.permute.xlu1 %5261 }
 0xe5d   :  { %v11513_v63 = vadd.f32 %v5079_v21, %v10955_v51  ;;  %v5289_v51 = vsel %vm316_vm2, %v5262_v28, 0.0  ;;  %v5122_v42 = vsel %vm316_vm2, %v11526_v3, 0.0  ;;  %v5140_v11 = vmul.f32 %v11526_v3, %v11526_v3  ;;  %v11559_v28 = vld [vmem:[%s12345_s3 + $0x10] sm:$0xf]  ;;  %v8498_v21 = vld [vmem:[%s12346_s4 + $0x508] sm:$0xff]  }
 0xe5e   :  { %5105 = vadd.xlane.f32.xlu1 %v5104_v45  ;;  %v5266_v16 = vpop.permute.xlu0 %5265  ;;  %v5159_v60 = vsel %vm316_vm2, %v5139_v22, 0.0  ;;  %v5432_v45 = vrot.slane %v11559_v28, %v9138_v44  ;;  %v8493_v44 = vld [vmem:[%s12346_s4 + $0x540] sm:$0xff]  }
 0xe5f   :  { %v5295_v7 = vsel %vm316_vm2, %v5266_v16, 0.0  ;;  %v5113_v9 = vsel %vm316_vm2, %v11513_v63, 0.0  ;;  %v5137_v20 = vmul.f32 %v11513_v63, %v11513_v63  ;;  %v5162_v17 = vsel %vm316_vm2, %v5140_v11, 0.0  ;;  %8092 = vmatprep.subr.bf16.mxu0 %v8493_v44  ;;  %v8502_v16 = vld [vmem:[%s12346_s4 + $0x510] sm:$0xff]  }
 0xe60   :  { %5148 = vadd.xlane.f32.xlu0 %v5147_v26  ;;  %v5062_v57 = vpop.permute.xlu1 %5061  ;;  %v5448_v26 = vrot.slane %v11559_v28, %v9155_v58  ;;  %v8494_v58 = vld [vmem:[%s12346_s4 + $0x500] sm:$0xff]  }
 0xe61   :  { %v5080_v38 = vadd.f32 %v5062_v57, %v11440_v46  ;;  %v5153_v34 = vsel %vm316_vm2, %v5137_v20, 0.0  ;;  %v8497_v57 = vld [vmem:[%s12346_s4 + $0x548] sm:$0xff]   ;;  %8093 = vmatpush3.bf16.msra.mxu0 %v8494_v58  ;;  %v8512_v20 = vld [vmem:[%s12346_s4 + $0x4b0] sm:$0xff]  }
 0xe62   :  { %5353 = vadd.xlane.f32.xlu1 %v5352_v2  ;;  %v5268_v29 = vpop.permute.xlu0 %5267  ;;  %v8489_v2 = vld [vmem:[%s12346_s4 + $0x4c0] sm:$0xff]   ;;  %8094 = vmatprep.subr.bf16.mxu0 %v8497_v57 }
 0xe63   :  { %v11538_v35 = vadd.f32 %v5080_v38, %v10972_v31  ;;  %v5298_v47 = vsel %vm316_vm2, %v5268_v29, 0.0  ;;  %8052 = vmatprep.subr.bf16.mxu1 %v8489_v2  ;;  %v8508_v29 = vld [vmem:[%s12346_s4 + $0x4a8] sm:$0xff]  }
 0xe64   :  { %5359 = vadd.xlane.f32.xlu0 %v5358_v25  ;;  %v5338_v18 = vpop.permute.xlu1 %5337  ;;  %8053 = vmatpush3.bf16.msra.mxu1 %v8490_v52  ;;  %v8492_v25 = vld [vmem:[%s12346_s4 + $0x488] sm:$0xff]  }
 0xe65   :  { %v5367_v48 = vsel %vm316_vm2, %v5338_v18, 0.0  ;;  %v5116_v46 = vsel %vm316_vm2, %v11538_v35, 0.0  ;;  %v5138_v15 = vmul.f32 %v11538_v35, %v11538_v35  ;;  %8054 = vmatprep.subr.bf16.mxu1 %v8491_v30  ;;  %8095 = vmatpush3.bf16.msra.mxu0 %v8498_v21  ;;  %v8505_v18 = vld [vmem:[%s12346_s4 + $0x558] sm:$0xff]   ;;  %v8514_v38 = vld [vmem:[%s12346_s4 + $0x528] sm:$0xff]  }
 0xe66   :  { %5151 = vadd.xlane.f32.xlu1 %v5150_v53  ;;  %v5334_v4 = vpop.permute.xlu0 %5333  ;;  %v8501_v53 = vld [vmem:[%s12346_s4 + $0x550] sm:$0xff]  }
 0xe67   :  { %v5361_v40 = vsel %vm316_vm2, %v5334_v4, 0.0  ;;  %v5156_v12 = vsel %vm316_vm2, %v5138_v15, 0.0  ;;  %8096 = vmatprep.subr.bf16.mxu0 %v8501_v53 }
 0xe68   :  { %5142 = vadd.xlane.f32.xlu0 %v5141_v6  ;;  %v5264_v32 = vpop.permute.xlu1 %5263  ;;  %8055 = vmatpush3.bf16.msra.mxu1 %v8492_v25  ;;  %v8499_v6 = vld [vmem:[%s12346_s4 + $0x4d8] sm:$0xff]  }
 0xe69   :  { %v5292_v24 = vsel %vm316_vm2, %v5264_v32, 0.0  ;;  %8056 = vmatprep.subr.bf16.mxu1 %v8495_v59  ;;  %8097 = vmatpush3.bf16.msra.mxu0 %v8502_v16  ;;  %v8507_v32 = vld [vmem:[%s12346_s4 + $0x4e8] sm:$0xff]  }
 0xe6a   :  { %5145 = vadd.xlane.f32.xlu1 %v5144_v49  ;;  %v5336_v39 = vpop.permute.xlu0 %5335  ;;  %v8500_v49 = vld [vmem:[%s12346_s4 + $0x498] sm:$0xff]   ;;  %8098 = vmatprep.subr.bf16.mxu0 %v8505_v18 }
 0xe6b   :  { %v5364_v31 = vsel %vm316_vm2, %v5336_v39, 0.0 }
 0xe6c   :  { %5296 = vadd.xlane.f32.xlu0 %v5295_v7  ;;  %v5340_v36 = vpop.permute.xlu1 %5339  ;;  %8057 = vmatpush3.bf16.msra.mxu1 %v8496_v10  ;;  %v8506_v7 = vld [vmem:[%s12346_s4 + $0x518] sm:$0xff]  }
 0xe6d   :  { %v5370_v61 = vsel %vm316_vm2, %v5340_v36, 0.0  ;;  %8058 = vmatprep.subr.bf16.mxu1 %v8499_v6  ;;  %8099 = vmatpush3.bf16.msra.mxu0 %v8506_v7 }
 0xe6e   :  { %5114 = vadd.xlane.f32.xlu1 %v5113_v9  ;;  %v8504_v9 = vld [vmem:[%s12346_s4 + $0x4a0] sm:$0xff]   ;;  %8100 = vmatprep.subr.bf16.mxu0 %v8509_v14 }
 0xe70   :  { %5290 = vadd.xlane.f32.xlu0 %v5289_v51  ;;  %8059 = vmatpush3.bf16.msra.mxu1 %v8500_v49  ;;  %v8510_v51 = vld [vmem:[%s12346_s4 + $0x520] sm:$0xff]  }
 0xe71   :  { %8060 = vmatprep.subr.bf16.mxu1 %v8503_v37  ;;  %8101 = vmatpush3.bf16.msra.mxu0 %v8510_v51 }
 0xe72   :  { %5293 = vadd.xlane.f32.xlu1 %v5292_v24  ;;  %v8513_v24 = vld [vmem:[%s12346_s4 + $0x568] sm:$0xff]  }
 0xe73   :  { %8102 = vmatprep.subr.bf16.mxu0 %v8513_v24 }
 0xe74   :  { %5120 = vadd.xlane.f32.xlu0 %v5119_v55  ;;  %8061 = vmatpush3.bf16.msra.mxu1 %v8504_v9  ;;  %v8511_v55 = vld [vmem:[%s12346_s4 + $0x4f0] sm:$0xff]  }
 0xe75   :  { %8062 = vmatprep.subr.bf16.mxu1 %v8507_v32  ;;  %8103 = vmatpush3.bf16.msra.mxu0 %v8514_v38 }
 0xe76   :  { %5123 = vadd.xlane.f32.xlu1 %v5122_v42 }
 0xe78   :  { %5368 = vadd.xlane.f32.xlu0 %v5367_v48  ;;  %8063 = vmatpush3.bf16.msra.mxu1 %v8508_v29 }
 0xe79   :  { %8064 = vmatprep.subr.bf16.mxu1 %v8511_v55 }
 0xe7a   :  { %5154 = vadd.xlane.f32.xlu1 %v5153_v34 }
 0xe7c   :  { %5299 = vadd.xlane.f32.xlu0 %v5298_v47  ;;  %8065 = vmatpush3.bf16.msra.mxu1 %v8512_v20 }
 0xe7e   :  { %5117 = vadd.xlane.f32.xlu1 %v5116_v46 }
 0xe80   :  { %5362 = vadd.xlane.f32.xlu0 %v5361_v40 }
 0xe82   :  { %5365 = vadd.xlane.f32.xlu1 %v5364_v31 }
 0xe84   :  { %5160 = vadd.xlane.f32.xlu0 %v5159_v60 }
 0xe86   :  { %5163 = vadd.xlane.f32.xlu1 %v5162_v17 }
 0xe88   :  { %5371 = vadd.xlane.f32.xlu0 %v5370_v61 }
 0xe8a   :  { %5157 = vadd.xlane.f32.xlu1 %v5156_v12 }
 0xe9b   :  { %5434 = vrot.lane.b32.xlu1 %v5432_v45, %s8860_s30 }
 0xe9e   :  { %5450 = vrot.lane.b32.xlu0 %v5448_v26, %s8860_s30 }
 0xed3   :  { %v5279_v34 = vpop.xlane.xlu1 %5278 }
 0xed4   :  { %v11647_v12 = vmul.f32 0.03125, %v5279_v34 }
 0xed5   :  { %v5285_v42 = vpop.xlane.xlu0 %5284 }
 0xed6   :  { %v11645_v15 = vmul.f32 0.03125, %v5285_v42  ;;  %v5381_v59 = vmul.f32 %v11647_v12, %v11647_v12 }
 0xed8   :  { %v5383_v44 = vmul.f32 %v11645_v15, %v11645_v15 }
 0xed9   :  { %v5109_v48 = vpop.xlane.xlu0 %5108 }
 0xeda   :  { %v11649_v45 = vmul.f32 0.03125, %v5109_v48 }
 0xedc   :  { %v5175_v10 = vmul.f32 %v11649_v45, %v11649_v45 }
 0xedd   :  { %v5357_v4 = vpop.xlane.xlu0 %5356 }
 0xede   :  { %v5375_v26 = vmul.f32 0.03125, %v5357_v4 }
 0xee0   :  { %v5391_v6 = vsub.f32 %v5375_v26, %v5383_v44 }
 0xee1   :  { %v5288_v47 = vpop.xlane.xlu0 %5287 }
 0xee2   :  { %v5407_v55 = vadd.f32 1e-05, %v5391_v6  ;;  %v11671_v38 = vmul.f32 0.03125, %v5288_v47 }
 0xee3   :  { %v5282_v46 = vpop.xlane.xlu1 %5281 }
 0xee4   :  { %v11667_v51 = vmul.f32 0.03125, %v5282_v46  ;;  %8747 = vrsqrt.f32 %v5407_v55 }
 0xee5   :  { %v5103_v39 = vpop.xlane.xlu0 %5102 }
 0xee6   :  { %v11655_v58 = vmul.f32 0.03125, %v5103_v39 }
 0xee7   :  { %v5112_v40 = vpop.xlane.xlu1 %5111 }
 0xee8   :  { %v11651_v52 = vmul.f32 0.03125, %v5112_v40  ;;  %v5173_v14 = vmul.f32 %v11655_v58, %v11655_v58 }
 0xee9   :  { %v5351_v22 = vpop.xlane.xlu0 %5350 }
 0xeea   :  { %v5373_v30 = vmul.f32 0.03125, %v5351_v22  ;;  %v5176_v49 = vmul.f32 %v11651_v52, %v11651_v52 }
 0xeeb   :  { %v5106_v31 = vpop.xlane.xlu1 %5105 }
 0xeec   :  { %v11659_v21 = vmul.f32 0.03125, %v5106_v31  ;;  %v5389_v37 = vsub.f32 %v5373_v30, %v5381_v59  ;;  %v5382_v31 = vmul.f32 %v11667_v51, %v11667_v51 }
 0xeed   :  { %v5149_v11 = vpop.xlane.xlu0 %5148 }
 0xeee   :  { %v5167_v57 = vmul.f32 0.03125, %v5149_v11  ;;  %v5174_v24 = vmul.f32 %v11659_v21, %v11659_v21  ;;  %v5405_v48 = vadd.f32 1e-05, %v5389_v37  ;;  %v5384_v11 = vmul.f32 %v11671_v38, %v11671_v38  ;;  %v8748_v55 = vpop.eup %8747 }
 0xeef   :  { %v5354_v60 = vpop.xlane.xlu1 %5353  ;;  %v11689_v37 = vrot.slane %v11559_v28, %v9303_v8 }
 0xef0   :  { %v5183_v9 = vsub.f32 %v5167_v57, %v5175_v10  ;;  %v5374_v4 = vmul.f32 0.03125, %v5354_v60  ;;  %8749 = vrsqrt.f32 %v5405_v48 }
 0xef1   :  { %v5360_v36 = vpop.xlane.xlu0 %5359 }
 0xef2   :  { %v5199_v39 = vadd.f32 1e-05, %v5183_v9  ;;  %v5376_v40 = vmul.f32 0.03125, %v5360_v36  ;;  %v5390_v47 = vsub.f32 %v5374_v4, %v5382_v31  ;;  %v11693_v9 = vrot.slane %v11559_v28, %v9309_v33 }
 0xef3   :  { %v5152_v17 = vpop.xlane.xlu1 %5151  ;;  %v5191_v33 = vsub.f32 %v11471_v50, %v11649_v45  ;;  %v5189_v45 = vsub.f32 %v11480_v19, %v11655_v58 }
 0xef4   :  { %v5168_v53 = vmul.f32 0.03125, %v5152_v17  ;;  %8751 = vrsqrt.f32 %v5199_v39  ;;  %v5392_v60 = vsub.f32 %v5376_v40, %v5384_v11  ;;  %v5406_v59 = vadd.f32 1e-05, %v5390_v47 }
 0xef5   :  { %v5143_v61 = vpop.xlane.xlu0 %5142 }
 0xef6   :  { %v5165_v16 = vmul.f32 0.03125, %v5143_v61  ;;  %v5184_v29 = vsub.f32 %v5168_v53, %v5176_v49  ;;  %v5408_v6 = vadd.f32 1e-05, %v5392_v60 }
 0xef7   :  { %v5146_v2 = vpop.xlane.xlu1 %5145 }
 0xef8   :  { %v5166_v7 = vmul.f32 0.03125, %v5146_v2  ;;  %v5181_v42 = vsub.f32 %v5165_v16, %v5173_v14  ;;  %v5200_v46 = vadd.f32 1e-05, %v5184_v29 }
 0xef9   :  { %v5297_v25 = vpop.xlane.xlu0 %5296 }
 0xefa   :  { %v5182_v34 = vsub.f32 %v5166_v7, %v5174_v24  ;;  %v5197_v17 = vadd.f32 1e-05, %v5181_v42  ;;  %v11679_v30 = vmul.f32 0.03125, %v5297_v25  ;;  %8753 = vrsqrt.f32 %v5200_v46  ;;  %v8750_v4 = vpop.eup %8749 }
 0xefb   :  { %v5115_v18 = vpop.xlane.xlu1 %5114  ;;  %v5399_v42 = vsub.f32 %v11378_v41, %v11645_v15  ;;  %v5398_v41 = vsub.f32 %v11402_v27, %v11667_v51  ;;  %v5190_v27 = vsub.f32 %v11491_v5, %v11659_v21 }
 0xefc   :  { %v5198_v26 = vadd.f32 1e-05, %v5182_v34  ;;  %v11677_v2 = vmul.f32 0.03125, %v5115_v18  ;;  %8755 = vrsqrt.f32 %v5197_v17  ;;  %v5387_v16 = vmul.f32 %v11679_v30, %v11679_v30 }
 0xefd   :  { %v5291_v32 = vpop.xlane.xlu0 %5290  ;;  %v5423_v17 = vmul.f32 %v8748_v55, %v5399_v42 }
 0xefe   :  { %8757 = vrsqrt.f32 %v5198_v26  ;;  %v5177_v53 = vmul.f32 %v11677_v2, %v11677_v2  ;;  %v11685_v49 = vmul.f32 0.03125, %v5291_v32  ;;  %v5397_v32 = vsub.f32 %v11372_v54, %v11647_v12  ;;  %v8752_v34 = vpop.eup %8751 }
 0xeff   :  { %v5294_v20 = vpop.xlane.xlu1 %5293  ;;  %8759 = vrsqrt.f32 %v5406_v59  ;;  %v5400_v54 = vsub.f32 %v11392_v23, %v11671_v38  ;;  %v5192_v23 = vsub.f32 %v11484_v13, %v11651_v52 }
 0xf00   :  { %v11695_v24 = vmul.f32 0.03125, %v5294_v20  ;;  %8761 = vrsqrt.f32 %v5408_v6  ;;  %v5385_v28 = vmul.f32 %v11685_v49, %v11685_v49 }
 0xf01   :  { %v5121_v22 = vpop.xlane.xlu0 %5120 }
 0xf02   :  { %v11701_v8 = vmul.f32 0.03125, %v5121_v22  ;;  %v5386_v22 = vmul.f32 %v11695_v24, %v11695_v24 }
 0xf03   :  { %v5124_v61 = vpop.xlane.xlu1 %5123 }
 0xf04   :  { %v11711_v15 = vmul.f32 0.03125, %v5124_v61  ;;  %v8754_v40 = vpop.eup %8753  ;;  %v5179_v51 = vmul.f32 %v11701_v8, %v11701_v8 }
 0xf05   :  { %v5369_v36 = vpop.xlane.xlu0 %5368  ;;  %v5216_v6 = vmul.f32 %v8754_v40, %v5192_v23 }
 0xf06   :  { %v5379_v44 = vmul.f32 0.03125, %v5369_v36  ;;  %v8756_v11 = vpop.eup %8755  ;;  %v5215_v36 = vmul.f32 %v8752_v34, %v5191_v33 }
 0xf07   :  { %v5155_v57 = vpop.xlane.xlu1 %5154 }
 0xf08   :  { %v5169_v10 = vmul.f32 0.03125, %v5155_v57  ;;  %v5395_v7 = vsub.f32 %v5379_v44, %v5387_v16  ;;  %v8758_v61 = vpop.eup %8757  ;;  %v5180_v44 = vmul.f32 %v11711_v15, %v11711_v15  ;;  %v5213_v16 = vmul.f32 %v8756_v11, %v5189_v45 }
 0xf09   :  { %v5300_v18 = vpop.xlane.xlu0 %5299  ;;  %v5228_v45 = vmul.f32 %v11689_v37, %v5216_v6 }
 0xf0a   :  { %v5185_v25 = vsub.f32 %v5169_v10, %v5177_v53  ;;  %v5411_v12 = vadd.f32 1e-05, %v5395_v7  ;;  %v11723_v47 = vmul.f32 0.03125, %v5300_v18  ;;  %v5421_v10 = vmul.f32 %v8750_v4, %v5397_v32  ;;  %v8760_v7 = vpop.eup %8759 }
 0xf0b   :  { %v5118_v14 = vpop.xlane.xlu1 %5117  ;;  %v5214_v18 = vmul.f32 %v8758_v61, %v5190_v27  ;;  %v8762_v33 = vpop.eup %8761  ;;  %v5422_v40 = vmul.f32 %v8760_v7, %v5398_v41  ;;  %v5401_v27 = vsub.f32 %v11429_v56, %v11685_v49 }
 0xf0c   :  { %v5201_v29 = vadd.f32 1e-05, %v5185_v25  ;;  %v11727_v57 = vmul.f32 0.03125, %v5118_v14  ;;  %v5227_v14 = vmul.f32 %v11689_v37, %v5215_v36  ;;  %v5424_v23 = vmul.f32 %v8762_v33, %v5400_v54 }
 0xf0d   :  { %v5363_v48 = vpop.xlane.xlu0 %5362 }
 0xf0e   :  { %8763 = vrsqrt.f32 %v5201_v29  ;;  %v5377_v20 = vmul.f32 0.03125, %v5363_v48  ;;  %v5388_v29 = vmul.f32 %v11723_v47, %v11723_v47  ;;  %v5178_v32 = vmul.f32 %v11727_v57, %v11727_v57 }
 0xf0f   :  { %v5366_v39 = vpop.xlane.xlu1 %5365  ;;  %8765 = vrsqrt.f32 %v5411_v12  ;;  %v5239_v11 = vadd.f32 %v11693_v9, %v5227_v14 }
 0xf10   :  { %v5393_v31 = vsub.f32 %v5377_v20, %v5385_v28  ;;  %v5378_v46 = vmul.f32 0.03125, %v5366_v39  ;;  %v5403_v28 = vsub.f32 %v11435_v0, %v11679_v30  ;;  %v5226_v0 = vmul.f32 %v11689_v37, %v5214_v18 }
 0xf11   :  { %v5161_v38 = vpop.xlane.xlu0 %5160  ;;  %v5195_v18 = vsub.f32 %v11522_v1, %v11701_v8 }
 0xf12   :  { %v5409_v58 = vadd.f32 1e-05, %v5393_v31  ;;  %v5394_v26 = vsub.f32 %v5378_v46, %v5386_v22  ;;  %v5171_v60 = vmul.f32 0.03125, %v5161_v38  ;;  %v5225_v22 = vmul.f32 %v11689_v37, %v5213_v16 }
 0xf13   :  { %v5164_v52 = vpop.xlane.xlu1 %5163  ;;  %v5193_v31 = vsub.f32 %v11513_v63, %v11677_v2 }
 0xf14   :  { %8767 = vrsqrt.f32 %v5409_v58  ;;  %v5410_v21 = vadd.f32 1e-05, %v5394_v26  ;;  %v5187_v59 = vsub.f32 %v5171_v60, %v5179_v51  ;;  %v5172_v53 = vmul.f32 0.03125, %v5164_v52 }
 0xf15   :  { %v5372_v25 = vpop.xlane.xlu0 %5371  ;;  %v5240_v60 = vadd.f32 %v11693_v9, %v5228_v45  ;;  %v5237_v36 = vadd.f32 %v11693_v9, %v5225_v22 }
 0xf16   :  { %v5203_v55 = vadd.f32 1e-05, %v5187_v59  ;;  %v5188_v42 = vsub.f32 %v5172_v53, %v5180_v44  ;;  %v5380_v48 = vmul.f32 0.03125, %v5372_v25  ;;  %8769 = vrsqrt.f32 %v5410_v21  ;;  %v8515_v59 = vld [vmem:[%s12346_s4 + $0x4f8] sm:$0xff]  }
 0xf17   :  { %v5158_v4 = vpop.xlane.xlu1 %5157  ;;  %v5238_v44 = vadd.f32 %v11693_v9, %v5226_v0  ;;  %v8516_v53 = vld [vmem:[%s12346_s4 + $0x4b8] sm:$0xff]   ;;  %8066 = vmatprep.subr.bf16.mxu1 %v8515_v59 }
 0xf18   :  { %v8764_v20 = vpop.eup %8763  ;;  %8771 = vrsqrt.f32 %v5203_v55  ;;  %v5204_v34 = vadd.f32 1e-05, %v5188_v42  ;;  %v5396_v12 = vsub.f32 %v5380_v48, %v5388_v29  ;;  %v5170_v39 = vmul.f32 0.03125, %v5158_v4  ;;  %v8517_v29 = vld [vmem:[%s12346_s4 + $0x570] sm:$0xff]   ;;  %8067 = vmatpush3.bf16.msra.mxu1 %v8516_v53  ;;  %v8520_v0 = vld [vmem:[%s12346_s4 + $0x578] sm:$0xff]  }
 0xf19   :  { %v5217_v51 = vmul.f32 %v8764_v20, %v5193_v31  ;;  %v11746_v38 = vpop.permute.xlu0 %5450  ;;  %v8766_v26 = vpop.eup %8765  ;;  %v8518_v55 = vld [vmem:[%s12346_s4 + $0x530] sm:$0xff]   ;;  %v5402_v4 = vsub.f32 %v11457_v62, %v11695_v24  ;;  %v5196_v20 = vsub.f32 %v11526_v3, %v11711_v15  ;;  %8104 = vmatprep.subr.bf16.mxu0 %v8517_v29  ;;  %v11793_v62 = vld [vmem:[%s12346_s4 + $0x580] sm:$0xff]   ;;  %v5404_v15 = vsub.f32 %v11446_v43, %v11723_v47  ;;  %v5511_v29 = vld [vmem:[#allocation2 + $0x48] sm:$0xff] }
 0xf1a   :  { %8773 = vrsqrt.f32 %v5204_v34  ;;  %v5412_v30 = vadd.f32 1e-05, %v5396_v12  ;;  %v5186_v46 = vsub.f32 %v5170_v39, %v5178_v32  ;;  %v5427_v48 = vmul.f32 %v8766_v26, %v5403_v28  ;;  %8105 = vmatpush3.bf16.msra.mxu0 %v8518_v55  ;;  %8254 = vmatprep.subr.bf16.mxu1 %v11793_v62  ;;  %v11818_v26 = vld [vmem:[#allocation2 + $0x8] sm:$0xff]  ;;  %v11849_v55 = vld [vmem:[#allocation2 + $0x50] sm:$0xff] }
 0xf1b   :  { %v11744_v41 = vpop.permute.xlu1 %5434  ;;  %v5194_v43 = vsub.f32 %v11538_v35, %v11727_v57  ;;  %8106 = vmatprep.subr.bf16.mxu0 %v8520_v0  ;;  %v5477_v0 = vld [vmem:[#allocation2] sm:$0xff] }
 0xf1c   :  { %8775 = vrsqrt.f32 %v5412_v30  ;;  %v5202_v61 = vadd.f32 1e-05, %v5186_v46  ;;  %v5437_v2 = vmul.f32 %v11744_v41, %v5421_v10  ;;  %v5438_v58 = vmul.f32 %v11744_v41, %v5422_v40  ;;  %v8521_v30 = vld [vmem:[%s12346_s4 + $0x538] sm:$0xff]  }
 0xf1d   :  { %v5439_v54 = vmul.f32 %v11744_v41, %v5423_v17  ;;  %v5440_v56 = vmul.f32 %v11744_v41, %v5424_v23  ;;  %v5229_v17 = vmul.f32 %v11689_v37, %v5217_v51  ;;  %v5443_v12 = vmul.f32 %v11744_v41, %v5427_v48  ;;  %v11812_v51 = vld [vmem:[#allocation2 + $0x18] sm:$0xff] }
 0xf1e   :  { %v8768_v49 = vpop.eup %8767  ;;  %8777 = vrsqrt.f32 %v5202_v61  ;;  %v5453_v52 = vadd.f32 %v11746_v38, %v5437_v2  ;;  %v5454_v21 = vadd.f32 %v11746_v38, %v5438_v58  ;;  %8107 = vmatpush3.bf16.msra.mxu0 %v8521_v30 }
 0xf1f   :  { %v5425_v10 = vmul.f32 %v8768_v49, %v5401_v27  ;;  %v5455_v6 = vadd.f32 %v11746_v38, %v5439_v54  ;;  %v5456_v16 = vadd.f32 %v11746_v38, %v5440_v56  ;;  %v5241_v28 = vadd.f32 %v11693_v9, %v5229_v17  ;;  %v5479_v49 = vld [vmem:[#allocation2 + $0x10] sm:$0xff] }
 0xf20   :  { %v5461_v25 = vsel %vm316_vm2, %v5237_v36, %v5453_v52  ;;  %v5462_v7 = vsel %vm316_vm2, %v5238_v44, %v5454_v21  ;;  %v8770_v42 = vpop.eup %8769  ;;  %v5459_v27 = vadd.f32 %v11746_v38, %v5443_v12 }
 0xf21   :  { %v5441_v33 = vmul.f32 %v11744_v41, %v5425_v10  ;;  %v5463_v14 = vsel %vm316_vm2, %v5239_v11, %v5455_v6  ;;  %v5464_v8 = vsel %vm316_vm2, %v5240_v60, %v5456_v16  ;;  %5469 = vst.msk [vmem:[#allocation2 + $0x20] sm:$0xff] %vm290_vm3, %v5461_v25  ;;  %5470 = vst.msk [vmem:[#allocation2 + $0x28] sm:$0xff] %vm290_vm3, %v5462_v7  ;;  %v11837_v10 = vld [vmem:[#allocation2 + $0x78] sm:$0xff] }
 0xf22   :  { %v8772_v32 = vpop.eup %8771  ;;  %5471 = vst.msk [vmem:[#allocation2 + $0x30] sm:$0xff] %vm290_vm3, %v5463_v14  ;;  %5472 = vst.msk [vmem:[#allocation2 + $0x38] sm:$0xff] %vm290_vm3, %v5464_v8  ;;  %v5426_v40 = vmul.f32 %v8770_v42, %v5402_v4  ;;  %v5491_v16 = vpack.c.bf16 %v5479_v49, %v11818_v26  ;;  %v5483_v14 = vld [vmem:[#allocation2 + $0x70] sm:$0xff] }
 0xf23   :  { %v5219_v34 = vmul.f32 %v8772_v32, %v5195_v18  ;;  %v5457_v39 = vadd.f32 %v11746_v38, %v5441_v33  ;;  %v5507_v33 = vld [vmem:[#allocation2 + $0x40] sm:$0xff] }
 0xf24   :  { %v8774_v24 = vpop.eup %8773  ;;  %v5442_v60 = vmul.f32 %v11744_v41, %v5426_v40  ;;  %v5508_v32 = vld [vmem:[#allocation2 + $0xa0] sm:$0xff]  ;;  %v5512_v40 = vld [vmem:[#allocation2 + $0xa8] sm:$0xff] }
 0xf25   :  { %v5231_v45 = vmul.f32 %v11689_v37, %v5219_v34  ;;  %v5220_v22 = vmul.f32 %v8774_v24, %v5196_v20  ;;  %v5465_v31 = vsel %vm316_vm2, %v5241_v28, %v5457_v39 }
 0xf26   :  { %v8776_v46 = vpop.eup %8775  ;;  %5473 = vst.msk [vmem:[#allocation2 + $0x80] sm:$0xff] %vm290_vm3, %v5465_v31  ;;  %v5458_v25 = vadd.f32 %v11746_v38, %v5442_v60  ;;  %v5486_v31 = vpack.c.bf16 %v11812_v51, %v5479_v49  ;;  %v8524_v49 = vld [vmem:[%s12346_s4 + $0x598] sm:$0xff]  }
 0xf27   :  { %v5243_v47 = vadd.f32 %v11693_v9, %v5231_v45  ;;  %v5232_v11 = vmul.f32 %v11689_v37, %v5220_v22  ;;  %v5428_v23 = vmul.f32 %v8776_v46, %v5404_v15  ;;  %v11868_v45 = vld [vmem:[#allocation2 + $0xb0] sm:$0xff] }
 0xf28   :  { %v8778_v61 = vpop.eup %8777  ;;  %v11814_v2 = vld [vmem:[#allocation2 + $0x28] sm:$0xff]  ;;  %v11816_v58 = vld [vmem:[#allocation2 + $0x20] sm:$0xff]  ;;  %v5518_v22 = vpack.c.bf16 %v11868_v45, %v5512_v40 }
 0xf29   :  { %v5218_v57 = vmul.f32 %v8778_v61, %v5194_v43  ;;  %v5444_v36 = vmul.f32 %v11744_v41, %v5428_v23  ;;  %v5467_v54 = vsel %vm316_vm2, %v5243_v47, %v5459_v27  ;;  %v11823_v56 = vld [vmem:[#allocation2 + $0x30] sm:$0xff]  ;;  %v11825_v44 = vld [vmem:[#allocation2 + $0x38] sm:$0xff]  ;;  %v5492_v21 = vpack.c.bf16 %v11816_v58, %v11812_v51  ;;  %v8522_v27 = vld [vmem:[%s12346_s4 + $0x588] sm:$0xff]  }
 0xf2a   :  { %5475 = vst.msk [vmem:[#allocation2 + $0x90] sm:$0xff] %vm290_vm3, %v5467_v54  ;;  %v5501_v52 = vpack.c.bf16 %v11823_v56, %v11814_v2  ;;  %v5497_v59 = vpack.c.bf16 %v11814_v2, %v11816_v58  ;;  %v5244_v41 = vadd.f32 %v11693_v9, %v5232_v11  ;;  %v5505_v6 = vpack.c.bf16 %v11825_v44, %v11823_v56 }
 0xf2b   :  { %v5230_v53 = vmul.f32 %v11689_v37, %v5218_v57  ;;  %v5460_v17 = vadd.f32 %v11746_v38, %v5444_v36  ;;  %5529 = vrot.lane.b32.xlu1 %v5492_v21, %s8862_s26  ;;  %v11859_v38 = vld [vmem:[#allocation2 + $0x68] sm:$0xff]  ;;  %v5509_v8 = vpack.c.bf16 %v5507_v33, %v11825_v44  ;;  %v5485_v47 = vpack.c.bf16 %v11818_v26, %v5477_v0  ;;  %v8523_v26 = vld [vmem:[%s12346_s4 + $0x590] sm:$0xff]  }
 0xf2c   :  { %5537 = vrot.lane.b32.xlu0 %v5501_v52, %s8862_s26  ;;  %v5493_v4 = vpack.c.bf16 %v5483_v14, %v11859_v38  ;;  %v5513_v2 = vpack.c.bf16 %v5511_v29, %v5507_v33  ;;  %v5488_v54 = vpack.c.bf16 %v11837_v10, %v5483_v14 }
 0xf2d   :  { %v5242_v18 = vadd.f32 %v11693_v9, %v5230_v53  ;;  %v5468_v7 = vsel %vm316_vm2, %v5244_v41, %v5460_v17  ;;  %v11847_v37 = vld [vmem:[#allocation2 + $0x80] sm:$0xff]  ;;  %v5517_v9 = vpack.c.bf16 %v11849_v55, %v5511_v29  ;;  %v5514_v17 = vpack.c.bf16 %v5512_v40, %v5508_v32 }
 0xf2e   :  { %5476 = vst.msk [vmem:[#allocation2 + $0x98] sm:$0xff] %vm290_vm3, %v5468_v7  ;;  %v5494_v42 = vpack.c.bf16 %v11847_v37, %v11837_v10  ;;  %v5520_v7 = vld [vmem:[#allocation2 + $0xb8] sm:$0xff]  ;;  %v8525_v29 = vld [vmem:[%s12348_s6] sm:$0xff]  }
 0xf2f   :  { %v5466_v48 = vsel %vm316_vm2, %v5242_v18, %v5458_v25  ;;  %5527 = vrot.lane.b32.xlu1 %v5491_v16, %s8862_s26  ;;  %v5519_v18 = vld [vmem:[#allocation2 + $0x58] sm:$0xff] }
 0xf30   :  { %5474 = vst.msk [vmem:[#allocation2 + $0x88] sm:$0xff] %vm290_vm3, %v5466_v48  ;;  %5533 = vrot.lane.b32.xlu0 %v5494_v42, %s8862_s26  ;;  %v5521_v25 = vpack.c.bf16 %v5519_v18, %v11849_v55 }
 0xf31   :  { %v5500_v28 = vld [vmem:[#allocation2 + $0x90] sm:$0xff] }
 0xf33   :  { %5543 = vrot.lane.b32.xlu1 %v5509_v8, %s8862_s26 }
 0xf34   :  { %5549 = vrot.lane.b32.xlu0 %v5517_v9, %s8862_s26 }
 0xf35   :  { %v5504_v20 = vld [vmem:[#allocation2 + $0x98] sm:$0xff] }
 0xf36   :  { %v5510_v34 = vpack.c.bf16 %v5508_v32, %v5504_v20  ;;  %v5506_v12 = vpack.c.bf16 %v5504_v20, %v5500_v28 }
 0xf37   :  { %v5496_v39 = vld [vmem:[#allocation2 + $0x88] sm:$0xff]  ;;  %5531 = vrot.lane.b32.xlu1 %v5493_v4, %s8862_s26 }
 0xf38   :  { %5545 = vrot.lane.b32.xlu0 %v5510_v34, %s8862_s26  ;;  %v5502_v24 = vpack.c.bf16 %v5500_v28, %v5496_v39  ;;  %v5498_v15 = vpack.c.bf16 %v5496_v39, %v11847_v37  ;;  %v5522_v37 = vpack.c.bf16 %v5520_v7, %v11868_v45 }
 0xf3b   :  { %5539 = vrot.lane.b32.xlu1 %v5502_v24, %s8862_s26 }
 0xf3f   :  { %5551 = vrot.lane.b32.xlu1 %v5518_v22, %s8862_s26 }
 0xf9d   :  { %v5530_v46 = vpop.permute.xlu1 %5529 }
 0xf9e   :  { %v5538_v30 = vpop.permute.xlu0 %5537  ;;  %v5559_v43 = vsel %vm290_vm3, %v5486_v31, %v5530_v46 }
 0xf9f   :  { %5932 = vmatprep.mubr.bf16.mxu1 %v5559_v43  ;;  %v5571_v51 = vsel %vm290_vm3, %v5497_v59, %v5538_v30 }
 0xfa1   :  { %v5528_v11 = vpop.permute.xlu1 %5527 }
 0xfa2   :  { %v5534_v23 = vpop.permute.xlu0 %5533  ;;  %v5555_v61 = vsel %vm290_vm3, %v5485_v47, %v5528_v11 }
 0xfa3   :  { %5933 = vmatmul.mubr.bf16.vlgmr.msra.gmra.mrb[80].mxu1 %v5555_v61  ;;  %v5567_v44 = vsel %vm290_vm3, %v5488_v54, %v5534_v23 }
 0xfa4   :  { %8255 = vmatpush3.bf16.msra.mxu1 %v11793_v62  ;;  %5940 = vmatprep.mubr.bf16.mxu1 %v5571_v51  ;;  %v5481_v62 = vld [vmem:[#allocation2 + $0x60] sm:$0xff] }
 0xfa5   :  { %v5544_v58 = vpop.permute.xlu1 %5543  ;;  %8256 = vmatprep.subr.bf16.mxu1 %v8522_v27  ;;  %v5487_v52 = vpack.c.bf16 %v11859_v38, %v5481_v62  ;;  %v7611_v38 = vld [vmem:[%s12347_s5 + $0x4] ss:$0 sm:$0xff] }
 0xfa6   :  { %v5550_v57 = vpop.permute.xlu0 %5549  ;;  %v5579_v60 = vsel %vm290_vm3, %v5505_v6, %v5544_v58 }
 0xfa7   :  { %v5587_v36 = vsel %vm290_vm3, %v5513_v2, %v5550_v57  ;;  %5997 = vmatprep.mubr.bf16.mxu0 %v5579_v60 }
 0xfa8   :  { %5998 = vmatmul.mubr.bf16.vlgmr.msra.gmra.mrb[88].mxu0 %v5571_v51  ;;  %8257 = vmatpush3.bf16.msra.mxu1 %v8522_v27 }
 0xfa9   :  { %v5532_v56 = vpop.permute.xlu1 %5531  ;;  %6005 = vmatprep.mubr.bf16.mxu0 %v5587_v36  ;;  %8258 = vmatprep.subr.bf16.mxu1 %v8523_v26 }
 0xfaa   :  { %v5546_v21 = vpop.permute.xlu0 %5545  ;;  %v5563_v53 = vsel %vm290_vm3, %v5487_v52, %v5532_v56 }
 0xfab   :  { %5941 = vmatmul.mubr.bf16.gmra.mrb[84].mxu1 %v5559_v43  ;;  %v5583_v41 = vsel %vm290_vm3, %v5506_v12, %v5546_v21 }
 0xfac   :  { %5948 = vmatprep.mubr.bf16.mxu1 %v5567_v44  ;;  %8259 = vmatpush3.bf16.msra.mxu1 %v8523_v26 }
 0xfad   :  { %8260 = vmatprep.subr.bf16.mxu1 %v8524_v49  ;;  %v5540_v59 = vpop.permute.xlu1 %5539 }
 0xfae   :  { %v5575_v10 = vsel %vm290_vm3, %v5498_v15, %v5540_v59 }
 0xfb0   :  { %6006 = vmatmul.mubr.bf16.gmra.mrb[92].mxu0 %v5579_v60  ;;  %8261 = vmatpush3.bf16.msra.mxu1 %v8524_v49 }
 0xfb1   :  { %6013 = vmatprep.mubr.bf16.mxu0 %v5583_v41  ;;  %v5552_v6 = vpop.permute.xlu1 %5551  ;;  %8270 = vmatprep.subr.bf16.mxu1 %v8525_v29 }
 0xfb2   :  { %v5591_v16 = vsel %vm290_vm3, %v5514_v17, %v5552_v6 }
 0xfb3   :  { %5949 = vmatmul.mubr.bf16.gmra.mrb[88].mxu1 %v5563_v53 }
 0xfb4   :  { %5956 = vmatprep.mubr.bf16.mxu1 %v5575_v10 }
 0xfb8   :  { %6014 = vmatmul.mubr.bf16.gmra.mrb[96].mxu0 %v5575_v10 }
 0xfb9   :  { %6021 = vmatprep.mubr.bf16.mxu0 %v5591_v16 }
 0xfbb   :  { %5957 = vmatmul.mubr.bf16.gmra.mrb[92].mxu1 %v5567_v44 }
 0xfbc   :  { %8262 = vmatprep.mubr.msk.bf16.mxu1 %vm290_vm3, %v5513_v2 }
 0xfc0   :  { %6022 = vmatmul.mubr.bf16.gmra.mrb[100].mxu0 %v5583_v41 }
 0xfc3   :  { %8263 = vmatmul.mubr.msk.bf16.vlgmr.msra.gmra.mrb[96].mxu1 %vm290_vm3, %v5521_v25 }
 0xfc4   :  { %8266 = vmatprep.mubr.msk.bf16.mxu1 %vm290_vm3, %v5514_v17  ;;  %8271 = vmatpush3.bf16.msra.mxu1 %v8525_v29 }
 0xfcb   :  { %8267 = vmatmul.mubr.msk.bf16.gmra.mrb[100].mxu1 %vm290_vm3, %v5522_v37 }
0x1076   :  { %v8068_v42 = vpop.f32.mrb[80].mxu1 }
0x1077   :  { %v8069_v48 = vpop.f32.mrb[81].mxu1 }
0x1078   :  { %v8070_v33 = vadd.f32 %v8069_v48, %v8068_v42  ;;  %v8071_v55 = vpop.f32.mrb[82].mxu1 }
0x1079   :  { %v8072_v9 = vpop.f32.mrb[83].mxu1 }
0x107a   :  { %v8073_v14 = vadd.f32 %v8072_v9, %v8071_v55  ;;  %v5935_v4 = vadd.f32 %v8070_v33, %v7611_v38 }
0x107b   :  { %v8108_v8 = vpop.f32.mrb[88].mxu0 }
0x107c   :  { %v8109_v32 = vpop.f32.mrb[89].mxu0  ;;  %v5938_v39 = vadd.f32 %v8073_v14, %v7611_v38 }
0x107d   :  { %v8110_v20 = vadd.f32 %v8109_v32, %v8108_v8  ;;  %v8111_v28 = vpop.f32.mrb[90].mxu0 }
0x107e   :  { %v8074_v34 = vpop.f32.mrb[84].mxu1  ;;  %v8112_v12 = vpop.f32.mrb[91].mxu0 }
0x107f   :  { %v8113_v24 = vadd.f32 %v8112_v12, %v8111_v28  ;;  %v8075_v15 = vpop.f32.mrb[85].mxu1  ;;  %v6000_v40 = vadd.f32 %v8110_v20, %v5935_v4 }
0x1080   :  { %v8076_v45 = vadd.f32 %v8075_v15, %v8074_v34  ;;  %v8077_v22 = vpop.f32.mrb[86].mxu1 }
0x1081   :  { %v8078_v31 = vpop.f32.mrb[87].mxu1  ;;  %v6003_v0 = vadd.f32 %v8113_v24, %v5938_v39 }
0x1082   :  { %v8079_v30 = vadd.f32 %v8078_v31, %v8077_v22  ;;  %v5943_v47 = vadd.f32 %v8076_v45, %v7611_v38 }
0x1083   :  { %v8114_v46 = vpop.f32.mrb[92].mxu0 }
0x1084   :  { %v8115_v43 = vpop.f32.mrb[93].mxu0  ;;  %v5946_v2 = vadd.f32 %v8079_v30, %v7611_v38 }
0x1085   :  { %v8116_v11 = vadd.f32 %v8115_v43, %v8114_v46  ;;  %v8117_v23 = vpop.f32.mrb[94].mxu0 }
0x1086   :  { %v8080_v27 = vpop.f32.mrb[88].mxu1  ;;  %v8118_v61 = vpop.f32.mrb[95].mxu0 }
0x1087   :  { %v8119_v51 = vadd.f32 %v8118_v61, %v8117_v23  ;;  %v8081_v58 = vpop.f32.mrb[89].mxu1  ;;  %v6008_v57 = vadd.f32 %v8116_v11, %v5943_v47 }
0x1088   :  { %v8082_v26 = vadd.f32 %v8081_v58, %v8080_v27  ;;  %v8083_v60 = vpop.f32.mrb[90].mxu1 }
0x1089   :  { %v8084_v36 = vpop.f32.mrb[91].mxu1  ;;  %v6011_v54 = vadd.f32 %v8119_v51, %v5946_v2 }
0x108a   :  { %v8085_v56 = vadd.f32 %v8084_v36, %v8083_v60  ;;  %v5951_v44 = vadd.f32 %v8082_v26, %v7611_v38 }
0x108b   :  { %v8120_v62 = vpop.f32.mrb[96].mxu0 }
0x108c   :  { %v8121_v49 = vpop.f32.mrb[97].mxu0  ;;  %v5954_v53 = vadd.f32 %v8085_v56, %v7611_v38 }
0x108d   :  { %v8122_v52 = vadd.f32 %v8121_v49, %v8120_v62  ;;  %v8123_v21 = vpop.f32.mrb[98].mxu0 }
0x108e   :  { %v8086_v59 = vpop.f32.mrb[92].mxu1  ;;  %v8124_v41 = vpop.f32.mrb[99].mxu0 }
0x108f   :  { %v8125_v17 = vadd.f32 %v8124_v41, %v8123_v21  ;;  %v8087_v10 = vpop.f32.mrb[93].mxu1  ;;  %v6016_v6 = vadd.f32 %v8122_v52, %v5951_v44 }
0x1090   :  { %v8088_v16 = vadd.f32 %v8087_v10, %v8086_v59  ;;  %v8089_v18 = vpop.f32.mrb[94].mxu1 }
0x1091   :  { %v8090_v25 = vpop.f32.mrb[95].mxu1  ;;  %v6019_v7 = vadd.f32 %v8125_v17, %v5954_v53 }
0x1092   :  { %v8091_v37 = vadd.f32 %v8090_v25, %v8089_v18  ;;  %v5959_v48 = vadd.f32 %v8088_v16, %v7611_v38 }
0x1093   :  { %v8126_v29 = vpop.f32.mrb[100].mxu0 }
0x1094   :  { %v8127_v42 = vpop.f32.mrb[101].mxu0  ;;  %v5962_v8 = vadd.f32 %v8091_v37, %v7611_v38 }
0x1095   :  { %v8128_v33 = vadd.f32 %v8127_v42, %v8126_v29  ;;  %v8129_v55 = vpop.f32.mrb[102].mxu0 }
0x1096   :  { %v8130_v9 = vpop.f32.mrb[103].mxu0  ;;  %v8264_v14 = vpop.f32.mrb[96].mxu1 }
0x1097   :  { %v8131_v32 = vadd.f32 %v8130_v9, %v8129_v55  ;;  %v11909_v4 = vadd.f32 %v8264_v14, %v6008_v57  ;;  %v6064_v20 = vpop.f32.mrb[97].mxu1  ;;  %v6024_v28 = vadd.f32 %v8128_v33, %v5959_v48 }
0x1098   :  { %v11911_v34 = vadd.f32 %v6064_v20, %v6000_v40  ;;  %v8265_v12 = vpop.f32.mrb[98].mxu1 }
0x1099   :  { %v6105_v39 = vmul.f32 0.044715, %v11909_v4  ;;  %v11914_v24 = vadd.f32 %v8265_v12, %v6011_v54  ;;  %v6067_v15 = vpop.f32.mrb[99].mxu1  ;;  %v6027_v45 = vadd.f32 %v8131_v32, %v5962_v8 }
0x109a   :  { %v6103_v22 = vmul.f32 0.044715, %v11911_v34  ;;  %v11917_v31 = vadd.f32 %v6067_v15, %v6003_v0 }
0x109b   :  { %v6113_v38 = vmul.f32 %v6105_v39, %v11909_v4  ;;  %v6106_v30 = vmul.f32 0.044715, %v11914_v24 }
0x109c   :  { %v6111_v46 = vmul.f32 %v6103_v22, %v11911_v34  ;;  %v6104_v40 = vmul.f32 0.044715, %v11917_v31 }
0x109d   :  { %v6121_v43 = vmul.f32 %v6113_v38, %v11909_v4  ;;  %v6114_v47 = vmul.f32 %v6106_v30, %v11914_v24 }
0x109e   :  { %v6119_v11 = vmul.f32 %v6111_v46, %v11911_v34  ;;  %v6112_v23 = vmul.f32 %v6104_v40, %v11917_v31  ;;  %v8268_v27 = vpop.f32.mrb[100].mxu1  ;;  %v6096_v46 = vmul.f32 0.5, %v11917_v31 }
0x109f   :  { %v6129_v0 = vadd.f32 %v6121_v43, %v11909_v4  ;;  %v6122_v61 = vmul.f32 %v6114_v47, %v11914_v24  ;;  %v11929_v2 = vadd.f32 %v8268_v27, %v6024_v28  ;;  %v6080_v51 = vpop.f32.mrb[101].mxu1  ;;  %v8526_v28 = vld [vmem:[%s12348_s6 + $0x8] sm:$0xff]  }
0x10a0   :  { %v6127_v58 = vadd.f32 %v6119_v11, %v11911_v34  ;;  %v6120_v57 = vmul.f32 %v6112_v23, %v11917_v31  ;;  %v11933_v26 = vadd.f32 %v6080_v51, %v6016_v6  ;;  %v8269_v60 = vpop.f32.mrb[102].mxu1  ;;  %8272 = vmatprep.subr.bf16.mxu1 %v8526_v28  ;;  %v6097_v11 = vmul.f32 0.5, %v11909_v4 }
0x10a1   :  { %v6130_v36 = vadd.f32 %v6122_v61, %v11914_v24  ;;  %v6109_v54 = vmul.f32 0.044715, %v11929_v2  ;;  %v11937_v56 = vadd.f32 %v8269_v60, %v6027_v45  ;;  %v6083_v62 = vpop.f32.mrb[103].mxu1  ;;  %v6137_v49 = vmul.f32 0.7978846, %v6129_v0  ;;  %8273 = vmatpush3.bf16.msra.mxu1 %v8526_v28  ;;  %v8530_v28 = vld [vmem:[%s12349_s8 + $0x18] sm:$0xff]  }
0x10a2   :  { %v6128_v44 = vadd.f32 %v6120_v57, %v11917_v31  ;;  %v6107_v52 = vmul.f32 0.044715, %v11933_v26  ;;  %v6084_v21 = vadd.f32 %v6083_v62, %v6019_v7  ;;  %v6135_v59 = vmul.f32 0.7978846, %v6127_v58 }
0x10a3   :  { %v6117_v41 = vmul.f32 %v6109_v54, %v11929_v2  ;;  %v6110_v53 = vmul.f32 0.044715, %v11937_v56  ;;  %8779 = vtanh.f32 %v6137_v49  ;;  %v6138_v17 = vmul.f32 0.7978846, %v6130_v36 }
0x10a4   :  { %v6115_v10 = vmul.f32 %v6107_v52, %v11933_v26  ;;  %v6108_v6 = vmul.f32 0.044715, %v6084_v21  ;;  %8781 = vtanh.f32 %v6135_v59  ;;  %v6136_v16 = vmul.f32 0.7978846, %v6128_v44 }
0x10a5   :  { %v6125_v18 = vmul.f32 %v6117_v41, %v11929_v2  ;;  %v6118_v25 = vmul.f32 %v6110_v53, %v11937_v56  ;;  %8783 = vtanh.f32 %v6138_v17  ;;  %v6095_v45 = vmul.f32 0.5, %v11911_v34 }
0x10a6   :  { %v6123_v37 = vmul.f32 %v6115_v10, %v11933_v26  ;;  %v6116_v7 = vmul.f32 %v6108_v6, %v6084_v21  ;;  %8785 = vtanh.f32 %v6136_v16  ;;  %v6098_v34 = vmul.f32 0.5, %v11914_v24 }
0x10a7   :  { %v6133_v29 = vadd.f32 %v6125_v18, %v11929_v2  ;;  %v6126_v42 = vmul.f32 %v6118_v25, %v11937_v56  ;;  %v6099_v31 = vmul.f32 0.5, %v11933_v26  ;;  %v6100_v4 = vmul.f32 0.5, %v6084_v21 }
0x10a8   :  { %v6131_v48 = vadd.f32 %v6123_v37, %v11933_v26  ;;  %v6124_v33 = vmul.f32 %v6116_v7, %v6084_v21  ;;  %v6101_v24 = vmul.f32 0.5, %v11929_v2  ;;  %v6102_v59 = vmul.f32 0.5, %v11937_v56 }
0x10a9   :  { %v6134_v55 = vadd.f32 %v6126_v42, %v11937_v56  ;;  %v6141_v9 = vmul.f32 0.7978846, %v6133_v29 }
0x10aa   :  { %v6132_v14 = vadd.f32 %v6124_v33, %v6084_v21  ;;  %v6139_v8 = vmul.f32 0.7978846, %v6131_v48 }
0x10ab   :  { %8787 = vtanh.f32 %v6141_v9  ;;  %v6142_v32 = vmul.f32 0.7978846, %v6134_v55 }
0x10ac   :  { %8789 = vtanh.f32 %v6139_v8  ;;  %v6140_v20 = vmul.f32 0.7978846, %v6132_v14 }
0x10ad   :  { %v8780_v12 = vpop.eup %8779  ;;  %8791 = vtanh.f32 %v6142_v32 }
0x10ae   :  { %v8782_v39 = vpop.eup %8781  ;;  %8793 = vtanh.f32 %v6140_v20  ;;  %v6153_v43 = vadd.f32 1.0, %v8780_v12  ;;  %v7652_v12 = vld [vmem:[%s12350_s7] ss:$0 sm:$0xff] }
0x10af   :  { %v8784_v15 = vpop.eup %8783  ;;  %v6151_v22 = vadd.f32 1.0, %v8782_v39 }
0x10b0   :  { %v8786_v38 = vpop.eup %8785  ;;  %v6154_v23 = vadd.f32 1.0, %v8784_v15  ;;  %v6161_v0 = vmul.f32 %v6153_v43, %v6097_v11 }
0x10b1   :  { %v6159_v30 = vmul.f32 %v6151_v22, %v6095_v45  ;;  %v6152_v40 = vadd.f32 1.0, %v8786_v38 }
0x10b2   :  { %v6162_v58 = vmul.f32 %v6154_v23, %v6098_v34 }
0x10b3   :  { %6175 = vrot.lane.b32.xlu0 %v6159_v30, %s8859_s0  ;;  %v6160_v47 = vmul.f32 %v6152_v40, %v6096_v46 }
0x10b5   :  { %v8788_v27 = vpop.eup %8787  ;;  %6177 = vrot.lane.b32.xlu1 %v6160_v47, %s8859_s0 }
0x10b6   :  { %v8790_v61 = vpop.eup %8789  ;;  %v6157_v62 = vadd.f32 1.0, %v8788_v27 }
0x10b7   :  { %v8792_v51 = vpop.eup %8791  ;;  %6179 = vrot.lane.b32.xlu0 %v6161_v0, %s8859_s0  ;;  %v6155_v57 = vadd.f32 1.0, %v8790_v61 }
0x10b8   :  { %v8794_v60 = vpop.eup %8793  ;;  %v6158_v44 = vadd.f32 1.0, %v8792_v51  ;;  %v6165_v52 = vmul.f32 %v6157_v62, %v6101_v24 }
0x10b9   :  { %6181 = vrot.lane.b32.xlu1 %v6162_v58, %s8859_s0  ;;  %v6163_v36 = vmul.f32 %v6155_v57, %v6099_v31  ;;  %v6156_v54 = vadd.f32 1.0, %v8794_v60 }
0x10ba   :  { %v6166_v26 = vmul.f32 %v6158_v44, %v6102_v59 }
0x10bb   :  { %6183 = vrot.lane.b32.xlu0 %v6163_v36, %s8859_s0  ;;  %v6164_v49 = vmul.f32 %v6156_v54, %v6100_v4 }
0x10bd   :  { %6185 = vrot.lane.b32.xlu1 %v6164_v49, %s8859_s0 }
0x10bf   :  { %6187 = vrot.lane.b32.xlu0 %v6165_v52, %s8859_s0 }
0x10c1   :  { %6189 = vrot.lane.b32.xlu1 %v6166_v26, %s8859_s0 }
0x1125   :  { %v6176_v41 = vpop.permute.xlu0 %6175 }
0x1126   :  { %v6199_v21 = vadd.f32 %v6176_v41, %v6159_v30 }
0x1127   :  { %v6178_v53 = vpop.permute.xlu1 %6177 }
0x1128   :  { %v6200_v17 = vadd.f32 %v6178_v53, %v6160_v47  ;;  %v11970_v6 = vadd.f32 %v6199_v21, %v11480_v19 }
0x1129   :  { %v6180_v10 = vpop.permute.xlu0 %6179 }
0x112a   :  { %v11973_v2 = vadd.f32 %v6200_v17, %v11491_v5  ;;  %v6201_v16 = vadd.f32 %v6180_v10, %v6161_v0 }
0x112b   :  { %v6182_v18 = vpop.permute.xlu1 %6181 }
0x112c   :  { %v6215_v56 = vpack.c.bf16 %v11973_v2, %v11970_v6  ;;  %v6202_v25 = vadd.f32 %v6182_v18, %v6162_v58  ;;  %v11978_v7 = vadd.f32 %v6201_v16, %v11471_v50 }
0x112d   :  { %v6184_v37 = vpop.permute.xlu0 %6183 }
0x112e   :  { %v11981_v29 = vadd.f32 %v6202_v25, %v11484_v13  ;;  %v6203_v42 = vadd.f32 %v6184_v37, %v6163_v36  ;;  %8274 = vmatprep.mubr.msk.bf16.mxu1 %vm316_vm2, %v6215_v56 }
0x112f   :  { %v6186_v19 = vpop.permute.xlu1 %6185 }
0x1130   :  { %v6216_v5 = vpack.c.bf16 %v11981_v29, %v11978_v7  ;;  %v6204_v48 = vadd.f32 %v6186_v19, %v6164_v49  ;;  %v11987_v55 = vadd.f32 %v6203_v42, %v11513_v63 }
0x1131   :  { %v6188_v33 = vpop.permute.xlu0 %6187 }
0x1132   :  { %v11990_v9 = vadd.f32 %v6204_v48, %v11538_v35  ;;  %v6205_v50 = vadd.f32 %v6188_v33, %v6165_v52  ;;  %8275 = vmatmul.mubr.msk.bf16.vlgmr.msra.gmra.mrb[104].mxu1 %vm316_vm2, %v6216_v5  ;;  %v8527_v35 = vld [vmem:[%s12349_s8] sm:$0xff]  }
0x1133   :  { %v6190_v13 = vpop.permute.xlu1 %6189  ;;  %8282 = vmatprep.subr.bf16.mxu0 %v8527_v35 }
0x1134   :  { %v6217_v14 = vpack.c.bf16 %v11990_v9, %v11987_v55  ;;  %v6206_v8 = vadd.f32 %v6190_v13, %v6166_v26  ;;  %v11996_v32 = vadd.f32 %v6205_v50, %v11522_v1  ;;  %8283 = vmatpush3.bf16.msra.mxu0 %v8527_v35  ;;  %v8528_v1 = vld [vmem:[%s12349_s8 + $0x8] sm:$0xff]  }
0x1135   :  { %8284 = vmatprep.subr.bf16.mxu0 %v8528_v1 }
0x1136   :  { %v11999_v20 = vadd.f32 %v6206_v8, %v11526_v3  ;;  %8278 = vmatprep.mubr.msk.bf16.mxu1 %vm316_vm2, %v6217_v14  ;;  %v8529_v3 = vld [vmem:[%s12349_s8 + $0x10] sm:$0xff]  }
0x1138   :  { %v6218_v63 = vpack.c.bf16 %v11999_v20, %v11996_v32  ;;  %8285 = vmatpush3.bf16.msra.mxu0 %v8528_v1 }
0x1139   :  { %8286 = vmatprep.subr.bf16.mxu0 %v8529_v3 }
0x113a   :  { %8279 = vmatmul.mubr.msk.bf16.gmra.mrb[108].mxu1 %vm316_vm2, %v6218_v63 }
0x113c   :  { %8287 = vmatpush3.bf16.msra.mxu0 %v8529_v3 }
0x113d   :  { %8288 = vmatprep.subr.bf16.mxu0 %v8530_v28 }
0x1140   :  { %8289 = vmatpush3.bf16.msra.mxu0 %v8530_v28 }
0x1205   :  { %v8276_v39 = vpop.f32.mrb[104].mxu1 }
0x1206   :  { %v12020_v15 = vadd.f32 %v8276_v39, %v7652_v12  ;;  %v6288_v45 = vpop.f32.mrb[105].mxu1 }
0x1207   :  { %v12022_v22 = vadd.f32 %v7652_v12, %v6288_v45  ;;  %v8277_v38 = vpop.f32.mrb[106].mxu1 }
0x1208   :  { %v6329_v30 = vmul.f32 0.044715, %v12020_v15  ;;  %v12025_v46 = vadd.f32 %v8277_v38, %v7652_v12  ;;  %v6291_v40 = vpop.f32.mrb[107].mxu1 }
0x1209   :  { %v6327_v43 = vmul.f32 0.044715, %v12022_v22  ;;  %v12028_v47 = vadd.f32 %v7652_v12, %v6291_v40 }
0x120a   :  { %v6337_v11 = vmul.f32 %v6329_v30, %v12020_v15  ;;  %v6330_v23 = vmul.f32 0.044715, %v12025_v46 }
0x120b   :  { %v6335_v27 = vmul.f32 %v6327_v43, %v12022_v22  ;;  %v6328_v0 = vmul.f32 0.044715, %v12028_v47 }
0x120c   :  { %v6345_v34 = vmul.f32 %v6337_v11, %v12020_v15  ;;  %v6338_v61 = vmul.f32 %v6330_v23, %v12025_v46  ;;  %v6321_v11 = vmul.f32 0.5, %v12020_v15  ;;  %v6322_v23 = vmul.f32 0.5, %v12025_v46 }
0x120d   :  { %v6343_v51 = vmul.f32 %v6335_v27, %v12022_v22  ;;  %v6336_v58 = vmul.f32 %v6328_v0, %v12028_v47  ;;  %v8280_v31 = vpop.f32.mrb[108].mxu1  ;;  %v6319_v0 = vmul.f32 0.5, %v12022_v22 }
0x120e   :  { %v6353_v57 = vadd.f32 %v6345_v34, %v12020_v15  ;;  %v6346_v60 = vmul.f32 %v6338_v61, %v12025_v46  ;;  %v12040_v36 = vadd.f32 %v8280_v31, %v7652_v12  ;;  %v6304_v4 = vpop.f32.mrb[109].mxu1  ;;  %v6320_v34 = vmul.f32 0.5, %v12028_v47 }
0x120f   :  { %v6351_v54 = vadd.f32 %v6343_v51, %v12022_v22  ;;  %v6344_v62 = vmul.f32 %v6336_v58, %v12028_v47  ;;  %v12044_v49 = vadd.f32 %v7652_v12, %v6304_v4  ;;  %v8281_v24 = vpop.f32.mrb[110].mxu1 }
0x1210   :  { %v6361_v44 = vmul.f32 0.7978846, %v6353_v57  ;;  %v6354_v52 = vadd.f32 %v6346_v60, %v12025_v46  ;;  %v6333_v59 = vmul.f32 0.044715, %v12040_v36  ;;  %v6316_v26 = vadd.f32 %v8281_v24, %v7652_v12  ;;  %v6307_v41 = vpop.f32.mrb[111].mxu1 }
0x1211   :  { %v6359_v21 = vmul.f32 0.7978846, %v6351_v54  ;;  %v6352_v53 = vadd.f32 %v6344_v62, %v12028_v47  ;;  %v6331_v17 = vmul.f32 0.044715, %v12044_v49  ;;  %v6308_v10 = vadd.f32 %v7652_v12, %v6307_v41 }
0x1212   :  { %8795 = vtanh.f32 %v6361_v44  ;;  %v6362_v16 = vmul.f32 0.7978846, %v6354_v52  ;;  %v6341_v18 = vmul.f32 %v6333_v59, %v12040_v36  ;;  %v6334_v56 = vmul.f32 0.044715, %v6316_v26 }
0x1213   :  { %8797 = vtanh.f32 %v6359_v21  ;;  %v6360_v25 = vmul.f32 0.7978846, %v6352_v53  ;;  %v6339_v37 = vmul.f32 %v6331_v17, %v12044_v49  ;;  %v6332_v42 = vmul.f32 0.044715, %v6308_v10 }
0x1214   :  { %8799 = vtanh.f32 %v6362_v16  ;;  %v6349_v19 = vmul.f32 %v6341_v18, %v12040_v36  ;;  %v6342_v5 = vmul.f32 %v6334_v56, %v6316_v26  ;;  %v6325_v22 = vmul.f32 0.5, %v12040_v36 }
0x1215   :  { %8801 = vtanh.f32 %v6360_v25  ;;  %v6347_v48 = vmul.f32 %v6339_v37, %v12044_v49  ;;  %v6340_v33 = vmul.f32 %v6332_v42, %v6308_v10  ;;  %v6326_v47 = vmul.f32 0.5, %v6316_v26 }
0x1216   :  { %v6357_v50 = vadd.f32 %v6349_v19, %v12040_v36  ;;  %v6350_v13 = vmul.f32 %v6342_v5, %v6316_v26  ;;  %v6323_v59 = vmul.f32 0.5, %v12044_v49  ;;  %v6324_v41 = vmul.f32 0.5, %v6308_v10  ;;  %v7659_v36 = vld [vmem:[%s12351_s9] ss:$0 sm:$0xff] }
0x1217   :  { %v6355_v14 = vadd.f32 %v6347_v48, %v12044_v49  ;;  %v6348_v8 = vmul.f32 %v6340_v33, %v6308_v10 }
0x1218   :  { %v6365_v63 = vmul.f32 0.7978846, %v6357_v50  ;;  %v6358_v35 = vadd.f32 %v6350_v13, %v6316_v26 }
0x1219   :  { %v6363_v1 = vmul.f32 0.7978846, %v6355_v14  ;;  %v6356_v3 = vadd.f32 %v6348_v8, %v6308_v10 }
0x121a   :  { %8803 = vtanh.f32 %v6365_v63  ;;  %v6366_v28 = vmul.f32 0.7978846, %v6358_v35 }
0x121b   :  { %8805 = vtanh.f32 %v6363_v1  ;;  %v6364_v12 = vmul.f32 0.7978846, %v6356_v3 }
0x121c   :  { %v8796_v39 = vpop.eup %8795  ;;  %8807 = vtanh.f32 %v6366_v28 }
0x121d   :  { %v8798_v45 = vpop.eup %8797  ;;  %v6377_v38 = vadd.f32 1.0, %v8796_v39  ;;  %8809 = vtanh.f32 %v6364_v12 }
0x121e   :  { %v8800_v30 = vpop.eup %8799  ;;  %v6375_v40 = vadd.f32 1.0, %v8798_v45 }
0x121f   :  { %v8802_v43 = vpop.eup %8801  ;;  %v6378_v27 = vadd.f32 1.0, %v8800_v30  ;;  %v6385_v51 = vmul.f32 %v6377_v38, %v6321_v11 }
0x1220   :  { %v6376_v61 = vadd.f32 1.0, %v8802_v43  ;;  %v6383_v31 = vmul.f32 %v6375_v40, %v6319_v0 }
0x1221   :  { %v6386_v58 = vmul.f32 %v6378_v27, %v6322_v23 }
0x1222   :  { %v6384_v57 = vmul.f32 %v6376_v61, %v6320_v34 }
0x1223   :  { %v6392_v60 = vpack.c.bf16 %v6386_v58, %v6385_v51 }
0x1224   :  { %v8804_v4 = vpop.eup %8803  ;;  %v6391_v54 = vpack.c.bf16 %v6384_v57, %v6383_v31 }
0x1225   :  { %v8806_v62 = vpop.eup %8805  ;;  %v6381_v24 = vadd.f32 1.0, %v8804_v4 }
0x1226   :  { %v8808_v44 = vpop.eup %8807  ;;  %8290 = vmatprep.mubr.msk.bf16.mxu0 %vm290_vm3, %v6391_v54  ;;  %v6379_v15 = vadd.f32 1.0, %v8806_v62 }
0x1227   :  { %v8810_v46 = vpop.eup %8809  ;;  %8291 = vmatmul.mubr.msk.bf16.vlgmr.msra.gmra.mrb[104].mxu0 %vm290_vm3, %v6392_v60  ;;  %v6382_v52 = vadd.f32 1.0, %v8808_v44  ;;  %v6389_v53 = vmul.f32 %v6381_v24, %v6325_v22  ;;  %v8531_v44 = vld [vmem:[%s12352_s11] sm:$0xff]   ;;  %v8534_v22 = vld [vmem:[%s12352_s11 + $0x18] sm:$0xff]  }
0x1228   :  { %v6380_v21 = vadd.f32 1.0, %v8810_v46  ;;  %v6387_v16 = vmul.f32 %v6379_v15, %v6323_v59  ;;  %v8532_v15 = vld [vmem:[%s12352_s11 + $0x8] sm:$0xff]   ;;  %8298 = vmatprep.subr.bf16.mxu1 %v8531_v44  ;;  %v8533_v46 = vld [vmem:[%s12352_s11 + $0x10] sm:$0xff]  }
0x1229   :  { %v6390_v17 = vmul.f32 %v6382_v52, %v6326_v47  ;;  %8299 = vmatpush3.bf16.msra.mxu1 %v8531_v44 }
0x122a   :  { %v6388_v18 = vmul.f32 %v6380_v21, %v6324_v41  ;;  %8300 = vmatprep.subr.bf16.mxu1 %v8532_v15 }
0x122b   :  { %v6394_v56 = vpack.c.bf16 %v6390_v17, %v6389_v53 }
0x122c   :  { %v6393_v25 = vpack.c.bf16 %v6388_v18, %v6387_v16 }
0x122d   :  { %8301 = vmatpush3.bf16.msra.mxu1 %v8532_v15 }
0x122e   :  { %8294 = vmatprep.mubr.msk.bf16.mxu0 %vm290_vm3, %v6393_v25  ;;  %8302 = vmatprep.subr.bf16.mxu1 %v8533_v46 }
0x122f   :  { %8295 = vmatmul.mubr.msk.bf16.gmra.mrb[108].mxu0 %vm290_vm3, %v6394_v56 }
0x1231   :  { %8303 = vmatpush3.bf16.msra.mxu1 %v8533_v46 }
0x1232   :  { %8304 = vmatprep.subr.bf16.mxu1 %v8534_v22 }
0x1235   :  { %8305 = vmatpush3.bf16.msra.mxu1 %v8534_v22 }
0x12fa   :  { %v8292_v26 = vpop.f32.mrb[104].mxu0 }
0x12fb   :  { %v12069_v37 = vadd.f32 %v8292_v26, %v7659_v36  ;;  %v6480_v49 = vpop.f32.mrb[105].mxu0 }
0x12fc   :  { %v8293_v10 = vpop.f32.mrb[106].mxu0  ;;  %v12071_v42 = vadd.f32 %v7659_v36, %v6480_v49 }
0x12fd   :  { %v6483_v19 = vpop.f32.mrb[107].mxu0  ;;  %v6519_v5 = vsel %vm290_vm3, %v12069_v37, 0.0  ;;  %v6548_v48 = vmul.f32 %v12069_v37, %v12069_v37  ;;  %v12080_v13 = vadd.f32 %v8293_v10, %v7659_v36 }
0x12fe   :  { %6520 = vadd.xlane.f32.xlu0 %v6519_v5  ;;  %v12077_v33 = vadd.f32 %v7659_v36, %v6483_v19  ;;  %v6513_v14 = vsel %vm290_vm3, %v12071_v42, 0.0  ;;  %v6546_v1 = vmul.f32 %v12071_v42, %v12071_v42 }
0x12ff   :  { %v6560_v50 = vsel %vm290_vm3, %v6548_v48, 0.0  ;;  %v6522_v12 = vsel %vm290_vm3, %v12080_v13, 0.0  ;;  %v6549_v39 = vmul.f32 %v12080_v13, %v12080_v13 }
0x1300   :  { %6561 = vadd.xlane.f32.xlu1 %v6560_v50  ;;  %v6516_v35 = vsel %vm290_vm3, %v12077_v33, 0.0  ;;  %v6554_v38 = vsel %vm290_vm3, %v6546_v1, 0.0  ;;  %v6547_v40 = vmul.f32 %v12077_v33, %v12077_v33 }
0x1301   :  { %v6563_v30 = vsel %vm290_vm3, %v6549_v39, 0.0 }
0x1302   :  { %6514 = vadd.xlane.f32.xlu0 %v6513_v14  ;;  %v8296_v8 = vpop.f32.mrb[108].mxu0  ;;  %v6557_v27 = vsel %vm290_vm3, %v6547_v40, 0.0 }
0x1303   :  { %v6496_v63 = vpop.f32.mrb[109].mxu0  ;;  %v12092_v45 = vadd.f32 %v8296_v8, %v7659_v36 }
0x1304   :  { %6517 = vadd.xlane.f32.xlu1 %v6516_v35  ;;  %v8297_v3 = vpop.f32.mrb[110].mxu0  ;;  %v12098_v43 = vadd.f32 %v7659_v36, %v6496_v63 }
0x1305   :  { %v6499_v28 = vpop.f32.mrb[111].mxu0  ;;  %v6531_v11 = vsel %vm290_vm3, %v12092_v45, 0.0  ;;  %v12102_v23 = vadd.f32 %v8297_v3, %v7659_v36  ;;  %v6552_v31 = vmul.f32 %v12092_v45, %v12092_v45 }
0x1306   :  { %6523 = vadd.xlane.f32.xlu0 %v6522_v12  ;;  %v6525_v0 = vsel %vm290_vm3, %v12098_v43, 0.0  ;;  %v6550_v34 = vmul.f32 %v12098_v43, %v12098_v43  ;;  %v12109_v61 = vadd.f32 %v7659_v36, %v6499_v28 }
0x1307   :  { %v6534_v51 = vsel %vm290_vm3, %v12102_v23, 0.0  ;;  %v6572_v4 = vsel %vm290_vm3, %v6552_v31, 0.0  ;;  %v6553_v62 = vmul.f32 %v12102_v23, %v12102_v23 }
0x1308   :  { %6555 = vadd.xlane.f32.xlu1 %v6554_v38  ;;  %v6566_v58 = vsel %vm290_vm3, %v6550_v34, 0.0  ;;  %v6528_v57 = vsel %vm290_vm3, %v12109_v61, 0.0  ;;  %v6551_v60 = vmul.f32 %v12109_v61, %v12109_v61 }
0x1309   :  { %v6575_v24 = vsel %vm290_vm3, %v6553_v62, 0.0 }
0x130a   :  { %6564 = vadd.xlane.f32.xlu0 %v6563_v30  ;;  %v6569_v54 = vsel %vm290_vm3, %v6551_v60, 0.0 }
0x130c   :  { %6532 = vadd.xlane.f32.xlu1 %v6531_v11 }
0x130e   :  { %6558 = vadd.xlane.f32.xlu0 %v6557_v27 }
0x1310   :  { %6526 = vadd.xlane.f32.xlu1 %v6525_v0 }
0x1312   :  { %6535 = vadd.xlane.f32.xlu0 %v6534_v51 }
0x1314   :  { %6567 = vadd.xlane.f32.xlu1 %v6566_v58 }
0x1316   :  { %6529 = vadd.xlane.f32.xlu0 %v6528_v57 }
0x1318   :  { %6573 = vadd.xlane.f32.xlu1 %v6572_v4 }
0x131a   :  { %6570 = vadd.xlane.f32.xlu0 %v6569_v54 }
0x131e   :  { %6576 = vadd.xlane.f32.xlu0 %v6575_v24 }
0x138b   :  { %v6521_v47 = vpop.xlane.xlu0 %6520 }
0x138c   :  { %v12137_v52 = vmul.f32 0.015625, %v6521_v47 }
0x138d   :  { %v6562_v59 = vpop.xlane.xlu1 %6561 }
0x138e   :  { %v6588_v21 = vmul.f32 %v12137_v52, %v12137_v52  ;;  %v6580_v53 = vmul.f32 0.015625, %v6562_v59 }
0x138f   :  { %v6515_v41 = vpop.xlane.xlu0 %6514 }
0x1390   :  { %v6538_v16 = vmul.f32 0.015625, %v6515_v41  ;;  %v6596_v56 = vsub.f32 %v6580_v53, %v6588_v21 }
0x1391   :  { %v6518_v17 = vpop.xlane.xlu1 %6517 }
0x1392   :  { %v6586_v26 = vmul.f32 %v6538_v16, %v6538_v16  ;;  %v6612_v19 = vadd.f32 1e-05, %v6596_v56  ;;  %v6539_v14 = vmul.f32 0.015625, %v6518_v17  ;;  %v6602_v15 = vsub.f32 %v12071_v42, %v6538_v16 }
0x1393   :  { %v6524_v18 = vpop.xlane.xlu0 %6523  ;;  %v6604_v17 = vsub.f32 %v12069_v37, %v12137_v52 }
0x1394   :  { %v6541_v25 = vmul.f32 0.015625, %v6524_v18  ;;  %8811 = vrsqrt.f32 %v6612_v19  ;;  %v6587_v28 = vmul.f32 %v6539_v14, %v6539_v14 }
0x1395   :  { %v6556_v36 = vpop.xlane.xlu1 %6555 }
0x1396   :  { %v6578_v49 = vmul.f32 0.015625, %v6556_v36  ;;  %v6589_v5 = vmul.f32 %v6541_v25, %v6541_v25  ;;  %v6605_v46 = vsub.f32 %v12080_v13, %v6541_v25  ;;  %v7668_v13 = vld [vmem:[%s12353_s10] ss:$0 sm:$0xff] }
0x1397   :  { %v6565_v10 = vpop.xlane.xlu0 %6564 }
0x1398   :  { %v6594_v48 = vsub.f32 %v6578_v49, %v6586_v26  ;;  %v6581_v50 = vmul.f32 0.015625, %v6565_v10  ;;  %v6603_v10 = vsub.f32 %v12077_v33, %v6539_v14  ;;  %v7669_v33 = vld [vmem:[%s12353_s10 + $0x1] ss:$0 sm:$0xff] }
0x1399   :  { %v6533_v8 = vpop.xlane.xlu1 %6532 }
0x139a   :  { %v6610_v63 = vadd.f32 1e-05, %v6594_v48  ;;  %v6597_v35 = vsub.f32 %v6581_v50, %v6589_v5  ;;  %v12141_v0 = vmul.f32 0.015625, %v6533_v8 }
0x139b   :  { %v6559_v1 = vpop.xlane.xlu0 %6558 }
0x139c   :  { %v6613_v3 = vadd.f32 1e-05, %v6597_v35  ;;  %8813 = vrsqrt.f32 %v6610_v63  ;;  %v6579_v12 = vmul.f32 0.015625, %v6559_v1  ;;  %v6592_v54 = vmul.f32 %v12141_v0, %v12141_v0 }
0x139d   :  { %v6527_v39 = vpop.xlane.xlu1 %6526 }
0x139e   :  { %8815 = vrsqrt.f32 %v6613_v3  ;;  %v6542_v38 = vmul.f32 0.015625, %v6527_v39  ;;  %v6595_v30 = vsub.f32 %v6579_v12, %v6587_v28  ;;  %v8812_v4 = vpop.eup %8811 }
0x139f   :  { %v6536_v40 = vpop.xlane.xlu0 %6535  ;;  %v6628_v49 = vmul.f32 %v8812_v4, %v6604_v17 }
0x13a0   :  { %v6611_v11 = vadd.f32 1e-05, %v6595_v30  ;;  %v6590_v34 = vmul.f32 %v6542_v38, %v6542_v38  ;;  %v6545_v22 = vmul.f32 0.015625, %v6536_v40  ;;  %v6606_v39 = vsub.f32 %v12098_v43, %v6542_v38 }
0x13a1   :  { %v6568_v27 = vpop.xlane.xlu1 %6567  ;;  %v6640_v8 = vmul.f32 %v7668_v13, %v6628_v49 }
0x13a2   :  { %v6582_v51 = vmul.f32 0.015625, %v6568_v27  ;;  %8817 = vrsqrt.f32 %v6611_v11  ;;  %v6593_v16 = vmul.f32 %v6545_v22, %v6545_v22 }
0x13a3   :  { %v6530_v58 = vpop.xlane.xlu0 %6529  ;;  %v6652_v12 = vadd.f32 %v7669_v33, %v6640_v8 }
0x13a4   :  { %v6598_v31 = vsub.f32 %v6582_v51, %v6590_v34  ;;  %v6543_v57 = vmul.f32 0.015625, %v6530_v58  ;;  %v6608_v34 = vsub.f32 %v12092_v45, %v12141_v0 }
0x13a5   :  { %v6574_v60 = vpop.xlane.xlu1 %6573 }
0x13a6   :  { %v6614_v62 = vadd.f32 1e-05, %v6598_v31  ;;  %v6584_v24 = vmul.f32 0.015625, %v6574_v60  ;;  %v8814_v44 = vpop.eup %8813  ;;  %v6591_v41 = vmul.f32 %v6543_v57, %v6543_v57  ;;  %v6607_v51 = vsub.f32 %v12109_v61, %v6543_v57  ;;  %v8535_v57 = vld [vmem:[%s12354_s13] sm:$0xff]  }
0x13a7   :  { %v6571_v47 = vpop.xlane.xlu0 %6570  ;;  %v6626_v26 = vmul.f32 %v8814_v44, %v6602_v15  ;;  %8314 = vmatprep.subr.bf16.mxu0 %v8535_v57 }
0x13a8   :  { %v8816_v59 = vpop.eup %8815  ;;  %8819 = vrsqrt.f32 %v6614_v62  ;;  %v6600_v21 = vsub.f32 %v6584_v24, %v6592_v54  ;;  %v6583_v53 = vmul.f32 0.015625, %v6571_v47  ;;  %v6609_v54 = vsub.f32 %v12102_v23, %v6545_v22  ;;  %v8536_v23 = vld [vmem:[%s12354_s13 + $0x8] sm:$0xff]   ;;  %8315 = vmatpush3.bf16.msra.mxu0 %v8535_v57  ;;  %v8537_v22 = vld [vmem:[%s12354_s13 + $0x10] sm:$0xff]  }
0x13a9   :  { %v6629_v18 = vmul.f32 %v8816_v59, %v6605_v46  ;;  %v6638_v50 = vmul.f32 %v7668_v13, %v6626_v26  ;;  %8316 = vmatprep.subr.bf16.mxu0 %v8536_v23  ;;  %v8538_v59 = vld [vmem:[%s12354_s13 + $0x18] sm:$0xff]  }
0x13aa   :  { %v6616_v56 = vadd.f32 1e-05, %v6600_v21  ;;  %v6599_v36 = vsub.f32 %v6583_v53, %v6591_v41  ;;  %v7670_v41 = vld [vmem:[%s12355_s12] ss:$0 sm:$0xff] }
0x13ab   :  { %v6577_v42 = vpop.xlane.xlu0 %6576  ;;  %v6641_v48 = vmul.f32 %v7668_v13, %v6629_v18  ;;  %v6650_v3 = vadd.f32 %v7669_v33, %v6638_v50 }
0x13ac   :  { %8821 = vrsqrt.f32 %v6616_v56  ;;  %v6615_v25 = vadd.f32 1e-05, %v6599_v36  ;;  %v6585_v19 = vmul.f32 0.015625, %v6577_v42  ;;  %v8818_v5 = vpop.eup %8817  ;;  %8317 = vmatpush3.bf16.msra.mxu0 %v8536_v23 }
0x13ad   :  { %v6627_v52 = vmul.f32 %v8818_v5, %v6603_v10  ;;  %v6653_v35 = vadd.f32 %v7669_v33, %v6641_v48  ;;  %8318 = vmatprep.subr.bf16.mxu0 %v8537_v22 }
0x13ae   :  { %8823 = vrsqrt.f32 %v6615_v25  ;;  %v6601_v37 = vsub.f32 %v6585_v19, %v6593_v16 }
0x13af   :  { %v6639_v63 = vmul.f32 %v7668_v13, %v6627_v52  ;;  %v6659_v40 = vpack.c.bf16 %v6653_v35, %v6652_v12 }
0x13b0   :  { %v6617_v14 = vadd.f32 1e-05, %v6601_v37  ;;  %8319 = vmatpush3.bf16.msra.mxu0 %v8537_v22 }
0x13b1   :  { %v6651_v28 = vadd.f32 %v7669_v33, %v6639_v63  ;;  %8320 = vmatprep.subr.bf16.mxu0 %v8538_v59 }
0x13b2   :  { %v8820_v1 = vpop.eup %8819  ;;  %8825 = vrsqrt.f32 %v6617_v14 }
0x13b3   :  { %v6658_v30 = vpack.c.bf16 %v6651_v28, %v6650_v3  ;;  %v6630_v11 = vmul.f32 %v8820_v1, %v6606_v39 }
0x13b4   :  { %8321 = vmatpush3.bf16.msra.mxu0 %v8538_v59 }
0x13b5   :  { %8306 = vmatprep.mubr.msk.bf16.mxu1 %vm290_vm3, %v6658_v30  ;;  %v6642_v60 = vmul.f32 %v7668_v13, %v6630_v11 }
0x13b6   :  { %v8822_v27 = vpop.eup %8821  ;;  %8307 = vmatmul.mubr.msk.bf16.vlgmr.msra.gmra.mrb[112].mxu1 %vm290_vm3, %v6659_v40 }
0x13b7   :  { %v6632_v4 = vmul.f32 %v8822_v27, %v6608_v34  ;;  %v6654_v62 = vadd.f32 %v7669_v33, %v6642_v60 }
0x13b8   :  { %v8824_v58 = vpop.eup %8823 }
0x13b9   :  { %v6631_v31 = vmul.f32 %v8824_v58, %v6607_v51  ;;  %v6644_v15 = vmul.f32 %v7668_v13, %v6632_v4 }
0x13bb   :  { %v6643_v43 = vmul.f32 %v7668_v13, %v6631_v31  ;;  %v6656_v45 = vadd.f32 %v7669_v33, %v6644_v15 }
0x13bc   :  { %v8826_v38 = vpop.eup %8825 }
0x13bd   :  { %v6655_v24 = vadd.f32 %v7669_v33, %v6643_v43  ;;  %v6633_v44 = vmul.f32 %v8826_v38, %v6609_v54 }
0x13bf   :  { %v6660_v46 = vpack.c.bf16 %v6655_v24, %v6654_v62  ;;  %v6645_v47 = vmul.f32 %v7668_v13, %v6633_v44 }
0x13c1   :  { %8310 = vmatprep.mubr.msk.bf16.mxu1 %vm290_vm3, %v6660_v46  ;;  %v6657_v61 = vadd.f32 %v7669_v33, %v6645_v47 }
0x13c3   :  { %v6661_v0 = vpack.c.bf16 %v6657_v61, %v6656_v45 }
0x13c5   :  { %8311 = vmatmul.mubr.msk.bf16.gmra.mrb[116].mxu1 %vm290_vm3, %v6661_v0 }
0x1489   :  { %v8308_v21 = vpop.f32.mrb[112].mxu1 }
0x148a   :  { %v6756_v53 = vadd.f32 %v8308_v21, %v7670_v41  ;;  %v6747_v17 = vpop.f32.mrb[113].mxu1 }
0x148b   :  { %v6748_v18 = vadd.f32 %v7670_v41, %v6747_v17  ;;  %v8309_v56 = vpop.f32.mrb[114].mxu1 }
0x148c   :  { %v6788_v36 = vmul.f32 0.044715, %v6756_v53  ;;  %v6759_v26 = vadd.f32 %v8309_v56, %v7670_v41  ;;  %v6750_v49 = vpop.f32.mrb[115].mxu1  ;;  %v6780_v0 = vmul.f32 0.5, %v6756_v53 }
0x148d   :  { %v6786_v10 = vmul.f32 0.044715, %v6748_v18  ;;  %v6751_v42 = vadd.f32 %v7670_v41, %v6750_v49 }
0x148e   :  { %v6796_v13 = vmul.f32 %v6788_v36, %v6756_v53  ;;  %v6789_v16 = vmul.f32 0.044715, %v6759_v26  ;;  %v6781_v49 = vmul.f32 0.5, %v6759_v26 }
0x148f   :  { %v6794_v25 = vmul.f32 %v6786_v10, %v6748_v18  ;;  %v6787_v19 = vmul.f32 0.044715, %v6751_v42 }
0x1490   :  { %v6804_v5 = vmul.f32 %v6796_v13, %v6756_v53  ;;  %v6797_v48 = vmul.f32 %v6789_v16, %v6759_v26 }
0x1491   :  { %v6802_v37 = vmul.f32 %v6794_v25, %v6748_v18  ;;  %v6795_v52 = vmul.f32 %v6787_v19, %v6751_v42  ;;  %v6779_v19 = vmul.f32 0.5, %v6751_v42 }
0x1492   :  { %v6812_v50 = vadd.f32 %v6804_v5, %v6756_v53  ;;  %v6805_v8 = vmul.f32 %v6797_v48, %v6759_v26 }
0x1493   :  { %v6810_v33 = vadd.f32 %v6802_v37, %v6748_v18  ;;  %v6803_v14 = vmul.f32 %v6795_v52, %v6751_v42 }
0x1494   :  { %v6820_v63 = vmul.f32 0.7978846, %v6812_v50  ;;  %v6813_v35 = vadd.f32 %v6805_v8, %v6759_v26 }
0x1495   :  { %v6818_v1 = vmul.f32 0.7978846, %v6810_v33  ;;  %v6811_v3 = vadd.f32 %v6803_v14, %v6751_v42 }
0x1496   :  { %8827 = vtanh.f32 %v6820_v63  ;;  %v6821_v28 = vmul.f32 0.7978846, %v6813_v35 }
0x1497   :  { %8829 = vtanh.f32 %v6818_v1  ;;  %v6819_v12 = vmul.f32 0.7978846, %v6811_v3 }
0x1498   :  { %v8312_v39 = vpop.f32.mrb[116].mxu1  ;;  %8831 = vtanh.f32 %v6821_v28 }
0x1499   :  { %v6772_v30 = vadd.f32 %v8312_v39, %v7670_v41  ;;  %v6763_v40 = vpop.f32.mrb[117].mxu1  ;;  %8833 = vtanh.f32 %v6819_v12 }
0x149a   :  { %v6764_v11 = vadd.f32 %v7670_v41, %v6763_v40  ;;  %v8313_v27 = vpop.f32.mrb[118].mxu1 }
0x149b   :  { %v6792_v34 = vmul.f32 0.044715, %v6772_v30  ;;  %v6775_v51 = vadd.f32 %v8313_v27, %v7670_v41  ;;  %v6766_v58 = vpop.f32.mrb[119].mxu1  ;;  %v6784_v1 = vmul.f32 0.5, %v6772_v30 }
0x149c   :  { %v6790_v31 = vmul.f32 0.044715, %v6764_v11  ;;  %v6767_v60 = vadd.f32 %v7670_v41, %v6766_v58  ;;  %v6778_v41 = vmul.f32 0.5, %v6748_v18  ;;  %v6782_v12 = vmul.f32 0.5, %v6764_v11 }
0x149d   :  { %v6800_v4 = vmul.f32 %v6792_v34, %v6772_v30  ;;  %v6793_v54 = vmul.f32 0.044715, %v6775_v51  ;;  %v6785_v3 = vmul.f32 0.5, %v6775_v51 }
0x149e   :  { %v6798_v43 = vmul.f32 %v6790_v31, %v6764_v11  ;;  %v6791_v38 = vmul.f32 0.044715, %v6767_v60  ;;  %v6783_v39 = vmul.f32 0.5, %v6767_v60 }
0x149f   :  { %v6808_v62 = vmul.f32 %v6800_v4, %v6772_v30  ;;  %v6801_v24 = vmul.f32 %v6793_v54, %v6775_v51 }
0x14a0   :  { %v6806_v44 = vmul.f32 %v6798_v43, %v6764_v11  ;;  %v6799_v15 = vmul.f32 %v6791_v38, %v6767_v60  ;;  %v8828_v46 = vpop.eup %8827  ;;  %v7679_v43 = vld [vmem:[%s12356_s14] ss:$0 sm:$0xff] }
0x14a1   :  { %v6816_v47 = vadd.f32 %v6808_v62, %v6772_v30  ;;  %v6809_v45 = vmul.f32 %v6801_v24, %v6775_v51  ;;  %v8830_v61 = vpop.eup %8829  ;;  %v6836_v57 = vadd.f32 1.0, %v8828_v46 }
0x14a2   :  { %v6814_v23 = vadd.f32 %v6806_v44, %v6764_v11  ;;  %v6807_v22 = vmul.f32 %v6799_v15, %v6767_v60  ;;  %v8832_v59 = vpop.eup %8831  ;;  %v6834_v56 = vadd.f32 1.0, %v8830_v61 }
0x14a3   :  { %v6824_v21 = vmul.f32 0.7978846, %v6816_v47  ;;  %v6817_v17 = vadd.f32 %v6809_v45, %v6775_v51  ;;  %v8834_v36 = vpop.eup %8833  ;;  %v6837_v10 = vadd.f32 1.0, %v8832_v59  ;;  %v6844_v48 = vmul.f32 %v6836_v57, %v6780_v0 }
0x14a4   :  { %v6822_v13 = vmul.f32 0.7978846, %v6814_v23  ;;  %v6815_v16 = vadd.f32 %v6807_v22, %v6767_v60  ;;  %v6835_v5 = vadd.f32 1.0, %v8834_v36  ;;  %v6842_v52 = vmul.f32 %v6834_v56, %v6778_v41 }
0x14a5   :  { %8835 = vtanh.f32 %v6824_v21  ;;  %v6825_v25 = vmul.f32 0.7978846, %v6817_v17  ;;  %v6845_v37 = vmul.f32 %v6837_v10, %v6781_v49 }
0x14a6   :  { %8837 = vtanh.f32 %v6822_v13  ;;  %v6823_v53 = vmul.f32 0.7978846, %v6815_v16  ;;  %v6843_v50 = vmul.f32 %v6835_v5, %v6779_v19 }
0x14a7   :  { %8839 = vtanh.f32 %v6825_v25  ;;  %v6851_v8 = vpack.c.bf16 %v6845_v37, %v6844_v48 }
0x14a8   :  { %8841 = vtanh.f32 %v6823_v53  ;;  %v6850_v18 = vpack.c.bf16 %v6843_v50, %v6842_v52 }
0x14aa   :  { %8322 = vmatprep.mubr.msk.bf16.mxu0 %vm290_vm3, %v6850_v18 }
0x14ab   :  { %8323 = vmatmul.mubr.msk.bf16.vlgmr.msra.gmra.mrb[112].mxu0 %vm290_vm3, %v6851_v8 }
0x14af   :  { %v8836_v26 = vpop.eup %8835 }
0x14b0   :  { %v8838_v33 = vpop.eup %8837  ;;  %v6840_v14 = vadd.f32 1.0, %v8836_v26 }
0x14b1   :  { %v8840_v63 = vpop.eup %8839  ;;  %v6838_v42 = vadd.f32 1.0, %v8838_v33 }
0x14b2   :  { %v8842_v35 = vpop.eup %8841  ;;  %v6841_v28 = vadd.f32 1.0, %v8840_v63  ;;  %v6848_v27 = vmul.f32 %v6840_v14, %v6784_v1 }
0x14b3   :  { %v6839_v40 = vadd.f32 1.0, %v8842_v35  ;;  %v6846_v58 = vmul.f32 %v6838_v42, %v6782_v12 }
0x14b4   :  { %v6849_v34 = vmul.f32 %v6841_v28, %v6785_v3 }
0x14b5   :  { %v6847_v31 = vmul.f32 %v6839_v40, %v6783_v39 }
0x14b6   :  { %v6853_v4 = vpack.c.bf16 %v6849_v34, %v6848_v27 }
0x14b7   :  { %v6852_v54 = vpack.c.bf16 %v6847_v31, %v6846_v58 }
0x14b9   :  { %8326 = vmatprep.mubr.msk.bf16.mxu0 %vm290_vm3, %v6852_v54 }
0x14ba   :  { %8327 = vmatmul.mubr.msk.bf16.gmra.mrb[116].mxu0 %vm290_vm3, %v6853_v4 }
0x157e   :  { %v8324_v30 = vpop.f32.mrb[112].mxu0 }
0x157f   :  { %v12187_v51 = vadd.f32 %v8324_v30, %v7679_v43  ;;  %v6939_v11 = vpop.f32.mrb[113].mxu0 }
0x1580   :  { %v8325_v60 = vpop.f32.mrb[114].mxu0  ;;  %v12189_v38 = vadd.f32 %v7679_v43, %v6939_v11 }
0x1581   :  { %v12191_v62 = vadd.f32 %v8325_v60, %v7679_v43  ;;  %v6942_v24 = vpop.f32.mrb[115].mxu0  ;;  %v6978_v44 = vsel %vm316_vm2, %v12187_v51, 0.0  ;;  %v7006_v45 = vmul.f32 %v12187_v51, %v12187_v51 }
0x1582   :  { %6979 = vadd.xlane.f32.xlu1 %v6978_v44  ;;  %v12195_v15 = vadd.f32 %v7679_v43, %v6942_v24  ;;  %v6972_v47 = vsel %vm316_vm2, %v12189_v38, 0.0  ;;  %v7004_v23 = vmul.f32 %v12189_v38, %v12189_v38 }
0x1583   :  { %v6981_v46 = vsel %vm316_vm2, %v12191_v62, 0.0  ;;  %v7007_v0 = vmul.f32 %v12191_v62, %v12191_v62  ;;  %v7018_v57 = vsel %vm316_vm2, %v7006_v45, 0.0 }
0x1584   :  { %6982 = vadd.xlane.f32.xlu0 %v6981_v46  ;;  %v6975_v61 = vsel %vm316_vm2, %v12195_v15, 0.0  ;;  %v7005_v59 = vmul.f32 %v12195_v15, %v12195_v15  ;;  %v7012_v41 = vsel %vm316_vm2, %v7004_v23, 0.0 }
0x1585   :  { %v7021_v22 = vsel %vm316_vm2, %v7007_v0, 0.0 }
0x1586   :  { %6973 = vadd.xlane.f32.xlu1 %v6972_v47  ;;  %v7015_v10 = vsel %vm316_vm2, %v7005_v59, 0.0 }
0x1588   :  { %6976 = vadd.xlane.f32.xlu0 %v6975_v61 }
0x158a   :  { %7019 = vadd.xlane.f32.xlu1 %v7018_v57 }
0x158c   :  { %7022 = vadd.xlane.f32.xlu0 %v7021_v22 }
0x158d   :  { %v8328_v21 = vpop.f32.mrb[116].mxu0 }
0x158e   :  { %v12213_v17 = vadd.f32 %v8328_v21, %v7679_v43  ;;  %v6955_v56 = vpop.f32.mrb[117].mxu0  ;;  %7013 = vadd.xlane.f32.xlu1 %v7012_v41 }
0x158f   :  { %v8329_v36 = vpop.f32.mrb[118].mxu0  ;;  %v12221_v25 = vadd.f32 %v7679_v43, %v6955_v56 }
0x1590   :  { %v12216_v49 = vadd.f32 %v8329_v36, %v7679_v43  ;;  %v6958_v13 = vpop.f32.mrb[119].mxu0  ;;  %v6990_v16 = vsel %vm316_vm2, %v12213_v17, 0.0  ;;  %7016 = vadd.xlane.f32.xlu0 %v7015_v10  ;;  %v7010_v8 = vmul.f32 %v12213_v17, %v12213_v17 }
0x1591   :  { %v12225_v5 = vadd.f32 %v7679_v43, %v6958_v13  ;;  %v6984_v48 = vsel %vm316_vm2, %v12221_v25, 0.0  ;;  %v7008_v37 = vmul.f32 %v12221_v25, %v12221_v25 }
0x1592   :  { %v6993_v19 = vsel %vm316_vm2, %v12216_v49, 0.0  ;;  %6991 = vadd.xlane.f32.xlu1 %v6990_v16  ;;  %v7011_v26 = vmul.f32 %v12216_v49, %v12216_v49  ;;  %v7030_v33 = vsel %vm316_vm2, %v7010_v8, 0.0 }
0x1593   :  { %v6987_v53 = vsel %vm316_vm2, %v12225_v5, 0.0  ;;  %v7009_v52 = vmul.f32 %v12225_v5, %v12225_v5  ;;  %v7024_v50 = vsel %vm316_vm2, %v7008_v37, 0.0 }
0x1594   :  { %6994 = vadd.xlane.f32.xlu0 %v6993_v19  ;;  %v7033_v14 = vsel %vm316_vm2, %v7011_v26, 0.0  ;;  %v12255_v19 = vld [vmem:[%s12357_s15] ss:$0 sm:$0xff]  ;;  %v12267_v26 = vld [vmem:[%s12357_s15 + $0x1] ss:$0 sm:$0xff] }
0x1595   :  { %v7027_v18 = vsel %vm316_vm2, %v7009_v52, 0.0 }
0x1596   :  { %6985 = vadd.xlane.f32.xlu1 %v6984_v48 }
0x1598   :  { %6988 = vadd.xlane.f32.xlu0 %v6987_v53 }
0x159a   :  { %7025 = vadd.xlane.f32.xlu1 %v7024_v50 }
0x159c   :  { %7028 = vadd.xlane.f32.xlu0 %v7027_v18 }
0x159e   :  { %7031 = vadd.xlane.f32.xlu1 %v7030_v33 }
0x15a0   :  { %7034 = vadd.xlane.f32.xlu0 %v7033_v14 }
0x160f   :  { %v6980_v63 = vpop.xlane.xlu1 %6979 }
0x1610   :  { %v6998_v1 = vmul.f32 0.03125, %v6980_v63 }
0x1611   :  { %v6983_v42 = vpop.xlane.xlu0 %6982 }
0x1612   :  { %v6999_v28 = vmul.f32 0.03125, %v6983_v42  ;;  %v7046_v39 = vmul.f32 %v6998_v1, %v6998_v1  ;;  %v7062_v10 = vsub.f32 %v12187_v51, %v6998_v1 }
0x1613   :  { %v6974_v35 = vpop.xlane.xlu1 %6973 }
0x1614   :  { %v6996_v40 = vmul.f32 0.03125, %v6974_v35  ;;  %v7047_v31 = vmul.f32 %v6999_v28, %v6999_v28  ;;  %v7063_v52 = vsub.f32 %v12191_v62, %v6999_v28 }
0x1615   :  { %v6977_v3 = vpop.xlane.xlu0 %6976 }
0x1616   :  { %v12243_v34 = vmul.f32 0.03125, %v6977_v3  ;;  %v7044_v30 = vmul.f32 %v6996_v40, %v6996_v40  ;;  %v7060_v42 = vsub.f32 %v12189_v38, %v6996_v40 }
0x1617   :  { %v7020_v12 = vpop.xlane.xlu1 %7019 }
0x1618   :  { %v7038_v27 = vmul.f32 0.03125, %v7020_v12  ;;  %v7045_v44 = vmul.f32 %v12243_v34, %v12243_v34  ;;  %v7061_v62 = vsub.f32 %v12195_v15, %v12243_v34 }
0x1619   :  { %v7023_v58 = vpop.xlane.xlu0 %7022 }
0x161a   :  { %v7054_v4 = vsub.f32 %v7038_v27, %v7046_v39  ;;  %v7039_v54 = vmul.f32 0.03125, %v7023_v58 }
0x161b   :  { %v7014_v43 = vpop.xlane.xlu1 %7013 }
0x161c   :  { %v7070_v11 = vadd.f32 1e-05, %v7054_v4  ;;  %v7055_v60 = vsub.f32 %v7039_v54, %v7047_v31  ;;  %v7036_v24 = vmul.f32 0.03125, %v7014_v43 }
0x161d   :  { %v7017_v46 = vpop.xlane.xlu0 %7016 }
0x161e   :  { %8843 = vrsqrt.f32 %v7070_v11  ;;  %v7071_v47 = vadd.f32 1e-05, %v7055_v60  ;;  %v7052_v45 = vsub.f32 %v7036_v24, %v7044_v30  ;;  %v7037_v61 = vmul.f32 0.03125, %v7017_v46 }
0x161f   :  { %v6992_v0 = vpop.xlane.xlu1 %6991 }
0x1620   :  { %8845 = vrsqrt.f32 %v7071_v47  ;;  %v7068_v57 = vadd.f32 1e-05, %v7052_v45  ;;  %v7053_v23 = vsub.f32 %v7037_v61, %v7045_v44  ;;  %v12257_v48 = vmul.f32 0.03125, %v6992_v0 }
0x1621   :  { %v6995_v22 = vpop.xlane.xlu0 %6994 }
0x1622   :  { %8847 = vrsqrt.f32 %v7068_v57  ;;  %v7069_v59 = vadd.f32 1e-05, %v7053_v23  ;;  %v12262_v8 = vmul.f32 0.03125, %v6995_v22  ;;  %v7050_v12 = vmul.f32 %v12257_v48, %v12257_v48 }
0x1623   :  { %v6986_v21 = vpop.xlane.xlu1 %6985 }
0x1624   :  { %8849 = vrsqrt.f32 %v7069_v59  ;;  %v12247_v41 = vmul.f32 0.03125, %v6986_v21  ;;  %v7051_v38 = vmul.f32 %v12262_v8, %v12262_v8 }
0x1625   :  { %v6989_v56 = vpop.xlane.xlu0 %6988 }
0x1626   :  { %v12249_v36 = vmul.f32 0.03125, %v6989_v56  ;;  %v7048_v37 = vmul.f32 %v12247_v41, %v12247_v41  ;;  %v7064_v22 = vsub.f32 %v12221_v25, %v12247_v41 }
0x1627   :  { %v7026_v13 = vpop.xlane.xlu1 %7025 }
0x1628   :  { %v8844_v16 = vpop.eup %8843  ;;  %v7040_v53 = vmul.f32 0.03125, %v7026_v13  ;;  %v7049_v33 = vmul.f32 %v12249_v36, %v12249_v36 }
0x1629   :  { %v7086_v50 = vmul.f32 %v8844_v16, %v7062_v10  ;;  %v7029_v18 = vpop.xlane.xlu0 %7028  ;;  %v7066_v10 = vsub.f32 %v12213_v17, %v12257_v48 }
0x162a   :  { %v8846_v51 = vpop.eup %8845  ;;  %v7056_v14 = vsub.f32 %v7040_v53, %v7048_v37  ;;  %v7041_v63 = vmul.f32 0.03125, %v7029_v18  ;;  %v7067_v37 = vsub.f32 %v12216_v49, %v12262_v8 }
0x162b   :  { %v7098_v35 = vmul.f32 %v12255_v19, %v7086_v50  ;;  %v7087_v1 = vmul.f32 %v8846_v51, %v7063_v52  ;;  %v7032_v3 = vpop.xlane.xlu1 %7031 }
0x162c   :  { %v8848_v28 = vpop.eup %8847  ;;  %v7072_v39 = vadd.f32 1e-05, %v7056_v14  ;;  %v7057_v27 = vsub.f32 %v7041_v63, %v7049_v33  ;;  %v7042_v58 = vmul.f32 0.03125, %v7032_v3 }
0x162d   :  { %v7110_v31 = vadd.f32 %v12267_v26, %v7098_v35  ;;  %v7099_v4 = vmul.f32 %v12255_v19, %v7087_v1  ;;  %v7084_v54 = vmul.f32 %v8848_v28, %v7060_v42  ;;  %v7035_v15 = vpop.xlane.xlu0 %7034 }
0x162e   :  { %v8850_v40 = vpop.eup %8849  ;;  %8851 = vrsqrt.f32 %v7072_v39  ;;  %v7073_v34 = vadd.f32 1e-05, %v7057_v27  ;;  %v7058_v43 = vsub.f32 %v7042_v58, %v7050_v12  ;;  %v7043_v30 = vmul.f32 0.03125, %v7035_v15 }
0x162f   :  { %v7118_v11 = vadd.f32 %v7110_v31, %v11978_v7  ;;  %v7111_v60 = vadd.f32 %v12267_v26, %v7099_v4  ;;  %v7096_v24 = vmul.f32 %v12255_v19, %v7084_v54  ;;  %v7085_v44 = vmul.f32 %v8850_v40, %v7061_v62 }
0x1630   :  { %8853 = vrsqrt.f32 %v7073_v34  ;;  %v7074_v46 = vadd.f32 1e-05, %v7058_v43  ;;  %v7059_v47 = vsub.f32 %v7043_v30, %v7051_v38 }
0x1631   :  { %7126 = vst.msk [vmem:[%s12358_s16 + $0x10] sm:$0xff] %vm316_vm2, %v7118_v11  ;;  %v7119_v45 = vadd.f32 %v7111_v60, %v11981_v29  ;;  %v7108_v61 = vadd.f32 %v12267_v26, %v7096_v24  ;;  %v7097_v0 = vmul.f32 %v12255_v19, %v7085_v44 }
0x1632   :  { %8855 = vrsqrt.f32 %v7074_v46  ;;  %v7075_v7 = vadd.f32 1e-05, %v7059_v47 }
0x1633   :  { %7127 = vst.msk [vmem:[%s12358_s16 + $0x18] sm:$0xff] %vm316_vm2, %v7119_v45  ;;  %v7116_v57 = vadd.f32 %v7108_v61, %v11970_v6  ;;  %v7109_v23 = vadd.f32 %v12267_v26, %v7097_v0  ;;  %v7065_v6 = vsub.f32 %v12225_v5, %v12249_v36 }
0x1634   :  { %8857 = vrsqrt.f32 %v7075_v7 }
0x1635   :  { %7124 = vst.msk [vmem:[%s12358_s16] sm:$0xff] %vm316_vm2, %v7116_v57  ;;  %v7117_v29 = vadd.f32 %v7109_v23, %v11973_v2 }
0x1637   :  { %7125 = vst.msk [vmem:[%s12358_s16 + $0x8] sm:$0xff] %vm316_vm2, %v7117_v29 }
0x1638   :  { %v8852_v59 = vpop.eup %8851 }
0x1639   :  { %v7088_v21 = vmul.f32 %v8852_v59, %v7064_v22 }
0x163a   :  { %v8854_v56 = vpop.eup %8853 }
0x163b   :  { %v7100_v13 = vmul.f32 %v12255_v19, %v7088_v21  ;;  %v7089_v2 = vmul.f32 %v8854_v56, %v7065_v6 }
0x163c   :  { %v8856_v16 = vpop.eup %8855 }
0x163d   :  { %v7112_v53 = vadd.f32 %v12267_v26, %v7100_v13  ;;  %v7101_v25 = vmul.f32 %v12255_v19, %v7089_v2  ;;  %v7090_v41 = vmul.f32 %v8856_v16, %v7066_v10 }
0x163e   :  { %v8858_v52 = vpop.eup %8857 }
0x163f   :  { %v7120_v5 = vadd.f32 %v7112_v53, %v11987_v55  ;;  %v7113_v36 = vadd.f32 %v12267_v26, %v7101_v25  ;;  %v7102_v50 = vmul.f32 %v12255_v19, %v7090_v41  ;;  %v7091_v17 = vmul.f32 %v8858_v52, %v7067_v37 }
0x1641   :  { %7128 = vst.msk [vmem:[%s12358_s16 + $0x20] sm:$0xff] %vm316_vm2, %v7120_v5  ;;  %v7121_v49 = vadd.f32 %v7113_v36, %v11990_v9  ;;  %v7114_v48 = vadd.f32 %v12267_v26, %v7102_v50  ;;  %v7103_v8 = vmul.f32 %v12255_v19, %v7091_v17 }
0x1643   :  { %7129 = vst.msk [vmem:[%s12358_s16 + $0x28] sm:$0xff] %vm316_vm2, %v7121_v49  ;;  %v7122_v55 = vadd.f32 %v7114_v48, %v11996_v32  ;;  %v7115_v18 = vadd.f32 %v12267_v26, %v7103_v8 }
0x1645   :  { %7130 = vst.msk [vmem:[%s12358_s16 + $0x30] sm:$0xff] %vm316_vm2, %v7122_v55  ;;  %v7123_v9 = vadd.f32 %v7115_v18, %v11999_v20 }
0x1647   :  { %7131 = vst.msk [vmem:[%s12358_s16 + $0x38] sm:$0xff] %vm316_vm2, %v7123_v9 }

</bundles_post_ra>
